<compile_context>
chip_gen: v7x
topology: tpu7x:2x2x1
jax: 0.10.0
libtpu: 0.0.40
codegen_flags: <defaults>
</compile_context>

<pallas_src>
import functools  # noqa: F401

import numpy as np

import jax
import jax.numpy as jnp
from jax.experimental import pallas as pl
from jax.experimental.pallas import tpu as pltpu  # noqa: F401  (TPU backend)


def _round_up(x, m):
    return (x + m - 1) // m * m


# --------------------------------------------------------------------------- #
# Single fused Pallas kernel: whole DQN forward
# --------------------------------------------------------------------------- #
def _dqn_fused_kernel(cols1_ref, s2_ref, t3_ref,
                      w1_ref, b1_ref,
                      w2_ref, b2_ref,
                      w3_ref, b3_ref,
                      wfc_ref, bfc_ref,
                      out_ref):
    f32 = jnp.float32
    bf16 = jnp.bfloat16

    # ---- conv1 + bn1 + relu :  [M1p, 4] @ [4, 64] ----------------------------
    h1 = jnp.dot(cols1_ref[...], w1_ref[...], preferred_element_type=f32)
    h1 = jnp.maximum(h1 + b1_ref[...], 0.0).astype(bf16)           # [M1p, 64]

    # ---- conv2 + bn2 + relu ---------------------------------------------------
    # conv = sum over the 4 (kh,kw) taps; the per-tap row gather (im2col) is a
    # constant 0/1 selection matmul -> no reshapes, everything stays 2D/MXU.
    m2p = s2_ref.shape[0] // 4
    kc2 = w2_ref.shape[0] // 4                                     # = 64
    acc2 = None
    for p in range(4):
        rows = jnp.dot(s2_ref[p * m2p:(p + 1) * m2p, :], h1,
                       preferred_element_type=f32).astype(bf16)     # [M2p, 64]
        part = jnp.dot(rows, w2_ref[p * kc2:(p + 1) * kc2, :],
                       preferred_element_type=f32)                  # [M2p, 256]
        acc2 = part if acc2 is None else acc2 + part
    h2 = jnp.maximum(acc2 + b2_ref[...], 0.0).astype(bf16)          # [M2p, 256]

    # ---- conv3 + bn3 + relu ---------------------------------------------------
    m3p = t3_ref.shape[0] // 4
    kc3 = w3_ref.shape[0] // 4                                      # = 256
    acc3 = None
    for p in range(4):
        rows = jnp.dot(t3_ref[p * m3p:(p + 1) * m3p, :], h2,
                       preferred_element_type=f32).astype(bf16)     # [M3p, 256]
        part = jnp.dot(rows, w3_ref[p * kc3:(p + 1) * kc3, :],
                       preferred_element_type=f32)                  # [M3p, 2048]
        acc3 = part if acc3 is None else acc3 + part
    h3 = jnp.maximum(acc3 + b3_ref[...], 0.0).astype(bf16)          # [M3p, 2048]

    # ---- fc (lane-dense padded output [M3p, 128]) -----------------------------
    out = jnp.dot(h3, wfc_ref[...], preferred_element_type=f32) + bfc_ref[...]
    out_ref[...] = out.astype(out_ref.dtype)


# --------------------------------------------------------------------------- #
# One-time parameter prep (plain JAX / numpy, executed outside the forward)
# --------------------------------------------------------------------------- #
def _fold_conv_bn(w, b, gamma, beta, mean, var, eps=1e-5):
    """PyTorch conv weight [C_out, C_in, kh, kw] -> matmul weight
    [kh*kw*C_in, C_out] with eval-mode BN scale folded into the columns,
    plus the per-channel additive shift."""
    c_out, c_in, kh, kw = w.shape
    w_mat = jnp.transpose(w, (2, 3, 1, 0)).reshape(kh * kw * c_in, c_out)
    scale = gamma / jnp.sqrt(var + eps)
    shift = beta + (b - mean) * scale
    return w_mat * scale[None, :], shift


def _build_selectors(batch):
    """Constant 0/1 row-selection matrices implementing the 2x2 im2col gathers.

    h1 rows: b*9 + i*3 + j  (3x3 map),  padded to m1p = ceil8(B*9)
    h2 rows: b*4 + i*2 + j  (2x2 map),  padded to m2p = ceil8(B*4)
    h3 rows: b              (1x1 map),  padded to m3p = ceil8(B)
    """
    m1p = _round_up(batch * 9, 8)
    m2p = _round_up(batch * 4, 8)
    m3p = _round_up(batch, 8)
    s2 = np.zeros((4, m2p, m1p), np.float32)
    t3 = np.zeros((4, m3p, m2p), np.float32)
    for b in range(batch):
        for kh in range(2):
            for kw in range(2):
                p = kh * 2 + kw
                for i in range(2):
                    for j in range(2):
                        s2[p, b * 4 + i * 2 + j,
                           b * 9 + (i + kh) * 3 + (j + kw)] = 1.0
                t3[p, b, b * 4 + p] = 1.0
    return s2.reshape(4 * m2p, m1p), t3.reshape(4 * m3p, m2p), m1p, m2p, m3p


def make_dqn_forward(params, action_size, batch):
    """Fold/pack parameters once, return a jitted forward running ONE fused
    Pallas kernel for the whole network."""
    w1, b1 = _fold_conv_bn(*params["conv1"], *params["bn1"])
    w2, b2 = _fold_conv_bn(*params["conv2"], *params["bn2"])
    w3, b3 = _fold_conv_bn(*params["conv3"], *params["bn3"])
    w_fc, b_fc = params["fc"]                                   # [A, 2048], [A]

    n_pad = _round_up(action_size, 128)                         # lane-dense fc out
    wfc = jnp.zeros((w_fc.shape[1], n_pad), jnp.float32).at[:, :action_size].set(w_fc.T)
    bfc = jnp.zeros((n_pad,), jnp.float32).at[:action_size].set(b_fc)

    s2_np, t3_np, m1p, m2p, m3p = _build_selectors(batch)

    weight_args = (
        jnp.asarray(s2_np, jnp.bfloat16),                       # [4*M2p, M1p]
        jnp.asarray(t3_np, jnp.bfloat16),                       # [4*M3p, M2p]
        w1.astype(jnp.bfloat16), b1.reshape(1, -1).astype(jnp.float32),
        w2.astype(jnp.bfloat16), b2.reshape(1, -1).astype(jnp.float32),
        w3.astype(jnp.bfloat16), b3.reshape(1, -1).astype(jnp.float32),
        wfc.astype(jnp.bfloat16), bfc.reshape(1, -1).astype(jnp.float32),
    )
    out_shape = (m3p, n_pad)

    @jax.jit
    def forward(state_nchw):
        # conv1 im2col on the raw input (tiny: [B*9, 4]); patch order (kh,kw,cin).
        x = jnp.transpose(state_nchw, (0, 2, 3, 1)).astype(jnp.float32)  # NHWC
        cols1 = jnp.concatenate(
            [x[:, :-1, :-1, :], x[:, :-1, 1:, :],
             x[:, 1:, :-1, :], x[:, 1:, 1:, :]], axis=-1,
        ).reshape(batch * 9, 4)
        cols1 = jnp.pad(cols1, ((0, m1p - batch * 9), (0, 0))).astype(jnp.bfloat16)

        args = (cols1,) + weight_args
        out_pad = pl.pallas_call(
            _dqn_fused_kernel,
            out_shape=jax.ShapeDtypeStruct(out_shape, jnp.float32),
            in_specs=[pl.BlockSpec(a.shape, lambda: (0, 0)) for a in args],
            out_specs=pl.BlockSpec(out_shape, lambda: (0, 0)),
        )(*args)
        return out_pad[:batch, :action_size]

    return forward


# --------------------------------------------------------------------------- #
# Plain-JAX reference (eval-mode BN), for correctness checking
# --------------------------------------------------------------------------- #
def dqn_reference(params, state_nchw, eps=1e-5):
    x = jnp.transpose(state_nchw, (0, 2, 3, 1)).astype(jnp.float32)
    for i in (1, 2, 3):
        w, b = params[f"conv{i}"]
        gamma, beta, mean, var = params[f"bn{i}"]
        y = jax.lax.conv_general_dilated(
            x, jnp.transpose(w, (2, 3, 1, 0)), (1, 1), "VALID",
            dimension_numbers=("NHWC", "HWIO", "NHWC")) + b
        y = (y - mean) / jnp.sqrt(var + eps) * gamma + beta
        x = jnp.maximum(y, 0.0)
    flat = x.reshape(x.shape[0], -1)
    w_fc, b_fc = params["fc"]
    return flat @ w_fc.T + b_fc


# --------------------------------------------------------------------------- #
# Parameter init (deterministic, synthetic)
# --------------------------------------------------------------------------- #
def init_params(key, action_size):
    ks = jax.random.split(key, 12)
    p = {}

    def conv_p(kw_, kb_, c_out, c_in):
        w = jax.random.normal(kw_, (c_out, c_in, 2, 2), jnp.float32) * 0.1
        b = jax.random.normal(kb_, (c_out,), jnp.float32) * 0.1
        return (w, b)

    def bn_p(kg, kb, c):
        gamma = 1.0 + 0.1 * jax.random.normal(kg, (c,), jnp.float32)
        beta = 0.1 * jax.random.normal(kb, (c,), jnp.float32)
        mean = 0.05 * jnp.arange(c, dtype=jnp.float32) / c
        var = jnp.ones((c,), jnp.float32) * 1.5
        return (gamma, beta, mean, var)

    p["conv1"] = conv_p(ks[0], ks[1], 64, 1)
    p["bn1"] = bn_p(ks[2], ks[3], 64)
    p["conv2"] = conv_p(ks[4], ks[5], 256, 64)
    p["bn2"] = bn_p(ks[6], ks[7], 256)
    p["conv3"] = conv_p(ks[8], ks[9], 2048, 256)
    p["bn3"] = bn_p(ks[10], ks[11], 2048)

    kfc_w, kfc_b = jax.random.split(jax.random.fold_in(key, 99))
    p["fc"] = (
        jax.random.normal(kfc_w, (action_size, 2048), jnp.float32) * 0.02,
        jax.random.normal(kfc_b, (action_size,), jnp.float32) * 0.02,
    )
    return p


if __name__ == "__main__":
    key = jax.random.PRNGKey(0)
    action_size = 4
    batch = 2

    params = init_params(key, action_size)
    state = jax.random.normal(jax.random.fold_in(key, 7), (batch, 1, 4, 4), jnp.float32)

    fwd = make_dqn_forward(params, action_size, batch)
    out = jax.block_until_ready(fwd(state))
    assert out.shape == (batch, action_size), out.shape

    # bf16 weights/activations with f32 accumulation -> loose tolerance.
    ref = jax.block_until_ready(dqn_reference(params, state))
    assert np.allclose(np.asarray(out), np.asarray(ref), rtol=0.1, atol=0.05), (
        "max abs err", float(np.max(np.abs(np.asarray(out) - np.asarray(ref)))))

    print("KERNEL_OK")
</pallas_src>

<mosaic_0001>
module attributes {stable_mosaic.version = 11 : i64} {
  func.func @_dqn_fused_kernel(%arg0: memref<24x4xbf16, #tpu.memory_space<vmem>>, %arg1: memref<32x24xbf16, #tpu.memory_space<vmem>>, %arg2: memref<32x8xbf16, #tpu.memory_space<vmem>>, %arg3: memref<4x64xbf16, #tpu.memory_space<vmem>>, %arg4: memref<1x64xf32, #tpu.memory_space<vmem>>, %arg5: memref<256x256xbf16, #tpu.memory_space<vmem>>, %arg6: memref<1x256xf32, #tpu.memory_space<vmem>>, %arg7: memref<1024x2048xbf16, #tpu.memory_space<vmem>>, %arg8: memref<1x2048xf32, #tpu.memory_space<vmem>>, %arg9: memref<2048x128xbf16, #tpu.memory_space<vmem>>, %arg10: memref<1x128xf32, #tpu.memory_space<vmem>>, %arg11: memref<8x128xf32, #tpu.memory_space<vmem>>) attributes {dimension_semantics = [], scalar_prefetch = 0 : i64, scratch_operands = 0 : i64, tpu.core_type = #tpu.core_type<tc>} {
    %c0 = arith.constant 0 : index
    %c0_0 = arith.constant 0 : index
    %0 = vector.load %arg0[%c0, %c0_0] : memref<24x4xbf16, #tpu.memory_space<vmem>>, vector<24x4xbf16>
    %c0_1 = arith.constant 0 : index
    %c0_2 = arith.constant 0 : index
    %1 = vector.load %arg3[%c0_1, %c0_2] : memref<4x64xbf16, #tpu.memory_space<vmem>>, vector<4x64xbf16>
    %cst = arith.constant dense<0.000000e+00> : vector<24x64xf32>
    %2 = tpu.matmul %0, %1, %cst {dimension_numbers = #tpu.dot_dimension_numbers<[1], [0], [0], [1], [0, 0, 1, 1], [], []>} : vector<24x4xbf16>, vector<4x64xbf16>, vector<24x64xf32> -> vector<24x64xf32>
    %c0_3 = arith.constant 0 : index
    %c0_4 = arith.constant 0 : index
    %3 = vector.load %arg4[%c0_3, %c0_4] : memref<1x64xf32, #tpu.memory_space<vmem>>, vector<1x64xf32>
    %4 = vector.broadcast %3 : vector<1x64xf32> to vector<24x64xf32>
    %5 = arith.addf %2, %4 : vector<24x64xf32>
    %cst_5 = arith.constant 0.000000e+00 : f32
    %6 = vector.broadcast %cst_5 : f32 to vector<24x64xf32>
    %7 = arith.maximumf %5, %6 : vector<24x64xf32>
    %8 = arith.truncf %7 : vector<24x64xf32> to vector<24x64xbf16>
    %c0_6 = arith.constant 0 : index
    %c0_7 = arith.constant 0 : index
    %9 = vector.load %arg1[%c0_6, %c0_7] : memref<32x24xbf16, #tpu.memory_space<vmem>>, vector<8x24xbf16>
    %cst_8 = arith.constant dense<0.000000e+00> : vector<8x64xf32>
    %10 = tpu.matmul %9, %8, %cst_8 {dimension_numbers = #tpu.dot_dimension_numbers<[1], [0], [0], [1], [0, 0, 1, 1], [], []>} : vector<8x24xbf16>, vector<24x64xbf16>, vector<8x64xf32> -> vector<8x64xf32>
    %11 = arith.truncf %10 : vector<8x64xf32> to vector<8x64xbf16>
    %c0_9 = arith.constant 0 : index
    %c0_10 = arith.constant 0 : index
    %12 = vector.load %arg5[%c0_9, %c0_10] : memref<256x256xbf16, #tpu.memory_space<vmem>>, vector<64x256xbf16>
    %cst_11 = arith.constant dense<0.000000e+00> : vector<8x256xf32>
    %13 = tpu.matmul %11, %12, %cst_11 {dimension_numbers = #tpu.dot_dimension_numbers<[1], [0], [0], [1], [0, 0, 1, 1], [], []>} : vector<8x64xbf16>, vector<64x256xbf16>, vector<8x256xf32> -> vector<8x256xf32>
    %c8 = arith.constant 8 : index
    %c0_12 = arith.constant 0 : index
    %14 = vector.load %arg1[%c8, %c0_12] : memref<32x24xbf16, #tpu.memory_space<vmem>>, vector<8x24xbf16>
    %cst_13 = arith.constant dense<0.000000e+00> : vector<8x64xf32>
    %15 = tpu.matmul %14, %8, %cst_13 {dimension_numbers = #tpu.dot_dimension_numbers<[1], [0], [0], [1], [0, 0, 1, 1], [], []>} : vector<8x24xbf16>, vector<24x64xbf16>, vector<8x64xf32> -> vector<8x64xf32>
    %16 = arith.truncf %15 : vector<8x64xf32> to vector<8x64xbf16>
    %c64 = arith.constant 64 : index
    %c0_14 = arith.constant 0 : index
    %17 = vector.load %arg5[%c64, %c0_14] : memref<256x256xbf16, #tpu.memory_space<vmem>>, vector<64x256xbf16>
    %cst_15 = arith.constant dense<0.000000e+00> : vector<8x256xf32>
    %18 = tpu.matmul %16, %17, %cst_15 {dimension_numbers = #tpu.dot_dimension_numbers<[1], [0], [0], [1], [0, 0, 1, 1], [], []>} : vector<8x64xbf16>, vector<64x256xbf16>, vector<8x256xf32> -> vector<8x256xf32>
    %19 = arith.addf %13, %18 : vector<8x256xf32>
    %c16 = arith.constant 16 : index
    %c0_16 = arith.constant 0 : index
    %20 = vector.load %arg1[%c16, %c0_16] : memref<32x24xbf16, #tpu.memory_space<vmem>>, vector<8x24xbf16>
    %cst_17 = arith.constant dense<0.000000e+00> : vector<8x64xf32>
    %21 = tpu.matmul %20, %8, %cst_17 {dimension_numbers = #tpu.dot_dimension_numbers<[1], [0], [0], [1], [0, 0, 1, 1], [], []>} : vector<8x24xbf16>, vector<24x64xbf16>, vector<8x64xf32> -> vector<8x64xf32>
    %22 = arith.truncf %21 : vector<8x64xf32> to vector<8x64xbf16>
    %c128 = arith.constant 128 : index
    %c0_18 = arith.constant 0 : index
    %23 = vector.load %arg5[%c128, %c0_18] : memref<256x256xbf16, #tpu.memory_space<vmem>>, vector<64x256xbf16>
    %cst_19 = arith.constant dense<0.000000e+00> : vector<8x256xf32>
    %24 = tpu.matmul %22, %23, %cst_19 {dimension_numbers = #tpu.dot_dimension_numbers<[1], [0], [0], [1], [0, 0, 1, 1], [], []>} : vector<8x64xbf16>, vector<64x256xbf16>, vector<8x256xf32> -> vector<8x256xf32>
    %25 = arith.addf %19, %24 : vector<8x256xf32>
    %c24 = arith.constant 24 : index
    %c0_20 = arith.constant 0 : index
    %26 = vector.load %arg1[%c24, %c0_20] : memref<32x24xbf16, #tpu.memory_space<vmem>>, vector<8x24xbf16>
    %cst_21 = arith.constant dense<0.000000e+00> : vector<8x64xf32>
    %27 = tpu.matmul %26, %8, %cst_21 {dimension_numbers = #tpu.dot_dimension_numbers<[1], [0], [0], [1], [0, 0, 1, 1], [], []>} : vector<8x24xbf16>, vector<24x64xbf16>, vector<8x64xf32> -> vector<8x64xf32>
    %28 = arith.truncf %27 : vector<8x64xf32> to vector<8x64xbf16>
    %c192 = arith.constant 192 : index
    %c0_22 = arith.constant 0 : index
    %29 = vector.load %arg5[%c192, %c0_22] : memref<256x256xbf16, #tpu.memory_space<vmem>>, vector<64x256xbf16>
    %cst_23 = arith.constant dense<0.000000e+00> : vector<8x256xf32>
    %30 = tpu.matmul %28, %29, %cst_23 {dimension_numbers = #tpu.dot_dimension_numbers<[1], [0], [0], [1], [0, 0, 1, 1], [], []>} : vector<8x64xbf16>, vector<64x256xbf16>, vector<8x256xf32> -> vector<8x256xf32>
    %31 = arith.addf %25, %30 : vector<8x256xf32>
    %c0_24 = arith.constant 0 : index
    %c0_25 = arith.constant 0 : index
    %32 = vector.load %arg6[%c0_24, %c0_25] : memref<1x256xf32, #tpu.memory_space<vmem>>, vector<1x256xf32>
    %33 = vector.broadcast %32 : vector<1x256xf32> to vector<8x256xf32>
    %34 = arith.addf %31, %33 : vector<8x256xf32>
    %cst_26 = arith.constant 0.000000e+00 : f32
    %35 = vector.broadcast %cst_26 : f32 to vector<8x256xf32>
    %36 = arith.maximumf %34, %35 : vector<8x256xf32>
    %37 = arith.truncf %36 : vector<8x256xf32> to vector<8x256xbf16>
    %c0_27 = arith.constant 0 : index
    %c0_28 = arith.constant 0 : index
    %38 = vector.load %arg2[%c0_27, %c0_28] : memref<32x8xbf16, #tpu.memory_space<vmem>>, vector<8x8xbf16>
    %cst_29 = arith.constant dense<0.000000e+00> : vector<8x256xf32>
    %39 = tpu.matmul %38, %37, %cst_29 {dimension_numbers = #tpu.dot_dimension_numbers<[1], [0], [0], [1], [0, 0, 1, 1], [], []>} : vector<8x8xbf16>, vector<8x256xbf16>, vector<8x256xf32> -> vector<8x256xf32>
    %40 = arith.truncf %39 : vector<8x256xf32> to vector<8x256xbf16>
    %c0_30 = arith.constant 0 : index
    %c0_31 = arith.constant 0 : index
    %41 = vector.load %arg7[%c0_30, %c0_31] : memref<1024x2048xbf16, #tpu.memory_space<vmem>>, vector<256x2048xbf16>
    %cst_32 = arith.constant dense<0.000000e+00> : vector<8x2048xf32>
    %42 = tpu.matmul %40, %41, %cst_32 {dimension_numbers = #tpu.dot_dimension_numbers<[1], [0], [0], [1], [0, 0, 1, 1], [], []>} : vector<8x256xbf16>, vector<256x2048xbf16>, vector<8x2048xf32> -> vector<8x2048xf32>
    %c8_33 = arith.constant 8 : index
    %c0_34 = arith.constant 0 : index
    %43 = vector.load %arg2[%c8_33, %c0_34] : memref<32x8xbf16, #tpu.memory_space<vmem>>, vector<8x8xbf16>
    %cst_35 = arith.constant dense<0.000000e+00> : vector<8x256xf32>
    %44 = tpu.matmul %43, %37, %cst_35 {dimension_numbers = #tpu.dot_dimension_numbers<[1], [0], [0], [1], [0, 0, 1, 1], [], []>} : vector<8x8xbf16>, vector<8x256xbf16>, vector<8x256xf32> -> vector<8x256xf32>
    %45 = arith.truncf %44 : vector<8x256xf32> to vector<8x256xbf16>
    %c256 = arith.constant 256 : index
    %c0_36 = arith.constant 0 : index
    %46 = vector.load %arg7[%c256, %c0_36] : memref<1024x2048xbf16, #tpu.memory_space<vmem>>, vector<256x2048xbf16>
    %cst_37 = arith.constant dense<0.000000e+00> : vector<8x2048xf32>
    %47 = tpu.matmul %45, %46, %cst_37 {dimension_numbers = #tpu.dot_dimension_numbers<[1], [0], [0], [1], [0, 0, 1, 1], [], []>} : vector<8x256xbf16>, vector<256x2048xbf16>, vector<8x2048xf32> -> vector<8x2048xf32>
    %48 = arith.addf %42, %47 : vector<8x2048xf32>
    %c16_38 = arith.constant 16 : index
    %c0_39 = arith.constant 0 : index
    %49 = vector.load %arg2[%c16_38, %c0_39] : memref<32x8xbf16, #tpu.memory_space<vmem>>, vector<8x8xbf16>
    %cst_40 = arith.constant dense<0.000000e+00> : vector<8x256xf32>
    %50 = tpu.matmul %49, %37, %cst_40 {dimension_numbers = #tpu.dot_dimension_numbers<[1], [0], [0], [1], [0, 0, 1, 1], [], []>} : vector<8x8xbf16>, vector<8x256xbf16>, vector<8x256xf32> -> vector<8x256xf32>
    %51 = arith.truncf %50 : vector<8x256xf32> to vector<8x256xbf16>
    %c512 = arith.constant 512 : index
    %c0_41 = arith.constant 0 : index
    %52 = vector.load %arg7[%c512, %c0_41] : memref<1024x2048xbf16, #tpu.memory_space<vmem>>, vector<256x2048xbf16>
    %cst_42 = arith.constant dense<0.000000e+00> : vector<8x2048xf32>
    %53 = tpu.matmul %51, %52, %cst_42 {dimension_numbers = #tpu.dot_dimension_numbers<[1], [0], [0], [1], [0, 0, 1, 1], [], []>} : vector<8x256xbf16>, vector<256x2048xbf16>, vector<8x2048xf32> -> vector<8x2048xf32>
    %54 = arith.addf %48, %53 : vector<8x2048xf32>
    %c24_43 = arith.constant 24 : index
    %c0_44 = arith.constant 0 : index
    %55 = vector.load %arg2[%c24_43, %c0_44] : memref<32x8xbf16, #tpu.memory_space<vmem>>, vector<8x8xbf16>
    %cst_45 = arith.constant dense<0.000000e+00> : vector<8x256xf32>
    %56 = tpu.matmul %55, %37, %cst_45 {dimension_numbers = #tpu.dot_dimension_numbers<[1], [0], [0], [1], [0, 0, 1, 1], [], []>} : vector<8x8xbf16>, vector<8x256xbf16>, vector<8x256xf32> -> vector<8x256xf32>
    %57 = arith.truncf %56 : vector<8x256xf32> to vector<8x256xbf16>
    %c768 = arith.constant 768 : index
    %c0_46 = arith.constant 0 : index
    %58 = vector.load %arg7[%c768, %c0_46] : memref<1024x2048xbf16, #tpu.memory_space<vmem>>, vector<256x2048xbf16>
    %cst_47 = arith.constant dense<0.000000e+00> : vector<8x2048xf32>
    %59 = tpu.matmul %57, %58, %cst_47 {dimension_numbers = #tpu.dot_dimension_numbers<[1], [0], [0], [1], [0, 0, 1, 1], [], []>} : vector<8x256xbf16>, vector<256x2048xbf16>, vector<8x2048xf32> -> vector<8x2048xf32>
    %60 = arith.addf %54, %59 : vector<8x2048xf32>
    %c0_48 = arith.constant 0 : index
    %c0_49 = arith.constant 0 : index
    %61 = vector.load %arg8[%c0_48, %c0_49] : memref<1x2048xf32, #tpu.memory_space<vmem>>, vector<1x2048xf32>
    %62 = vector.broadcast %61 : vector<1x2048xf32> to vector<8x2048xf32>
    %63 = arith.addf %60, %62 : vector<8x2048xf32>
    %cst_50 = arith.constant 0.000000e+00 : f32
    %64 = vector.broadcast %cst_50 : f32 to vector<8x2048xf32>
    %65 = arith.maximumf %63, %64 : vector<8x2048xf32>
    %66 = arith.truncf %65 : vector<8x2048xf32> to vector<8x2048xbf16>
    %c0_51 = arith.constant 0 : index
    %c0_52 = arith.constant 0 : index
    %67 = vector.load %arg9[%c0_51, %c0_52] : memref<2048x128xbf16, #tpu.memory_space<vmem>>, vector<2048x128xbf16>
    %cst_53 = arith.constant dense<0.000000e+00> : vector<8x128xf32>
    %68 = tpu.matmul %66, %67, %cst_53 {dimension_numbers = #tpu.dot_dimension_numbers<[1], [0], [0], [1], [0, 0, 1, 1], [], []>} : vector<8x2048xbf16>, vector<2048x128xbf16>, vector<8x128xf32> -> vector<8x128xf32>
    %c0_54 = arith.constant 0 : index
    %c0_55 = arith.constant 0 : index
    %69 = vector.load %arg10[%c0_54, %c0_55] : memref<1x128xf32, #tpu.memory_space<vmem>>, vector<1x128xf32>
    %70 = vector.broadcast %69 : vector<1x128xf32> to vector<8x128xf32>
    %71 = arith.addf %68, %70 : vector<8x128xf32>
    %c0_56 = arith.constant 0 : index
    %c0_57 = arith.constant 0 : index
    %72 = vector.load %arg11[%c0_56, %c0_57] : memref<8x128xf32, #tpu.memory_space<vmem>>, vector<8x128xf32>
    tpu.vector_store %arg11[%c0_56, %c0_57], %71 {strides = array<i32>} : memref<8x128xf32, #tpu.memory_space<vmem>>, vector<8x128xf32>,
    return
  }
}

</mosaic_0001>

<bundles_post_ra>
// kernel: forward.1
= control target key start
LH: loop header
LB: loop body
LE: loop exit
PB: predicated region body
PF: predicated region fallthrough
CT: control target
= control target key end

     0   :  { %vm65_vm0 = vcmask 1041408   ;;  %vm58_vm1 = vcmask 31744   ;;  %v11486_v4 = vmov 0.0   ;;  %vm11487_vm2 = vmmov 0   ;;  %s15520_s3 = inlined_call_operand.vmem [shape: bf16[4,64], index: 3, kind: input, shape index: {}]   ;;  %s15521_s0 = inlined_call_operand.vmem [shape: bf16[24,4], index: 0, kind: input, shape index: {}]   ;;  %s15522_s5 = inlined_call_operand.vmem [shape: bf16[256,256], index: 5, kind: input, shape index: {}]   ;;  %s15523_s4 = inlined_call_operand.vmem [shape: f32[1,64], index: 4, kind: input, shape index: {}]   ;;  %s15524_s1 = inlined_call_operand.vmem [shape: bf16[32,24], index: 1, kind: input, shape index: {}]   ;;  %s15525_s7 = inlined_call_operand.vmem [shape: bf16[1024,2048], index: 7, kind: input, shape index: {}]   ;;  %s15526_s6 = inlined_call_operand.vmem [shape: f32[1,256], index: 6, kind: input, shape index: {}]   ;;  %s15527_s2 = inlined_call_operand.vmem [shape: bf16[32,8], index: 2, kind: input, shape index: {}]   ;;  %s15528_s9 = inlined_call_operand.vmem [shape: bf16[2048,128], index: 9, kind: input, shape index: {}]   ;;  %s15529_s8 = inlined_call_operand.vmem [shape: f32[1,2048], index: 8, kind: input, shape index: {}]   ;;  %s15530_s10 = inlined_call_operand.vmem [shape: f32[1,128], index: 10, kind: input, shape index: {}]   ;;  %s15531_s11 = inlined_call_operand.vmem [shape: f32[8,128], index: 11, kind: output, shape index: {}]  }
   0x1   :  { %v42_v0 = vld [vmem:[%s15520_s3] sm:$0x3]  ;;  %v11309_v3 = vld [vmem:[%s15521_s0 + $0x8] ss:$0 sps:$4 sm:$0xff]   ;;  %11272 = vmatprep.subr.bf16.mxu1 %v11486_v4  ;;  %11276 = vmatprep.mubr.msk.bf16.mxu1 %vm11487_vm2, %v11486_v4  ;;  %vm127_vm3 = vcmask 1043456   ;;  %vm123_vm4 = vcmask 195584  }
   0x2   :  { %11304 = vmatprep.subr.msk.bf16.mxu0 %vm65_vm0, %v42_v0  ;;  %v67_v1 = vsel %vm65_vm0, %v42_v0, 0  ;;  %v11308_v2 = vld [vmem:[%s15521_s0] sm:$0xff]   ;;  %v11318_v25 = vld [vmem:[%s15522_s5 + $0x54] ss:$8 sps:$4 sm:$0xff]   ;;  %v11316_v27 = vld [vmem:[%s15522_s5 + $0x50] ss:$8 sps:$4 sm:$0xff]  }
   0x3   :  { %11267 = vmatpush3.bf16.msra.mxu0 %v67_v1  ;;  %11268 = vmatprep.mubr.msk.bf16.mxu0 %vm58_vm1, %v11308_v2  ;;  %v9869_v5 = vld [vmem:[%s15523_s4] ss:$0 sm:$0xff]  ;;  %v11312_v18 = vld [vmem:[%s15522_s5 + $0x44] ss:$8 sps:$4 sm:$0xff]   ;;  %v11321_v26 = vld [vmem:[%s15522_s5 + $0x14] ss:$8 sps:$4 sm:$0xff]  }
   0x4   :  { %11280 = vmatprep.subr.bf16.mxu0 %v11486_v4  ;;  %v11315_v19 = vld [vmem:[%s15522_s5 + $0x4] ss:$8 sps:$4 sm:$0xff]   ;;  %v122_v21 = vld [vmem:[%s15524_s1] sm:$0xf]  ;;  %v11319_v28 = vld [vmem:[%s15522_s5 + $0x10] ss:$8 sps:$4 sm:$0xff]  }
   0x5   :  { %v180_v22 = vld [vmem:[%s15524_s1 + $0x4] sm:$0xf]  ;;  %v11310_v23 = vld [vmem:[%s15522_s5 + $0x40] ss:$8 sps:$4 sm:$0xff]   ;;  %v11330_v33 = vld [vmem:[%s15522_s5 + $0x74] ss:$8 sps:$4 sm:$0xff]  }
   0x6   :  { %11269 = vmatmul.mubr.msk.bf16.vlgmr.msra.gmra.mrb[0].mxu0 %vm58_vm1, %v11309_v3  ;;  %v11313_v24 = vld [vmem:[%s15522_s5] ss:$8 sps:$4 sm:$0xff]   ;;  %v11324_v29 = vld [vmem:[%s15522_s5 + $0x64] ss:$8 sps:$4 sm:$0xff]   ;;  %v11333_v34 = vld [vmem:[%s15522_s5 + $0x34] ss:$8 sps:$4 sm:$0xff]  }
   0x7   :  { %11284 = vmatprep.mubr.msk.bf16.mxu0 %vm11487_vm2, %v11486_v4  ;;  %v11327_v30 = vld [vmem:[%s15522_s5 + $0x24] ss:$8 sps:$4 sm:$0xff]   ;;  %v11322_v31 = vld [vmem:[%s15522_s5 + $0x60] ss:$8 sps:$4 sm:$0xff]   ;;  %v11328_v35 = vld [vmem:[%s15522_s5 + $0x70] ss:$8 sps:$4 sm:$0xff]  }
   0x8   :  { %v11325_v32 = vld [vmem:[%s15522_s5 + $0x20] ss:$8 sps:$4 sm:$0xff]   ;;  %v11331_v36 = vld [vmem:[%s15522_s5 + $0x30] ss:$8 sps:$4 sm:$0xff]   ;;  %v11488_v37 = vmov 0   ;;  %vm273_vm5 = vcmask 523264  }
   0x9   :  { %v11336_v38 = vld [vmem:[%s15522_s5 + $0x84] ss:$8 sps:$4 sm:$0xff]   ;;  %v11334_v45 = vld [vmem:[%s15522_s5 + $0x80] ss:$8 sps:$4 sm:$0xff]   ;;  %v11339_v48 = vld [vmem:[%s15522_s5 + $0x94] ss:$8 sps:$4 sm:$0xff]  }
   0xa   :  { %v11337_v51 = vld [vmem:[%s15522_s5 + $0x90] ss:$8 sps:$4 sm:$0xff]   ;;  %v402_v52 = vld [vmem:[%s15524_s1 + $0x8] sm:$0xf]  ;;  %v541_v53 = vld [vmem:[%s15524_s1 + $0xc] sm:$0xf] }
   0xb   :  { %v11342_v54 = vld [vmem:[%s15522_s5 + $0xa4] ss:$8 sps:$4 sm:$0xff]   ;;  %v11340_v56 = vld [vmem:[%s15522_s5 + $0xa0] ss:$8 sps:$4 sm:$0xff]   ;;  %v11348_v58 = vld [vmem:[%s15522_s5 + $0xb4] ss:$8 sps:$4 sm:$0xff]  }
   0xc   :  { %v11345_v55 = vld [vmem:[%s15522_s5 + $0xc4] ss:$8 sps:$4 sm:$0xff]   ;;  %v11343_v57 = vld [vmem:[%s15522_s5 + $0xc0] ss:$8 sps:$4 sm:$0xff]   ;;  %v11351_v59 = vld [vmem:[%s15522_s5 + $0xd4] ss:$8 sps:$4 sm:$0xff]  }
   0xd   :  { %v11346_v60 = vld [vmem:[%s15522_s5 + $0xb0] ss:$8 sps:$4 sm:$0xff]   ;;  %v11354_v62 = vld [vmem:[%s15522_s5 + $0xe4] ss:$8 sps:$4 sm:$0xff]   ;;  %v11352_v63 = vld [vmem:[%s15522_s5 + $0xe0] ss:$8 sps:$4 sm:$0xff]  }
   0xe   :  { %v11349_v61 = vld [vmem:[%s15522_s5 + $0xd0] ss:$8 sps:$4 sm:$0xff]   ;;  %v11357_v0 = vld [vmem:[%s15522_s5 + $0xf4] ss:$8 sps:$4 sm:$0xff]   ;;  %vm699_vm6 = vcmask 64512  }
   0xf   :  { %v11355_v1 = vld [vmem:[%s15522_s5 + $0xf0] ss:$8 sps:$4 sm:$0xff]  }
  0xd9   :  { %v11270_v6 = vpop.f32.mrb[0].mxu0 }
  0xda   :  { %v112_v7 = vadd.f32 %v11270_v6, %v9869_v5  ;;  %v103_v8 = vpop.f32.mrb[1].mxu0 }
  0xdb   :  { %v104_v9 = vadd.f32 %v9869_v5, %v103_v8  ;;  %v11271_v10 = vpop.f32.mrb[2].mxu0 }
  0xdc   :  { %v106_v11 = vpop.f32.mrb[3].mxu0  ;;  %v119_v13 = vmax.f32 %v112_v7, 0.0 }
  0xdd   :  { %v107_v12 = vadd.f32 %v9869_v5, %v106_v11  ;;  %v117_v14 = vmax.f32 %v104_v9, 0.0 }
  0xde   :  { %v121_v17 = vpack.c.bf16 %v119_v13, %v119_v13 }
  0xdf   :  { %v118_v15 = vmax.f32 %v107_v12, 0.0 }
  0xe0   :  { %v11580_v20 = vsel %vm127_vm3, %v121_v17, 0 }
  0xe1   :  { %v11567_v16 = vpack.c.bf16 %v118_v15, %v117_v14 }
  0xe3   :  { %11273 = vmatpush3.bf16.msra.mxu1 %v11567_v16  ;;  %11281 = vmatpush3.bf16.msra.mxu0 %v11567_v16 }
  0xe4   :  { %11274 = vmatprep.subr.bf16.mxu1 %v11486_v4  ;;  %11282 = vmatprep.subr.bf16.mxu0 %v11486_v4 }
  0xe7   :  { %11275 = vmatpush3.bf16.msra.mxu1 %v11580_v20  ;;  %11283 = vmatpush3.bf16.msra.mxu0 %v11580_v20 }
  0xe8   :  { %277 = vmatprep.subr.bf16.mxu1 %v11312_v18  ;;  %361 = vmatprep.subr.bf16.mxu0 %v11315_v19 }
  0xea   :  { %11277 = vmatmul.mubr.msk.bf16.vlgmr.msra.gmra.mrb[0].mxu1 %vm123_vm4, %v122_v21  ;;  %11285 = vmatmul.mubr.msk.bf16.vlgmr.msra.gmra.mrb[4].mxu0 %vm123_vm4, %v180_v22  ;;  %v1055_v22 = vld [vmem:[%s15525_s7 + $0x800] sm:$0xff] }
  0xeb   :  { %278 = vmatpush1.bf16.msra.mxu1 %v11310_v23  ;;  %362 = vmatpush1.bf16.msra.mxu0 %v11313_v24  ;;  %v1063_v23 = vld [vmem:[%s15525_s7 + $0x840] sm:$0xff] }
  0xec   :  { %279 = vmatprep.subr.bf16.mxu1 %v11318_v25  ;;  %363 = vmatprep.subr.bf16.mxu0 %v11321_v26  ;;  %v9918_v24 = vcombine.low %v1055_v22, %v1063_v23  ;;  %v9919_v25 = vcombine.high %v1055_v22, %v1063_v23  ;;  %v1071_v26 = vld [vmem:[%s15525_s7 + $0x880] sm:$0xff] }
  0xed   :  { %309 = vmatprep.mubr.bf16.mxu1 %v11488_v37  ;;  %393 = vmatprep.mubr.bf16.mxu0 %v11488_v37 }
  0xef   :  { %280 = vmatpush1.bf16.msra.mxu1 %v11316_v27  ;;  %364 = vmatpush1.bf16.msra.mxu0 %v11319_v28  ;;  %v1079_v27 = vld [vmem:[%s15525_s7 + $0x8c0] sm:$0xff] }
  0xf0   :  { %281 = vmatprep.subr.bf16.mxu1 %v11324_v29  ;;  %365 = vmatprep.subr.bf16.mxu0 %v11327_v30  ;;  %v9935_v28 = vcombine.high %v1071_v26, %v1079_v27  ;;  %v9934_v29 = vcombine.low %v1071_v26, %v1079_v27  ;;  %v1087_v30 = vld [vmem:[%s15525_s7 + $0x900] sm:$0xff] }
  0xf1   :  { %v680_v26 = vld [vmem:[%s15526_s6] sm:$0x3] }
  0xf3   :  { %282 = vmatpush1.bf16.msra.mxu1 %v11322_v31  ;;  %366 = vmatpush1.bf16.msra.mxu0 %v11325_v32  ;;  %v1095_v31 = vld [vmem:[%s15525_s7 + $0x940] sm:$0xff] }
  0xf4   :  { %283 = vmatprep.subr.bf16.mxu1 %v11330_v33  ;;  %367 = vmatprep.subr.bf16.mxu0 %v11333_v34  ;;  %v9951_v32 = vcombine.high %v1087_v30, %v1095_v31  ;;  %v9950_v33 = vcombine.low %v1087_v30, %v1095_v31  ;;  %v1103_v34 = vld [vmem:[%s15525_s7 + $0x980] sm:$0xff] }
  0xf7   :  { %284 = vmatpush1.bf16.msra.mxu1 %v11328_v35  ;;  %368 = vmatpush1.bf16.msra.mxu0 %v11331_v36  ;;  %v1111_v35 = vld [vmem:[%s15525_s7 + $0x9c0] sm:$0xff] }
  0xf8   :  { %11288 = vmatprep.subr.bf16.mxu1 %v11486_v4  ;;  %498 = vmatprep.subr.bf16.mxu0 %v11336_v38  ;;  %v9967_v36 = vcombine.high %v1103_v34, %v1111_v35  ;;  %v9966_v38 = vcombine.low %v1103_v34, %v1111_v35 }
 0x1bd   :  { %v165_v39 = vpop.f32.mrb[0].mxu1  ;;  %v218_v40 = vpop.f32.mrb[4].mxu0 }
 0x1be   :  { %v171_v41 = vpack.c.bf16 %v165_v39, %v165_v39  ;;  %v224_v42 = vpack.c.bf16 %v218_v40, %v218_v40  ;;  %v11286_v43 = vpop.f32.mrb[5].mxu0  ;;  %v11278_v44 = vpop.f32.mrb[1].mxu1  ;;  %v1119_v39 = vld [vmem:[%s15525_s7 + $0xa00] sm:$0xff] }
 0x1bf   :  { %v221_v46 = vpop.f32.mrb[6].mxu0  ;;  %v168_v47 = vpop.f32.mrb[2].mxu1  ;;  %v1127_v40 = vld [vmem:[%s15525_s7 + $0xa40] sm:$0xff] }
 0x1c0   :  { %v11287_v49 = vpop.f32.mrb[7].mxu0  ;;  %9884 = vmatmul.mubr.msk.bf16.vlgmr.msra.gmra.mrb[4].mxu1 %vm273_vm5, %v224_v42  ;;  %9893 = vmatmul.mubr.msk.bf16.vlgmr.msra.gmra.mrb[8].mxu0 %vm273_vm5, %v171_v41  ;;  %v11279_v50 = vpop.f32.mrb[3].mxu1  ;;  %v9983_v41 = vcombine.high %v1119_v39, %v1127_v40  ;;  %v9982_v42 = vcombine.low %v1119_v39, %v1127_v40  ;;  %v1135_v43 = vld [vmem:[%s15525_s7 + $0xa80] sm:$0xff] }
 0x1c1   :  { %11289 = vmatpush3.bf16.msra.mxu1 %v11567_v16  ;;  %11292 = vmatprep.mubr.msk.bf16.mxu1 %vm11487_vm2, %v11486_v4  ;;  %v1143_v44 = vld [vmem:[%s15525_s7 + $0xac0] sm:$0xff] }
 0x1c2   :  { %11290 = vmatprep.subr.bf16.mxu1 %v11486_v4  ;;  %499 = vmatpush1.bf16.msra.mxu0 %v11334_v45  ;;  %v9999_v45 = vcombine.high %v1135_v43, %v1143_v44  ;;  %v9998_v46 = vcombine.low %v1135_v43, %v1143_v44  ;;  %v1151_v47 = vld [vmem:[%s15525_s7 + $0xb00] sm:$0xff]  ;;  %v1064_v43 = vld [vmem:[%s15525_s7 + $0x848] sm:$0xff] }
 0x1c3   :  { %500 = vmatprep.subr.bf16.mxu0 %v11339_v48  ;;  %530 = vmatprep.mubr.bf16.mxu0 %v11488_v37  ;;  %v1159_v48 = vld [vmem:[%s15525_s7 + $0xb40] sm:$0xff] }
 0x1c4   :  { %v10015_v49 = vcombine.high %v1151_v47, %v1159_v48  ;;  %v10014_v50 = vcombine.low %v1151_v47, %v1159_v48  ;;  %v698_v44 = vld [vmem:[%s15527_s2] sm:$0xf]  ;;  %v1080_v47 = vld [vmem:[%s15525_s7 + $0x8c8] sm:$0xff]  ;;  %v1008_v48 = vld [vmem:[%s15527_s2 + $0x4] sm:$0xf] }
 0x1c5   :  { %11291 = vmatpush3.bf16.msra.mxu1 %v11580_v20 }
 0x1c6   :  { %11296 = vmatprep.subr.bf16.mxu1 %v11486_v4  ;;  %501 = vmatpush1.bf16.msra.mxu0 %v11337_v51  ;;  %v1167_v51 = vld [vmem:[%s15525_s7 + $0xb80] sm:$0xff] }
 0x1c7   :  { %502 = vmatprep.subr.bf16.mxu0 %v11342_v54 }
 0x1c8   :  { %11293 = vmatmul.mubr.msk.bf16.vlgmr.msra.gmra.mrb[8].mxu1 %vm123_vm4, %v402_v52  ;;  %v1175_v52 = vld [vmem:[%s15525_s7 + $0xbc0] sm:$0xff] }
 0x1c9   :  { %11297 = vmatpush3.bf16.msra.mxu1 %v11567_v16  ;;  %11300 = vmatprep.mubr.msk.bf16.mxu1 %vm11487_vm2, %v11486_v4  ;;  %v10030_v54 = vcombine.low %v1167_v51, %v1175_v52 }
 0x1ca   :  { %11298 = vmatprep.subr.bf16.mxu1 %v11486_v4  ;;  %503 = vmatpush1.bf16.msra.mxu0 %v11340_v56  ;;  %v1191_v56 = vld [vmem:[%s15525_s7 + $0xc40] sm:$0xff] }
 0x1cb   :  { %504 = vmatprep.subr.bf16.mxu0 %v11348_v58 }
 0x1cd   :  { %11299 = vmatpush3.bf16.msra.mxu1 %v11580_v20 }
 0x1ce   :  { %637 = vmatprep.subr.bf16.mxu1 %v11345_v55  ;;  %505 = vmatpush1.bf16.msra.mxu0 %v11346_v60  ;;  %v1183_v55 = vld [vmem:[%s15525_s7 + $0xc00] sm:$0xff] }
 0x1cf   :  { %v10046_v58 = vcombine.low %v1183_v55, %v1191_v56  ;;  %v1207_v60 = vld [vmem:[%s15525_s7 + $0xcc0] sm:$0xff] }
 0x1d0   :  { %11301 = vmatmul.mubr.msk.bf16.vlgmr.msra.gmra.mrb[12].mxu1 %vm123_vm4, %v541_v53  ;;  %v10031_v53 = vcombine.high %v1167_v51, %v1175_v52  ;;  %v1088_v51 = vld [vmem:[%s15525_s7 + $0x908] sm:$0xff] }
 0x1d1   :  { %669 = vmatprep.mubr.bf16.mxu1 %v11488_v37  ;;  %638 = vmatpush1.bf16.msra.mxu1 %v11343_v57  ;;  %v10047_v57 = vcombine.high %v1183_v55, %v1191_v56  ;;  %v1096_v52 = vld [vmem:[%s15525_s7 + $0x948] sm:$0xff] }
 0x1d2   :  { %639 = vmatprep.subr.bf16.mxu1 %v11351_v59  ;;  %v1199_v59 = vld [vmem:[%s15525_s7 + $0xc80] sm:$0xff]  ;;  %v1104_v55 = vld [vmem:[%s15525_s7 + $0x988] sm:$0xff] }
 0x1d3   :  { %v1112_v56 = vld [vmem:[%s15525_s7 + $0x9c8] sm:$0xff] }
 0x1d5   :  { %640 = vmatpush1.bf16.msra.mxu1 %v11349_v61  ;;  %v10063_v61 = vcombine.high %v1199_v59, %v1207_v60 }
 0x1d6   :  { %641 = vmatprep.subr.bf16.mxu1 %v11354_v62  ;;  %v10062_v62 = vcombine.low %v1199_v59, %v1207_v60  ;;  %v1120_v59 = vld [vmem:[%s15525_s7 + $0xa08] sm:$0xff] }
 0x1d7   :  { %v1128_v60 = vld [vmem:[%s15525_s7 + $0xa48] sm:$0xff] }
 0x1d9   :  { %642 = vmatpush1.bf16.msra.mxu1 %v11352_v63  ;;  %v1215_v63 = vld [vmem:[%s15525_s7 + $0xd00] sm:$0xff] }
 0x1da   :  { %643 = vmatprep.subr.bf16.mxu1 %v11357_v0  ;;  %v1223_v0 = vld [vmem:[%s15525_s7 + $0xd40] sm:$0xff] }
 0x1dd   :  { %644 = vmatpush1.bf16.msra.mxu1 %v11355_v1  ;;  %v10079_v1 = vcombine.high %v1215_v63, %v1223_v0 }
 0x1de   :  { %2591 = vmatprep.subr.bf16.mxu1 %v9919_v25 }
 0x293   :  { %v311_v2 = vpop.f32.mrb[4].mxu1  ;;  %v395_v3 = vpop.f32.mrb[8].mxu0 }
 0x294   :  { %v11708_v4 = vadd.f32 %v395_v3, %v311_v2  ;;  %v313_v5 = vpop.f32.mrb[5].mxu1  ;;  %v397_v6 = vpop.f32.mrb[9].mxu0  ;;  %v10078_v2 = vcombine.low %v1215_v63, %v1223_v0  ;;  %v1231_v3 = vld [vmem:[%s15525_s7 + $0xd80] sm:$0xff]  ;;  %v1136_v63 = vld [vmem:[%s15525_s7 + $0xa88] sm:$0xff] }
 0x295   :  { %v11710_v7 = vadd.f32 %v397_v6, %v313_v5  ;;  %v315_v8 = vpop.f32.mrb[6].mxu1  ;;  %v399_v9 = vpop.f32.mrb[10].mxu0  ;;  %v1239_v5 = vld [vmem:[%s15525_s7 + $0xdc0] sm:$0xff]  ;;  %v1144_v0 = vld [vmem:[%s15525_s7 + $0xac8] sm:$0xff] }
 0x296   :  { %v316_v10 = vpop.f32.mrb[7].mxu1  ;;  %v400_v11 = vpop.f32.mrb[11].mxu0  ;;  %v10095_v6 = vcombine.high %v1231_v3, %v1239_v5  ;;  %v10094_v8 = vcombine.low %v1231_v3, %v1239_v5  ;;  %v1247_v9 = vld [vmem:[%s15525_s7 + $0xe00] sm:$0xff]  ;;  %v1152_v3 = vld [vmem:[%s15525_s7 + $0xb08] sm:$0xff] }
 0x297   :  { %v1255_v10 = vld [vmem:[%s15525_s7 + $0xe40] sm:$0xff]  ;;  %v1160_v5 = vld [vmem:[%s15525_s7 + $0xb48] sm:$0xff] }
 0x298   :  { %v10111_v11 = vcombine.high %v1247_v9, %v1255_v10 }
 0x29b   :  { %v440_v12 = vpop.f32.mrb[8].mxu1 }
 0x29c   :  { %v446_v13 = vpack.c.bf16 %v440_v12, %v440_v12  ;;  %v11294_v14 = vpop.f32.mrb[9].mxu1  ;;  %v10110_v12 = vcombine.low %v1247_v9, %v1255_v10  ;;  %v1168_v9 = vld [vmem:[%s15525_s7 + $0xb88] sm:$0xff] }
 0x29d   :  { %v443_v15 = vpop.f32.mrb[10].mxu1  ;;  %v1271_v14 = vld [vmem:[%s15525_s7 + $0xec0] sm:$0xff]  ;;  %v1176_v10 = vld [vmem:[%s15525_s7 + $0xbc8] sm:$0xff] }
 0x29e   :  { %v11295_v16 = vpop.f32.mrb[11].mxu1  ;;  %9903 = vmatmul.mubr.msk.bf16.vlgmr.msra.gmra.mrb[12].mxu0 %vm273_vm5, %v446_v13  ;;  %v1263_v13 = vld [vmem:[%s15525_s7 + $0xe80] sm:$0xff] }
 0x29f   :  { %741 = vmatprep.mubr.bf16.mxu0 %v11488_v37  ;;  %v10127_v15 = vcombine.high %v1263_v13, %v1271_v14  ;;  %v10126_v16 = vcombine.low %v1263_v13, %v1271_v14  ;;  %v1184_v13 = vld [vmem:[%s15525_s7 + $0xc08] sm:$0xff] }
 0x2a0   :  { %v1192_v14 = vld [vmem:[%s15525_s7 + $0xc48] sm:$0xff] }
 0x2a3   :  { %v579_v17 = vpop.f32.mrb[12].mxu1 }
 0x2a4   :  { %v585_v18 = vpack.c.bf16 %v579_v17, %v579_v17  ;;  %v11302_v19 = vpop.f32.mrb[13].mxu1  ;;  %v682_v17 = vlaneseq }
 0x2a5   :  { %v582_v20 = vpop.f32.mrb[14].mxu1 }
 0x2a6   :  { %v11303_v21 = vpop.f32.mrb[15].mxu1  ;;  %9913 = vmatmul.mubr.msk.bf16.vlgmr.msra.gmra.mrb[16].mxu1 %vm273_vm5, %v585_v18  ;;  %v11799_v18 = vshrl.u32 %v682_v17, 7  ;;  %v1200_v17 = vld [vmem:[%s15525_s7 + $0xc88] sm:$0xff] }
 0x2a7   :  { %2592 = vmatpush1.bf16.msra.mxu1 %v9918_v24 }
 0x2a8   :  { %2593 = vmatprep.subr.bf16.mxu1 %v9935_v28  ;;  %v11804_v25 = vsub.s32 0, %v11799_v18  ;;  %v11810_v27 = vsub.s32 1, %v11799_v18 }
 0x2aa   :  { %v685_v28 = vrot.slane %v680_v26, %v11804_v25 }
 0x2ab   :  { %2594 = vmatpush1.bf16.msra.mxu1 %v9934_v29 }
 0x2ac   :  { %2595 = vmatprep.subr.bf16.mxu1 %v9951_v32 }
 0x2af   :  { %2596 = vmatpush1.bf16.msra.mxu1 %v9950_v33 }
 0x2b0   :  { %2597 = vmatprep.subr.bf16.mxu1 %v9967_v36 }
 0x2b3   :  { %2598 = vmatpush1.bf16.msra.mxu1 %v9966_v38 }
 0x2b4   :  { %2599 = vmatprep.subr.bf16.mxu1 %v9983_v41 }
 0x2b7   :  { %2600 = vmatpush1.bf16.msra.mxu1 %v9982_v42  ;;  %v1056_v42 = vld [vmem:[%s15525_s7 + $0x808] sm:$0xff] }
 0x2b8   :  { %2601 = vmatprep.subr.bf16.mxu1 %v9999_v45  ;;  %v9921_v45 = vcombine.high %v1056_v42, %v1064_v43 }
 0x2bb   :  { %2602 = vmatpush1.bf16.msra.mxu1 %v9998_v46  ;;  %v1072_v46 = vld [vmem:[%s15525_s7 + $0x888] sm:$0xff] }
 0x2bc   :  { %2603 = vmatprep.subr.bf16.mxu1 %v10015_v49  ;;  %v9920_v49 = vcombine.low %v1056_v42, %v1064_v43  ;;  %v1279_v42 = vld [vmem:[%s15525_s7 + $0xf00] sm:$0xff] }
 0x2bd   :  { %v1287_v43 = vld [vmem:[%s15525_s7 + $0xf40] sm:$0xff] }
 0x2bf   :  { %2604 = vmatpush1.bf16.msra.mxu1 %v10014_v50  ;;  %v9937_v50 = vcombine.high %v1072_v46, %v1080_v47 }
 0x2c0   :  { %2605 = vmatprep.subr.bf16.mxu1 %v10031_v53  ;;  %v9936_v53 = vcombine.low %v1072_v46, %v1080_v47  ;;  %v10143_v46 = vcombine.high %v1279_v42, %v1287_v43  ;;  %v1288_v47 = vld [vmem:[%s15525_s7 + $0xf48] sm:$0xff] }
 0x2c3   :  { %2606 = vmatpush1.bf16.msra.mxu1 %v10030_v54  ;;  %v9953_v54 = vcombine.high %v1088_v51, %v1096_v52 }
 0x2c4   :  { %2607 = vmatprep.subr.bf16.mxu1 %v10047_v57  ;;  %v9952_v57 = vcombine.low %v1088_v51, %v1096_v52  ;;  %v1303_v51 = vld [vmem:[%s15525_s7 + $0xfc0] sm:$0xff]  ;;  %v1296_v52 = vld [vmem:[%s15525_s7 + $0xf88] sm:$0xff] }
 0x2c7   :  { %2608 = vmatpush1.bf16.msra.mxu1 %v10046_v58  ;;  %v9969_v58 = vcombine.high %v1104_v55, %v1112_v56 }
 0x2c8   :  { %2609 = vmatprep.subr.bf16.mxu1 %v10063_v61  ;;  %v9968_v61 = vcombine.low %v1104_v55, %v1112_v56 }
 0x2cb   :  { %2610 = vmatpush1.bf16.msra.mxu1 %v10062_v62  ;;  %v9985_v62 = vcombine.high %v1120_v59, %v1128_v60 }
 0x2cc   :  { %2611 = vmatprep.subr.bf16.mxu1 %v10079_v1  ;;  %v9984_v1 = vcombine.low %v1120_v59, %v1128_v60  ;;  %v1065_v59 = vld [vmem:[%s15525_s7 + $0x850] sm:$0xff]  ;;  %v1058_v60 = vld [vmem:[%s15525_s7 + $0x818] sm:$0xff] }
 0x2cf   :  { %2612 = vmatpush1.bf16.msra.mxu1 %v10078_v2  ;;  %v10001_v2 = vcombine.high %v1136_v63, %v1144_v0 }
 0x2d0   :  { %2613 = vmatprep.subr.bf16.mxu1 %v10095_v6  ;;  %v10000_v6 = vcombine.low %v1136_v63, %v1144_v0 }
 0x2d3   :  { %2614 = vmatpush1.bf16.msra.mxu1 %v10094_v8  ;;  %v10017_v8 = vcombine.high %v1152_v3, %v1160_v5 }
 0x2d4   :  { %2615 = vmatprep.subr.bf16.mxu1 %v10111_v11  ;;  %v10016_v11 = vcombine.low %v1152_v3, %v1160_v5 }
 0x2d7   :  { %2616 = vmatpush1.bf16.msra.mxu1 %v10110_v12  ;;  %v10033_v12 = vcombine.high %v1168_v9, %v1176_v10 }
 0x2d8   :  { %2617 = vmatprep.subr.bf16.mxu1 %v10127_v15  ;;  %v10032_v15 = vcombine.low %v1168_v9, %v1176_v10  ;;  %v1073_v9 = vld [vmem:[%s15525_s7 + $0x890] sm:$0xff] }
 0x2db   :  { %2618 = vmatpush1.bf16.msra.mxu1 %v10126_v16  ;;  %v10049_v16 = vcombine.high %v1184_v13, %v1192_v14 }
 0x2dc   :  { %2619 = vmatprep.subr.bf16.mxu1 %v10143_v46 }
 0x371   :  { %v532_v19 = vpop.f32.mrb[12].mxu0 }
 0x372   :  { %v539_v20 = vadd.f32 %v532_v19, %v11708_v4  ;;  %v534_v21 = vpop.f32.mrb[13].mxu0  ;;  %v689_v4 = vrot.slane %v680_v26, %v11810_v27  ;;  %v1208_v19 = vld [vmem:[%s15525_s7 + $0xcc8] sm:$0xff] }
 0x373   :  { %v540_v22 = vadd.f32 %v534_v21, %v11710_v7  ;;  %v536_v23 = vpop.f32.mrb[14].mxu0  ;;  %v10065_v21 = vcombine.high %v1200_v17, %v1208_v19 }
 0x374   :  { %v537_v24 = vpop.f32.mrb[15].mxu0  ;;  %v1224_v23 = vld [vmem:[%s15525_s7 + $0xd48] sm:$0xff] }
 0x375   :  { %v10064_v24 = vcombine.low %v1200_v17, %v1208_v19  ;;  %v1089_v19 = vld [vmem:[%s15525_s7 + $0x910] sm:$0xff] }
 0x379   :  { %v671_v29 = vpop.f32.mrb[16].mxu1 }
 0x37a   :  { %v678_v30 = vadd.f32 %v671_v29, %v539_v20  ;;  %v673_v31 = vpop.f32.mrb[17].mxu1  ;;  %v10048_v20 = vcombine.low %v1184_v13, %v1192_v14  ;;  %v1240_v29 = vld [vmem:[%s15525_s7 + $0xdc8] sm:$0xff]  ;;  %v1082_v13 = vld [vmem:[%s15525_s7 + $0x8d8] sm:$0xff] }
 0x37b   :  { %v679_v7 = vadd.f32 %v673_v31, %v540_v22  ;;  %v675_v32 = vpop.f32.mrb[18].mxu1  ;;  %v1216_v22 = vld [vmem:[%s15525_s7 + $0xd08] sm:$0xff] }
 0x37c   :  { %v692_v33 = vadd.f32 %v685_v28, %v678_v30  ;;  %v676_v34 = vpop.f32.mrb[19].mxu1  ;;  %v10081_v26 = vcombine.high %v1216_v22, %v1224_v23  ;;  %v1232_v28 = vld [vmem:[%s15525_s7 + $0xd88] sm:$0xff] }
 0x37d   :  { %v693_v35 = vadd.f32 %v689_v4, %v679_v7  ;;  %v10080_v4 = vcombine.low %v1216_v22, %v1224_v23  ;;  %v10097_v30 = vcombine.high %v1232_v28, %v1240_v29  ;;  %v1248_v31 = vld [vmem:[%s15525_s7 + $0xe08] sm:$0xff]  ;;  %v10096_v32 = vcombine.low %v1232_v28, %v1240_v29  ;;  %v1097_v22 = vld [vmem:[%s15525_s7 + $0x950] sm:$0xff]  ;;  %v1090_v23 = vld [vmem:[%s15525_s7 + $0x918] sm:$0xff] }
 0x37e   :  { %v694_v36 = vmax.f32 %v692_v33, 0.0  ;;  %v1256_v7 = vld [vmem:[%s15525_s7 + $0xe48] sm:$0xff]  ;;  %v9955_v29 = vcombine.high %v1089_v19, %v1097_v22 }
 0x37f   :  { %v695_v38 = vmax.f32 %v693_v35, 0.0  ;;  %v10113_v33 = vcombine.high %v1248_v31, %v1256_v7  ;;  %v1264_v34 = vld [vmem:[%s15525_s7 + $0xe88] sm:$0xff] }
 0x380   :  { %v696_v39 = vpack.c.bf16 %v694_v36, %v694_v36  ;;  %v1272_v35 = vld [vmem:[%s15525_s7 + $0xec8] sm:$0xff]  ;;  %v10112_v36 = vcombine.low %v1248_v31, %v1256_v7  ;;  %v1113_v31 = vld [vmem:[%s15525_s7 + $0x9d0] sm:$0xff]  ;;  %v1106_v7 = vld [vmem:[%s15525_s7 + $0x998] sm:$0xff] }
 0x381   :  { %v11814_v40 = vpack.c.bf16 %v695_v38, %v695_v38  ;;  %v10129_v38 = vcombine.high %v1264_v34, %v1272_v35 }
 0x382   :  { %v11817_v41 = vsel %vm127_vm3, %v696_v39, 0  ;;  %v10128_v39 = vcombine.low %v1264_v34, %v1272_v35 }
 0x383   :  { %9914 = vmatprep.subr.msk.bf16.mxu0 %vm127_vm3, %v11814_v40 }
 0x384   :  { %710 = vmatpush1.bf16.msra.mxu0 %v11817_v41 }
 0x385   :  { %9916 = vmatprep.subr.msk.bf16.mxu0 %vm127_vm3, %v11814_v40 }
 0x387   :  { %9915 = vmatmul.mubr.msk.bf16.vlgmr.msra.gmra.mrb[16].mxu0 %vm699_vm6, %v698_v44  ;;  %v1280_v44 = vld [vmem:[%s15525_s7 + $0xf08] sm:$0xff] }
 0x388   :  { %1013 = vmatpush1.bf16.msra.mxu0 %v11817_v41  ;;  %1044 = vmatprep.mubr.bf16.mxu0 %v11488_v37 }
 0x389   :  { %2632 = vmatprep.subr.bf16.mxu0 %v9921_v45  ;;  %v10142_v45 = vcombine.low %v1279_v42, %v1287_v43  ;;  %v1122_v42 = vld [vmem:[%s15525_s7 + $0xa18] sm:$0xff] }
 0x38a   :  { %v1130_v43 = vld [vmem:[%s15525_s7 + $0xa58] sm:$0xff] }
 0x38b   :  { %2620 = vmatpush1.bf16.msra.mxu1 %v10142_v45 }
 0x38f   :  { %9917 = vmatmul.mubr.msk.bf16.vlgmr.msra.gmra.mrb[20].mxu0 %vm699_vm6, %v1008_v48  ;;  %v10144_v48 = vcombine.low %v1280_v44, %v1288_v47 }
 0x390   :  { %2633 = vmatpush1.bf16.msra.mxu0 %v9920_v49  ;;  %v10145_v49 = vcombine.high %v1280_v44, %v1288_v47  ;;  %v9989_v47 = vcombine.high %v1122_v42, %v1130_v43 }
 0x391   :  { %2634 = vmatprep.subr.bf16.mxu0 %v9937_v50  ;;  %v1295_v50 = vld [vmem:[%s15525_s7 + $0xf80] sm:$0xff] }
 0x392   :  { %v10158_v55 = vcombine.low %v1295_v50, %v1303_v51 }
 0x394   :  { %2635 = vmatpush1.bf16.msra.mxu0 %v9936_v53  ;;  %v10159_v53 = vcombine.high %v1295_v50, %v1303_v51  ;;  %v1138_v50 = vld [vmem:[%s15525_s7 + $0xa98] sm:$0xff] }
 0x395   :  { %2636 = vmatprep.subr.bf16.mxu0 %v9953_v54  ;;  %v1304_v54 = vld [vmem:[%s15525_s7 + $0xfc8] sm:$0xff]  ;;  %v1146_v51 = vld [vmem:[%s15525_s7 + $0xad8] sm:$0xff] }
 0x396   :  { %v10160_v56 = vcombine.low %v1296_v52, %v1304_v54  ;;  %2621 = vmatprep.subr.bf16.mxu1 %v10159_v53  ;;  %v9988_v53 = vcombine.low %v1122_v42, %v1130_v43  ;;  %v1233_v42 = vld [vmem:[%s15525_s7 + $0xd90] sm:$0xff] }
 0x397   :  { %2622 = vmatpush1.bf16.msra.mxu1 %v10158_v55  ;;  %v10005_v55 = vcombine.high %v1138_v50, %v1146_v51  ;;  %v1241_v43 = vld [vmem:[%s15525_s7 + $0xdd0] sm:$0xff] }
 0x398   :  { %2637 = vmatpush1.bf16.msra.mxu0 %v9952_v57  ;;  %v10161_v57 = vcombine.high %v1296_v52, %v1304_v54 }
 0x399   :  { %2638 = vmatprep.subr.bf16.mxu0 %v9969_v58  ;;  %v1057_v58 = vld [vmem:[%s15525_s7 + $0x810] sm:$0xff] }
 0x39a   :  { %v9922_v63 = vcombine.low %v1057_v58, %v1065_v59 }
 0x39c   :  { %2639 = vmatpush1.bf16.msra.mxu0 %v9968_v61  ;;  %v9923_v61 = vcombine.high %v1057_v58, %v1065_v59  ;;  %v1154_v58 = vld [vmem:[%s15525_s7 + $0xb18] sm:$0xff] }
 0x39d   :  { %2640 = vmatprep.subr.bf16.mxu0 %v9985_v62  ;;  %v1066_v62 = vld [vmem:[%s15525_s7 + $0x858] sm:$0xff] }
 0x39e   :  { %v9924_v0 = vcombine.low %v1058_v60, %v1066_v62  ;;  %2673 = vmatprep.subr.bf16.mxu1 %v9923_v61  ;;  %v1162_v59 = vld [vmem:[%s15525_s7 + $0xb58] sm:$0xff]  ;;  %v10004_v61 = vcombine.low %v1138_v50, %v1146_v51  ;;  %v1249_v50 = vld [vmem:[%s15525_s7 + $0xe10] sm:$0xff] }
 0x39f   :  { %v1257_v51 = vld [vmem:[%s15525_s7 + $0xe50] sm:$0xff] }
 0x3a0   :  { %2641 = vmatpush1.bf16.msra.mxu0 %v9984_v1  ;;  %v9925_v1 = vcombine.high %v1058_v60, %v1066_v62 }
 0x3a1   :  { %2642 = vmatprep.subr.bf16.mxu0 %v10001_v2 }
 0x3a4   :  { %2643 = vmatpush1.bf16.msra.mxu0 %v10000_v6 }
 0x3a5   :  { %2644 = vmatprep.subr.bf16.mxu0 %v10017_v8 }
 0x3a8   :  { %2645 = vmatpush1.bf16.msra.mxu0 %v10016_v11  ;;  %v1081_v11 = vld [vmem:[%s15525_s7 + $0x8d0] sm:$0xff] }
 0x3a9   :  { %2646 = vmatprep.subr.bf16.mxu0 %v10033_v12  ;;  %v1074_v12 = vld [vmem:[%s15525_s7 + $0x898] sm:$0xff] }
 0x3aa   :  { %v9940_v28 = vcombine.low %v1074_v12, %v1082_v13 }
 0x3ac   :  { %2647 = vmatpush1.bf16.msra.mxu0 %v10032_v15 }
 0x3ad   :  { %2648 = vmatprep.subr.bf16.mxu0 %v10049_v16 }
 0x3b0   :  { %2649 = vmatpush1.bf16.msra.mxu0 %v10048_v20  ;;  %v9939_v20 = vcombine.high %v1073_v9, %v1081_v11 }
 0x3b1   :  { %2650 = vmatprep.subr.bf16.mxu0 %v10065_v21  ;;  %v9941_v21 = vcombine.high %v1074_v12, %v1082_v13  ;;  %v1185_v12 = vld [vmem:[%s15525_s7 + $0xc10] sm:$0xff] }
 0x3b2   :  { %v1193_v13 = vld [vmem:[%s15525_s7 + $0xc50] sm:$0xff] }
 0x3b4   :  { %2651 = vmatpush1.bf16.msra.mxu0 %v10064_v24  ;;  %v1098_v24 = vld [vmem:[%s15525_s7 + $0x958] sm:$0xff] }
 0x3b5   :  { %2652 = vmatprep.subr.bf16.mxu0 %v10081_v26  ;;  %v9938_v26 = vcombine.low %v1073_v9, %v1081_v11  ;;  %v9956_v34 = vcombine.low %v1090_v23, %v1098_v24  ;;  %v10020_v9 = vcombine.low %v1154_v58, %v1162_v59 }
 0x3b8   :  { %2653 = vmatpush1.bf16.msra.mxu0 %v10080_v4  ;;  %v9957_v4 = vcombine.high %v1090_v23, %v1098_v24  ;;  %v1201_v23 = vld [vmem:[%s15525_s7 + $0xc90] sm:$0xff] }
 0x3b9   :  { %2654 = vmatprep.subr.bf16.mxu0 %v10097_v30  ;;  %v1105_v30 = vld [vmem:[%s15525_s7 + $0x990] sm:$0xff] }
 0x3ba   :  { %v9971_v35 = vcombine.high %v1105_v30, %v1113_v31  ;;  %v9970_v44 = vcombine.low %v1105_v30, %v1113_v31  ;;  %v1209_v24 = vld [vmem:[%s15525_s7 + $0xcd0] sm:$0xff] }
 0x3bb   :  { %v10067_v30 = vcombine.high %v1201_v23, %v1209_v24 }
 0x3bc   :  { %2655 = vmatpush1.bf16.msra.mxu0 %v10096_v32  ;;  %v1114_v32 = vld [vmem:[%s15525_s7 + $0x9d8] sm:$0xff] }
 0x3bd   :  { %2656 = vmatprep.subr.bf16.mxu0 %v10113_v33  ;;  %v9954_v33 = vcombine.low %v1089_v19, %v1097_v22  ;;  %v9972_v45 = vcombine.low %v1106_v7, %v1114_v32 }
 0x3c0   :  { %2657 = vmatpush1.bf16.msra.mxu0 %v10112_v36  ;;  %v9973_v36 = vcombine.high %v1106_v7, %v1114_v32  ;;  %v1217_v7 = vld [vmem:[%s15525_s7 + $0xd10] sm:$0xff] }
 0x3c1   :  { %2658 = vmatprep.subr.bf16.mxu0 %v10129_v38  ;;  %v1121_v38 = vld [vmem:[%s15525_s7 + $0xa10] sm:$0xff] }
 0x3c2   :  { %v1225_v32 = vld [vmem:[%s15525_s7 + $0xd50] sm:$0xff] }
 0x3c4   :  { %2659 = vmatpush1.bf16.msra.mxu0 %v10128_v39  ;;  %v1129_v39 = vld [vmem:[%s15525_s7 + $0xa50] sm:$0xff] }
 0x3c5   :  { %2660 = vmatprep.subr.bf16.mxu0 %v10145_v49  ;;  %v9987_v46 = vcombine.high %v1121_v38, %v1129_v39  ;;  %v1145_v49 = vld [vmem:[%s15525_s7 + $0xad0] sm:$0xff]  ;;  %v9986_v52 = vcombine.low %v1121_v38, %v1129_v39  ;;  %v10083_v38 = vcombine.high %v1217_v7, %v1225_v32 }
 0x3c8   :  { %2661 = vmatpush1.bf16.msra.mxu0 %v10144_v48  ;;  %v1137_v48 = vld [vmem:[%s15525_s7 + $0xa90] sm:$0xff] }
 0x3c9   :  { %2662 = vmatprep.subr.bf16.mxu0 %v10161_v57  ;;  %v10003_v54 = vcombine.high %v1137_v48, %v1145_v49  ;;  %v1161_v57 = vld [vmem:[%s15525_s7 + $0xb50] sm:$0xff]  ;;  %v10002_v60 = vcombine.low %v1137_v48, %v1145_v49  ;;  %v10099_v48 = vcombine.high %v1233_v42, %v1241_v43 }
 0x3cc   :  { %2663 = vmatpush1.bf16.msra.mxu0 %v10160_v56  ;;  %v1153_v56 = vld [vmem:[%s15525_s7 + $0xb10] sm:$0xff] }
 0x3cd   :  { %2714 = vmatprep.subr.bf16.mxu0 %v9925_v1  ;;  %v10019_v62 = vcombine.high %v1153_v56, %v1161_v57  ;;  %v1177_v1 = vld [vmem:[%s15525_s7 + $0xbd0] sm:$0xff] }
 0x45a   :  { %v11954_v2 = vpop.f32.mrb[16].mxu0 }
 0x45b   :  { %v11956_v3 = vpop.f32.mrb[17].mxu0 }
 0x45c   :  { %v747_v5 = vpop.f32.mrb[18].mxu0 }
 0x45d   :  { %v748_v6 = vpop.f32.mrb[19].mxu0  ;;  %v1170_v5 = vld [vmem:[%s15525_s7 + $0xb98] sm:$0xff] }
 0x45e   :  { %v1178_v6 = vld [vmem:[%s15525_s7 + $0xbd8] sm:$0xff] }
 0x45f   :  { %v10037_v11 = vcombine.high %v1170_v5, %v1178_v6 }
 0x462   :  { %v1046_v8 = vpop.f32.mrb[20].mxu0 }
 0x463   :  { %v1048_v10 = vpop.f32.mrb[21].mxu0  ;;  %v11972_v16 = vpack.c.bf16 %v1046_v8, %v1046_v8  ;;  %v10018_v8 = vcombine.low %v1153_v56, %v1161_v57  ;;  %v10115_v56 = vcombine.high %v1249_v50, %v1257_v51 }
 0x464   :  { %v11970_v14 = vpack.c.bf16 %v1048_v10, %v1048_v10  ;;  %v1050_v15 = vpop.f32.mrb[22].mxu0 }
 0x465   :  { %v1051_v17 = vpop.f32.mrb[23].mxu0  ;;  %v1186_v15 = vld [vmem:[%s15525_s7 + $0xc18] sm:$0xff] }
 0x466   :  { %2623 = vmatprep.mubr.bf16.mxu1 %v11970_v14  ;;  %2664 = vmatprep.mubr.bf16.mxu0 %v11970_v14  ;;  %v1194_v17 = vld [vmem:[%s15525_s7 + $0xc58] sm:$0xff] }
 0x467   :  { %2624 = vmatmul.mubr.bf16.vlgmr.msra.gmra.mrb[20].mxu1 %v11972_v16  ;;  %2665 = vmatmul.mubr.bf16.vlgmr.msra.gmra.mrb[24].mxu0 %v11972_v16  ;;  %v10053_v22 = vcombine.high %v1186_v15, %v1194_v17 }
 0x468   :  { %2674 = vmatpush1.bf16.msra.mxu1 %v9922_v63  ;;  %2715 = vmatpush1.bf16.msra.mxu0 %v9924_v0  ;;  %v10021_v63 = vcombine.high %v1154_v58, %v1162_v59  ;;  %v1169_v0 = vld [vmem:[%s15525_s7 + $0xb90] sm:$0xff] }
 0x469   :  { %2705 = vmatprep.mubr.bf16.mxu1 %v11970_v14  ;;  %2746 = vmatprep.mubr.bf16.mxu0 %v11970_v14  ;;  %v10035_v10 = vcombine.high %v1169_v0, %v1177_v1  ;;  %v10034_v19 = vcombine.low %v1169_v0, %v1177_v1  ;;  %v1265_v58 = vld [vmem:[%s15525_s7 + $0xe90] sm:$0xff] }
 0x46a   :  { %2675 = vmatprep.subr.bf16.mxu1 %v9939_v20  ;;  %2716 = vmatprep.subr.bf16.mxu0 %v9941_v21  ;;  %v10036_v20 = vcombine.low %v1170_v5, %v1178_v6  ;;  %v10051_v21 = vcombine.high %v1185_v12, %v1193_v13  ;;  %v1273_v59 = vld [vmem:[%s15525_s7 + $0xed0] sm:$0xff] }
 0x46b   :  { %v10131_v0 = vcombine.high %v1265_v58, %v1273_v59  ;;  %v1281_v5 = vld [vmem:[%s15525_s7 + $0xf10] sm:$0xff] }
 0x46c   :  { %2676 = vmatpush1.bf16.msra.mxu1 %v9938_v26  ;;  %2717 = vmatpush1.bf16.msra.mxu0 %v9940_v28  ;;  %v1202_v26 = vld [vmem:[%s15525_s7 + $0xc98] sm:$0xff]  ;;  %v1289_v6 = vld [vmem:[%s15525_s7 + $0xf50] sm:$0xff] }
 0x46d   :  { %2677 = vmatprep.subr.bf16.mxu1 %v9955_v29  ;;  %2718 = vmatprep.subr.bf16.mxu0 %v9957_v4  ;;  %v1210_v28 = vld [vmem:[%s15525_s7 + $0xcd8] sm:$0xff]  ;;  %v10050_v29 = vcombine.low %v1185_v12, %v1193_v13  ;;  %v10052_v4 = vcombine.low %v1186_v15, %v1194_v17  ;;  %v10147_v12 = vcombine.high %v1281_v5, %v1289_v6  ;;  %v1297_v15 = vld [vmem:[%s15525_s7 + $0xf90] sm:$0xff] }
 0x46e   :  { %v10069_v31 = vcombine.high %v1202_v26, %v1210_v28  ;;  %v1305_v17 = vld [vmem:[%s15525_s7 + $0xfd0] sm:$0xff] }
 0x470   :  { %2678 = vmatpush1.bf16.msra.mxu1 %v9954_v33  ;;  %2719 = vmatpush1.bf16.msra.mxu0 %v9956_v34  ;;  %v1218_v33 = vld [vmem:[%s15525_s7 + $0xd18] sm:$0xff] }
 0x471   :  { %2679 = vmatprep.subr.bf16.mxu1 %v9971_v35  ;;  %2720 = vmatprep.subr.bf16.mxu0 %v9973_v36  ;;  %v1226_v34 = vld [vmem:[%s15525_s7 + $0xd58] sm:$0xff]  ;;  %v10066_v35 = vcombine.low %v1201_v23, %v1209_v24  ;;  %v10068_v36 = vcombine.low %v1202_v26, %v1210_v28  ;;  %v10163_v23 = vcombine.high %v1297_v15, %v1305_v17  ;;  %v1059_v26 = vld [vmem:[%s15525_s7 + $0x820] sm:$0xff] }
 0x472   :  { %v10085_v39 = vcombine.high %v1218_v33, %v1226_v34  ;;  %v1067_v28 = vld [vmem:[%s15525_s7 + $0x860] sm:$0xff] }
 0x474   :  { %2680 = vmatpush1.bf16.msra.mxu1 %v9970_v44  ;;  %2721 = vmatpush1.bf16.msra.mxu0 %v9972_v45  ;;  %v1234_v44 = vld [vmem:[%s15525_s7 + $0xd98] sm:$0xff] }
 0x475   :  { %2681 = vmatprep.subr.bf16.mxu1 %v9987_v46  ;;  %2722 = vmatprep.subr.bf16.mxu0 %v9989_v47  ;;  %v1242_v45 = vld [vmem:[%s15525_s7 + $0xdd8] sm:$0xff]  ;;  %v10082_v46 = vcombine.low %v1217_v7, %v1225_v32  ;;  %v10084_v47 = vcombine.low %v1218_v33, %v1226_v34  ;;  %v9927_v7 = vcombine.high %v1059_v26, %v1067_v28  ;;  %v1075_v33 = vld [vmem:[%s15525_s7 + $0x8a0] sm:$0xff] }
 0x476   :  { %v10101_v49 = vcombine.high %v1234_v44, %v1242_v45  ;;  %v1083_v34 = vld [vmem:[%s15525_s7 + $0x8e0] sm:$0xff] }
 0x478   :  { %2682 = vmatpush1.bf16.msra.mxu1 %v9986_v52  ;;  %2723 = vmatpush1.bf16.msra.mxu0 %v9988_v53  ;;  %v1250_v52 = vld [vmem:[%s15525_s7 + $0xe18] sm:$0xff] }
 0x479   :  { %2683 = vmatprep.subr.bf16.mxu1 %v10003_v54  ;;  %2724 = vmatprep.subr.bf16.mxu0 %v10005_v55  ;;  %v1258_v53 = vld [vmem:[%s15525_s7 + $0xe58] sm:$0xff]  ;;  %v10098_v54 = vcombine.low %v1233_v42, %v1241_v43  ;;  %v10100_v55 = vcombine.low %v1234_v44, %v1242_v45  ;;  %v9943_v42 = vcombine.high %v1075_v33, %v1083_v34  ;;  %v1091_v44 = vld [vmem:[%s15525_s7 + $0x920] sm:$0xff] }
 0x47a   :  { %v10117_v57 = vcombine.high %v1250_v52, %v1258_v53  ;;  %v1099_v45 = vld [vmem:[%s15525_s7 + $0x960] sm:$0xff] }
 0x47c   :  { %2684 = vmatpush1.bf16.msra.mxu1 %v10002_v60  ;;  %2725 = vmatpush1.bf16.msra.mxu0 %v10004_v61  ;;  %v1266_v60 = vld [vmem:[%s15525_s7 + $0xe98] sm:$0xff] }
 0x47d   :  { %2685 = vmatprep.subr.bf16.mxu1 %v10019_v62  ;;  %2726 = vmatprep.subr.bf16.mxu0 %v10021_v63  ;;  %v1274_v61 = vld [vmem:[%s15525_s7 + $0xed8] sm:$0xff]  ;;  %v10114_v62 = vcombine.low %v1249_v50, %v1257_v51  ;;  %v10116_v63 = vcombine.low %v1250_v52, %v1258_v53  ;;  %v9959_v50 = vcombine.high %v1091_v44, %v1099_v45  ;;  %v1107_v52 = vld [vmem:[%s15525_s7 + $0x9a0] sm:$0xff] }
 0x47e   :  { %v10133_v1 = vcombine.high %v1266_v60, %v1274_v61  ;;  %v1115_v53 = vld [vmem:[%s15525_s7 + $0x9e0] sm:$0xff] }
 0x480   :  { %2686 = vmatpush1.bf16.msra.mxu1 %v10018_v8  ;;  %2727 = vmatpush1.bf16.msra.mxu0 %v10020_v9  ;;  %v1282_v8 = vld [vmem:[%s15525_s7 + $0xf18] sm:$0xff] }
 0x481   :  { %2687 = vmatprep.subr.bf16.mxu1 %v10035_v10  ;;  %2728 = vmatprep.subr.bf16.mxu0 %v10037_v11  ;;  %v1290_v9 = vld [vmem:[%s15525_s7 + $0xf58] sm:$0xff]  ;;  %v10130_v10 = vcombine.low %v1265_v58, %v1273_v59  ;;  %v10132_v11 = vcombine.low %v1266_v60, %v1274_v61  ;;  %v9975_v58 = vcombine.high %v1107_v52, %v1115_v53  ;;  %v1123_v60 = vld [vmem:[%s15525_s7 + $0xa20] sm:$0xff] }
 0x482   :  { %v10149_v13 = vcombine.high %v1282_v8, %v1290_v9  ;;  %v1131_v61 = vld [vmem:[%s15525_s7 + $0xa60] sm:$0xff] }
 0x484   :  { %2688 = vmatpush1.bf16.msra.mxu1 %v10034_v19  ;;  %2729 = vmatpush1.bf16.msra.mxu0 %v10036_v20  ;;  %v1298_v19 = vld [vmem:[%s15525_s7 + $0xf98] sm:$0xff] }
 0x485   :  { %2689 = vmatprep.subr.bf16.mxu1 %v10051_v21  ;;  %2730 = vmatprep.subr.bf16.mxu0 %v10053_v22  ;;  %v1306_v20 = vld [vmem:[%s15525_s7 + $0xfd8] sm:$0xff]  ;;  %v10146_v21 = vcombine.low %v1281_v5, %v1289_v6  ;;  %v10148_v22 = vcombine.low %v1282_v8, %v1290_v9  ;;  %v9991_v5 = vcombine.high %v1123_v60, %v1131_v61  ;;  %v1139_v8 = vld [vmem:[%s15525_s7 + $0xaa0] sm:$0xff] }
 0x486   :  { %v10165_v24 = vcombine.high %v1298_v19, %v1306_v20  ;;  %v1147_v9 = vld [vmem:[%s15525_s7 + $0xae0] sm:$0xff] }
 0x488   :  { %2690 = vmatpush1.bf16.msra.mxu1 %v10050_v29  ;;  %2731 = vmatpush1.bf16.msra.mxu0 %v10052_v4  ;;  %v1060_v29 = vld [vmem:[%s15525_s7 + $0x828] sm:$0xff] }
 0x489   :  { %2691 = vmatprep.subr.bf16.mxu1 %v10067_v30  ;;  %2732 = vmatprep.subr.bf16.mxu0 %v10069_v31  ;;  %v1068_v4 = vld [vmem:[%s15525_s7 + $0x868] sm:$0xff]  ;;  %v10162_v30 = vcombine.low %v1297_v15, %v1305_v17  ;;  %v10164_v31 = vcombine.low %v1298_v19, %v1306_v20  ;;  %v10007_v15 = vcombine.high %v1139_v8, %v1147_v9  ;;  %v1155_v19 = vld [vmem:[%s15525_s7 + $0xb20] sm:$0xff] }
 0x48a   :  { %v9929_v32 = vcombine.high %v1060_v29, %v1068_v4  ;;  %v1163_v20 = vld [vmem:[%s15525_s7 + $0xb60] sm:$0xff] }
 0x48c   :  { %2692 = vmatpush1.bf16.msra.mxu1 %v10066_v35  ;;  %2733 = vmatpush1.bf16.msra.mxu0 %v10068_v36  ;;  %v1076_v35 = vld [vmem:[%s15525_s7 + $0x8a8] sm:$0xff] }
 0x48d   :  { %2693 = vmatprep.subr.bf16.mxu1 %v10083_v38  ;;  %2734 = vmatprep.subr.bf16.mxu0 %v10085_v39  ;;  %v1084_v36 = vld [vmem:[%s15525_s7 + $0x8e8] sm:$0xff]  ;;  %v9926_v38 = vcombine.low %v1059_v26, %v1067_v28  ;;  %v9928_v39 = vcombine.low %v1060_v29, %v1068_v4  ;;  %v10023_v26 = vcombine.high %v1155_v19, %v1163_v20  ;;  %v1171_v29 = vld [vmem:[%s15525_s7 + $0xba0] sm:$0xff] }
 0x48e   :  { %v9945_v43 = vcombine.high %v1076_v35, %v1084_v36  ;;  %v1179_v4 = vld [vmem:[%s15525_s7 + $0xbe0] sm:$0xff] }
 0x490   :  { %2694 = vmatpush1.bf16.msra.mxu1 %v10082_v46  ;;  %2735 = vmatpush1.bf16.msra.mxu0 %v10084_v47  ;;  %v1092_v46 = vld [vmem:[%s15525_s7 + $0x928] sm:$0xff] }
 0x491   :  { %2695 = vmatprep.subr.bf16.mxu1 %v10099_v48  ;;  %2736 = vmatprep.subr.bf16.mxu0 %v10101_v49  ;;  %v1100_v47 = vld [vmem:[%s15525_s7 + $0x968] sm:$0xff]  ;;  %v9942_v48 = vcombine.low %v1075_v33, %v1083_v34  ;;  %v9944_v49 = vcombine.low %v1076_v35, %v1084_v36  ;;  %v10039_v33 = vcombine.high %v1171_v29, %v1179_v4  ;;  %v1187_v35 = vld [vmem:[%s15525_s7 + $0xc20] sm:$0xff] }
 0x492   :  { %v9961_v51 = vcombine.high %v1092_v46, %v1100_v47  ;;  %v1195_v36 = vld [vmem:[%s15525_s7 + $0xc60] sm:$0xff] }
 0x494   :  { %2696 = vmatpush1.bf16.msra.mxu1 %v10098_v54  ;;  %2737 = vmatpush1.bf16.msra.mxu0 %v10100_v55  ;;  %v1108_v54 = vld [vmem:[%s15525_s7 + $0x9a8] sm:$0xff] }
 0x495   :  { %2697 = vmatprep.subr.bf16.mxu1 %v10115_v56  ;;  %2738 = vmatprep.subr.bf16.mxu0 %v10117_v57  ;;  %v1116_v55 = vld [vmem:[%s15525_s7 + $0x9e8] sm:$0xff]  ;;  %v9958_v56 = vcombine.low %v1091_v44, %v1099_v45  ;;  %v9960_v57 = vcombine.low %v1092_v46, %v1100_v47  ;;  %v10055_v44 = vcombine.high %v1187_v35, %v1195_v36  ;;  %v1203_v46 = vld [vmem:[%s15525_s7 + $0xca0] sm:$0xff] }
 0x496   :  { %v9977_v59 = vcombine.high %v1108_v54, %v1116_v55  ;;  %v1211_v47 = vld [vmem:[%s15525_s7 + $0xce0] sm:$0xff] }
 0x498   :  { %2698 = vmatpush1.bf16.msra.mxu1 %v10114_v62  ;;  %2739 = vmatpush1.bf16.msra.mxu0 %v10116_v63  ;;  %v1124_v62 = vld [vmem:[%s15525_s7 + $0xa28] sm:$0xff] }
 0x499   :  { %2699 = vmatprep.subr.bf16.mxu1 %v10131_v0  ;;  %2740 = vmatprep.subr.bf16.mxu0 %v10133_v1  ;;  %v1132_v63 = vld [vmem:[%s15525_s7 + $0xa68] sm:$0xff]  ;;  %v9974_v0 = vcombine.low %v1107_v52, %v1115_v53  ;;  %v9976_v1 = vcombine.low %v1108_v54, %v1116_v55  ;;  %v10071_v52 = vcombine.high %v1203_v46, %v1211_v47  ;;  %v1219_v54 = vld [vmem:[%s15525_s7 + $0xd20] sm:$0xff] }
 0x49a   :  { %v9993_v6 = vcombine.high %v1124_v62, %v1132_v63  ;;  %v1227_v55 = vld [vmem:[%s15525_s7 + $0xd60] sm:$0xff] }
 0x49c   :  { %2700 = vmatpush1.bf16.msra.mxu1 %v10130_v10  ;;  %2741 = vmatpush1.bf16.msra.mxu0 %v10132_v11  ;;  %v1140_v10 = vld [vmem:[%s15525_s7 + $0xaa8] sm:$0xff] }
 0x49d   :  { %2701 = vmatprep.subr.bf16.mxu1 %v10147_v12  ;;  %2742 = vmatprep.subr.bf16.mxu0 %v10149_v13  ;;  %v1148_v11 = vld [vmem:[%s15525_s7 + $0xae8] sm:$0xff]  ;;  %v9990_v12 = vcombine.low %v1123_v60, %v1131_v61  ;;  %v9992_v13 = vcombine.low %v1124_v62, %v1132_v63  ;;  %v10087_v60 = vcombine.high %v1219_v54, %v1227_v55  ;;  %v1235_v62 = vld [vmem:[%s15525_s7 + $0xda0] sm:$0xff] }
 0x49e   :  { %v10009_v17 = vcombine.high %v1140_v10, %v1148_v11  ;;  %v1243_v63 = vld [vmem:[%s15525_s7 + $0xde0] sm:$0xff] }
 0x4a0   :  { %2702 = vmatpush1.bf16.msra.mxu1 %v10146_v21  ;;  %2743 = vmatpush1.bf16.msra.mxu0 %v10148_v22  ;;  %v1156_v21 = vld [vmem:[%s15525_s7 + $0xb28] sm:$0xff] }
 0x4a1   :  { %2703 = vmatprep.subr.bf16.mxu1 %v10163_v23  ;;  %2744 = vmatprep.subr.bf16.mxu0 %v10165_v24  ;;  %v1164_v22 = vld [vmem:[%s15525_s7 + $0xb68] sm:$0xff]  ;;  %v10006_v23 = vcombine.low %v1139_v8, %v1147_v9  ;;  %v10008_v24 = vcombine.low %v1140_v10, %v1148_v11  ;;  %v10103_v8 = vcombine.high %v1235_v62, %v1243_v63  ;;  %v1251_v10 = vld [vmem:[%s15525_s7 + $0xe20] sm:$0xff] }
 0x4a2   :  { %v10025_v28 = vcombine.high %v1156_v21, %v1164_v22  ;;  %v1259_v11 = vld [vmem:[%s15525_s7 + $0xe60] sm:$0xff] }
 0x4a4   :  { %2704 = vmatpush1.bf16.msra.mxu1 %v10162_v30  ;;  %2745 = vmatpush1.bf16.msra.mxu0 %v10164_v31  ;;  %v1172_v30 = vld [vmem:[%s15525_s7 + $0xba8] sm:$0xff] }
 0x4a5   :  { %2755 = vmatprep.subr.bf16.mxu1 %v9927_v7  ;;  %2796 = vmatprep.subr.bf16.mxu0 %v9929_v32  ;;  %v1180_v31 = vld [vmem:[%s15525_s7 + $0xbe8] sm:$0xff]  ;;  %v10022_v7 = vcombine.low %v1155_v19, %v1163_v20  ;;  %v10024_v32 = vcombine.low %v1156_v21, %v1164_v22  ;;  %v10119_v19 = vcombine.high %v1251_v10, %v1259_v11  ;;  %v1267_v21 = vld [vmem:[%s15525_s7 + $0xea0] sm:$0xff] }
 0x4a6   :  { %v10041_v34 = vcombine.high %v1172_v30, %v1180_v31  ;;  %v1275_v22 = vld [vmem:[%s15525_s7 + $0xee0] sm:$0xff] }
 0x4a7   :  { %2706 = vmatmul.mubr.bf16.vlgmr.msra.gmra.mrb[24].mxu1 %v11972_v16  ;;  %2747 = vmatmul.mubr.bf16.vlgmr.msra.gmra.mrb[28].mxu0 %v11972_v16 }
 0x4a8   :  { %2756 = vmatpush1.bf16.msra.mxu1 %v9926_v38  ;;  %2787 = vmatprep.mubr.bf16.mxu1 %v11970_v14  ;;  %v1188_v38 = vld [vmem:[%s15525_s7 + $0xc28] sm:$0xff] }
 0x4a9   :  { %2797 = vmatpush1.bf16.msra.mxu0 %v9928_v39  ;;  %2828 = vmatprep.mubr.bf16.mxu0 %v11970_v14  ;;  %v1196_v39 = vld [vmem:[%s15525_s7 + $0xc68] sm:$0xff] }
 0x4aa   :  { %2757 = vmatprep.subr.bf16.mxu1 %v9943_v42  ;;  %2798 = vmatprep.subr.bf16.mxu0 %v9945_v43  ;;  %v10038_v42 = vcombine.low %v1171_v29, %v1179_v4  ;;  %v10040_v43 = vcombine.low %v1172_v30, %v1180_v31  ;;  %v10057_v45 = vcombine.high %v1188_v38, %v1196_v39  ;;  %v1283_v30 = vld [vmem:[%s15525_s7 + $0xf20] sm:$0xff] }
 0x4ab   :  { %v10135_v29 = vcombine.high %v1267_v21, %v1275_v22  ;;  %v1291_v31 = vld [vmem:[%s15525_s7 + $0xf60] sm:$0xff] }
 0x4ac   :  { %2758 = vmatpush1.bf16.msra.mxu1 %v9942_v48  ;;  %v1204_v48 = vld [vmem:[%s15525_s7 + $0xca8] sm:$0xff] }
 0x4ad   :  { %2799 = vmatpush1.bf16.msra.mxu0 %v9944_v49  ;;  %2759 = vmatprep.subr.bf16.mxu1 %v9959_v50  ;;  %v1212_v49 = vld [vmem:[%s15525_s7 + $0xce8] sm:$0xff]  ;;  %v10054_v50 = vcombine.low %v1187_v35, %v1195_v36  ;;  %v10151_v35 = vcombine.high %v1283_v30, %v1291_v31 }
 0x4ae   :  { %2800 = vmatprep.subr.bf16.mxu0 %v9961_v51  ;;  %v10056_v51 = vcombine.low %v1188_v38, %v1196_v39  ;;  %v10073_v53 = vcombine.high %v1204_v48, %v1212_v49  ;;  %v1299_v38 = vld [vmem:[%s15525_s7 + $0xfa0] sm:$0xff] }
 0x4af   :  { %v1307_v39 = vld [vmem:[%s15525_s7 + $0xfe0] sm:$0xff] }
 0x4b0   :  { %2760 = vmatpush1.bf16.msra.mxu1 %v9958_v56  ;;  %v1220_v56 = vld [vmem:[%s15525_s7 + $0xd28] sm:$0xff] }
 0x4b1   :  { %2801 = vmatpush1.bf16.msra.mxu0 %v9960_v57  ;;  %2761 = vmatprep.subr.bf16.mxu1 %v9975_v58  ;;  %v1228_v57 = vld [vmem:[%s15525_s7 + $0xd68] sm:$0xff]  ;;  %v10070_v58 = vcombine.low %v1203_v46, %v1211_v47  ;;  %v10167_v46 = vcombine.high %v1299_v38, %v1307_v39 }
 0x4b2   :  { %2802 = vmatprep.subr.bf16.mxu0 %v9977_v59  ;;  %v10072_v59 = vcombine.low %v1204_v48, %v1212_v49  ;;  %v10089_v61 = vcombine.high %v1220_v56, %v1228_v57  ;;  %v1061_v48 = vld [vmem:[%s15525_s7 + $0x830] sm:$0xff] }
 0x4b3   :  { %v1069_v49 = vld [vmem:[%s15525_s7 + $0x870] sm:$0xff] }
 0x4b4   :  { %2762 = vmatpush1.bf16.msra.mxu1 %v9974_v0  ;;  %v1236_v0 = vld [vmem:[%s15525_s7 + $0xda8] sm:$0xff] }
 0x4b5   :  { %2803 = vmatpush1.bf16.msra.mxu0 %v9976_v1  ;;  %2763 = vmatprep.subr.bf16.mxu1 %v9991_v5  ;;  %v1244_v1 = vld [vmem:[%s15525_s7 + $0xde8] sm:$0xff]  ;;  %v10086_v5 = vcombine.low %v1219_v54, %v1227_v55  ;;  %v9931_v54 = vcombine.high %v1061_v48, %v1069_v49 }
 0x4b6   :  { %2804 = vmatprep.subr.bf16.mxu0 %v9993_v6  ;;  %v10088_v6 = vcombine.low %v1220_v56, %v1228_v57  ;;  %v10105_v9 = vcombine.high %v1236_v0, %v1244_v1  ;;  %v1077_v56 = vld [vmem:[%s15525_s7 + $0x8b0] sm:$0xff] }
 0x4b7   :  { %v1085_v57 = vld [vmem:[%s15525_s7 + $0x8f0] sm:$0xff] }
 0x4b8   :  { %2764 = vmatpush1.bf16.msra.mxu1 %v9990_v12  ;;  %v1252_v12 = vld [vmem:[%s15525_s7 + $0xe28] sm:$0xff] }
 0x4b9   :  { %2805 = vmatpush1.bf16.msra.mxu0 %v9992_v13  ;;  %2765 = vmatprep.subr.bf16.mxu1 %v10007_v15  ;;  %v1260_v13 = vld [vmem:[%s15525_s7 + $0xe68] sm:$0xff]  ;;  %v10102_v15 = vcombine.low %v1235_v62, %v1243_v63  ;;  %v9947_v62 = vcombine.high %v1077_v56, %v1085_v57  ;;  %v1093_v63 = vld [vmem:[%s15525_s7 + $0x930] sm:$0xff] }
 0x4ba   :  { %2806 = vmatprep.subr.bf16.mxu0 %v10009_v17  ;;  %v10104_v17 = vcombine.low %v1236_v0, %v1244_v1  ;;  %v10121_v20 = vcombine.high %v1252_v12, %v1260_v13  ;;  %v1101_v0 = vld [vmem:[%s15525_s7 + $0x970] sm:$0xff] }
 0x4bc   :  { %2766 = vmatpush1.bf16.msra.mxu1 %v10006_v23  ;;  %v1268_v23 = vld [vmem:[%s15525_s7 + $0xea8] sm:$0xff] }
 0x4bd   :  { %2807 = vmatpush1.bf16.msra.mxu0 %v10008_v24  ;;  %2767 = vmatprep.subr.bf16.mxu1 %v10023_v26  ;;  %v1276_v24 = vld [vmem:[%s15525_s7 + $0xee8] sm:$0xff]  ;;  %v10118_v26 = vcombine.low %v1251_v10, %v1259_v11  ;;  %v9963_v10 = vcombine.high %v1093_v63, %v1101_v0 }
 0x4be   :  { %2808 = vmatprep.subr.bf16.mxu0 %v10025_v28  ;;  %v10120_v28 = vcombine.low %v1252_v12, %v1260_v13  ;;  %v10137_v4 = vcombine.high %v1268_v23, %v1276_v24  ;;  %v1109_v12 = vld [vmem:[%s15525_s7 + $0x9b0] sm:$0xff] }
 0x4bf   :  { %v1117_v13 = vld [vmem:[%s15525_s7 + $0x9f0] sm:$0xff] }
 0x4c0   :  { %2768 = vmatpush1.bf16.msra.mxu1 %v10022_v7  ;;  %v1284_v7 = vld [vmem:[%s15525_s7 + $0xf28] sm:$0xff] }
 0x4c1   :  { %2809 = vmatpush1.bf16.msra.mxu0 %v10024_v32  ;;  %2769 = vmatprep.subr.bf16.mxu1 %v10039_v33  ;;  %v1292_v32 = vld [vmem:[%s15525_s7 + $0xf68] sm:$0xff]  ;;  %v10134_v33 = vcombine.low %v1267_v21, %v1275_v22  ;;  %v1125_v22 = vld [vmem:[%s15525_s7 + $0xa30] sm:$0xff] }
 0x4c2   :  { %2810 = vmatprep.subr.bf16.mxu0 %v10041_v34  ;;  %v10136_v34 = vcombine.low %v1268_v23, %v1276_v24  ;;  %v10153_v36 = vcombine.high %v1284_v7, %v1292_v32  ;;  %v1133_v23 = vld [vmem:[%s15525_s7 + $0xa70] sm:$0xff]  ;;  %v1126_v24 = vld [vmem:[%s15525_s7 + $0xa38] sm:$0xff] }
 0x4c4   :  { %2770 = vmatpush1.bf16.msra.mxu1 %v10038_v42  ;;  %v1300_v42 = vld [vmem:[%s15525_s7 + $0xfa8] sm:$0xff] }
 0x4c5   :  { %2811 = vmatpush1.bf16.msra.mxu0 %v10040_v43  ;;  %2771 = vmatprep.subr.bf16.mxu1 %v10055_v44  ;;  %v1308_v43 = vld [vmem:[%s15525_s7 + $0xfe8] sm:$0xff]  ;;  %v10150_v44 = vcombine.low %v1283_v30, %v1291_v31  ;;  %v1141_v31 = vld [vmem:[%s15525_s7 + $0xab0] sm:$0xff] }
 0x4c6   :  { %2812 = vmatprep.subr.bf16.mxu0 %v10057_v45  ;;  %v10152_v45 = vcombine.low %v1284_v7, %v1292_v32  ;;  %v10169_v47 = vcombine.high %v1300_v42, %v1308_v43  ;;  %v1149_v7 = vld [vmem:[%s15525_s7 + $0xaf0] sm:$0xff]  ;;  %v1142_v32 = vld [vmem:[%s15525_s7 + $0xab8] sm:$0xff] }
 0x4c8   :  { %2772 = vmatpush1.bf16.msra.mxu1 %v10054_v50  ;;  %v1062_v50 = vld [vmem:[%s15525_s7 + $0x838] sm:$0xff] }
 0x4c9   :  { %2813 = vmatpush1.bf16.msra.mxu0 %v10056_v51  ;;  %2773 = vmatprep.subr.bf16.mxu1 %v10071_v52  ;;  %v1070_v51 = vld [vmem:[%s15525_s7 + $0x878] sm:$0xff]  ;;  %v10166_v52 = vcombine.low %v1299_v38, %v1307_v39  ;;  %v1157_v39 = vld [vmem:[%s15525_s7 + $0xb30] sm:$0xff] }
 0x4ca   :  { %2814 = vmatprep.subr.bf16.mxu0 %v10073_v53  ;;  %v10168_v53 = vcombine.low %v1300_v42, %v1308_v43  ;;  %v9933_v55 = vcombine.high %v1062_v50, %v1070_v51  ;;  %v1165_v42 = vld [vmem:[%s15525_s7 + $0xb70] sm:$0xff]  ;;  %v1158_v43 = vld [vmem:[%s15525_s7 + $0xb38] sm:$0xff] }
 0x4cc   :  { %2774 = vmatpush1.bf16.msra.mxu1 %v10070_v58  ;;  %v9930_v58 = vcombine.low %v1061_v48, %v1069_v49  ;;  %v1173_v49 = vld [vmem:[%s15525_s7 + $0xbb0] sm:$0xff] }
 0x4cd   :  { %2815 = vmatpush1.bf16.msra.mxu0 %v10072_v59  ;;  %2775 = vmatprep.subr.bf16.mxu1 %v10087_v60  ;;  %v1078_v59 = vld [vmem:[%s15525_s7 + $0x8b8] sm:$0xff] }
 0x4ce   :  { %2816 = vmatprep.subr.bf16.mxu0 %v10089_v61  ;;  %v1086_v60 = vld [vmem:[%s15525_s7 + $0x8f8] sm:$0xff]  ;;  %v9932_v61 = vcombine.low %v1062_v50, %v1070_v51  ;;  %v1181_v50 = vld [vmem:[%s15525_s7 + $0xbf0] sm:$0xff] }
 0x4cf   :  { %v9949_v1 = vcombine.high %v1078_v59, %v1086_v60  ;;  %v1174_v51 = vld [vmem:[%s15525_s7 + $0xbb8] sm:$0xff] }
 0x4d0   :  { %2776 = vmatpush1.bf16.msra.mxu1 %v10086_v5  ;;  %v1094_v5 = vld [vmem:[%s15525_s7 + $0x938] sm:$0xff] }
 0x4d1   :  { %2817 = vmatpush1.bf16.msra.mxu0 %v10088_v6  ;;  %2777 = vmatprep.subr.bf16.mxu1 %v10103_v8  ;;  %v1102_v6 = vld [vmem:[%s15525_s7 + $0x978] sm:$0xff]  ;;  %v9946_v8 = vcombine.low %v1077_v56, %v1085_v57  ;;  %v1189_v57 = vld [vmem:[%s15525_s7 + $0xc30] sm:$0xff] }
 0x4d2   :  { %2818 = vmatprep.subr.bf16.mxu0 %v10105_v9  ;;  %v9948_v9 = vcombine.low %v1078_v59, %v1086_v60  ;;  %v9965_v11 = vcombine.high %v1094_v5, %v1102_v6  ;;  %v1190_v59 = vld [vmem:[%s15525_s7 + $0xc38] sm:$0xff] }
 0x4d3   :  { %v1198_v60 = vld [vmem:[%s15525_s7 + $0xc78] sm:$0xff] }
 0x4d4   :  { %2778 = vmatpush1.bf16.msra.mxu1 %v10102_v15  ;;  %v1110_v15 = vld [vmem:[%s15525_s7 + $0x9b8] sm:$0xff] }
 0x4d5   :  { %2819 = vmatpush1.bf16.msra.mxu0 %v10104_v17  ;;  %2779 = vmatprep.subr.bf16.mxu1 %v10119_v19  ;;  %v1118_v17 = vld [vmem:[%s15525_s7 + $0x9f8] sm:$0xff]  ;;  %v9964_v19 = vcombine.low %v1094_v5, %v1102_v6  ;;  %v1213_v5 = vld [vmem:[%s15525_s7 + $0xcf0] sm:$0xff] }
 0x4d6   :  { %2820 = vmatprep.subr.bf16.mxu0 %v10121_v20  ;;  %v9979_v20 = vcombine.high %v1109_v12, %v1117_v13  ;;  %v9981_v21 = vcombine.high %v1110_v15, %v1118_v17  ;;  %v1206_v6 = vld [vmem:[%s15525_s7 + $0xcb8] sm:$0xff] }
 0x4d8   :  { %2780 = vmatpush1.bf16.msra.mxu1 %v10118_v26  ;;  %v1134_v26 = vld [vmem:[%s15525_s7 + $0xa78] sm:$0xff] }
 0x4d9   :  { %2821 = vmatpush1.bf16.msra.mxu0 %v10120_v28  ;;  %2781 = vmatprep.subr.bf16.mxu1 %v10135_v29  ;;  %v9978_v28 = vcombine.low %v1109_v12, %v1117_v13  ;;  %v9980_v29 = vcombine.low %v1110_v15, %v1118_v17  ;;  %v9997_v30 = vcombine.high %v1126_v24, %v1134_v26  ;;  %v1221_v13 = vld [vmem:[%s15525_s7 + $0xd30] sm:$0xff]  ;;  %v1222_v17 = vld [vmem:[%s15525_s7 + $0xd38] sm:$0xff] }
 0x4da   :  { %2822 = vmatprep.subr.bf16.mxu0 %v10137_v4  ;;  %v9995_v4 = vcombine.high %v1125_v22, %v1133_v23  ;;  %v1229_v15 = vld [vmem:[%s15525_s7 + $0xd70] sm:$0xff] }
 0x4dc   :  { %2782 = vmatpush1.bf16.msra.mxu1 %v10134_v33  ;;  %v1150_v33 = vld [vmem:[%s15525_s7 + $0xaf8] sm:$0xff] }
 0x4dd   :  { %2823 = vmatpush1.bf16.msra.mxu0 %v10136_v34  ;;  %2783 = vmatprep.subr.bf16.mxu1 %v10151_v35  ;;  %v9994_v34 = vcombine.low %v1125_v22, %v1133_v23  ;;  %v9996_v35 = vcombine.low %v1126_v24, %v1134_v26  ;;  %v10013_v38 = vcombine.high %v1142_v32, %v1150_v33  ;;  %v1237_v23 = vld [vmem:[%s15525_s7 + $0xdb0] sm:$0xff]  ;;  %v1238_v26 = vld [vmem:[%s15525_s7 + $0xdb8] sm:$0xff] }
 0x4de   :  { %2824 = vmatprep.subr.bf16.mxu0 %v10153_v36  ;;  %v10011_v36 = vcombine.high %v1141_v31, %v1149_v7  ;;  %v1245_v24 = vld [vmem:[%s15525_s7 + $0xdf0] sm:$0xff] }
 0x4e0   :  { %2784 = vmatpush1.bf16.msra.mxu1 %v10150_v44  ;;  %v1166_v44 = vld [vmem:[%s15525_s7 + $0xb78] sm:$0xff] }
 0x4e1   :  { %2825 = vmatpush1.bf16.msra.mxu0 %v10152_v45  ;;  %2785 = vmatprep.subr.bf16.mxu1 %v10167_v46  ;;  %v10010_v45 = vcombine.low %v1141_v31, %v1149_v7  ;;  %v10012_v46 = vcombine.low %v1142_v32, %v1150_v33  ;;  %v10029_v48 = vcombine.high %v1158_v43, %v1166_v44  ;;  %v1253_v7 = vld [vmem:[%s15525_s7 + $0xe30] sm:$0xff]  ;;  %v1254_v33 = vld [vmem:[%s15525_s7 + $0xe38] sm:$0xff] }
 0x4e2   :  { %2826 = vmatprep.subr.bf16.mxu0 %v10169_v47  ;;  %v10027_v47 = vcombine.high %v1157_v39, %v1165_v42  ;;  %v1261_v32 = vld [vmem:[%s15525_s7 + $0xe70] sm:$0xff] }
 0x4e4   :  { %2786 = vmatpush1.bf16.msra.mxu1 %v10166_v52  ;;  %v1182_v52 = vld [vmem:[%s15525_s7 + $0xbf8] sm:$0xff] }
 0x4e5   :  { %2827 = vmatpush1.bf16.msra.mxu0 %v10168_v53  ;;  %2837 = vmatprep.subr.bf16.mxu1 %v9931_v54  ;;  %v10026_v53 = vcombine.low %v1157_v39, %v1165_v42  ;;  %v10028_v54 = vcombine.low %v1158_v43, %v1166_v44  ;;  %v10045_v56 = vcombine.high %v1174_v51, %v1182_v52  ;;  %v1269_v42 = vld [vmem:[%s15525_s7 + $0xeb0] sm:$0xff]  ;;  %v1270_v44 = vld [vmem:[%s15525_s7 + $0xeb8] sm:$0xff] }
 0x4e6   :  { %2878 = vmatprep.subr.bf16.mxu0 %v9933_v55  ;;  %v10043_v55 = vcombine.high %v1173_v49, %v1181_v50  ;;  %v1277_v43 = vld [vmem:[%s15525_s7 + $0xef0] sm:$0xff] }
 0x4e7   :  { %2788 = vmatmul.mubr.bf16.vlgmr.msra.gmra.mrb[28].mxu1 %v11972_v16 }
 0x4e8   :  { %2829 = vmatmul.mubr.bf16.vlgmr.msra.gmra.mrb[32].mxu0 %v11972_v16  ;;  %2838 = vmatpush1.bf16.msra.mxu1 %v9930_v58  ;;  %v1197_v58 = vld [vmem:[%s15525_s7 + $0xc70] sm:$0xff] }
 0x4e9   :  { %2869 = vmatprep.mubr.bf16.mxu1 %v11970_v14  ;;  %2879 = vmatpush1.bf16.msra.mxu0 %v9932_v61  ;;  %v10042_v61 = vcombine.low %v1173_v49, %v1181_v50  ;;  %v1285_v50 = vld [vmem:[%s15525_s7 + $0xf30] sm:$0xff] }
 0x4ea   :  { %2910 = vmatprep.mubr.bf16.mxu0 %v11970_v14  ;;  %2839 = vmatprep.subr.bf16.mxu1 %v9947_v62  ;;  %v9962_v14 = vcombine.low %v1093_v63, %v1101_v0  ;;  %v10044_v62 = vcombine.low %v1174_v51, %v1182_v52  ;;  %v10059_v63 = vcombine.high %v1189_v57, %v1197_v58  ;;  %v1293_v51 = vld [vmem:[%s15525_s7 + $0xf70] sm:$0xff]  ;;  %v1286_v52 = vld [vmem:[%s15525_s7 + $0xf38] sm:$0xff] }
 0x4eb   :  { %2880 = vmatprep.subr.bf16.mxu0 %v9949_v1  ;;  %v10061_v0 = vcombine.high %v1190_v59, %v1198_v60  ;;  %v1205_v1 = vld [vmem:[%s15525_s7 + $0xcb0] sm:$0xff] }
 0x4ec   :  { %2840 = vmatpush1.bf16.msra.mxu1 %v9946_v8  ;;  %v1214_v8 = vld [vmem:[%s15525_s7 + $0xcf8] sm:$0xff] }
 0x4ed   :  { %2881 = vmatpush1.bf16.msra.mxu0 %v9948_v9  ;;  %2841 = vmatprep.subr.bf16.mxu1 %v9963_v10  ;;  %v10058_v9 = vcombine.low %v1189_v57, %v1197_v58  ;;  %v10060_v10 = vcombine.low %v1190_v59, %v1198_v60  ;;  %v10077_v12 = vcombine.high %v1206_v6, %v1214_v8  ;;  %v1301_v58 = vld [vmem:[%s15525_s7 + $0xfb0] sm:$0xff]  ;;  %v1302_v60 = vld [vmem:[%s15525_s7 + $0xfb8] sm:$0xff] }
 0x4ee   :  { %2882 = vmatprep.subr.bf16.mxu0 %v9965_v11  ;;  %v10075_v11 = vcombine.high %v1205_v1, %v1213_v5  ;;  %v1309_v59 = vld [vmem:[%s15525_s7 + $0xff0] sm:$0xff] }
 0x4f0   :  { %2842 = vmatpush1.bf16.msra.mxu1 %v9962_v14  ;;  %v1230_v14 = vld [vmem:[%s15525_s7 + $0xd78] sm:$0xff] }
 0x4f1   :  { %2883 = vmatpush1.bf16.msra.mxu0 %v9964_v19  ;;  %2843 = vmatprep.subr.bf16.mxu1 %v9979_v20  ;;  %v10074_v19 = vcombine.low %v1205_v1, %v1213_v5  ;;  %v10076_v20 = vcombine.low %v1206_v6, %v1214_v8  ;;  %v10093_v22 = vcombine.high %v1222_v17, %v1230_v14  ;;  %v752_v5 = vld [vmem:[%s15525_s7] sm:$0xff]  ;;  %v753_v8 = vld [vmem:[%s15525_s7 + $0x8] sm:$0xff] }
 0x4f2   :  { %2884 = vmatprep.subr.bf16.mxu0 %v9981_v21  ;;  %v10091_v21 = vcombine.high %v1221_v13, %v1229_v15  ;;  %v760_v6 = vld [vmem:[%s15525_s7 + $0x40] sm:$0xff] }
 0x4f4   :  { %2844 = vmatpush1.bf16.msra.mxu1 %v9978_v28  ;;  %v1246_v28 = vld [vmem:[%s15525_s7 + $0xdf8] sm:$0xff] }
 0x4f5   :  { %2885 = vmatpush1.bf16.msra.mxu0 %v9980_v29  ;;  %2845 = vmatprep.subr.bf16.mxu1 %v9995_v4  ;;  %v10090_v29 = vcombine.low %v1221_v13, %v1229_v15  ;;  %v10092_v4 = vcombine.low %v1222_v17, %v1230_v14  ;;  %v10109_v31 = vcombine.high %v1238_v26, %v1246_v28  ;;  %v768_v15 = vld [vmem:[%s15525_s7 + $0x80] sm:$0xff] }
 0x4f6   :  { %2886 = vmatprep.subr.bf16.mxu0 %v9997_v30  ;;  %v10107_v30 = vcombine.high %v1237_v23, %v1245_v24  ;;  %v776_v17 = vld [vmem:[%s15525_s7 + $0xc0] sm:$0xff]  ;;  %v10174_v14 = vcombine.low %v752_v5, %v760_v6 }
 0x4f8   :  { %2846 = vmatpush1.bf16.msra.mxu1 %v9994_v34  ;;  %v1262_v34 = vld [vmem:[%s15525_s7 + $0xe78] sm:$0xff] }
 0x4f9   :  { %2887 = vmatpush1.bf16.msra.mxu0 %v9996_v35  ;;  %2847 = vmatprep.subr.bf16.mxu1 %v10011_v36  ;;  %v10106_v35 = vcombine.low %v1237_v23, %v1245_v24  ;;  %v10108_v36 = vcombine.low %v1238_v26, %v1246_v28  ;;  %v10125_v39 = vcombine.high %v1254_v33, %v1262_v34  ;;  %v784_v23 = vld [vmem:[%s15525_s7 + $0x100] sm:$0xff] }
 0x4fa   :  { %2888 = vmatprep.subr.bf16.mxu0 %v10013_v38  ;;  %v10123_v38 = vcombine.high %v1253_v7, %v1261_v32  ;;  %v792_v24 = vld [vmem:[%s15525_s7 + $0x140] sm:$0xff]  ;;  %v12572_v26 = vpack.c.bf16 %v11956_v3, %v11956_v3 }
 0x4fc   :  { %2848 = vmatpush1.bf16.msra.mxu1 %v10010_v45  ;;  %v1278_v45 = vld [vmem:[%s15525_s7 + $0xef8] sm:$0xff] }
 0x4fd   :  { %2889 = vmatpush1.bf16.msra.mxu0 %v10012_v46  ;;  %2849 = vmatprep.subr.bf16.mxu1 %v10027_v47  ;;  %v10122_v46 = vcombine.low %v1253_v7, %v1261_v32  ;;  %v10124_v47 = vcombine.low %v1254_v33, %v1262_v34  ;;  %v10141_v49 = vcombine.high %v1270_v44, %v1278_v45  ;;  %v800_v32 = vld [vmem:[%s15525_s7 + $0x180] sm:$0xff]  ;;  %v809_v34 = vld [vmem:[%s15525_s7 + $0x1c8] sm:$0xff] }
 0x4fe   :  { %2890 = vmatprep.subr.bf16.mxu0 %v10029_v48  ;;  %v10139_v48 = vcombine.high %v1269_v42, %v1277_v43  ;;  %v808_v33 = vld [vmem:[%s15525_s7 + $0x1c0] sm:$0xff] }
 0x500   :  { %2850 = vmatpush1.bf16.msra.mxu1 %v10026_v53  ;;  %v1294_v53 = vld [vmem:[%s15525_s7 + $0xf78] sm:$0xff] }
 0x501   :  { %2891 = vmatpush1.bf16.msra.mxu0 %v10028_v54  ;;  %2851 = vmatprep.subr.bf16.mxu1 %v10043_v55  ;;  %v10138_v54 = vcombine.low %v1269_v42, %v1277_v43  ;;  %v10140_v55 = vcombine.low %v1270_v44, %v1278_v45  ;;  %v10157_v57 = vcombine.high %v1286_v52, %v1294_v53  ;;  %v816_v42 = vld [vmem:[%s15525_s7 + $0x200] sm:$0xff]  ;;  %v817_v44 = vld [vmem:[%s15525_s7 + $0x208] sm:$0xff] }
 0x502   :  { %2892 = vmatprep.subr.bf16.mxu0 %v10045_v56  ;;  %v10155_v56 = vcombine.high %v1285_v50, %v1293_v51  ;;  %v824_v43 = vld [vmem:[%s15525_s7 + $0x240] sm:$0xff]  ;;  %v825_v45 = vld [vmem:[%s15525_s7 + $0x248] sm:$0xff] }
 0x504   :  { %2852 = vmatpush1.bf16.msra.mxu1 %v10042_v61  ;;  %v1310_v61 = vld [vmem:[%s15525_s7 + $0xff8] sm:$0xff] }
 0x505   :  { %2893 = vmatpush1.bf16.msra.mxu0 %v10044_v62  ;;  %2853 = vmatprep.subr.bf16.mxu1 %v10059_v63  ;;  %v10154_v62 = vcombine.low %v1285_v50, %v1293_v51  ;;  %v10156_v63 = vcombine.low %v1286_v52, %v1294_v53  ;;  %v10173_v1 = vcombine.high %v1302_v60, %v1310_v61  ;;  %v832_v50 = vld [vmem:[%s15525_s7 + $0x280] sm:$0xff]  ;;  %v833_v52 = vld [vmem:[%s15525_s7 + $0x288] sm:$0xff] }
 0x506   :  { %2894 = vmatprep.subr.bf16.mxu0 %v10061_v0  ;;  %v10171_v0 = vcombine.high %v1301_v58, %v1309_v59  ;;  %v840_v51 = vld [vmem:[%s15525_s7 + $0x2c0] sm:$0xff]  ;;  %v841_v53 = vld [vmem:[%s15525_s7 + $0x2c8] sm:$0xff] }
 0x508   :  { %2854 = vmatpush1.bf16.msra.mxu1 %v10058_v9  ;;  %v761_v9 = vld [vmem:[%s15525_s7 + $0x48] sm:$0xff] }
 0x509   :  { %2895 = vmatpush1.bf16.msra.mxu0 %v10060_v10  ;;  %2855 = vmatprep.subr.bf16.mxu1 %v10075_v11  ;;  %v10170_v10 = vcombine.low %v1301_v58, %v1309_v59  ;;  %v10172_v11 = vcombine.low %v1302_v60, %v1310_v61  ;;  %v10177_v13 = vcombine.high %v753_v8, %v761_v9  ;;  %v848_v58 = vld [vmem:[%s15525_s7 + $0x300] sm:$0xff]  ;;  %v849_v60 = vld [vmem:[%s15525_s7 + $0x308] sm:$0xff] }
 0x50a   :  { %2896 = vmatprep.subr.bf16.mxu0 %v10077_v12  ;;  %v10175_v12 = vcombine.high %v752_v5, %v760_v6  ;;  %v856_v59 = vld [vmem:[%s15525_s7 + $0x340] sm:$0xff]  ;;  %v857_v61 = vld [vmem:[%s15525_s7 + $0x348] sm:$0xff] }
 0x50b   :  { %v10273_v6 = vcombine.high %v849_v60, %v857_v61 }
 0x50c   :  { %2856 = vmatpush1.bf16.msra.mxu1 %v10074_v19  ;;  %v769_v19 = vld [vmem:[%s15525_s7 + $0x88] sm:$0xff] }
 0x50d   :  { %2897 = vmatpush1.bf16.msra.mxu0 %v10076_v20  ;;  %2857 = vmatprep.subr.bf16.mxu1 %v10091_v21  ;;  %v777_v20 = vld [vmem:[%s15525_s7 + $0xc8] sm:$0xff]  ;;  %v10176_v21 = vcombine.low %v753_v8, %v761_v9  ;;  %v864_v8 = vld [vmem:[%s15525_s7 + $0x380] sm:$0xff] }
 0x50e   :  { %2898 = vmatprep.subr.bf16.mxu0 %v10093_v22  ;;  %v10191_v22 = vcombine.high %v768_v15, %v776_v17  ;;  %v10193_v28 = vcombine.high %v769_v19, %v777_v20  ;;  %v10192_v3 = vcombine.low %v769_v19, %v777_v20  ;;  %v872_v9 = vld [vmem:[%s15525_s7 + $0x3c0] sm:$0xff] }
 0x510   :  { %2858 = vmatpush1.bf16.msra.mxu1 %v10090_v29  ;;  %v785_v29 = vld [vmem:[%s15525_s7 + $0x108] sm:$0xff] }
 0x511   :  { %2899 = vmatpush1.bf16.msra.mxu0 %v10092_v4  ;;  %2859 = vmatprep.subr.bf16.mxu1 %v10107_v30  ;;  %v793_v4 = vld [vmem:[%s15525_s7 + $0x148] sm:$0xff]  ;;  %v10190_v30 = vcombine.low %v768_v15, %v776_v17 }
 0x512   :  { %2900 = vmatprep.subr.bf16.mxu0 %v10109_v31  ;;  %v10207_v31 = vcombine.high %v784_v23, %v792_v24  ;;  %v10209_v7 = vcombine.high %v785_v29, %v793_v4 }
 0x514   :  { %2860 = vmatpush1.bf16.msra.mxu1 %v10106_v35  ;;  %v10206_v35 = vcombine.low %v784_v23, %v792_v24  ;;  %v880_v24 = vld [vmem:[%s15525_s7 + $0x400] sm:$0xff] }
 0x515   :  { %2901 = vmatpush1.bf16.msra.mxu0 %v10108_v36  ;;  %2861 = vmatprep.subr.bf16.mxu1 %v10123_v38  ;;  %v10208_v36 = vcombine.low %v785_v29, %v793_v4  ;;  %v10223_v38 = vcombine.high %v800_v32, %v808_v33  ;;  %v881_v29 = vld [vmem:[%s15525_s7 + $0x408] sm:$0xff] }
 0x516   :  { %2902 = vmatprep.subr.bf16.mxu0 %v10125_v39  ;;  %v889_v4 = vld [vmem:[%s15525_s7 + $0x448] sm:$0xff] }
 0x518   :  { %2862 = vmatpush1.bf16.msra.mxu1 %v10122_v46  ;;  %v10222_v46 = vcombine.low %v800_v32, %v808_v33  ;;  %v896_v32 = vld [vmem:[%s15525_s7 + $0x480] sm:$0xff] }
 0x519   :  { %2903 = vmatpush1.bf16.msra.mxu0 %v10124_v47  ;;  %2863 = vmatprep.subr.bf16.mxu1 %v10139_v48  ;;  %v10239_v48 = vcombine.high %v816_v42, %v824_v43  ;;  %v904_v33 = vld [vmem:[%s15525_s7 + $0x4c0] sm:$0xff] }
 0x51a   :  { %2904 = vmatprep.subr.bf16.mxu0 %v10141_v49  ;;  %v10241_v49 = vcombine.high %v817_v44, %v825_v45 }
 0x51c   :  { %2864 = vmatpush1.bf16.msra.mxu1 %v10138_v54  ;;  %v10238_v54 = vcombine.low %v816_v42, %v824_v43  ;;  %v912_v42 = vld [vmem:[%s15525_s7 + $0x500] sm:$0xff] }
 0x51d   :  { %2905 = vmatpush1.bf16.msra.mxu0 %v10140_v55  ;;  %2865 = vmatprep.subr.bf16.mxu1 %v10155_v56  ;;  %v10240_v55 = vcombine.low %v817_v44, %v825_v45  ;;  %v10255_v56 = vcombine.high %v832_v50, %v840_v51  ;;  %v920_v43 = vld [vmem:[%s15525_s7 + $0x540] sm:$0xff]  ;;  %v913_v44 = vld [vmem:[%s15525_s7 + $0x508] sm:$0xff] }
 0x51e   :  { %2906 = vmatprep.subr.bf16.mxu0 %v10157_v57  ;;  %v10257_v57 = vcombine.high %v833_v52, %v841_v53  ;;  %v921_v45 = vld [vmem:[%s15525_s7 + $0x548] sm:$0xff] }
 0x520   :  { %2866 = vmatpush1.bf16.msra.mxu1 %v10154_v62  ;;  %v10254_v62 = vcombine.low %v832_v50, %v840_v51  ;;  %v928_v50 = vld [vmem:[%s15525_s7 + $0x580] sm:$0xff] }
 0x521   :  { %2907 = vmatpush1.bf16.msra.mxu0 %v10156_v63  ;;  %2867 = vmatprep.subr.bf16.mxu1 %v10171_v0  ;;  %v10256_v63 = vcombine.low %v833_v52, %v841_v53  ;;  %v10271_v0 = vcombine.high %v848_v58, %v856_v59  ;;  %v936_v51 = vld [vmem:[%s15525_s7 + $0x5c0] sm:$0xff]  ;;  %v929_v52 = vld [vmem:[%s15525_s7 + $0x588] sm:$0xff] }
 0x522   :  { %2908 = vmatprep.subr.bf16.mxu0 %v10173_v1  ;;  %v937_v53 = vld [vmem:[%s15525_s7 + $0x5c8] sm:$0xff] }
 0x524   :  { %2868 = vmatpush1.bf16.msra.mxu1 %v10170_v10 }
 0x525   :  { %2909 = vmatpush1.bf16.msra.mxu0 %v10172_v11  ;;  %4199 = vmatprep.subr.bf16.mxu1 %v10175_v12  ;;  %v865_v12 = vld [vmem:[%s15525_s7 + $0x388] sm:$0xff] }
 0x526   :  { %4240 = vmatprep.subr.bf16.mxu0 %v10177_v13  ;;  %v873_v13 = vld [vmem:[%s15525_s7 + $0x3c8] sm:$0xff] }
 0x527   :  { %2870 = vmatmul.mubr.bf16.vlgmr.msra.gmra.mrb[32].mxu1 %v11972_v16  ;;  %v10289_v23 = vcombine.high %v865_v12, %v873_v13 }
 0x528   :  { %2911 = vmatmul.mubr.bf16.vlgmr.msra.gmra.mrb[36].mxu0 %v11972_v16  ;;  %4200 = vmatpush1.bf16.msra.mxu1 %v10174_v14  ;;  %v801_v16 = vld [vmem:[%s15525_s7 + $0x188] sm:$0xff]  ;;  %v10270_v14 = vcombine.low %v848_v58, %v856_v59  ;;  %v944_v58 = vld [vmem:[%s15525_s7 + $0x600] sm:$0xff] }
 0x529   :  { %4231 = vmatprep.mubr.bf16.mxu1 %v12572_v26  ;;  %4241 = vmatpush1.bf16.msra.mxu0 %v10176_v21  ;;  %v10225_v39 = vcombine.high %v801_v16, %v809_v34  ;;  %v10224_v47 = vcombine.low %v801_v16, %v809_v34  ;;  %v10272_v21 = vcombine.low %v849_v60, %v857_v61  ;;  %v897_v16 = vld [vmem:[%s15525_s7 + $0x488] sm:$0xff]  ;;  %v952_v59 = vld [vmem:[%s15525_s7 + $0x640] sm:$0xff] }
 0x52a   :  { %4272 = vmatprep.mubr.bf16.mxu0 %v12572_v26  ;;  %4201 = vmatprep.subr.bf16.mxu1 %v10191_v22  ;;  %v10287_v22 = vcombine.high %v864_v8, %v872_v9  ;;  %v905_v34 = vld [vmem:[%s15525_s7 + $0x4c8] sm:$0xff] }
 0x52b   :  { %4242 = vmatprep.subr.bf16.mxu0 %v10193_v28  ;;  %v888_v28 = vld [vmem:[%s15525_s7 + $0x440] sm:$0xff]  ;;  %v945_v60 = vld [vmem:[%s15525_s7 + $0x608] sm:$0xff] }
 0x52c   :  { %4202 = vmatpush1.bf16.msra.mxu1 %v10190_v30  ;;  %v10286_v30 = vcombine.low %v864_v8, %v872_v9  ;;  %v953_v61 = vld [vmem:[%s15525_s7 + $0x648] sm:$0xff]  ;;  %v960_v8 = vld [vmem:[%s15525_s7 + $0x680] sm:$0xff] }
 0x52d   :  { %4243 = vmatpush1.bf16.msra.mxu0 %v10192_v3  ;;  %4203 = vmatprep.subr.bf16.mxu1 %v10207_v31  ;;  %v10288_v3 = vcombine.low %v865_v12, %v873_v13  ;;  %v10303_v31 = vcombine.high %v880_v24, %v888_v28  ;;  %v968_v9 = vld [vmem:[%s15525_s7 + $0x6c0] sm:$0xff]  ;;  %v961_v12 = vld [vmem:[%s15525_s7 + $0x688] sm:$0xff] }
 0x52e   :  { %4244 = vmatprep.subr.bf16.mxu0 %v10209_v7  ;;  %v10305_v7 = vcombine.high %v881_v29, %v889_v4  ;;  %v969_v13 = vld [vmem:[%s15525_s7 + $0x6c8] sm:$0xff] }
 0x530   :  { %4204 = vmatpush1.bf16.msra.mxu1 %v10206_v35  ;;  %v10302_v35 = vcombine.low %v880_v24, %v888_v28  ;;  %v10382_v24 = vcombine.low %v960_v8, %v968_v9  ;;  %v10384_v28 = vcombine.low %v961_v12, %v969_v13 }
 0x531   :  { %4245 = vmatpush1.bf16.msra.mxu0 %v10208_v36  ;;  %4205 = vmatprep.subr.bf16.mxu1 %v10223_v38  ;;  %v10304_v36 = vcombine.low %v881_v29, %v889_v4  ;;  %v10319_v38 = vcombine.high %v896_v32, %v904_v33 }
 0x532   :  { %4246 = vmatprep.subr.bf16.mxu0 %v10225_v39  ;;  %v10321_v39 = vcombine.high %v897_v16, %v905_v34 }
 0x534   :  { %4206 = vmatpush1.bf16.msra.mxu1 %v10222_v46  ;;  %v10318_v46 = vcombine.low %v896_v32, %v904_v33 }
 0x535   :  { %4247 = vmatpush1.bf16.msra.mxu0 %v10224_v47  ;;  %4207 = vmatprep.subr.bf16.mxu1 %v10239_v48  ;;  %v10320_v47 = vcombine.low %v897_v16, %v905_v34  ;;  %v10335_v48 = vcombine.high %v912_v42, %v920_v43 }
 0x536   :  { %4248 = vmatprep.subr.bf16.mxu0 %v10241_v49  ;;  %v10337_v49 = vcombine.high %v913_v44, %v921_v45 }
 0x538   :  { %4208 = vmatpush1.bf16.msra.mxu1 %v10238_v54  ;;  %v10334_v54 = vcombine.low %v912_v42, %v920_v43 }
 0x539   :  { %4249 = vmatpush1.bf16.msra.mxu0 %v10240_v55  ;;  %4209 = vmatprep.subr.bf16.mxu1 %v10255_v56  ;;  %v10336_v55 = vcombine.low %v913_v44, %v921_v45  ;;  %v10351_v56 = vcombine.high %v928_v50, %v936_v51 }
 0x53a   :  { %v12632_v1 = vpop.f32.mrb[20].mxu1  ;;  %v12634_v5 = vpop.f32.mrb[24].mxu0  ;;  %4250 = vmatprep.subr.bf16.mxu0 %v10257_v57  ;;  %v10353_v57 = vcombine.high %v929_v52, %v937_v53 }
 0x53b   :  { %v12642_v10 = vpop.f32.mrb[21].mxu1  ;;  %v12644_v11 = vpop.f32.mrb[25].mxu0 }
 0x53c   :  { %4210 = vmatpush1.bf16.msra.mxu1 %v10254_v62  ;;  %v2629_v15 = vpop.f32.mrb[22].mxu1  ;;  %v2670_v17 = vpop.f32.mrb[26].mxu0  ;;  %v10350_v62 = vcombine.low %v928_v50, %v936_v51  ;;  %v779_v50 = vld [vmem:[%s15525_s7 + $0xd8] sm:$0xff]  ;;  %v12774_v51 = vpack.c.bf16 %v11954_v2, %v11954_v2 }
 0x53d   :  { %4251 = vmatpush1.bf16.msra.mxu0 %v10256_v63  ;;  %v2630_v19 = vpop.f32.mrb[23].mxu1  ;;  %v2671_v20 = vpop.f32.mrb[27].mxu0  ;;  %4211 = vmatprep.subr.bf16.mxu1 %v10271_v0  ;;  %v10352_v63 = vcombine.low %v929_v52, %v937_v53  ;;  %v10367_v0 = vcombine.high %v944_v58, %v952_v59  ;;  %v10366_v15 = vcombine.low %v944_v58, %v952_v59  ;;  %v787_v2 = vld [vmem:[%s15525_s7 + $0x118] sm:$0xff] }
 0x53e   :  { %4252 = vmatprep.subr.bf16.mxu0 %v10273_v6  ;;  %v10369_v6 = vcombine.high %v945_v60, %v953_v61  ;;  %v10368_v17 = vcombine.low %v945_v60, %v953_v61  ;;  %v10385_v19 = vcombine.high %v961_v12, %v969_v13  ;;  %v976_v20 = vld [vmem:[%s15525_s7 + $0x700] sm:$0xff] }
 0x540   :  { %4212 = vmatpush1.bf16.msra.mxu1 %v10270_v14  ;;  %v10383_v14 = vcombine.high %v960_v8, %v968_v9 }
 0x541   :  { %4253 = vmatpush1.bf16.msra.mxu0 %v10272_v21  ;;  %4213 = vmatprep.subr.bf16.mxu1 %v10287_v22  ;;  %v984_v21 = vld [vmem:[%s15525_s7 + $0x740] sm:$0xff]  ;;  %v977_v22 = vld [vmem:[%s15525_s7 + $0x708] sm:$0xff] }
 0x542   :  { %4254 = vmatprep.subr.bf16.mxu0 %v10289_v23  ;;  %v985_v23 = vld [vmem:[%s15525_s7 + $0x748] sm:$0xff]  ;;  %v10399_v29 = vcombine.high %v976_v20, %v984_v21  ;;  %v10398_v32 = vcombine.low %v976_v20, %v984_v21 }
 0x543   :  { %v10401_v4 = vcombine.high %v977_v22, %v985_v23  ;;  %v10400_v33 = vcombine.low %v977_v22, %v985_v23 }
 0x544   :  { %4214 = vmatpush1.bf16.msra.mxu1 %v10286_v30  ;;  %v992_v30 = vld [vmem:[%s15525_s7 + $0x780] sm:$0xff] }
 0x545   :  { %4255 = vmatpush1.bf16.msra.mxu0 %v10288_v3  ;;  %4215 = vmatprep.subr.bf16.mxu1 %v10303_v31  ;;  %v1000_v3 = vld [vmem:[%s15525_s7 + $0x7c0] sm:$0xff]  ;;  %v993_v31 = vld [vmem:[%s15525_s7 + $0x788] sm:$0xff] }
 0x546   :  { %4256 = vmatprep.subr.bf16.mxu0 %v10305_v7  ;;  %v1001_v7 = vld [vmem:[%s15525_s7 + $0x7c8] sm:$0xff]  ;;  %v10415_v16 = vcombine.high %v992_v30, %v1000_v3  ;;  %v10414_v42 = vcombine.low %v992_v30, %v1000_v3 }
 0x547   :  { %v10417_v34 = vcombine.high %v993_v31, %v1001_v7  ;;  %v10416_v43 = vcombine.low %v993_v31, %v1001_v7 }
 0x548   :  { %4216 = vmatpush1.bf16.msra.mxu1 %v10302_v35  ;;  %v754_v35 = vld [vmem:[%s15525_s7 + $0x10] sm:$0xff] }
 0x549   :  { %4257 = vmatpush1.bf16.msra.mxu0 %v10304_v36  ;;  %4217 = vmatprep.subr.bf16.mxu1 %v10319_v38  ;;  %v762_v36 = vld [vmem:[%s15525_s7 + $0x50] sm:$0xff]  ;;  %v755_v38 = vld [vmem:[%s15525_s7 + $0x18] sm:$0xff] }
 0x54a   :  { %4258 = vmatprep.subr.bf16.mxu0 %v10321_v39  ;;  %v763_v39 = vld [vmem:[%s15525_s7 + $0x58] sm:$0xff]  ;;  %v10179_v44 = vcombine.high %v754_v35, %v762_v36 }
 0x54b   :  { %v10181_v45 = vcombine.high %v755_v38, %v763_v39  ;;  %v10180_v52 = vcombine.low %v755_v38, %v763_v39 }
 0x54c   :  { %4218 = vmatpush1.bf16.msra.mxu1 %v10318_v46  ;;  %v770_v46 = vld [vmem:[%s15525_s7 + $0x90] sm:$0xff] }
 0x54d   :  { %4259 = vmatpush1.bf16.msra.mxu0 %v10320_v47  ;;  %4219 = vmatprep.subr.bf16.mxu1 %v10335_v48  ;;  %v778_v47 = vld [vmem:[%s15525_s7 + $0xd0] sm:$0xff]  ;;  %v10178_v48 = vcombine.low %v754_v35, %v762_v36 }
 0x54e   :  { %4260 = vmatprep.subr.bf16.mxu0 %v10337_v49  ;;  %v771_v49 = vld [vmem:[%s15525_s7 + $0x98] sm:$0xff]  ;;  %v10195_v53 = vcombine.high %v770_v46, %v778_v47  ;;  %v10194_v58 = vcombine.low %v770_v46, %v778_v47 }
 0x54f   :  { %v10196_v59 = vcombine.low %v771_v49, %v779_v50 }
 0x550   :  { %4220 = vmatpush1.bf16.msra.mxu1 %v10334_v54  ;;  %v786_v54 = vld [vmem:[%s15525_s7 + $0x110] sm:$0xff] }
 0x551   :  { %4261 = vmatpush1.bf16.msra.mxu0 %v10336_v55  ;;  %4221 = vmatprep.subr.bf16.mxu1 %v10351_v56  ;;  %v794_v55 = vld [vmem:[%s15525_s7 + $0x150] sm:$0xff]  ;;  %v10197_v56 = vcombine.high %v771_v49, %v779_v50  ;;  %v875_v49 = vld [vmem:[%s15525_s7 + $0x3d8] sm:$0xff] }
 0x552   :  { %4262 = vmatprep.subr.bf16.mxu0 %v10353_v57  ;;  %v795_v57 = vld [vmem:[%s15525_s7 + $0x158] sm:$0xff]  ;;  %v10211_v60 = vcombine.high %v786_v54, %v794_v55  ;;  %v10210_v8 = vcombine.low %v786_v54, %v794_v55 }
 0x553   :  { %v10213_v61 = vcombine.high %v787_v2, %v795_v57  ;;  %v10212_v9 = vcombine.low %v787_v2, %v795_v57 }
 0x554   :  { %4222 = vmatpush1.bf16.msra.mxu1 %v10350_v62  ;;  %v802_v62 = vld [vmem:[%s15525_s7 + $0x190] sm:$0xff] }
 0x555   :  { %4263 = vmatpush1.bf16.msra.mxu0 %v10352_v63  ;;  %4223 = vmatprep.subr.bf16.mxu1 %v10367_v0  ;;  %v810_v63 = vld [vmem:[%s15525_s7 + $0x1d0] sm:$0xff]  ;;  %v803_v0 = vld [vmem:[%s15525_s7 + $0x198] sm:$0xff] }
 0x556   :  { %4264 = vmatprep.subr.bf16.mxu0 %v10369_v6  ;;  %v811_v6 = vld [vmem:[%s15525_s7 + $0x1d8] sm:$0xff]  ;;  %v10227_v12 = vcombine.high %v802_v62, %v810_v63  ;;  %v10226_v20 = vcombine.low %v802_v62, %v810_v63 }
 0x557   :  { %v10229_v13 = vcombine.high %v803_v0, %v811_v6  ;;  %v10228_v21 = vcombine.low %v803_v0, %v811_v6 }
 0x558   :  { %4224 = vmatpush1.bf16.msra.mxu1 %v10366_v15  ;;  %v818_v15 = vld [vmem:[%s15525_s7 + $0x210] sm:$0xff] }
 0x559   :  { %4265 = vmatpush1.bf16.msra.mxu0 %v10368_v17  ;;  %4225 = vmatprep.subr.bf16.mxu1 %v10383_v14  ;;  %v826_v17 = vld [vmem:[%s15525_s7 + $0x250] sm:$0xff]  ;;  %v819_v14 = vld [vmem:[%s15525_s7 + $0x218] sm:$0xff] }
 0x55a   :  { %4266 = vmatprep.subr.bf16.mxu0 %v10385_v19  ;;  %v827_v19 = vld [vmem:[%s15525_s7 + $0x258] sm:$0xff]  ;;  %v10243_v22 = vcombine.high %v818_v15, %v826_v17  ;;  %v10242_v30 = vcombine.low %v818_v15, %v826_v17 }
 0x55b   :  { %v10245_v23 = vcombine.high %v819_v14, %v827_v19  ;;  %v10244_v3 = vcombine.low %v819_v14, %v827_v19 }
 0x55c   :  { %4226 = vmatpush1.bf16.msra.mxu1 %v10382_v24  ;;  %v834_v24 = vld [vmem:[%s15525_s7 + $0x290] sm:$0xff] }
 0x55d   :  { %4267 = vmatpush1.bf16.msra.mxu0 %v10384_v28  ;;  %4227 = vmatprep.subr.bf16.mxu1 %v10399_v29  ;;  %v842_v28 = vld [vmem:[%s15525_s7 + $0x2d0] sm:$0xff]  ;;  %v835_v29 = vld [vmem:[%s15525_s7 + $0x298] sm:$0xff] }
 0x55e   :  { %4268 = vmatprep.subr.bf16.mxu0 %v10401_v4  ;;  %v843_v4 = vld [vmem:[%s15525_s7 + $0x2d8] sm:$0xff]  ;;  %v10259_v31 = vcombine.high %v834_v24, %v842_v28  ;;  %v10258_v35 = vcombine.low %v834_v24, %v842_v28 }
 0x55f   :  { %v10261_v7 = vcombine.high %v835_v29, %v843_v4  ;;  %v10260_v36 = vcombine.low %v835_v29, %v843_v4 }
 0x560   :  { %4228 = vmatpush1.bf16.msra.mxu1 %v10398_v32  ;;  %v850_v32 = vld [vmem:[%s15525_s7 + $0x310] sm:$0xff] }
 0x561   :  { %4269 = vmatpush1.bf16.msra.mxu0 %v10400_v33  ;;  %4229 = vmatprep.subr.bf16.mxu1 %v10415_v16  ;;  %v858_v33 = vld [vmem:[%s15525_s7 + $0x350] sm:$0xff]  ;;  %v851_v16 = vld [vmem:[%s15525_s7 + $0x318] sm:$0xff] }
 0x562   :  { %4270 = vmatprep.subr.bf16.mxu0 %v10417_v34  ;;  %v859_v34 = vld [vmem:[%s15525_s7 + $0x358] sm:$0xff]  ;;  %v10275_v38 = vcombine.high %v850_v32, %v858_v33 }
 0x564   :  { %4230 = vmatpush1.bf16.msra.mxu1 %v10414_v42 }
 0x565   :  { %4271 = vmatpush1.bf16.msra.mxu0 %v10416_v43  ;;  %4281 = vmatprep.subr.bf16.mxu1 %v10179_v44  ;;  %v10277_v43 = vcombine.high %v851_v16, %v859_v34  ;;  %v866_v44 = vld [vmem:[%s15525_s7 + $0x390] sm:$0xff] }
 0x566   :  { %4322 = vmatprep.subr.bf16.mxu0 %v10181_v45  ;;  %v874_v45 = vld [vmem:[%s15525_s7 + $0x3d0] sm:$0xff] }
 0x567   :  { %4232 = vmatmul.mubr.bf16.vlgmr.msra.gmra.mrb[36].mxu1 %v12774_v51  ;;  %v10291_v2 = vcombine.high %v866_v44, %v874_v45  ;;  %v10290_v62 = vcombine.low %v866_v44, %v874_v45 }
 0x568   :  { %4273 = vmatmul.mubr.bf16.vlgmr.msra.gmra.mrb[40].mxu0 %v12774_v51  ;;  %4282 = vmatpush1.bf16.msra.mxu1 %v10178_v48  ;;  %v867_v48 = vld [vmem:[%s15525_s7 + $0x398] sm:$0xff] }
 0x569   :  { %4313 = vmatprep.mubr.bf16.mxu1 %v12572_v26  ;;  %4323 = vmatpush1.bf16.msra.mxu0 %v10180_v52  ;;  %v10293_v57 = vcombine.high %v867_v48, %v875_v49  ;;  %v10292_v63 = vcombine.low %v867_v48, %v875_v49 }
 0x56a   :  { %4354 = vmatprep.mubr.bf16.mxu0 %v12572_v26  ;;  %4283 = vmatprep.subr.bf16.mxu1 %v10195_v53  ;;  %v10274_v53 = vcombine.low %v850_v32, %v858_v33 }
 0x56b   :  { %4324 = vmatprep.subr.bf16.mxu0 %v10197_v56  ;;  %v10276_v56 = vcombine.low %v851_v16, %v859_v34 }
 0x56c   :  { %4284 = vmatpush1.bf16.msra.mxu1 %v10194_v58  ;;  %v882_v58 = vld [vmem:[%s15525_s7 + $0x410] sm:$0xff] }
 0x56d   :  { %4325 = vmatpush1.bf16.msra.mxu0 %v10196_v59  ;;  %4285 = vmatprep.subr.bf16.mxu1 %v10211_v60  ;;  %v890_v59 = vld [vmem:[%s15525_s7 + $0x450] sm:$0xff]  ;;  %v883_v60 = vld [vmem:[%s15525_s7 + $0x418] sm:$0xff] }
 0x56e   :  { %4326 = vmatprep.subr.bf16.mxu0 %v10213_v61  ;;  %v891_v61 = vld [vmem:[%s15525_s7 + $0x458] sm:$0xff]  ;;  %v10307_v0 = vcombine.high %v882_v58, %v890_v59  ;;  %v10306_v15 = vcombine.low %v882_v58, %v890_v59  ;;  %v978_v58 = vld [vmem:[%s15525_s7 + $0x710] sm:$0xff] }
 0x56f   :  { %v10309_v6 = vcombine.high %v883_v60, %v891_v61  ;;  %v10308_v17 = vcombine.low %v883_v60, %v891_v61  ;;  %v986_v59 = vld [vmem:[%s15525_s7 + $0x750] sm:$0xff]  ;;  %v979_v60 = vld [vmem:[%s15525_s7 + $0x718] sm:$0xff] }
 0x570   :  { %4286 = vmatpush1.bf16.msra.mxu1 %v10210_v8  ;;  %v898_v8 = vld [vmem:[%s15525_s7 + $0x490] sm:$0xff]  ;;  %v987_v61 = vld [vmem:[%s15525_s7 + $0x758] sm:$0xff] }
 0x571   :  { %4327 = vmatpush1.bf16.msra.mxu0 %v10212_v9  ;;  %4287 = vmatprep.subr.bf16.mxu1 %v10227_v12  ;;  %v906_v9 = vld [vmem:[%s15525_s7 + $0x4d0] sm:$0xff]  ;;  %v899_v12 = vld [vmem:[%s15525_s7 + $0x498] sm:$0xff] }
 0x572   :  { %4328 = vmatprep.subr.bf16.mxu0 %v10229_v13  ;;  %v907_v13 = vld [vmem:[%s15525_s7 + $0x4d8] sm:$0xff]  ;;  %v10323_v14 = vcombine.high %v898_v8, %v906_v9  ;;  %v10322_v24 = vcombine.low %v898_v8, %v906_v9  ;;  %v994_v8 = vld [vmem:[%s15525_s7 + $0x790] sm:$0xff] }
 0x573   :  { %v10325_v19 = vcombine.high %v899_v12, %v907_v13  ;;  %v10324_v28 = vcombine.low %v899_v12, %v907_v13  ;;  %v1002_v9 = vld [vmem:[%s15525_s7 + $0x7d0] sm:$0xff]  ;;  %v995_v12 = vld [vmem:[%s15525_s7 + $0x798] sm:$0xff] }
 0x574   :  { %4288 = vmatpush1.bf16.msra.mxu1 %v10226_v20  ;;  %v914_v20 = vld [vmem:[%s15525_s7 + $0x510] sm:$0xff]  ;;  %v1003_v13 = vld [vmem:[%s15525_s7 + $0x7d8] sm:$0xff] }
 0x575   :  { %4329 = vmatpush1.bf16.msra.mxu0 %v10228_v21  ;;  %4289 = vmatprep.subr.bf16.mxu1 %v10243_v22  ;;  %v922_v21 = vld [vmem:[%s15525_s7 + $0x550] sm:$0xff]  ;;  %v915_v22 = vld [vmem:[%s15525_s7 + $0x518] sm:$0xff] }
 0x576   :  { %4330 = vmatprep.subr.bf16.mxu0 %v10245_v23  ;;  %v923_v23 = vld [vmem:[%s15525_s7 + $0x558] sm:$0xff]  ;;  %v10339_v29 = vcombine.high %v914_v20, %v922_v21  ;;  %v10338_v32 = vcombine.low %v914_v20, %v922_v21  ;;  %v756_v20 = vld [vmem:[%s15525_s7 + $0x20] sm:$0xff] }
 0x577   :  { %v10341_v4 = vcombine.high %v915_v22, %v923_v23  ;;  %v10340_v33 = vcombine.low %v915_v22, %v923_v23  ;;  %v764_v21 = vld [vmem:[%s15525_s7 + $0x60] sm:$0xff]  ;;  %v757_v22 = vld [vmem:[%s15525_s7 + $0x28] sm:$0xff] }
 0x578   :  { %4290 = vmatpush1.bf16.msra.mxu1 %v10242_v30  ;;  %v930_v30 = vld [vmem:[%s15525_s7 + $0x590] sm:$0xff]  ;;  %v765_v23 = vld [vmem:[%s15525_s7 + $0x68] sm:$0xff] }
 0x579   :  { %4331 = vmatpush1.bf16.msra.mxu0 %v10244_v3  ;;  %4291 = vmatprep.subr.bf16.mxu1 %v10259_v31  ;;  %v938_v3 = vld [vmem:[%s15525_s7 + $0x5d0] sm:$0xff]  ;;  %v931_v31 = vld [vmem:[%s15525_s7 + $0x598] sm:$0xff] }
 0x57a   :  { %v12840_v39 = vpop.f32.mrb[24].mxu1  ;;  %v12842_v42 = vpop.f32.mrb[28].mxu0  ;;  %4332 = vmatprep.subr.bf16.mxu0 %v10261_v7  ;;  %v939_v7 = vld [vmem:[%s15525_s7 + $0x5d8] sm:$0xff]  ;;  %v10355_v16 = vcombine.high %v930_v30, %v938_v3  ;;  %v10354_v44 = vcombine.low %v930_v30, %v938_v3  ;;  %v772_v30 = vld [vmem:[%s15525_s7 + $0xa0] sm:$0xff] }
 0x57b   :  { %v12850_v46 = vpop.f32.mrb[25].mxu1  ;;  %v12852_v47 = vpop.f32.mrb[29].mxu0  ;;  %v10357_v34 = vcombine.high %v931_v31, %v939_v7  ;;  %v10356_v45 = vcombine.low %v931_v31, %v939_v7  ;;  %v780_v3 = vld [vmem:[%s15525_s7 + $0xe0] sm:$0xff]  ;;  %v10182_v31 = vcombine.low %v756_v20, %v764_v21  ;;  %v773_v7 = vld [vmem:[%s15525_s7 + $0xa8] sm:$0xff] }
 0x57c   :  { %v2711_v50 = vpop.f32.mrb[26].mxu1  ;;  %v2752_v52 = vpop.f32.mrb[30].mxu0  ;;  %4292 = vmatpush1.bf16.msra.mxu1 %v10258_v35  ;;  %v946_v35 = vld [vmem:[%s15525_s7 + $0x610] sm:$0xff] }
 0x57d   :  { %4333 = vmatpush1.bf16.msra.mxu0 %v10260_v36  ;;  %v2712_v54 = vpop.f32.mrb[27].mxu1  ;;  %v2753_v55 = vpop.f32.mrb[31].mxu0  ;;  %4293 = vmatprep.subr.bf16.mxu1 %v10275_v38  ;;  %v954_v36 = vld [vmem:[%s15525_s7 + $0x650] sm:$0xff]  ;;  %v947_v38 = vld [vmem:[%s15525_s7 + $0x618] sm:$0xff] }
 0x57e   :  { %4334 = vmatprep.subr.bf16.mxu0 %v10277_v43  ;;  %v955_v43 = vld [vmem:[%s15525_s7 + $0x658] sm:$0xff]  ;;  %v10371_v48 = vcombine.high %v946_v35, %v954_v36  ;;  %v962_v50 = vld [vmem:[%s15525_s7 + $0x690] sm:$0xff]  ;;  %v10370_v55 = vcombine.low %v946_v35, %v954_v36  ;;  %v796_v35 = vld [vmem:[%s15525_s7 + $0x160] sm:$0xff] }
 0x57f   :  { %v10373_v49 = vcombine.high %v947_v38, %v955_v43  ;;  %v970_v52 = vld [vmem:[%s15525_s7 + $0x6d0] sm:$0xff]  ;;  %v971_v54 = vld [vmem:[%s15525_s7 + $0x6d8] sm:$0xff] }
 0x580   :  { %4294 = vmatpush1.bf16.msra.mxu1 %v10274_v53  ;;  %v963_v53 = vld [vmem:[%s15525_s7 + $0x698] sm:$0xff] }
 0x581   :  { %4335 = vmatpush1.bf16.msra.mxu0 %v10276_v56  ;;  %4295 = vmatprep.subr.bf16.mxu1 %v10291_v2  ;;  %v10372_v56 = vcombine.low %v947_v38, %v955_v43  ;;  %v10387_v2 = vcombine.high %v962_v50, %v970_v52  ;;  %v789_v38 = vld [vmem:[%s15525_s7 + $0x128] sm:$0xff] }
 0x582   :  { %4336 = vmatprep.subr.bf16.mxu0 %v10293_v57  ;;  %v10389_v57 = vcombine.high %v963_v53, %v971_v54  ;;  %v797_v43 = vld [vmem:[%s15525_s7 + $0x168] sm:$0xff] }
 0x584   :  { %4296 = vmatpush1.bf16.msra.mxu1 %v10290_v62  ;;  %v10386_v62 = vcombine.low %v962_v50, %v970_v52  ;;  %v804_v50 = vld [vmem:[%s15525_s7 + $0x1a0] sm:$0xff] }
 0x585   :  { %4337 = vmatpush1.bf16.msra.mxu0 %v10292_v63  ;;  %4297 = vmatprep.subr.bf16.mxu1 %v10307_v0  ;;  %v10388_v63 = vcombine.low %v963_v53, %v971_v54  ;;  %v10403_v0 = vcombine.high %v978_v58, %v986_v59  ;;  %v812_v52 = vld [vmem:[%s15525_s7 + $0x1e0] sm:$0xff]  ;;  %v805_v53 = vld [vmem:[%s15525_s7 + $0x1a8] sm:$0xff] }
 0x586   :  { %4338 = vmatprep.subr.bf16.mxu0 %v10309_v6  ;;  %v10405_v6 = vcombine.high %v979_v60, %v987_v61  ;;  %v813_v54 = vld [vmem:[%s15525_s7 + $0x1e8] sm:$0xff] }
 0x588   :  { %4298 = vmatpush1.bf16.msra.mxu1 %v10306_v15  ;;  %v10402_v15 = vcombine.low %v978_v58, %v986_v59  ;;  %v820_v58 = vld [vmem:[%s15525_s7 + $0x220] sm:$0xff] }
 0x589   :  { %4339 = vmatpush1.bf16.msra.mxu0 %v10308_v17  ;;  %4299 = vmatprep.subr.bf16.mxu1 %v10323_v14  ;;  %v10404_v17 = vcombine.low %v979_v60, %v987_v61  ;;  %v10419_v14 = vcombine.high %v994_v8, %v1002_v9  ;;  %v828_v59 = vld [vmem:[%s15525_s7 + $0x260] sm:$0xff]  ;;  %v821_v60 = vld [vmem:[%s15525_s7 + $0x228] sm:$0xff] }
 0x58a   :  { %4340 = vmatprep.subr.bf16.mxu0 %v10325_v19  ;;  %v10421_v19 = vcombine.high %v995_v12, %v1003_v13  ;;  %v829_v61 = vld [vmem:[%s15525_s7 + $0x268] sm:$0xff] }
 0x58c   :  { %4300 = vmatpush1.bf16.msra.mxu1 %v10322_v24  ;;  %v10418_v24 = vcombine.low %v994_v8, %v1002_v9  ;;  %v836_v8 = vld [vmem:[%s15525_s7 + $0x2a0] sm:$0xff] }
 0x58d   :  { %4341 = vmatpush1.bf16.msra.mxu0 %v10324_v28  ;;  %4301 = vmatprep.subr.bf16.mxu1 %v10339_v29  ;;  %v10420_v28 = vcombine.low %v995_v12, %v1003_v13  ;;  %v10183_v29 = vcombine.high %v756_v20, %v764_v21  ;;  %v844_v9 = vld [vmem:[%s15525_s7 + $0x2e0] sm:$0xff]  ;;  %v837_v12 = vld [vmem:[%s15525_s7 + $0x2a8] sm:$0xff] }
 0x58e   :  { %4342 = vmatprep.subr.bf16.mxu0 %v10341_v4  ;;  %v10185_v4 = vcombine.high %v757_v22, %v765_v23  ;;  %v845_v13 = vld [vmem:[%s15525_s7 + $0x2e8] sm:$0xff]  ;;  %v852_v20 = vld [vmem:[%s15525_s7 + $0x320] sm:$0xff] }
 0x58f   :  { %v860_v21 = vld [vmem:[%s15525_s7 + $0x360] sm:$0xff] }
 0x590   :  { %4302 = vmatpush1.bf16.msra.mxu1 %v10338_v32  ;;  %v781_v32 = vld [vmem:[%s15525_s7 + $0xe8] sm:$0xff] }
 0x591   :  { %4343 = vmatpush1.bf16.msra.mxu0 %v10340_v33  ;;  %4303 = vmatprep.subr.bf16.mxu1 %v10355_v16  ;;  %v10184_v33 = vcombine.low %v757_v22, %v765_v23  ;;  %v10199_v16 = vcombine.high %v772_v30, %v780_v3  ;;  %v10201_v36 = vcombine.high %v773_v7, %v781_v32  ;;  %v853_v22 = vld [vmem:[%s15525_s7 + $0x328] sm:$0xff] }
 0x592   :  { %4344 = vmatprep.subr.bf16.mxu0 %v10357_v34  ;;  %v788_v34 = vld [vmem:[%s15525_s7 + $0x120] sm:$0xff]  ;;  %v861_v23 = vld [vmem:[%s15525_s7 + $0x368] sm:$0xff] }
 0x594   :  { %4304 = vmatpush1.bf16.msra.mxu1 %v10354_v44  ;;  %v10198_v44 = vcombine.low %v772_v30, %v780_v3  ;;  %v10281_v30 = vcombine.high %v853_v22, %v861_v23  ;;  %v868_v3 = vld [vmem:[%s15525_s7 + $0x3a0] sm:$0xff] }
 0x595   :  { %4345 = vmatpush1.bf16.msra.mxu0 %v10356_v45  ;;  %4305 = vmatprep.subr.bf16.mxu1 %v10371_v48  ;;  %v10200_v45 = vcombine.low %v773_v7, %v781_v32  ;;  %v10215_v48 = vcombine.high %v788_v34, %v796_v35 }
 0x596   :  { %4346 = vmatprep.subr.bf16.mxu0 %v10373_v49  ;;  %v10217_v49 = vcombine.high %v789_v38, %v797_v43 }
 0x598   :  { %4306 = vmatpush1.bf16.msra.mxu1 %v10370_v55  ;;  %v10214_v55 = vcombine.low %v788_v34, %v796_v35 }
 0x599   :  { %4347 = vmatpush1.bf16.msra.mxu0 %v10372_v56  ;;  %4307 = vmatprep.subr.bf16.mxu1 %v10387_v2  ;;  %v10216_v56 = vcombine.low %v789_v38, %v797_v43  ;;  %v10231_v2 = vcombine.high %v804_v50, %v812_v52 }
 0x59a   :  { %4348 = vmatprep.subr.bf16.mxu0 %v10389_v57  ;;  %v10233_v57 = vcombine.high %v805_v53, %v813_v54 }
 0x59c   :  { %4308 = vmatpush1.bf16.msra.mxu1 %v10386_v62  ;;  %v10230_v62 = vcombine.low %v804_v50, %v812_v52  ;;  %v884_v50 = vld [vmem:[%s15525_s7 + $0x420] sm:$0xff] }
 0x59d   :  { %4349 = vmatpush1.bf16.msra.mxu0 %v10388_v63  ;;  %4309 = vmatprep.subr.bf16.mxu1 %v10403_v0  ;;  %v10232_v63 = vcombine.low %v805_v53, %v813_v54  ;;  %v10247_v0 = vcombine.high %v820_v58, %v828_v59  ;;  %v892_v52 = vld [vmem:[%s15525_s7 + $0x460] sm:$0xff]  ;;  %v885_v53 = vld [vmem:[%s15525_s7 + $0x428] sm:$0xff] }
 0x59e   :  { %4350 = vmatprep.subr.bf16.mxu0 %v10405_v6  ;;  %v10249_v6 = vcombine.high %v821_v60, %v829_v61  ;;  %v893_v54 = vld [vmem:[%s15525_s7 + $0x468] sm:$0xff] }
 0x5a0   :  { %4310 = vmatpush1.bf16.msra.mxu1 %v10402_v15  ;;  %v10246_v15 = vcombine.low %v820_v58, %v828_v59  ;;  %v900_v58 = vld [vmem:[%s15525_s7 + $0x4a0] sm:$0xff] }
 0x5a1   :  { %4351 = vmatpush1.bf16.msra.mxu0 %v10404_v17  ;;  %4311 = vmatprep.subr.bf16.mxu1 %v10419_v14  ;;  %v10248_v17 = vcombine.low %v821_v60, %v829_v61  ;;  %v10263_v14 = vcombine.high %v836_v8, %v844_v9  ;;  %v908_v59 = vld [vmem:[%s15525_s7 + $0x4e0] sm:$0xff]  ;;  %v901_v60 = vld [vmem:[%s15525_s7 + $0x4a8] sm:$0xff] }
 0x5a2   :  { %4352 = vmatprep.subr.bf16.mxu0 %v10421_v19  ;;  %v10265_v19 = vcombine.high %v837_v12, %v845_v13  ;;  %v909_v61 = vld [vmem:[%s15525_s7 + $0x4e8] sm:$0xff] }
 0x5a4   :  { %4312 = vmatpush1.bf16.msra.mxu1 %v10418_v24  ;;  %v10262_v24 = vcombine.low %v836_v8, %v844_v9  ;;  %v916_v8 = vld [vmem:[%s15525_s7 + $0x520] sm:$0xff] }
 0x5a5   :  { %4353 = vmatpush1.bf16.msra.mxu0 %v10420_v28  ;;  %4363 = vmatprep.subr.bf16.mxu1 %v10183_v29  ;;  %v10264_v28 = vcombine.low %v837_v12, %v845_v13  ;;  %v10279_v29 = vcombine.high %v852_v20, %v860_v21  ;;  %v924_v9 = vld [vmem:[%s15525_s7 + $0x560] sm:$0xff]  ;;  %v917_v12 = vld [vmem:[%s15525_s7 + $0x528] sm:$0xff] }
 0x5a6   :  { %4404 = vmatprep.subr.bf16.mxu0 %v10185_v4  ;;  %v925_v13 = vld [vmem:[%s15525_s7 + $0x568] sm:$0xff] }
 0x5a7   :  { %4314 = vmatmul.mubr.bf16.vlgmr.msra.gmra.mrb[40].mxu1 %v12774_v51 }
 0x5a8   :  { %4355 = vmatmul.mubr.bf16.vlgmr.msra.gmra.mrb[44].mxu0 %v12774_v51  ;;  %4364 = vmatpush1.bf16.msra.mxu1 %v10182_v31  ;;  %v876_v31 = vld [vmem:[%s15525_s7 + $0x3e0] sm:$0xff] }
 0x5a9   :  { %4395 = vmatprep.mubr.bf16.mxu1 %v12572_v26  ;;  %4405 = vmatpush1.bf16.msra.mxu0 %v10184_v33  ;;  %v869_v33 = vld [vmem:[%s15525_s7 + $0x3a8] sm:$0xff] }
 0x5aa   :  { %4436 = vmatprep.mubr.bf16.mxu0 %v12572_v26  ;;  %4365 = vmatprep.subr.bf16.mxu1 %v10199_v16  ;;  %v877_v16 = vld [vmem:[%s15525_s7 + $0x3e8] sm:$0xff] }
 0x5ab   :  { %4406 = vmatprep.subr.bf16.mxu0 %v10201_v36  ;;  %v10278_v36 = vcombine.low %v852_v20, %v860_v21  ;;  %v932_v20 = vld [vmem:[%s15525_s7 + $0x5a0] sm:$0xff] }
 0x5ac   :  { %4366 = vmatpush1.bf16.msra.mxu1 %v10198_v44  ;;  %v10280_v44 = vcombine.low %v853_v22, %v861_v23  ;;  %v940_v21 = vld [vmem:[%s15525_s7 + $0x5e0] sm:$0xff]  ;;  %v933_v22 = vld [vmem:[%s15525_s7 + $0x5a8] sm:$0xff] }
 0x5ad   :  { %4407 = vmatpush1.bf16.msra.mxu0 %v10200_v45  ;;  %4367 = vmatprep.subr.bf16.mxu1 %v10215_v48  ;;  %v10295_v45 = vcombine.high %v868_v3, %v876_v31  ;;  %v941_v23 = vld [vmem:[%s15525_s7 + $0x5e8] sm:$0xff] }
 0x5ae   :  { %4408 = vmatprep.subr.bf16.mxu0 %v10217_v49  ;;  %v10297_v49 = vcombine.high %v869_v33, %v877_v16 }
 0x5b0   :  { %4368 = vmatpush1.bf16.msra.mxu1 %v10214_v55  ;;  %v10294_v55 = vcombine.low %v868_v3, %v876_v31  ;;  %v948_v3 = vld [vmem:[%s15525_s7 + $0x620] sm:$0xff] }
 0x5b1   :  { %4409 = vmatpush1.bf16.msra.mxu0 %v10216_v56  ;;  %4369 = vmatprep.subr.bf16.mxu1 %v10231_v2  ;;  %v10296_v56 = vcombine.low %v869_v33, %v877_v16  ;;  %v10311_v2 = vcombine.high %v884_v50, %v892_v52  ;;  %v956_v31 = vld [vmem:[%s15525_s7 + $0x660] sm:$0xff]  ;;  %v949_v33 = vld [vmem:[%s15525_s7 + $0x628] sm:$0xff] }
 0x5b2   :  { %4410 = vmatprep.subr.bf16.mxu0 %v10233_v57  ;;  %v10313_v57 = vcombine.high %v885_v53, %v893_v54  ;;  %v957_v16 = vld [vmem:[%s15525_s7 + $0x668] sm:$0xff] }
 0x5b4   :  { %4370 = vmatpush1.bf16.msra.mxu1 %v10230_v62  ;;  %v10310_v62 = vcombine.low %v884_v50, %v892_v52  ;;  %v10374_v50 = vcombine.low %v948_v3, %v956_v31  ;;  %v10376_v52 = vcombine.low %v949_v33, %v957_v16 }
 0x5b5   :  { %4411 = vmatpush1.bf16.msra.mxu0 %v10232_v63  ;;  %4371 = vmatprep.subr.bf16.mxu1 %v10247_v0  ;;  %v10312_v63 = vcombine.low %v885_v53, %v893_v54  ;;  %v10327_v0 = vcombine.high %v900_v58, %v908_v59 }
 0x5b6   :  { %4412 = vmatprep.subr.bf16.mxu0 %v10249_v6  ;;  %v10329_v6 = vcombine.high %v901_v60, %v909_v61 }
 0x5b8   :  { %4372 = vmatpush1.bf16.msra.mxu1 %v10246_v15  ;;  %v10326_v15 = vcombine.low %v900_v58, %v908_v59 }
 0x5b9   :  { %4413 = vmatpush1.bf16.msra.mxu0 %v10248_v17  ;;  %4373 = vmatprep.subr.bf16.mxu1 %v10263_v14  ;;  %v10328_v17 = vcombine.low %v901_v60, %v909_v61  ;;  %v10343_v14 = vcombine.high %v916_v8, %v924_v9 }
 0x5ba   :  { %v13044_v4 = vpop.f32.mrb[28].mxu1  ;;  %4414 = vmatprep.subr.bf16.mxu0 %v10265_v19  ;;  %v10345_v19 = vcombine.high %v917_v12, %v925_v13 }
 0x5bb   :  { %v13052_v7 = vpop.f32.mrb[32].mxu0  ;;  %v13054_v32 = vpop.f32.mrb[29].mxu1 }
 0x5bc   :  { %v13062_v34 = vpop.f32.mrb[33].mxu0  ;;  %v2793_v35 = vpop.f32.mrb[30].mxu1  ;;  %4374 = vmatpush1.bf16.msra.mxu1 %v10262_v24  ;;  %v10342_v24 = vcombine.low %v916_v8, %v924_v9 }
 0x5bd   :  { %v2834_v38 = vpop.f32.mrb[34].mxu0  ;;  %4415 = vmatpush1.bf16.msra.mxu0 %v10264_v28  ;;  %v2794_v43 = vpop.f32.mrb[31].mxu1  ;;  %4375 = vmatprep.subr.bf16.mxu1 %v10279_v29  ;;  %v10344_v28 = vcombine.low %v917_v12, %v925_v13  ;;  %v10359_v29 = vcombine.high %v932_v20, %v940_v21  ;;  %v10358_v35 = vcombine.low %v932_v20, %v940_v21 }
 0x5be   :  { %v2835_v48 = vpop.f32.mrb[35].mxu0  ;;  %4416 = vmatprep.subr.bf16.mxu0 %v10281_v30  ;;  %v10361_v30 = vcombine.high %v933_v22, %v941_v23  ;;  %v10375_v38 = vcombine.high %v948_v3, %v956_v31  ;;  %v10377_v43 = vcombine.high %v949_v33, %v957_v16  ;;  %v783_v3 = vld [vmem:[%s15525_s7 + $0xf8] sm:$0xff]  ;;  %v790_v16 = vld [vmem:[%s15525_s7 + $0x130] sm:$0xff] }
 0x5bf   :  { %v965_v48 = vld [vmem:[%s15525_s7 + $0x6a8] sm:$0xff] }
 0x5c0   :  { %4376 = vmatpush1.bf16.msra.mxu1 %v10278_v36  ;;  %v10360_v36 = vcombine.low %v933_v22, %v941_v23 }
 0x5c1   :  { %4417 = vmatpush1.bf16.msra.mxu0 %v10280_v44  ;;  %4377 = vmatprep.subr.bf16.mxu1 %v10295_v45  ;;  %v964_v44 = vld [vmem:[%s15525_s7 + $0x6a0] sm:$0xff] }
 0x5c2   :  { %4418 = vmatprep.subr.bf16.mxu0 %v10297_v49  ;;  %v972_v45 = vld [vmem:[%s15525_s7 + $0x6e0] sm:$0xff]  ;;  %v973_v49 = vld [vmem:[%s15525_s7 + $0x6e8] sm:$0xff] }
 0x5c3   :  { %v10391_v53 = vcombine.high %v964_v44, %v972_v45  ;;  %v10393_v54 = vcombine.high %v965_v48, %v973_v49  ;;  %v10390_v58 = vcombine.low %v964_v44, %v972_v45  ;;  %v10392_v59 = vcombine.low %v965_v48, %v973_v49 }
 0x5c4   :  { %4378 = vmatpush1.bf16.msra.mxu1 %v10294_v55  ;;  %v980_v55 = vld [vmem:[%s15525_s7 + $0x720] sm:$0xff] }
 0x5c5   :  { %4419 = vmatpush1.bf16.msra.mxu0 %v10296_v56  ;;  %4379 = vmatprep.subr.bf16.mxu1 %v10311_v2  ;;  %v988_v56 = vld [vmem:[%s15525_s7 + $0x760] sm:$0xff]  ;;  %v981_v2 = vld [vmem:[%s15525_s7 + $0x728] sm:$0xff] }
 0x5c6   :  { %4420 = vmatprep.subr.bf16.mxu0 %v10313_v57  ;;  %v989_v57 = vld [vmem:[%s15525_s7 + $0x768] sm:$0xff]  ;;  %v10407_v60 = vcombine.high %v980_v55, %v988_v56  ;;  %v10406_v8 = vcombine.low %v980_v55, %v988_v56 }
 0x5c7   :  { %v10409_v61 = vcombine.high %v981_v2, %v989_v57  ;;  %v10408_v9 = vcombine.low %v981_v2, %v989_v57  ;;  %v822_v57 = vld [vmem:[%s15525_s7 + $0x230] sm:$0xff] }
 0x5c8   :  { %4380 = vmatpush1.bf16.msra.mxu1 %v10310_v62  ;;  %v996_v62 = vld [vmem:[%s15525_s7 + $0x7a0] sm:$0xff] }
 0x5c9   :  { %4421 = vmatpush1.bf16.msra.mxu0 %v10312_v63  ;;  %4381 = vmatprep.subr.bf16.mxu1 %v10327_v0  ;;  %v1004_v63 = vld [vmem:[%s15525_s7 + $0x7e0] sm:$0xff]  ;;  %v997_v0 = vld [vmem:[%s15525_s7 + $0x7a8] sm:$0xff] }
 0x5ca   :  { %4422 = vmatprep.subr.bf16.mxu0 %v10329_v6  ;;  %v1005_v6 = vld [vmem:[%s15525_s7 + $0x7e8] sm:$0xff]  ;;  %v10423_v12 = vcombine.high %v996_v62, %v1004_v63  ;;  %v10422_v20 = vcombine.low %v996_v62, %v1004_v63 }
 0x5cb   :  { %v10425_v13 = vcombine.high %v997_v0, %v1005_v6  ;;  %v10424_v21 = vcombine.low %v997_v0, %v1005_v6  ;;  %v838_v6 = vld [vmem:[%s15525_s7 + $0x2b0] sm:$0xff] }
 0x5cc   :  { %4382 = vmatpush1.bf16.msra.mxu1 %v10326_v15  ;;  %v758_v15 = vld [vmem:[%s15525_s7 + $0x30] sm:$0xff] }
 0x5cd   :  { %4423 = vmatpush1.bf16.msra.mxu0 %v10328_v17  ;;  %4383 = vmatprep.subr.bf16.mxu1 %v10343_v14  ;;  %v766_v17 = vld [vmem:[%s15525_s7 + $0x70] sm:$0xff]  ;;  %v759_v14 = vld [vmem:[%s15525_s7 + $0x38] sm:$0xff] }
 0x5ce   :  { %4424 = vmatprep.subr.bf16.mxu0 %v10345_v19  ;;  %v767_v19 = vld [vmem:[%s15525_s7 + $0x78] sm:$0xff]  ;;  %v10187_v22 = vcombine.high %v758_v15, %v766_v17 }
 0x5cf   :  { %v10189_v23 = vcombine.high %v759_v14, %v767_v19  ;;  %v10188_v31 = vcombine.low %v759_v14, %v767_v19  ;;  %v854_v19 = vld [vmem:[%s15525_s7 + $0x330] sm:$0xff] }
 0x5d0   :  { %4384 = vmatpush1.bf16.msra.mxu1 %v10342_v24  ;;  %v774_v24 = vld [vmem:[%s15525_s7 + $0xb0] sm:$0xff] }
 0x5d1   :  { %4425 = vmatpush1.bf16.msra.mxu0 %v10344_v28  ;;  %4385 = vmatprep.subr.bf16.mxu1 %v10359_v29  ;;  %v782_v28 = vld [vmem:[%s15525_s7 + $0xf0] sm:$0xff]  ;;  %v10186_v29 = vcombine.low %v758_v15, %v766_v17 }
 0x5d2   :  { %4426 = vmatprep.subr.bf16.mxu0 %v10361_v30  ;;  %v775_v30 = vld [vmem:[%s15525_s7 + $0xb8] sm:$0xff]  ;;  %v10203_v33 = vcombine.high %v774_v24, %v782_v28  ;;  %v10202_v44 = vcombine.low %v774_v24, %v782_v28 }
 0x5d3   :  { %v10204_v45 = vcombine.low %v775_v30, %v783_v3 }
 0x5d4   :  { %4386 = vmatpush1.bf16.msra.mxu1 %v10358_v35  ;;  %v798_v35 = vld [vmem:[%s15525_s7 + $0x170] sm:$0xff] }
 0x5d5   :  { %4427 = vmatpush1.bf16.msra.mxu0 %v10360_v36  ;;  %4387 = vmatprep.subr.bf16.mxu1 %v10375_v38  ;;  %v10205_v36 = vcombine.high %v775_v30, %v783_v3  ;;  %v791_v38 = vld [vmem:[%s15525_s7 + $0x138] sm:$0xff]  ;;  %v10219_v48 = vcombine.high %v790_v16, %v798_v35  ;;  %v870_v3 = vld [vmem:[%s15525_s7 + $0x3b0] sm:$0xff] }
 0x5d6   :  { %4428 = vmatprep.subr.bf16.mxu0 %v10377_v43  ;;  %v799_v43 = vld [vmem:[%s15525_s7 + $0x178] sm:$0xff] }
 0x5d7   :  { %v10221_v49 = vcombine.high %v791_v38, %v799_v43  ;;  %v10220_v55 = vcombine.low %v791_v38, %v799_v43 }
 0x5d8   :  { %4388 = vmatpush1.bf16.msra.mxu1 %v10374_v50  ;;  %v806_v50 = vld [vmem:[%s15525_s7 + $0x1b0] sm:$0xff] }
 0x5d9   :  { %4429 = vmatpush1.bf16.msra.mxu0 %v10376_v52  ;;  %4389 = vmatprep.subr.bf16.mxu1 %v10391_v53  ;;  %v814_v52 = vld [vmem:[%s15525_s7 + $0x1f0] sm:$0xff]  ;;  %v807_v53 = vld [vmem:[%s15525_s7 + $0x1b8] sm:$0xff] }
 0x5da   :  { %4430 = vmatprep.subr.bf16.mxu0 %v10393_v54  ;;  %v815_v54 = vld [vmem:[%s15525_s7 + $0x1f8] sm:$0xff]  ;;  %v10235_v56 = vcombine.high %v806_v50, %v814_v52 }
 0x5db   :  { %v10237_v2 = vcombine.high %v807_v53, %v815_v54  ;;  %v10236_v62 = vcombine.low %v807_v53, %v815_v54  ;;  %v886_v54 = vld [vmem:[%s15525_s7 + $0x430] sm:$0xff] }
 0x5dc   :  { %4390 = vmatpush1.bf16.msra.mxu1 %v10390_v58  ;;  %v830_v58 = vld [vmem:[%s15525_s7 + $0x270] sm:$0xff] }
 0x5dd   :  { %4431 = vmatpush1.bf16.msra.mxu0 %v10392_v59  ;;  %4391 = vmatprep.subr.bf16.mxu1 %v10407_v60  ;;  %v823_v59 = vld [vmem:[%s15525_s7 + $0x238] sm:$0xff]  ;;  %v10251_v63 = vcombine.high %v822_v57, %v830_v58 }
 0x5de   :  { %4432 = vmatprep.subr.bf16.mxu0 %v10409_v61  ;;  %v831_v60 = vld [vmem:[%s15525_s7 + $0x278] sm:$0xff]  ;;  %v10234_v61 = vcombine.low %v806_v50, %v814_v52 }
 0x5df   :  { %v10253_v0 = vcombine.high %v823_v59, %v831_v60  ;;  %v10252_v15 = vcombine.low %v823_v59, %v831_v60  ;;  %v902_v60 = vld [vmem:[%s15525_s7 + $0x4b0] sm:$0xff] }
 0x5e0   :  { %4392 = vmatpush1.bf16.msra.mxu1 %v10406_v8  ;;  %v846_v8 = vld [vmem:[%s15525_s7 + $0x2f0] sm:$0xff] }
 0x5e1   :  { %4433 = vmatpush1.bf16.msra.mxu0 %v10408_v9  ;;  %4393 = vmatprep.subr.bf16.mxu1 %v10423_v12  ;;  %v839_v9 = vld [vmem:[%s15525_s7 + $0x2b8] sm:$0xff]  ;;  %v10267_v17 = vcombine.high %v838_v6, %v846_v8 }
 0x5e2   :  { %4434 = vmatprep.subr.bf16.mxu0 %v10425_v13  ;;  %v847_v12 = vld [vmem:[%s15525_s7 + $0x2f8] sm:$0xff]  ;;  %v10250_v13 = vcombine.low %v822_v57, %v830_v58 }
 0x5e3   :  { %v10269_v14 = vcombine.high %v839_v9, %v847_v12  ;;  %v10268_v24 = vcombine.low %v839_v9, %v847_v12  ;;  %v918_v12 = vld [vmem:[%s15525_s7 + $0x530] sm:$0xff] }
 0x5e4   :  { %4394 = vmatpush1.bf16.msra.mxu1 %v10422_v20  ;;  %v862_v20 = vld [vmem:[%s15525_s7 + $0x370] sm:$0xff] }
 0x5e5   :  { %4435 = vmatpush1.bf16.msra.mxu0 %v10424_v21  ;;  %4445 = vmatprep.subr.bf16.mxu1 %v10187_v22  ;;  %v855_v21 = vld [vmem:[%s15525_s7 + $0x338] sm:$0xff]  ;;  %v10283_v28 = vcombine.high %v854_v19, %v862_v20 }
 0x5e6   :  { %4486 = vmatprep.subr.bf16.mxu0 %v10189_v23  ;;  %v863_v22 = vld [vmem:[%s15525_s7 + $0x378] sm:$0xff]  ;;  %v10266_v23 = vcombine.low %v838_v6, %v846_v8 }
 0x5e7   :  { %4396 = vmatmul.mubr.bf16.vlgmr.msra.gmra.mrb[44].mxu1 %v12774_v51  ;;  %v10285_v30 = vcombine.high %v855_v21, %v863_v22 }
 0x5e8   :  { %4437 = vmatmul.mubr.bf16.vlgmr.msra.gmra.mrb[48].mxu0 %v12774_v51  ;;  %4446 = vmatpush1.bf16.msra.mxu1 %v10186_v29 }
 0x5e9   :  { %4477 = vmatprep.mubr.bf16.mxu1 %v12572_v26  ;;  %4487 = vmatpush1.bf16.msra.mxu0 %v10188_v31  ;;  %v878_v31 = vld [vmem:[%s15525_s7 + $0x3f0] sm:$0xff] }
 0x5ea   :  { %4518 = vmatprep.mubr.bf16.mxu0 %v12572_v26  ;;  %4447 = vmatprep.subr.bf16.mxu1 %v10203_v33  ;;  %v10218_v26 = vcombine.low %v790_v16, %v798_v35  ;;  %v871_v35 = vld [vmem:[%s15525_s7 + $0x3b8] sm:$0xff]  ;;  %v10299_v50 = vcombine.high %v870_v3, %v878_v31 }
 0x5eb   :  { %4488 = vmatprep.subr.bf16.mxu0 %v10205_v36  ;;  %v879_v36 = vld [vmem:[%s15525_s7 + $0x3f8] sm:$0xff] }
 0x5ec   :  { %4448 = vmatpush1.bf16.msra.mxu1 %v10202_v44  ;;  %v10282_v44 = vcombine.low %v854_v19, %v862_v20  ;;  %v10301_v53 = vcombine.high %v871_v35, %v879_v36  ;;  %v10300_v57 = vcombine.low %v871_v35, %v879_v36  ;;  %v950_v36 = vld [vmem:[%s15525_s7 + $0x630] sm:$0xff] }
 0x5ed   :  { %4489 = vmatpush1.bf16.msra.mxu0 %v10204_v45  ;;  %4449 = vmatprep.subr.bf16.mxu1 %v10219_v48 }
 0x5ee   :  { %4490 = vmatprep.subr.bf16.mxu0 %v10221_v49  ;;  %v10284_v49 = vcombine.low %v855_v21, %v863_v22  ;;  %v934_v22 = vld [vmem:[%s15525_s7 + $0x5b0] sm:$0xff] }
 0x5f0   :  { %4450 = vmatpush1.bf16.msra.mxu1 %v10218_v26  ;;  %v894_v26 = vld [vmem:[%s15525_s7 + $0x470] sm:$0xff] }
 0x5f1   :  { %4491 = vmatpush1.bf16.msra.mxu0 %v10220_v55  ;;  %4451 = vmatprep.subr.bf16.mxu1 %v10235_v56  ;;  %v887_v55 = vld [vmem:[%s15525_s7 + $0x438] sm:$0xff]  ;;  %v10315_v58 = vcombine.high %v886_v54, %v894_v26 }
 0x5f2   :  { %4492 = vmatprep.subr.bf16.mxu0 %v10237_v2  ;;  %v895_v56 = vld [vmem:[%s15525_s7 + $0x478] sm:$0xff]  ;;  %v10298_v2 = vcombine.low %v870_v3, %v878_v31 }
 0x5f3   :  { %v10317_v59 = vcombine.high %v887_v55, %v895_v56  ;;  %v10316_v6 = vcombine.low %v887_v55, %v895_v56  ;;  %v975_v55 = vld [vmem:[%s15525_s7 + $0x6f8] sm:$0xff] }
 0x5f4   :  { %4452 = vmatpush1.bf16.msra.mxu1 %v10234_v61  ;;  %v910_v61 = vld [vmem:[%s15525_s7 + $0x4f0] sm:$0xff] }
 0x5f5   :  { %4493 = vmatpush1.bf16.msra.mxu0 %v10236_v62  ;;  %4453 = vmatprep.subr.bf16.mxu1 %v10251_v63  ;;  %v903_v62 = vld [vmem:[%s15525_s7 + $0x4b8] sm:$0xff]  ;;  %v10331_v8 = vcombine.high %v902_v60, %v910_v61 }
 0x5f6   :  { %4494 = vmatprep.subr.bf16.mxu0 %v10253_v0  ;;  %v911_v63 = vld [vmem:[%s15525_s7 + $0x4f8] sm:$0xff]  ;;  %v10314_v0 = vcombine.low %v886_v54, %v894_v26  ;;  %v974_v54 = vld [vmem:[%s15525_s7 + $0x6f0] sm:$0xff] }
 0x5f7   :  { %v10333_v9 = vcombine.high %v903_v62, %v911_v63  ;;  %v10332_v19 = vcombine.low %v903_v62, %v911_v63  ;;  %v967_v26 = vld [vmem:[%s15525_s7 + $0x6b8] sm:$0xff] }
 0x5f8   :  { %4454 = vmatpush1.bf16.msra.mxu1 %v10250_v13  ;;  %v926_v13 = vld [vmem:[%s15525_s7 + $0x570] sm:$0xff]  ;;  %v991_v62 = vld [vmem:[%s15525_s7 + $0x778] sm:$0xff] }
 0x5f9   :  { %4495 = vmatpush1.bf16.msra.mxu0 %v10252_v15  ;;  %4455 = vmatprep.subr.bf16.mxu1 %v10267_v17  ;;  %v919_v15 = vld [vmem:[%s15525_s7 + $0x538] sm:$0xff]  ;;  %v10347_v20 = vcombine.high %v918_v12, %v926_v13 }
 0x5fa   :  { %v13248_v29 = vpop.f32.mrb[32].mxu1  ;;  %4496 = vmatprep.subr.bf16.mxu0 %v10269_v14  ;;  %v927_v17 = vld [vmem:[%s15525_s7 + $0x578] sm:$0xff]  ;;  %v10330_v14 = vcombine.low %v902_v60, %v910_v61  ;;  %v990_v60 = vld [vmem:[%s15525_s7 + $0x770] sm:$0xff] }
 0x5fb   :  { %v13256_v33 = vpop.f32.mrb[36].mxu0  ;;  %v13258_v16 = vpop.f32.mrb[33].mxu1  ;;  %v10349_v21 = vcombine.high %v919_v15, %v927_v17  ;;  %v10348_v3 = vcombine.low %v919_v15, %v927_v17  ;;  %v983_v61 = vld [vmem:[%s15525_s7 + $0x738] sm:$0xff] }
 0x5fc   :  { %v13266_v38 = vpop.f32.mrb[37].mxu0  ;;  %v2875_v43 = vpop.f32.mrb[34].mxu1  ;;  %4456 = vmatpush1.bf16.msra.mxu1 %v10266_v23  ;;  %v942_v23 = vld [vmem:[%s15525_s7 + $0x5f0] sm:$0xff]  ;;  %v1007_v15 = vld [vmem:[%s15525_s7 + $0x7f8] sm:$0xff] }
 0x5fd   :  { %v2916_v45 = vpop.f32.mrb[38].mxu0  ;;  %4497 = vmatpush1.bf16.msra.mxu0 %v10268_v24  ;;  %v2876_v48 = vpop.f32.mrb[35].mxu1  ;;  %4457 = vmatprep.subr.bf16.mxu1 %v10283_v28  ;;  %v935_v24 = vld [vmem:[%s15525_s7 + $0x5b8] sm:$0xff]  ;;  %v10363_v31 = vcombine.high %v934_v22, %v942_v23  ;;  %v958_v43 = vld [vmem:[%s15525_s7 + $0x670] sm:$0xff] }
 0x5fe   :  { %v2917_v52 = vpop.f32.mrb[39].mxu0  ;;  %4498 = vmatprep.subr.bf16.mxu0 %v10285_v30  ;;  %v943_v28 = vld [vmem:[%s15525_s7 + $0x5f8] sm:$0xff]  ;;  %v10346_v30 = vcombine.low %v918_v12, %v926_v13  ;;  %v10362_v48 = vcombine.low %v934_v22, %v942_v23  ;;  %v10378_v56 = vcombine.low %v950_v36, %v958_v43  ;;  %v1006_v12 = vld [vmem:[%s15525_s7 + $0x7f0] sm:$0xff]  ;;  %v4527_v23 = vld [vmem:[%s15527_s2 + $0x8] sm:$0xf] }
 0x5ff   :  { %v10365_v35 = vcombine.high %v935_v24, %v943_v28  ;;  %v959_v45 = vld [vmem:[%s15525_s7 + $0x678] sm:$0xff] }
 0x600   :  { %4458 = vmatpush1.bf16.msra.mxu1 %v10282_v44  ;;  %v951_v44 = vld [vmem:[%s15525_s7 + $0x638] sm:$0xff] }
 0x601   :  { %4499 = vmatpush1.bf16.msra.mxu0 %v10284_v49  ;;  %4459 = vmatprep.subr.bf16.mxu1 %v10299_v50  ;;  %v10364_v49 = vcombine.low %v935_v24, %v943_v28  ;;  %v10379_v50 = vcombine.high %v950_v36, %v958_v43  ;;  %v10381_v52 = vcombine.high %v951_v44, %v959_v45  ;;  %v999_v13 = vld [vmem:[%s15525_s7 + $0x7b8] sm:$0xff] }
 0x602   :  { %4500 = vmatprep.subr.bf16.mxu0 %v10301_v53  ;;  %v966_v53 = vld [vmem:[%s15525_s7 + $0x6b0] sm:$0xff]  ;;  %v10428_v22 = vcombine.low %v999_v13, %v1007_v15 }
 0x603   :  { %v10394_v63 = vcombine.low %v966_v53, %v974_v54 }
 0x604   :  { %4460 = vmatpush1.bf16.msra.mxu1 %v10298_v2  ;;  %v10380_v2 = vcombine.low %v951_v44, %v959_v45 }
 0x605   :  { %4501 = vmatpush1.bf16.msra.mxu0 %v10300_v57  ;;  %4461 = vmatprep.subr.bf16.mxu1 %v10315_v58  ;;  %v10395_v57 = vcombine.high %v966_v53, %v974_v54  ;;  %v10397_v58 = vcombine.high %v967_v26, %v975_v55  ;;  %v4598_v53 = vld [vmem:[%s15525_s7 + $0x10c0] sm:$0xff] }
 0x606   :  { %4502 = vmatprep.subr.bf16.mxu0 %v10317_v59  ;;  %v982_v59 = vld [vmem:[%s15525_s7 + $0x730] sm:$0xff] }
 0x607   :  { %v10410_v17 = vcombine.low %v982_v59, %v990_v60 }
 0x608   :  { %4462 = vmatpush1.bf16.msra.mxu1 %v10314_v0  ;;  %v10396_v0 = vcombine.low %v967_v26, %v975_v55 }
 0x609   :  { %4503 = vmatpush1.bf16.msra.mxu0 %v10316_v6  ;;  %4463 = vmatprep.subr.bf16.mxu1 %v10331_v8  ;;  %v10411_v6 = vcombine.high %v982_v59, %v990_v60  ;;  %v10413_v8 = vcombine.high %v983_v61, %v991_v62  ;;  %v4614_v59 = vld [vmem:[%s15525_s7 + $0x1140] sm:$0xff]  ;;  %v4607_v60 = vld [vmem:[%s15525_s7 + $0x1108] sm:$0xff] }
 0x60a   :  { %4504 = vmatprep.subr.bf16.mxu0 %v10333_v9  ;;  %v998_v9 = vld [vmem:[%s15525_s7 + $0x7b0] sm:$0xff] }
 0x60c   :  { %4464 = vmatpush1.bf16.msra.mxu1 %v10330_v14  ;;  %v10412_v14 = vcombine.low %v983_v61, %v991_v62  ;;  %v4615_v61 = vld [vmem:[%s15525_s7 + $0x1148] sm:$0xff] }
 0x60d   :  { %4505 = vmatpush1.bf16.msra.mxu0 %v10332_v19  ;;  %4465 = vmatprep.subr.bf16.mxu1 %v10347_v20  ;;  %v10427_v19 = vcombine.high %v998_v9, %v1006_v12  ;;  %v10429_v20 = vcombine.high %v999_v13, %v1007_v15  ;;  %v4631_v13 = vld [vmem:[%s15525_s7 + $0x11c8] sm:$0xff] }
 0x60e   :  { %4506 = vmatprep.subr.bf16.mxu0 %v10349_v21  ;;  %v10426_v21 = vcombine.low %v998_v9, %v1006_v12  ;;  %v4630_v9 = vld [vmem:[%s15525_s7 + $0x11c0] sm:$0xff]  ;;  %v4623_v12 = vld [vmem:[%s15525_s7 + $0x1188] sm:$0xff] }
 0x610   :  { %4466 = vmatpush1.bf16.msra.mxu1 %v10346_v30 }
 0x611   :  { %4507 = vmatpush1.bf16.msra.mxu0 %v10348_v3  ;;  %4467 = vmatprep.subr.bf16.mxu1 %v10363_v31 }
 0x612   :  { %4508 = vmatprep.subr.bf16.mxu0 %v10365_v35 }
 0x614   :  { %4468 = vmatpush1.bf16.msra.mxu1 %v10362_v48 }
 0x615   :  { %4509 = vmatpush1.bf16.msra.mxu0 %v10364_v49  ;;  %4469 = vmatprep.subr.bf16.mxu1 %v10379_v50 }
 0x616   :  { %4510 = vmatprep.subr.bf16.mxu0 %v10381_v52  ;;  %v4590_v52 = vld [vmem:[%s15525_s7 + $0x1080] sm:$0xff] }
 0x617   :  { %v10449_v55 = vcombine.high %v4590_v52, %v4598_v53  ;;  %v10448_v62 = vcombine.low %v4590_v52, %v4598_v53  ;;  %v4671_v52 = vld [vmem:[%s15525_s7 + $0x1308] sm:$0xff] }
 0x618   :  { %4470 = vmatpush1.bf16.msra.mxu1 %v10378_v56  ;;  %v4591_v56 = vld [vmem:[%s15525_s7 + $0x1088] sm:$0xff] }
 0x619   :  { %4511 = vmatpush1.bf16.msra.mxu0 %v10380_v2  ;;  %4471 = vmatprep.subr.bf16.mxu1 %v10395_v57  ;;  %v4599_v2 = vld [vmem:[%s15525_s7 + $0x10c8] sm:$0xff]  ;;  %v4606_v57 = vld [vmem:[%s15525_s7 + $0x1100] sm:$0xff] }
 0x61a   :  { %4512 = vmatprep.subr.bf16.mxu0 %v10397_v58  ;;  %v10451_v58 = vcombine.high %v4591_v56, %v4599_v2  ;;  %v10464_v15 = vcombine.low %v4606_v57, %v4614_v59  ;;  %v4679_v53 = vld [vmem:[%s15525_s7 + $0x1348] sm:$0xff] }
 0x61c   :  { %4472 = vmatpush1.bf16.msra.mxu1 %v10394_v63  ;;  %v10450_v63 = vcombine.low %v4591_v56, %v4599_v2  ;;  %v10531_v56 = vcombine.high %v4671_v52, %v4679_v53  ;;  %v4686_v2 = vld [vmem:[%s15525_s7 + $0x1380] sm:$0xff] }
 0x61d   :  { %4513 = vmatpush1.bf16.msra.mxu0 %v10396_v0  ;;  %4473 = vmatprep.subr.bf16.mxu1 %v10411_v6  ;;  %v10465_v0 = vcombine.high %v4606_v57, %v4614_v59  ;;  %v10467_v6 = vcombine.high %v4607_v60, %v4615_v61  ;;  %v4694_v57 = vld [vmem:[%s15525_s7 + $0x13c0] sm:$0xff]  ;;  %v4695_v59 = vld [vmem:[%s15525_s7 + $0x13c8] sm:$0xff] }
 0x61e   :  { %4514 = vmatprep.subr.bf16.mxu0 %v10413_v8  ;;  %v4622_v8 = vld [vmem:[%s15525_s7 + $0x1180] sm:$0xff] }
 0x620   :  { %4474 = vmatpush1.bf16.msra.mxu1 %v10410_v17  ;;  %v10466_v17 = vcombine.low %v4607_v60, %v4615_v61  ;;  %v10530_v61 = vcombine.low %v4671_v52, %v4679_v53 }
 0x621   :  { %4515 = vmatpush1.bf16.msra.mxu0 %v10412_v14  ;;  %4475 = vmatprep.subr.bf16.mxu1 %v10427_v19  ;;  %v10481_v14 = vcombine.high %v4622_v8, %v4630_v9  ;;  %v10483_v19 = vcombine.high %v4623_v12, %v4631_v13 }
 0x622   :  { %4516 = vmatprep.subr.bf16.mxu0 %v10429_v20  ;;  %v4638_v20 = vld [vmem:[%s15525_s7 + $0x1200] sm:$0xff] }
 0x624   :  { %4476 = vmatpush1.bf16.msra.mxu1 %v10426_v21  ;;  %v4646_v21 = vld [vmem:[%s15525_s7 + $0x1240] sm:$0xff] }
 0x625   :  { %4517 = vmatpush1.bf16.msra.mxu0 %v10428_v22  ;;  %10430 = vmatprep.subr.msk.bf16.mxu1 %vm127_vm3, %v11814_v40  ;;  %v4639_v22 = vld [vmem:[%s15525_s7 + $0x1208] sm:$0xff] }
 0x627   :  { %4478 = vmatmul.mubr.bf16.vlgmr.msra.gmra.mrb[48].mxu1 %v12774_v51 }
 0x628   :  { %4519 = vmatmul.mubr.bf16.vlgmr.msra.gmra.mrb[52].mxu0 %v12774_v51  ;;  %4532 = vmatpush1.bf16.msra.mxu1 %v11817_v41 }
 0x629   :  { %4563 = vmatprep.mubr.bf16.mxu1 %v11488_v37 }
 0x62f   :  { %10431 = vmatmul.mubr.msk.bf16.vlgmr.msra.gmra.mrb[52].mxu1 %vm699_vm6, %v4527_v23  ;;  %v4647_v23 = vld [vmem:[%s15525_s7 + $0x1248] sm:$0xff] }
 0x63a   :  { %v4233_v24 = vpop.f32.mrb[36].mxu1 }
 0x63b   :  { %v13375_v28 = vadd.f32 %v4233_v24, %v12632_v1  ;;  %v4274_v30 = vpop.f32.mrb[40].mxu0  ;;  %v4235_v3 = vpop.f32.mrb[37].mxu1  ;;  %v4574_v1 = vld [vmem:[%s15525_s7 + $0x1000] sm:$0xff]  ;;  %v10480_v24 = vcombine.low %v4622_v8, %v4630_v9  ;;  %v4703_v8 = vld [vmem:[%s15525_s7 + $0x1408] sm:$0xff] }
 0x63c   :  { %v13378_v31 = vadd.f32 %v4274_v30, %v12634_v5  ;;  %v13381_v51 = vadd.f32 %v4235_v3, %v12642_v10  ;;  %v4276_v35 = vpop.f32.mrb[41].mxu0  ;;  %v4237_v36 = vpop.f32.mrb[38].mxu1  ;;  %v4582_v5 = vld [vmem:[%s15525_s7 + $0x1040] sm:$0xff]  ;;  %v4575_v10 = vld [vmem:[%s15525_s7 + $0x1008] sm:$0xff]  ;;  %v10482_v30 = vcombine.low %v4623_v12, %v4631_v13  ;;  %v10497_v3 = vcombine.high %v4638_v20, %v4646_v21 }
 0x63d   :  { %v13384_v43 = vadd.f32 %v4276_v35, %v12644_v11  ;;  %v4278_v44 = vpop.f32.mrb[42].mxu0  ;;  %v4238_v45 = vpop.f32.mrb[39].mxu1  ;;  %v10432_v49 = vcombine.low %v4574_v1, %v4582_v5  ;;  %v10433_v50 = vcombine.high %v4574_v1, %v4582_v5  ;;  %v4583_v11 = vld [vmem:[%s15525_s7 + $0x1048] sm:$0xff]  ;;  %v10499_v35 = vcombine.high %v4639_v22, %v4647_v23  ;;  %v4654_v36 = vld [vmem:[%s15525_s7 + $0x1280] sm:$0xff] }
 0x63e   :  { %v4279_v48 = vpop.f32.mrb[43].mxu0  ;;  %v10434_v54 = vcombine.low %v4575_v10, %v4583_v11  ;;  %v10435_v26 = vcombine.high %v4575_v10, %v4583_v11  ;;  %v4662_v44 = vld [vmem:[%s15525_s7 + $0x12c0] sm:$0xff]  ;;  %v4655_v45 = vld [vmem:[%s15525_s7 + $0x1288] sm:$0xff]  ;;  %v10496_v1 = vcombine.low %v4638_v20, %v4646_v21  ;;  %v10498_v5 = vcombine.low %v4639_v22, %v4647_v23 }
 0x63f   :  { %6110 = vmatprep.subr.bf16.mxu0 %v10433_v50  ;;  %v4663_v48 = vld [vmem:[%s15525_s7 + $0x12c8] sm:$0xff]  ;;  %v10513_v10 = vcombine.high %v4654_v36, %v4662_v44  ;;  %v4670_v50 = vld [vmem:[%s15525_s7 + $0x1300] sm:$0xff]  ;;  %v10544_v12 = vcombine.low %v4686_v2, %v4694_v57 }
 0x640   :  { %6151 = vmatprep.subr.bf16.mxu1 %v10435_v26  ;;  %6111 = vmatpush1.bf16.msra.mxu0 %v10432_v49  ;;  %v10515_v49 = vcombine.high %v4655_v45, %v4663_v48  ;;  %v4678_v11 = vld [vmem:[%s15525_s7 + $0x1340] sm:$0xff]  ;;  %v10514_v26 = vcombine.low %v4655_v45, %v4663_v48  ;;  %v4711_v9 = vld [vmem:[%s15525_s7 + $0x1448] sm:$0xff] }
 0x641   :  { %6152 = vmatpush1.bf16.msra.mxu1 %v10434_v54  ;;  %6112 = vmatprep.subr.bf16.mxu0 %v10449_v55  ;;  %v10512_v54 = vcombine.low %v4654_v36, %v4662_v44  ;;  %v10529_v55 = vcombine.high %v4670_v50, %v4678_v11  ;;  %v10528_v60 = vcombine.low %v4670_v50, %v4678_v11  ;;  %v4719_v20 = vld [vmem:[%s15525_s7 + $0x1488] sm:$0xff] }
 0x642   :  { %6153 = vmatprep.subr.bf16.mxu1 %v10451_v58  ;;  %v4687_v58 = vld [vmem:[%s15525_s7 + $0x1388] sm:$0xff]  ;;  %v10562_v23 = vcombine.low %v4703_v8, %v4711_v9 }
 0x643   :  { %v10546_v13 = vcombine.low %v4687_v58, %v4695_v59  ;;  %v4727_v21 = vld [vmem:[%s15525_s7 + $0x14c8] sm:$0xff] }
 0x644   :  { %6113 = vmatpush1.bf16.msra.mxu0 %v10448_v62  ;;  %v10545_v62 = vcombine.high %v4686_v2, %v4694_v57  ;;  %v4735_v36 = vld [vmem:[%s15525_s7 + $0x1508] sm:$0xff]  ;;  %v10578_v48 = vcombine.low %v4719_v20, %v4727_v21 }
 0x645   :  { %6154 = vmatpush1.bf16.msra.mxu1 %v10450_v63  ;;  %6114 = vmatprep.subr.bf16.mxu0 %v10465_v0  ;;  %v10547_v63 = vcombine.high %v4687_v58, %v4695_v59  ;;  %v4702_v0 = vld [vmem:[%s15525_s7 + $0x1400] sm:$0xff]  ;;  %v4743_v44 = vld [vmem:[%s15525_s7 + $0x1548] sm:$0xff] }
 0x646   :  { %6155 = vmatprep.subr.bf16.mxu1 %v10467_v6  ;;  %v4710_v6 = vld [vmem:[%s15525_s7 + $0x1440] sm:$0xff]  ;;  %v4751_v50 = vld [vmem:[%s15525_s7 + $0x1588] sm:$0xff]  ;;  %v10594_v53 = vcombine.low %v4735_v36, %v4743_v44 }
 0x647   :  { %v10560_v22 = vcombine.low %v4702_v0, %v4710_v6  ;;  %v4759_v11 = vld [vmem:[%s15525_s7 + $0x15c8] sm:$0xff] }
 0x648   :  { %6115 = vmatpush1.bf16.msra.mxu0 %v10464_v15  ;;  %v10561_v15 = vcombine.high %v4702_v0, %v4710_v6  ;;  %v4767_v2 = vld [vmem:[%s15525_s7 + $0x1608] sm:$0xff]  ;;  %v10610_v59 = vcombine.low %v4751_v50, %v4759_v11  ;;  %v4782_v0 = vld [vmem:[%s15525_s7 + $0x1680] sm:$0xff] }
 0x649   :  { %6156 = vmatpush1.bf16.msra.mxu1 %v10466_v17  ;;  %6116 = vmatprep.subr.bf16.mxu0 %v10481_v14  ;;  %v10563_v17 = vcombine.high %v4703_v8, %v4711_v9  ;;  %v4718_v14 = vld [vmem:[%s15525_s7 + $0x1480] sm:$0xff]  ;;  %v4775_v57 = vld [vmem:[%s15525_s7 + $0x1648] sm:$0xff] }
 0x64a   :  { %6157 = vmatprep.subr.bf16.mxu1 %v10483_v19  ;;  %v4726_v19 = vld [vmem:[%s15525_s7 + $0x14c0] sm:$0xff]  ;;  %v4783_v8 = vld [vmem:[%s15525_s7 + $0x1688] sm:$0xff] }
 0x64b   :  { %v10576_v45 = vcombine.low %v4718_v14, %v4726_v19  ;;  %v4790_v6 = vld [vmem:[%s15525_s7 + $0x16c0] sm:$0xff] }
 0x64c   :  { %6117 = vmatpush1.bf16.msra.mxu0 %v10480_v24  ;;  %v10577_v24 = vcombine.high %v4718_v14, %v4726_v19  ;;  %v10640_v19 = vcombine.low %v4782_v0, %v4790_v6 }
 0x64d   :  { %6158 = vmatpush1.bf16.msra.mxu1 %v10482_v30  ;;  %6118 = vmatprep.subr.bf16.mxu0 %v10497_v3  ;;  %v10579_v30 = vcombine.high %v4719_v20, %v4727_v21  ;;  %v4734_v3 = vld [vmem:[%s15525_s7 + $0x1500] sm:$0xff] }
 0x64e   :  { %6159 = vmatprep.subr.bf16.mxu1 %v10499_v35  ;;  %v4742_v35 = vld [vmem:[%s15525_s7 + $0x1540] sm:$0xff] }
 0x64f   :  { %v10592_v52 = vcombine.low %v4734_v3, %v4742_v35 }
 0x650   :  { %6119 = vmatpush1.bf16.msra.mxu0 %v10496_v1  ;;  %v10593_v1 = vcombine.high %v4734_v3, %v4742_v35 }
 0x651   :  { %6160 = vmatpush1.bf16.msra.mxu1 %v10498_v5  ;;  %6120 = vmatprep.subr.bf16.mxu0 %v10513_v10  ;;  %v10595_v5 = vcombine.high %v4735_v36, %v4743_v44  ;;  %v4750_v10 = vld [vmem:[%s15525_s7 + $0x1580] sm:$0xff] }
 0x652   :  { %6161 = vmatprep.subr.bf16.mxu1 %v10515_v49  ;;  %v4758_v49 = vld [vmem:[%s15525_s7 + $0x15c0] sm:$0xff] }
 0x653   :  { %v10608_v58 = vcombine.low %v4750_v10, %v4758_v49  ;;  %v4798_v36 = vld [vmem:[%s15525_s7 + $0x1700] sm:$0xff] }
 0x654   :  { %6121 = vmatpush1.bf16.msra.mxu0 %v10512_v54  ;;  %v10609_v54 = vcombine.high %v4750_v10, %v4758_v49  ;;  %v4814_v10 = vld [vmem:[%s15525_s7 + $0x1780] sm:$0xff] }
 0x655   :  { %6162 = vmatpush1.bf16.msra.mxu1 %v10514_v26  ;;  %6122 = vmatprep.subr.bf16.mxu0 %v10529_v55  ;;  %v10611_v26 = vcombine.high %v4751_v50, %v4759_v11  ;;  %v4766_v55 = vld [vmem:[%s15525_s7 + $0x1600] sm:$0xff]  ;;  %v4815_v50 = vld [vmem:[%s15525_s7 + $0x1788] sm:$0xff] }
 0x656   :  { %6163 = vmatprep.subr.bf16.mxu1 %v10531_v56  ;;  %v4774_v56 = vld [vmem:[%s15525_s7 + $0x1640] sm:$0xff] }
 0x657   :  { %v4822_v49 = vld [vmem:[%s15525_s7 + $0x17c0] sm:$0xff] }
 0x658   :  { %6123 = vmatpush1.bf16.msra.mxu0 %v10528_v60  ;;  %v10625_v60 = vcombine.high %v4766_v55, %v4774_v56  ;;  %v10673_v11 = vcombine.high %v4814_v10, %v4822_v49 }
 0x659   :  { %6164 = vmatpush1.bf16.msra.mxu1 %v10530_v61  ;;  %6124 = vmatprep.subr.bf16.mxu0 %v10545_v62  ;;  %v10627_v61 = vcombine.high %v4767_v2, %v4775_v57  ;;  %v10624_v62 = vcombine.low %v4766_v55, %v4774_v56  ;;  %v4576_v55 = vld [vmem:[%s15525_s7 + $0x1010] sm:$0xff] }
 0x65a   :  { %6165 = vmatprep.subr.bf16.mxu1 %v10547_v63  ;;  %v10626_v63 = vcombine.low %v4767_v2, %v4775_v57  ;;  %v4584_v56 = vld [vmem:[%s15525_s7 + $0x1050] sm:$0xff]  ;;  %v4577_v2 = vld [vmem:[%s15525_s7 + $0x1018] sm:$0xff] }
 0x65b   :  { %v10436_v57 = vcombine.low %v4576_v55, %v4584_v56 }
 0x65c   :  { %6125 = vmatpush1.bf16.msra.mxu0 %v10544_v12  ;;  %v10641_v12 = vcombine.high %v4782_v0, %v4790_v6 }
 0x65d   :  { %6166 = vmatpush1.bf16.msra.mxu1 %v10546_v13  ;;  %6126 = vmatprep.subr.bf16.mxu0 %v10561_v15  ;;  %v4791_v13 = vld [vmem:[%s15525_s7 + $0x16c8] sm:$0xff] }
 0x65e   :  { %6167 = vmatprep.subr.bf16.mxu1 %v10563_v17  ;;  %v10642_v20 = vcombine.low %v4783_v8, %v4791_v13  ;;  %v10643_v21 = vcombine.high %v4783_v8, %v4791_v13 }
 0x660   :  { %6127 = vmatpush1.bf16.msra.mxu0 %v10560_v22 }
 0x661   :  { %6168 = vmatpush1.bf16.msra.mxu1 %v10562_v23  ;;  %6128 = vmatprep.subr.bf16.mxu0 %v10577_v24 }
 0x662   :  { %6169 = vmatprep.subr.bf16.mxu1 %v10579_v30 }
 0x664   :  { %6129 = vmatpush1.bf16.msra.mxu0 %v10576_v45 }
 0x665   :  { %6170 = vmatpush1.bf16.msra.mxu1 %v10578_v48  ;;  %6130 = vmatprep.subr.bf16.mxu0 %v10593_v1  ;;  %v4807_v48 = vld [vmem:[%s15525_s7 + $0x1748] sm:$0xff] }
 0x666   :  { %6171 = vmatprep.subr.bf16.mxu1 %v10595_v5 }
 0x668   :  { %6131 = vmatpush1.bf16.msra.mxu0 %v10592_v52  ;;  %v4823_v52 = vld [vmem:[%s15525_s7 + $0x17c8] sm:$0xff] }
 0x669   :  { %6172 = vmatpush1.bf16.msra.mxu1 %v10594_v53  ;;  %6132 = vmatprep.subr.bf16.mxu0 %v10609_v54  ;;  %v10672_v53 = vcombine.low %v4814_v10, %v4822_v49  ;;  %v10674_v54 = vcombine.low %v4815_v50, %v4823_v52  ;;  %v4608_v10 = vld [vmem:[%s15525_s7 + $0x1110] sm:$0xff] }
 0x66a   :  { %6173 = vmatprep.subr.bf16.mxu1 %v10611_v26  ;;  %v10675_v26 = vcombine.high %v4815_v50, %v4823_v52  ;;  %v4609_v52 = vld [vmem:[%s15525_s7 + $0x1118] sm:$0xff] }
 0x66c   :  { %6133 = vmatpush1.bf16.msra.mxu0 %v10608_v58  ;;  %v10437_v58 = vcombine.high %v4576_v55, %v4584_v56 }
 0x66d   :  { %6174 = vmatpush1.bf16.msra.mxu1 %v10610_v59  ;;  %6134 = vmatprep.subr.bf16.mxu0 %v10625_v60  ;;  %v4585_v59 = vld [vmem:[%s15525_s7 + $0x1058] sm:$0xff] }
 0x66e   :  { %6175 = vmatprep.subr.bf16.mxu1 %v10627_v61  ;;  %v10438_v60 = vcombine.low %v4577_v2, %v4585_v59  ;;  %v10439_v61 = vcombine.high %v4577_v2, %v4585_v59  ;;  %v4624_v2 = vld [vmem:[%s15525_s7 + $0x1190] sm:$0xff]  ;;  %v4633_v59 = vld [vmem:[%s15525_s7 + $0x11d8] sm:$0xff] }
 0x670   :  { %6135 = vmatpush1.bf16.msra.mxu0 %v10624_v62 }
 0x671   :  { %6176 = vmatpush1.bf16.msra.mxu1 %v10626_v63  ;;  %6136 = vmatprep.subr.bf16.mxu0 %v10641_v12 }
 0x672   :  { %6177 = vmatprep.subr.bf16.mxu1 %v10643_v21 }
 0x674   :  { %6137 = vmatpush1.bf16.msra.mxu0 %v10640_v19 }
 0x675   :  { %6178 = vmatpush1.bf16.msra.mxu1 %v10642_v20 }
 0x67a   :  { %v4315_v9 = vpop.f32.mrb[40].mxu1 }
 0x67b   :  { %v13555_v15 = vadd.f32 %v4315_v9, %v12840_v39  ;;  %v4356_v17 = vpop.f32.mrb[44].mxu0  ;;  %v4317_v14 = vpop.f32.mrb[41].mxu1 }
 0x67c   :  { %v13558_v22 = vadd.f32 %v4356_v17, %v12842_v42  ;;  %v13561_v23 = vadd.f32 %v4317_v14, %v12850_v46  ;;  %v4358_v24 = vpop.f32.mrb[45].mxu0  ;;  %v4319_v30 = vpop.f32.mrb[42].mxu1  ;;  %v4806_v42 = vld [vmem:[%s15525_s7 + $0x1740] sm:$0xff]  ;;  %v4799_v46 = vld [vmem:[%s15525_s7 + $0x1708] sm:$0xff] }
 0x67d   :  { %v13564_v3 = vadd.f32 %v4358_v24, %v12852_v47  ;;  %v4360_v35 = vpop.f32.mrb[46].mxu0  ;;  %v4320_v39 = vpop.f32.mrb[43].mxu1  ;;  %v10656_v47 = vcombine.low %v4798_v36, %v4806_v42  ;;  %v10657_v45 = vcombine.high %v4798_v36, %v4806_v42  ;;  %v10658_v1 = vcombine.low %v4799_v46, %v4807_v48 }
 0x67e   :  { %v4361_v44 = vpop.f32.mrb[47].mxu0  ;;  %v10659_v5 = vcombine.high %v4799_v46, %v4807_v48 }
 0x67f   :  { %6138 = vmatprep.subr.bf16.mxu0 %v10657_v45 }
 0x680   :  { %6179 = vmatprep.subr.bf16.mxu1 %v10659_v5  ;;  %6139 = vmatpush1.bf16.msra.mxu0 %v10656_v47 }
 0x681   :  { %6180 = vmatpush1.bf16.msra.mxu1 %v10658_v1  ;;  %6140 = vmatprep.subr.bf16.mxu0 %v10673_v11  ;;  %v4616_v11 = vld [vmem:[%s15525_s7 + $0x1150] sm:$0xff] }
 0x682   :  { %6181 = vmatprep.subr.bf16.mxu1 %v10675_v26  ;;  %v10469_v55 = vcombine.high %v4608_v10, %v4616_v11 }
 0x684   :  { %6141 = vmatpush1.bf16.msra.mxu0 %v10672_v53  ;;  %v4617_v53 = vld [vmem:[%s15525_s7 + $0x1158] sm:$0xff] }
 0x685   :  { %6182 = vmatpush1.bf16.msra.mxu1 %v10674_v54  ;;  %6192 = vmatprep.subr.bf16.mxu0 %v10437_v58  ;;  %v10471_v56 = vcombine.high %v4609_v52, %v4617_v53  ;;  %v4632_v58 = vld [vmem:[%s15525_s7 + $0x11d0] sm:$0xff] }
 0x686   :  { %6233 = vmatprep.subr.bf16.mxu1 %v10439_v61  ;;  %v10470_v61 = vcombine.low %v4609_v52, %v4617_v53  ;;  %v4689_v52 = vld [vmem:[%s15525_s7 + $0x1398] sm:$0xff] }
 0x687   :  { %v4697_v53 = vld [vmem:[%s15525_s7 + $0x13d8] sm:$0xff] }
 0x6ba   :  { %v4397_v62 = vpop.f32.mrb[44].mxu1 }
 0x6bb   :  { %v13603_v63 = vadd.f32 %v4397_v62, %v13044_v4  ;;  %v4438_v0 = vpop.f32.mrb[48].mxu0  ;;  %v4399_v6 = vpop.f32.mrb[45].mxu1  ;;  %v10485_v62 = vcombine.high %v4624_v2, %v4632_v58 }
 0x6bc   :  { %v13606_v8 = vadd.f32 %v4438_v0, %v13052_v7  ;;  %v13609_v9 = vadd.f32 %v4399_v6, %v13054_v32  ;;  %v4440_v12 = vpop.f32.mrb[49].mxu0  ;;  %v4401_v13 = vpop.f32.mrb[46].mxu1  ;;  %v4640_v6 = vld [vmem:[%s15525_s7 + $0x1210] sm:$0xff] }
 0x6bd   :  { %v13612_v17 = vadd.f32 %v4440_v12, %v13062_v34  ;;  %v4442_v14 = vpop.f32.mrb[50].mxu0  ;;  %v4402_v19 = vpop.f32.mrb[47].mxu1  ;;  %v4648_v12 = vld [vmem:[%s15525_s7 + $0x1250] sm:$0xff]  ;;  %v4641_v13 = vld [vmem:[%s15525_s7 + $0x1218] sm:$0xff] }
 0x6be   :  { %v4443_v20 = vpop.f32.mrb[51].mxu0  ;;  %v4649_v14 = vld [vmem:[%s15525_s7 + $0x1258] sm:$0xff]  ;;  %v10484_v19 = vcombine.low %v4624_v2, %v4632_v58  ;;  %v4704_v2 = vld [vmem:[%s15525_s7 + $0x1410] sm:$0xff] }
 0x6bf   :  { %v4712_v58 = vld [vmem:[%s15525_s7 + $0x1450] sm:$0xff] }
 0x6fa   :  { %v4479_v21 = vpop.f32.mrb[48].mxu1 }
 0x6fb   :  { %v13615_v4 = vadd.f32 %v4479_v21, %v13248_v29  ;;  %v4520_v24 = vpop.f32.mrb[52].mxu0  ;;  %v4481_v30 = vpop.f32.mrb[49].mxu1  ;;  %v4592_v29 = vld [vmem:[%s15525_s7 + $0x1090] sm:$0xff]  ;;  %v10501_v21 = vcombine.high %v4640_v6, %v4648_v12 }
 0x6fc   :  { %v13618_v7 = vadd.f32 %v4520_v24, %v13256_v33  ;;  %v13621_v32 = vadd.f32 %v4481_v30, %v13258_v16  ;;  %v4522_v35 = vpop.f32.mrb[53].mxu0  ;;  %v4483_v39 = vpop.f32.mrb[50].mxu1  ;;  %v4600_v33 = vld [vmem:[%s15525_s7 + $0x10d0] sm:$0xff]  ;;  %v4593_v16 = vld [vmem:[%s15525_s7 + $0x1098] sm:$0xff]  ;;  %v10503_v24 = vcombine.high %v4641_v13, %v4649_v14 }
 0x6fd   :  { %v13624_v34 = vadd.f32 %v4522_v35, %v13266_v38  ;;  %v4524_v36 = vpop.f32.mrb[54].mxu0  ;;  %v4484_v42 = vpop.f32.mrb[51].mxu1  ;;  %v4601_v38 = vld [vmem:[%s15525_s7 + $0x10d8] sm:$0xff]  ;;  %v10453_v49 = vcombine.high %v4592_v29, %v4600_v33  ;;  %v10452_v54 = vcombine.low %v4592_v29, %v4600_v33  ;;  %v4656_v30 = vld [vmem:[%s15525_s7 + $0x1290] sm:$0xff] }
 0x6fe   :  { %v4525_v46 = vpop.f32.mrb[55].mxu0  ;;  %v10455_v50 = vcombine.high %v4593_v16, %v4601_v38  ;;  %v10454_v26 = vcombine.low %v4593_v16, %v4601_v38  ;;  %v4664_v35 = vld [vmem:[%s15525_s7 + $0x12d0] sm:$0xff]  ;;  %v4657_v39 = vld [vmem:[%s15525_s7 + $0x1298] sm:$0xff]  ;;  %v10500_v42 = vcombine.low %v4640_v6, %v4648_v12 }
 0x6ff   :  { %v4665_v36 = vld [vmem:[%s15525_s7 + $0x12d8] sm:$0xff]  ;;  %v10502_v46 = vcombine.low %v4641_v13, %v4649_v14  ;;  %v4680_v33 = vld [vmem:[%s15525_s7 + $0x1350] sm:$0xff] }
 0x700   :  { %v10519_v29 = vcombine.high %v4657_v39, %v4665_v36  ;;  %v4673_v16 = vld [vmem:[%s15525_s7 + $0x1318] sm:$0xff]  ;;  %v4720_v6 = vld [vmem:[%s15525_s7 + $0x1490] sm:$0xff] }
 0x701   :  { %v4681_v38 = vld [vmem:[%s15525_s7 + $0x1358] sm:$0xff]  ;;  %v4728_v12 = vld [vmem:[%s15525_s7 + $0x14d0] sm:$0xff] }
 0x702   :  { %v4565_v44 = vpop.f32.mrb[52].mxu1  ;;  %v4721_v13 = vld [vmem:[%s15525_s7 + $0x1498] sm:$0xff] }
 0x703   :  { %v4567_v47 = vpop.f32.mrb[53].mxu1  ;;  %v13640_v1 = vpack.c.bf16 %v4565_v44, %v4565_v44  ;;  %v10517_v44 = vcombine.high %v4656_v30, %v4664_v35  ;;  %v4729_v14 = vld [vmem:[%s15525_s7 + $0x14d8] sm:$0xff] }
 0x704   :  { %v13638_v45 = vpack.c.bf16 %v4567_v47, %v4567_v47  ;;  %v4569_v48 = vpop.f32.mrb[54].mxu1  ;;  %v4672_v47 = vld [vmem:[%s15525_s7 + $0x1310] sm:$0xff] }
 0x705   :  { %v4570_v5 = vpop.f32.mrb[55].mxu1  ;;  %v10516_v48 = vcombine.low %v4656_v30, %v4664_v35  ;;  %v4736_v30 = vld [vmem:[%s15525_s7 + $0x1510] sm:$0xff] }
 0x706   :  { %6142 = vmatprep.mubr.bf16.mxu0 %v13638_v45  ;;  %6183 = vmatprep.mubr.bf16.mxu1 %v13638_v45  ;;  %v10518_v5 = vcombine.low %v4657_v39, %v4665_v36  ;;  %v4744_v35 = vld [vmem:[%s15525_s7 + $0x1550] sm:$0xff]  ;;  %v4737_v39 = vld [vmem:[%s15525_s7 + $0x1518] sm:$0xff] }
 0x707   :  { %6143 = vmatmul.mubr.bf16.vlgmr.msra.gmra.mrb[56].mxu0 %v13640_v1  ;;  %6184 = vmatmul.mubr.bf16.vlgmr.msra.gmra.mrb[56].mxu1 %v13640_v1  ;;  %v4745_v36 = vld [vmem:[%s15525_s7 + $0x1558] sm:$0xff] }
 0x708   :  { %6193 = vmatpush1.bf16.msra.mxu0 %v10436_v57  ;;  %6234 = vmatpush1.bf16.msra.mxu1 %v10438_v60  ;;  %v4625_v57 = vld [vmem:[%s15525_s7 + $0x1198] sm:$0xff]  ;;  %v10468_v60 = vcombine.low %v4608_v10, %v4616_v11  ;;  %v10533_v10 = vcombine.high %v4672_v47, %v4680_v33  ;;  %v4696_v11 = vld [vmem:[%s15525_s7 + $0x13d0] sm:$0xff] }
 0x709   :  { %6224 = vmatprep.mubr.bf16.mxu0 %v13638_v45  ;;  %6265 = vmatprep.mubr.bf16.mxu1 %v13638_v45  ;;  %v10487_v0 = vcombine.high %v4625_v57, %v4633_v59  ;;  %v10486_v20 = vcombine.low %v4625_v57, %v4633_v59  ;;  %v4705_v57 = vld [vmem:[%s15525_s7 + $0x1418] sm:$0xff] }
 0x70a   :  { %6194 = vmatprep.subr.bf16.mxu0 %v10453_v49  ;;  %6235 = vmatprep.subr.bf16.mxu1 %v10455_v50  ;;  %v10535_v49 = vcombine.high %v4673_v16, %v4681_v38  ;;  %v4688_v50 = vld [vmem:[%s15525_s7 + $0x1390] sm:$0xff]  ;;  %v4713_v59 = vld [vmem:[%s15525_s7 + $0x1458] sm:$0xff] }
 0x70c   :  { %6195 = vmatpush1.bf16.msra.mxu0 %v10452_v54  ;;  %6236 = vmatpush1.bf16.msra.mxu1 %v10454_v26  ;;  %v10532_v54 = vcombine.low %v4672_v47, %v4680_v33  ;;  %v10534_v26 = vcombine.low %v4673_v16, %v4681_v38  ;;  %v4752_v47 = vld [vmem:[%s15525_s7 + $0x1590] sm:$0xff]  ;;  %v4753_v16 = vld [vmem:[%s15525_s7 + $0x1598] sm:$0xff] }
 0x70d   :  { %6196 = vmatprep.subr.bf16.mxu0 %v10469_v55  ;;  %6237 = vmatprep.subr.bf16.mxu1 %v10471_v56  ;;  %v10549_v55 = vcombine.high %v4688_v50, %v4696_v11  ;;  %v10551_v56 = vcombine.high %v4689_v52, %v4697_v53  ;;  %v4760_v33 = vld [vmem:[%s15525_s7 + $0x15d0] sm:$0xff]  ;;  %v4761_v38 = vld [vmem:[%s15525_s7 + $0x15d8] sm:$0xff] }
 0x710   :  { %6197 = vmatpush1.bf16.msra.mxu0 %v10468_v60  ;;  %6238 = vmatpush1.bf16.msra.mxu1 %v10470_v61  ;;  %v10548_v60 = vcombine.low %v4688_v50, %v4696_v11  ;;  %v10550_v61 = vcombine.low %v4689_v52, %v4697_v53  ;;  %v4768_v50 = vld [vmem:[%s15525_s7 + $0x1610] sm:$0xff]  ;;  %v4769_v52 = vld [vmem:[%s15525_s7 + $0x1618] sm:$0xff] }
 0x711   :  { %6198 = vmatprep.subr.bf16.mxu0 %v10485_v62  ;;  %6239 = vmatprep.subr.bf16.mxu1 %v10487_v0  ;;  %v10565_v62 = vcombine.high %v4704_v2, %v4712_v58  ;;  %v10567_v0 = vcombine.high %v4705_v57, %v4713_v59  ;;  %v4776_v11 = vld [vmem:[%s15525_s7 + $0x1650] sm:$0xff]  ;;  %v4777_v53 = vld [vmem:[%s15525_s7 + $0x1658] sm:$0xff] }
 0x714   :  { %6199 = vmatpush1.bf16.msra.mxu0 %v10484_v19  ;;  %6240 = vmatpush1.bf16.msra.mxu1 %v10486_v20  ;;  %v10564_v19 = vcombine.low %v4704_v2, %v4712_v58  ;;  %v10566_v20 = vcombine.low %v4705_v57, %v4713_v59  ;;  %v4784_v2 = vld [vmem:[%s15525_s7 + $0x1690] sm:$0xff]  ;;  %v4785_v57 = vld [vmem:[%s15525_s7 + $0x1698] sm:$0xff] }
 0x715   :  { %6200 = vmatprep.subr.bf16.mxu0 %v10501_v21  ;;  %6241 = vmatprep.subr.bf16.mxu1 %v10503_v24  ;;  %v10581_v21 = vcombine.high %v4720_v6, %v4728_v12  ;;  %v10583_v24 = vcombine.high %v4721_v13, %v4729_v14  ;;  %v4792_v58 = vld [vmem:[%s15525_s7 + $0x16d0] sm:$0xff]  ;;  %v4793_v59 = vld [vmem:[%s15525_s7 + $0x16d8] sm:$0xff] }
 0x718   :  { %6201 = vmatpush1.bf16.msra.mxu0 %v10500_v42  ;;  %6242 = vmatpush1.bf16.msra.mxu1 %v10502_v46  ;;  %v10580_v42 = vcombine.low %v4720_v6, %v4728_v12  ;;  %v10582_v46 = vcombine.low %v4721_v13, %v4729_v14  ;;  %v4800_v6 = vld [vmem:[%s15525_s7 + $0x1710] sm:$0xff]  ;;  %v4801_v13 = vld [vmem:[%s15525_s7 + $0x1718] sm:$0xff] }
 0x719   :  { %6202 = vmatprep.subr.bf16.mxu0 %v10517_v44  ;;  %6243 = vmatprep.subr.bf16.mxu1 %v10519_v29  ;;  %v10597_v44 = vcombine.high %v4736_v30, %v4744_v35  ;;  %v10599_v29 = vcombine.high %v4737_v39, %v4745_v36  ;;  %v4808_v12 = vld [vmem:[%s15525_s7 + $0x1750] sm:$0xff]  ;;  %v4809_v14 = vld [vmem:[%s15525_s7 + $0x1758] sm:$0xff] }
 0x71c   :  { %6203 = vmatpush1.bf16.msra.mxu0 %v10516_v48  ;;  %6244 = vmatpush1.bf16.msra.mxu1 %v10518_v5  ;;  %v10596_v48 = vcombine.low %v4736_v30, %v4744_v35  ;;  %v10598_v5 = vcombine.low %v4737_v39, %v4745_v36  ;;  %v4816_v30 = vld [vmem:[%s15525_s7 + $0x1790] sm:$0xff]  ;;  %v4817_v39 = vld [vmem:[%s15525_s7 + $0x1798] sm:$0xff] }
 0x71d   :  { %6204 = vmatprep.subr.bf16.mxu0 %v10533_v10  ;;  %6245 = vmatprep.subr.bf16.mxu1 %v10535_v49  ;;  %v10613_v10 = vcombine.high %v4752_v47, %v4760_v33  ;;  %v10615_v49 = vcombine.high %v4753_v16, %v4761_v38  ;;  %v4824_v35 = vld [vmem:[%s15525_s7 + $0x17d0] sm:$0xff]  ;;  %v4825_v36 = vld [vmem:[%s15525_s7 + $0x17d8] sm:$0xff] }
 0x720   :  { %6205 = vmatpush1.bf16.msra.mxu0 %v10532_v54  ;;  %6246 = vmatpush1.bf16.msra.mxu1 %v10534_v26  ;;  %v10612_v54 = vcombine.low %v4752_v47, %v4760_v33  ;;  %v10614_v26 = vcombine.low %v4753_v16, %v4761_v38  ;;  %v4578_v47 = vld [vmem:[%s15525_s7 + $0x1020] sm:$0xff]  ;;  %v4579_v16 = vld [vmem:[%s15525_s7 + $0x1028] sm:$0xff] }
 0x721   :  { %6206 = vmatprep.subr.bf16.mxu0 %v10549_v55  ;;  %6247 = vmatprep.subr.bf16.mxu1 %v10551_v56  ;;  %v10629_v55 = vcombine.high %v4768_v50, %v4776_v11  ;;  %v10631_v56 = vcombine.high %v4769_v52, %v4777_v53  ;;  %v4586_v33 = vld [vmem:[%s15525_s7 + $0x1060] sm:$0xff]  ;;  %v4587_v38 = vld [vmem:[%s15525_s7 + $0x1068] sm:$0xff] }
 0x724   :  { %6207 = vmatpush1.bf16.msra.mxu0 %v10548_v60  ;;  %6248 = vmatpush1.bf16.msra.mxu1 %v10550_v61  ;;  %v10628_v60 = vcombine.low %v4768_v50, %v4776_v11  ;;  %v10630_v61 = vcombine.low %v4769_v52, %v4777_v53  ;;  %v4594_v50 = vld [vmem:[%s15525_s7 + $0x10a0] sm:$0xff]  ;;  %v4595_v52 = vld [vmem:[%s15525_s7 + $0x10a8] sm:$0xff] }
 0x725   :  { %6208 = vmatprep.subr.bf16.mxu0 %v10565_v62  ;;  %6249 = vmatprep.subr.bf16.mxu1 %v10567_v0  ;;  %v10645_v62 = vcombine.high %v4784_v2, %v4792_v58  ;;  %v10647_v0 = vcombine.high %v4785_v57, %v4793_v59  ;;  %v4602_v11 = vld [vmem:[%s15525_s7 + $0x10e0] sm:$0xff]  ;;  %v4603_v53 = vld [vmem:[%s15525_s7 + $0x10e8] sm:$0xff] }
 0x728   :  { %6209 = vmatpush1.bf16.msra.mxu0 %v10564_v19  ;;  %6250 = vmatpush1.bf16.msra.mxu1 %v10566_v20  ;;  %v10644_v19 = vcombine.low %v4784_v2, %v4792_v58  ;;  %v10646_v20 = vcombine.low %v4785_v57, %v4793_v59  ;;  %v4610_v2 = vld [vmem:[%s15525_s7 + $0x1120] sm:$0xff]  ;;  %v4611_v57 = vld [vmem:[%s15525_s7 + $0x1128] sm:$0xff] }
 0x729   :  { %6210 = vmatprep.subr.bf16.mxu0 %v10581_v21  ;;  %6251 = vmatprep.subr.bf16.mxu1 %v10583_v24  ;;  %v10661_v21 = vcombine.high %v4800_v6, %v4808_v12  ;;  %v10663_v24 = vcombine.high %v4801_v13, %v4809_v14  ;;  %v4618_v58 = vld [vmem:[%s15525_s7 + $0x1160] sm:$0xff]  ;;  %v4619_v59 = vld [vmem:[%s15525_s7 + $0x1168] sm:$0xff] }
 0x72c   :  { %6211 = vmatpush1.bf16.msra.mxu0 %v10580_v42  ;;  %6252 = vmatpush1.bf16.msra.mxu1 %v10582_v46  ;;  %v10660_v42 = vcombine.low %v4800_v6, %v4808_v12  ;;  %v10662_v46 = vcombine.low %v4801_v13, %v4809_v14  ;;  %v4626_v6 = vld [vmem:[%s15525_s7 + $0x11a0] sm:$0xff]  ;;  %v4627_v13 = vld [vmem:[%s15525_s7 + $0x11a8] sm:$0xff] }
 0x72d   :  { %6212 = vmatprep.subr.bf16.mxu0 %v10597_v44  ;;  %6253 = vmatprep.subr.bf16.mxu1 %v10599_v29  ;;  %v10677_v44 = vcombine.high %v4816_v30, %v4824_v35  ;;  %v10679_v29 = vcombine.high %v4817_v39, %v4825_v36  ;;  %v4634_v12 = vld [vmem:[%s15525_s7 + $0x11e0] sm:$0xff]  ;;  %v4635_v14 = vld [vmem:[%s15525_s7 + $0x11e8] sm:$0xff] }
 0x730   :  { %6213 = vmatpush1.bf16.msra.mxu0 %v10596_v48  ;;  %6254 = vmatpush1.bf16.msra.mxu1 %v10598_v5  ;;  %v10676_v48 = vcombine.low %v4816_v30, %v4824_v35  ;;  %v10678_v5 = vcombine.low %v4817_v39, %v4825_v36  ;;  %v4642_v30 = vld [vmem:[%s15525_s7 + $0x1220] sm:$0xff]  ;;  %v4643_v39 = vld [vmem:[%s15525_s7 + $0x1228] sm:$0xff] }
 0x731   :  { %6214 = vmatprep.subr.bf16.mxu0 %v10613_v10  ;;  %6255 = vmatprep.subr.bf16.mxu1 %v10615_v49  ;;  %v10441_v10 = vcombine.high %v4578_v47, %v4586_v33  ;;  %v10443_v49 = vcombine.high %v4579_v16, %v4587_v38  ;;  %v4650_v35 = vld [vmem:[%s15525_s7 + $0x1260] sm:$0xff]  ;;  %v4651_v36 = vld [vmem:[%s15525_s7 + $0x1268] sm:$0xff] }
 0x734   :  { %6215 = vmatpush1.bf16.msra.mxu0 %v10612_v54  ;;  %6256 = vmatpush1.bf16.msra.mxu1 %v10614_v26  ;;  %v10440_v54 = vcombine.low %v4578_v47, %v4586_v33  ;;  %v10442_v26 = vcombine.low %v4579_v16, %v4587_v38  ;;  %v4658_v47 = vld [vmem:[%s15525_s7 + $0x12a0] sm:$0xff]  ;;  %v4659_v16 = vld [vmem:[%s15525_s7 + $0x12a8] sm:$0xff] }
 0x735   :  { %6216 = vmatprep.subr.bf16.mxu0 %v10629_v55  ;;  %6257 = vmatprep.subr.bf16.mxu1 %v10631_v56  ;;  %v10457_v55 = vcombine.high %v4594_v50, %v4602_v11  ;;  %v10459_v56 = vcombine.high %v4595_v52, %v4603_v53  ;;  %v4666_v33 = vld [vmem:[%s15525_s7 + $0x12e0] sm:$0xff]  ;;  %v4667_v38 = vld [vmem:[%s15525_s7 + $0x12e8] sm:$0xff] }
 0x738   :  { %6217 = vmatpush1.bf16.msra.mxu0 %v10628_v60  ;;  %6258 = vmatpush1.bf16.msra.mxu1 %v10630_v61  ;;  %v10456_v60 = vcombine.low %v4594_v50, %v4602_v11  ;;  %v10458_v61 = vcombine.low %v4595_v52, %v4603_v53  ;;  %v4674_v50 = vld [vmem:[%s15525_s7 + $0x1320] sm:$0xff]  ;;  %v4675_v52 = vld [vmem:[%s15525_s7 + $0x1328] sm:$0xff] }
 0x739   :  { %6218 = vmatprep.subr.bf16.mxu0 %v10645_v62  ;;  %6259 = vmatprep.subr.bf16.mxu1 %v10647_v0  ;;  %v10473_v62 = vcombine.high %v4610_v2, %v4618_v58  ;;  %v10475_v0 = vcombine.high %v4611_v57, %v4619_v59  ;;  %v4682_v11 = vld [vmem:[%s15525_s7 + $0x1360] sm:$0xff]  ;;  %v4683_v53 = vld [vmem:[%s15525_s7 + $0x1368] sm:$0xff] }
 0x73c   :  { %6219 = vmatpush1.bf16.msra.mxu0 %v10644_v19  ;;  %6260 = vmatpush1.bf16.msra.mxu1 %v10646_v20  ;;  %v10472_v19 = vcombine.low %v4610_v2, %v4618_v58  ;;  %v10474_v20 = vcombine.low %v4611_v57, %v4619_v59  ;;  %v4690_v2 = vld [vmem:[%s15525_s7 + $0x13a0] sm:$0xff]  ;;  %v4691_v57 = vld [vmem:[%s15525_s7 + $0x13a8] sm:$0xff] }
 0x73d   :  { %6220 = vmatprep.subr.bf16.mxu0 %v10661_v21  ;;  %6261 = vmatprep.subr.bf16.mxu1 %v10663_v24  ;;  %v10489_v21 = vcombine.high %v4626_v6, %v4634_v12  ;;  %v10491_v24 = vcombine.high %v4627_v13, %v4635_v14  ;;  %v4698_v58 = vld [vmem:[%s15525_s7 + $0x13e0] sm:$0xff]  ;;  %v4699_v59 = vld [vmem:[%s15525_s7 + $0x13e8] sm:$0xff] }
 0x740   :  { %6221 = vmatpush1.bf16.msra.mxu0 %v10660_v42  ;;  %6262 = vmatpush1.bf16.msra.mxu1 %v10662_v46  ;;  %v10488_v42 = vcombine.low %v4626_v6, %v4634_v12  ;;  %v10490_v46 = vcombine.low %v4627_v13, %v4635_v14  ;;  %v4706_v6 = vld [vmem:[%s15525_s7 + $0x1420] sm:$0xff]  ;;  %v4707_v13 = vld [vmem:[%s15525_s7 + $0x1428] sm:$0xff] }
 0x741   :  { %6222 = vmatprep.subr.bf16.mxu0 %v10677_v44  ;;  %6263 = vmatprep.subr.bf16.mxu1 %v10679_v29  ;;  %v10505_v44 = vcombine.high %v4642_v30, %v4650_v35  ;;  %v10507_v29 = vcombine.high %v4643_v39, %v4651_v36  ;;  %v4714_v12 = vld [vmem:[%s15525_s7 + $0x1460] sm:$0xff]  ;;  %v4715_v14 = vld [vmem:[%s15525_s7 + $0x1468] sm:$0xff] }
 0x744   :  { %6223 = vmatpush1.bf16.msra.mxu0 %v10676_v48  ;;  %6264 = vmatpush1.bf16.msra.mxu1 %v10678_v5  ;;  %v10504_v48 = vcombine.low %v4642_v30, %v4650_v35  ;;  %v10506_v5 = vcombine.low %v4643_v39, %v4651_v36  ;;  %v4722_v30 = vld [vmem:[%s15525_s7 + $0x14a0] sm:$0xff]  ;;  %v4723_v39 = vld [vmem:[%s15525_s7 + $0x14a8] sm:$0xff] }
 0x745   :  { %6274 = vmatprep.subr.bf16.mxu0 %v10441_v10  ;;  %6315 = vmatprep.subr.bf16.mxu1 %v10443_v49  ;;  %v10521_v10 = vcombine.high %v4658_v47, %v4666_v33  ;;  %v10523_v49 = vcombine.high %v4659_v16, %v4667_v38  ;;  %v4730_v35 = vld [vmem:[%s15525_s7 + $0x14e0] sm:$0xff]  ;;  %v4731_v36 = vld [vmem:[%s15525_s7 + $0x14e8] sm:$0xff] }
 0x747   :  { %6225 = vmatmul.mubr.bf16.vlgmr.msra.gmra.mrb[60].mxu0 %v13640_v1  ;;  %6266 = vmatmul.mubr.bf16.vlgmr.msra.gmra.mrb[60].mxu1 %v13640_v1 }
 0x748   :  { %6275 = vmatpush1.bf16.msra.mxu0 %v10440_v54  ;;  %6306 = vmatprep.mubr.bf16.mxu0 %v13638_v45  ;;  %v10520_v54 = vcombine.low %v4658_v47, %v4666_v33  ;;  %v4738_v47 = vld [vmem:[%s15525_s7 + $0x1520] sm:$0xff] }
 0x749   :  { %6316 = vmatpush1.bf16.msra.mxu1 %v10442_v26  ;;  %6347 = vmatprep.mubr.bf16.mxu1 %v13638_v45  ;;  %v10522_v26 = vcombine.low %v4659_v16, %v4667_v38  ;;  %v4746_v33 = vld [vmem:[%s15525_s7 + $0x1560] sm:$0xff]  ;;  %v4739_v16 = vld [vmem:[%s15525_s7 + $0x1528] sm:$0xff] }
 0x74a   :  { %6276 = vmatprep.subr.bf16.mxu0 %v10457_v55  ;;  %6317 = vmatprep.subr.bf16.mxu1 %v10459_v56  ;;  %v10537_v55 = vcombine.high %v4674_v50, %v4682_v11  ;;  %v10539_v56 = vcombine.high %v4675_v52, %v4683_v53  ;;  %v4747_v38 = vld [vmem:[%s15525_s7 + $0x1568] sm:$0xff] }
 0x74c   :  { %6277 = vmatpush1.bf16.msra.mxu0 %v10456_v60  ;;  %v10536_v60 = vcombine.low %v4674_v50, %v4682_v11  ;;  %v4754_v50 = vld [vmem:[%s15525_s7 + $0x15a0] sm:$0xff] }
 0x74d   :  { %6318 = vmatpush1.bf16.msra.mxu1 %v10458_v61  ;;  %6278 = vmatprep.subr.bf16.mxu0 %v10473_v62  ;;  %v10538_v61 = vcombine.low %v4675_v52, %v4683_v53  ;;  %v10553_v62 = vcombine.high %v4690_v2, %v4698_v58  ;;  %v4762_v11 = vld [vmem:[%s15525_s7 + $0x15e0] sm:$0xff]  ;;  %v4755_v52 = vld [vmem:[%s15525_s7 + $0x15a8] sm:$0xff] }
 0x74e   :  { %6319 = vmatprep.subr.bf16.mxu1 %v10475_v0  ;;  %v10555_v0 = vcombine.high %v4691_v57, %v4699_v59  ;;  %v4763_v53 = vld [vmem:[%s15525_s7 + $0x15e8] sm:$0xff] }
 0x750   :  { %6279 = vmatpush1.bf16.msra.mxu0 %v10472_v19  ;;  %v10552_v19 = vcombine.low %v4690_v2, %v4698_v58  ;;  %v4770_v2 = vld [vmem:[%s15525_s7 + $0x1620] sm:$0xff] }
 0x751   :  { %6320 = vmatpush1.bf16.msra.mxu1 %v10474_v20  ;;  %6280 = vmatprep.subr.bf16.mxu0 %v10489_v21  ;;  %v10554_v20 = vcombine.low %v4691_v57, %v4699_v59  ;;  %v10569_v21 = vcombine.high %v4706_v6, %v4714_v12  ;;  %v4778_v58 = vld [vmem:[%s15525_s7 + $0x1660] sm:$0xff]  ;;  %v4771_v57 = vld [vmem:[%s15525_s7 + $0x1628] sm:$0xff] }
 0x752   :  { %6321 = vmatprep.subr.bf16.mxu1 %v10491_v24  ;;  %v10571_v24 = vcombine.high %v4707_v13, %v4715_v14  ;;  %v4779_v59 = vld [vmem:[%s15525_s7 + $0x1668] sm:$0xff] }
 0x754   :  { %6281 = vmatpush1.bf16.msra.mxu0 %v10488_v42  ;;  %v10568_v42 = vcombine.low %v4706_v6, %v4714_v12  ;;  %v4786_v6 = vld [vmem:[%s15525_s7 + $0x16a0] sm:$0xff] }
 0x755   :  { %6322 = vmatpush1.bf16.msra.mxu1 %v10490_v46  ;;  %6282 = vmatprep.subr.bf16.mxu0 %v10505_v44  ;;  %v10570_v46 = vcombine.low %v4707_v13, %v4715_v14  ;;  %v10585_v44 = vcombine.high %v4722_v30, %v4730_v35  ;;  %v4794_v12 = vld [vmem:[%s15525_s7 + $0x16e0] sm:$0xff]  ;;  %v4787_v13 = vld [vmem:[%s15525_s7 + $0x16a8] sm:$0xff] }
 0x756   :  { %6323 = vmatprep.subr.bf16.mxu1 %v10507_v29  ;;  %v10587_v29 = vcombine.high %v4723_v39, %v4731_v36  ;;  %v4795_v14 = vld [vmem:[%s15525_s7 + $0x16e8] sm:$0xff] }
 0x758   :  { %6283 = vmatpush1.bf16.msra.mxu0 %v10504_v48  ;;  %v10584_v48 = vcombine.low %v4722_v30, %v4730_v35  ;;  %v4802_v30 = vld [vmem:[%s15525_s7 + $0x1720] sm:$0xff] }
 0x759   :  { %6324 = vmatpush1.bf16.msra.mxu1 %v10506_v5  ;;  %6284 = vmatprep.subr.bf16.mxu0 %v10521_v10  ;;  %v10586_v5 = vcombine.low %v4723_v39, %v4731_v36  ;;  %v10601_v10 = vcombine.high %v4738_v47, %v4746_v33  ;;  %v4810_v35 = vld [vmem:[%s15525_s7 + $0x1760] sm:$0xff]  ;;  %v4803_v39 = vld [vmem:[%s15525_s7 + $0x1728] sm:$0xff] }
 0x75a   :  { %6325 = vmatprep.subr.bf16.mxu1 %v10523_v49  ;;  %v10603_v49 = vcombine.high %v4739_v16, %v4747_v38  ;;  %v4811_v36 = vld [vmem:[%s15525_s7 + $0x1768] sm:$0xff] }
 0x75c   :  { %6285 = vmatpush1.bf16.msra.mxu0 %v10520_v54  ;;  %v10600_v54 = vcombine.low %v4738_v47, %v4746_v33  ;;  %v4818_v47 = vld [vmem:[%s15525_s7 + $0x17a0] sm:$0xff] }
 0x75d   :  { %6326 = vmatpush1.bf16.msra.mxu1 %v10522_v26  ;;  %6286 = vmatprep.subr.bf16.mxu0 %v10537_v55  ;;  %v10602_v26 = vcombine.low %v4739_v16, %v4747_v38  ;;  %v10617_v55 = vcombine.high %v4754_v50, %v4762_v11  ;;  %v4826_v33 = vld [vmem:[%s15525_s7 + $0x17e0] sm:$0xff]  ;;  %v4819_v16 = vld [vmem:[%s15525_s7 + $0x17a8] sm:$0xff] }
 0x75e   :  { %6327 = vmatprep.subr.bf16.mxu1 %v10539_v56  ;;  %v10619_v56 = vcombine.high %v4755_v52, %v4763_v53  ;;  %v4827_v38 = vld [vmem:[%s15525_s7 + $0x17e8] sm:$0xff] }
 0x760   :  { %6287 = vmatpush1.bf16.msra.mxu0 %v10536_v60  ;;  %v10616_v60 = vcombine.low %v4754_v50, %v4762_v11  ;;  %v4580_v50 = vld [vmem:[%s15525_s7 + $0x1030] sm:$0xff] }
 0x761   :  { %6328 = vmatpush1.bf16.msra.mxu1 %v10538_v61  ;;  %6288 = vmatprep.subr.bf16.mxu0 %v10553_v62  ;;  %v10618_v61 = vcombine.low %v4755_v52, %v4763_v53  ;;  %v10633_v62 = vcombine.high %v4770_v2, %v4778_v58  ;;  %v4588_v11 = vld [vmem:[%s15525_s7 + $0x1070] sm:$0xff]  ;;  %v4581_v52 = vld [vmem:[%s15525_s7 + $0x1038] sm:$0xff] }
 0x762   :  { %6329 = vmatprep.subr.bf16.mxu1 %v10555_v0  ;;  %v10635_v0 = vcombine.high %v4771_v57, %v4779_v59  ;;  %v4589_v53 = vld [vmem:[%s15525_s7 + $0x1078] sm:$0xff] }
 0x764   :  { %6289 = vmatpush1.bf16.msra.mxu0 %v10552_v19  ;;  %v10632_v19 = vcombine.low %v4770_v2, %v4778_v58  ;;  %v4596_v2 = vld [vmem:[%s15525_s7 + $0x10b0] sm:$0xff] }
 0x765   :  { %6330 = vmatpush1.bf16.msra.mxu1 %v10554_v20  ;;  %6290 = vmatprep.subr.bf16.mxu0 %v10569_v21  ;;  %v10634_v20 = vcombine.low %v4771_v57, %v4779_v59  ;;  %v10649_v21 = vcombine.high %v4786_v6, %v4794_v12  ;;  %v4604_v58 = vld [vmem:[%s15525_s7 + $0x10f0] sm:$0xff]  ;;  %v10444_v57 = vcombine.low %v4580_v50, %v4588_v11  ;;  %v4597_v59 = vld [vmem:[%s15525_s7 + $0x10b8] sm:$0xff] }
 0x766   :  { %6331 = vmatprep.subr.bf16.mxu1 %v10571_v24  ;;  %v10651_v24 = vcombine.high %v4787_v13, %v4795_v14 }
 0x768   :  { %6291 = vmatpush1.bf16.msra.mxu0 %v10568_v42  ;;  %v10648_v42 = vcombine.low %v4786_v6, %v4794_v12  ;;  %v4620_v6 = vld [vmem:[%s15525_s7 + $0x1170] sm:$0xff] }
 0x769   :  { %6332 = vmatpush1.bf16.msra.mxu1 %v10570_v46  ;;  %6292 = vmatprep.subr.bf16.mxu0 %v10585_v44  ;;  %v10650_v46 = vcombine.low %v4787_v13, %v4795_v14  ;;  %v10665_v44 = vcombine.high %v4802_v30, %v4810_v35  ;;  %v4613_v13 = vld [vmem:[%s15525_s7 + $0x1138] sm:$0xff] }
 0x76a   :  { %6333 = vmatprep.subr.bf16.mxu1 %v10587_v29  ;;  %v10667_v29 = vcombine.high %v4803_v39, %v4811_v36  ;;  %v4621_v14 = vld [vmem:[%s15525_s7 + $0x1178] sm:$0xff] }
 0x76c   :  { %6293 = vmatpush1.bf16.msra.mxu0 %v10584_v48  ;;  %v10664_v48 = vcombine.low %v4802_v30, %v4810_v35  ;;  %v4628_v30 = vld [vmem:[%s15525_s7 + $0x11b0] sm:$0xff] }
 0x76d   :  { %6334 = vmatpush1.bf16.msra.mxu1 %v10586_v5  ;;  %6294 = vmatprep.subr.bf16.mxu0 %v10601_v10  ;;  %v10666_v5 = vcombine.low %v4803_v39, %v4811_v36  ;;  %v10681_v10 = vcombine.high %v4818_v47, %v4826_v33  ;;  %v4636_v35 = vld [vmem:[%s15525_s7 + $0x11f0] sm:$0xff]  ;;  %v4629_v39 = vld [vmem:[%s15525_s7 + $0x11b8] sm:$0xff] }
 0x76e   :  { %6335 = vmatprep.subr.bf16.mxu1 %v10603_v49  ;;  %v10683_v49 = vcombine.high %v4819_v16, %v4827_v38  ;;  %v4637_v36 = vld [vmem:[%s15525_s7 + $0x11f8] sm:$0xff] }
 0x770   :  { %6295 = vmatpush1.bf16.msra.mxu0 %v10600_v54  ;;  %v10680_v54 = vcombine.low %v4818_v47, %v4826_v33  ;;  %v4652_v47 = vld [vmem:[%s15525_s7 + $0x1270] sm:$0xff]  ;;  %v4645_v33 = vld [vmem:[%s15525_s7 + $0x1238] sm:$0xff] }
 0x771   :  { %6336 = vmatpush1.bf16.msra.mxu1 %v10602_v26  ;;  %6296 = vmatprep.subr.bf16.mxu0 %v10617_v55  ;;  %v10682_v26 = vcombine.low %v4819_v16, %v4827_v38  ;;  %v10445_v55 = vcombine.high %v4580_v50, %v4588_v11  ;;  %v4653_v16 = vld [vmem:[%s15525_s7 + $0x1278] sm:$0xff]  ;;  %v10492_v38 = vcombine.low %v4628_v30, %v4636_v35  ;;  %v4668_v50 = vld [vmem:[%s15525_s7 + $0x12f0] sm:$0xff] }
 0x772   :  { %6337 = vmatprep.subr.bf16.mxu1 %v10619_v56  ;;  %v10447_v56 = vcombine.high %v4581_v52, %v4589_v53  ;;  %v4661_v11 = vld [vmem:[%s15525_s7 + $0x12b8] sm:$0xff] }
 0x774   :  { %6297 = vmatpush1.bf16.msra.mxu0 %v10616_v60  ;;  %v4605_v60 = vld [vmem:[%s15525_s7 + $0x10f8] sm:$0xff] }
 0x775   :  { %6338 = vmatpush1.bf16.msra.mxu1 %v10618_v61  ;;  %6298 = vmatprep.subr.bf16.mxu0 %v10633_v62  ;;  %v10446_v61 = vcombine.low %v4581_v52, %v4589_v53  ;;  %v10461_v62 = vcombine.high %v4596_v2, %v4604_v58  ;;  %v10463_v12 = vcombine.high %v4597_v59, %v4605_v60  ;;  %v4669_v52 = vld [vmem:[%s15525_s7 + $0x12f8] sm:$0xff] }
 0x776   :  { %6339 = vmatprep.subr.bf16.mxu1 %v10635_v0  ;;  %v4612_v0 = vld [vmem:[%s15525_s7 + $0x1130] sm:$0xff] }
 0x778   :  { %6299 = vmatpush1.bf16.msra.mxu0 %v10632_v19  ;;  %v10460_v19 = vcombine.low %v4596_v2, %v4604_v58  ;;  %v4684_v2 = vld [vmem:[%s15525_s7 + $0x1370] sm:$0xff]  ;;  %v4677_v58 = vld [vmem:[%s15525_s7 + $0x1338] sm:$0xff] }
 0x779   :  { %6340 = vmatpush1.bf16.msra.mxu1 %v10634_v20  ;;  %6300 = vmatprep.subr.bf16.mxu0 %v10649_v21  ;;  %v10462_v20 = vcombine.low %v4597_v59, %v4605_v60  ;;  %v10477_v21 = vcombine.high %v4612_v0, %v4620_v6  ;;  %v10526_v60 = vcombine.low %v4661_v11, %v4669_v52 }
 0x77a   :  { %6341 = vmatprep.subr.bf16.mxu1 %v10651_v24  ;;  %v10479_v24 = vcombine.high %v4613_v13, %v4621_v14 }
 0x77c   :  { %6301 = vmatpush1.bf16.msra.mxu0 %v10648_v42  ;;  %v10478_v42 = vcombine.low %v4613_v13, %v4621_v14  ;;  %v4701_v13 = vld [vmem:[%s15525_s7 + $0x13f8] sm:$0xff] }
 0x77d   :  { %6342 = vmatpush1.bf16.msra.mxu1 %v10650_v46  ;;  %6302 = vmatprep.subr.bf16.mxu0 %v10665_v44  ;;  %v10493_v46 = vcombine.high %v4628_v30, %v4636_v35  ;;  %v10495_v44 = vcombine.high %v4629_v39, %v4637_v36  ;;  %v4716_v30 = vld [vmem:[%s15525_s7 + $0x1470] sm:$0xff]  ;;  %v4709_v35 = vld [vmem:[%s15525_s7 + $0x1438] sm:$0xff] }
 0x77e   :  { %6343 = vmatprep.subr.bf16.mxu1 %v10667_v29  ;;  %v4644_v29 = vld [vmem:[%s15525_s7 + $0x1230] sm:$0xff] }
 0x77f   :  { %v10508_v53 = vcombine.low %v4644_v29, %v4652_v47 }
 0x780   :  { %6303 = vmatpush1.bf16.msra.mxu0 %v10664_v48  ;;  %v10494_v48 = vcombine.low %v4629_v39, %v4637_v36  ;;  %v4717_v39 = vld [vmem:[%s15525_s7 + $0x1478] sm:$0xff] }
 0x781   :  { %6344 = vmatpush1.bf16.msra.mxu1 %v10666_v5  ;;  %6304 = vmatprep.subr.bf16.mxu0 %v10681_v10  ;;  %v10509_v5 = vcombine.high %v4644_v29, %v4652_v47  ;;  %v10511_v10 = vcombine.high %v4645_v33, %v4653_v16  ;;  %v4732_v29 = vld [vmem:[%s15525_s7 + $0x14f0] sm:$0xff]  ;;  %v4725_v47 = vld [vmem:[%s15525_s7 + $0x14b8] sm:$0xff] }
 0x782   :  { %6345 = vmatprep.subr.bf16.mxu1 %v10683_v49  ;;  %v4660_v49 = vld [vmem:[%s15525_s7 + $0x12b0] sm:$0xff] }
 0x783   :  { %v10524_v59 = vcombine.low %v4660_v49, %v4668_v50 }
 0x784   :  { %6305 = vmatpush1.bf16.msra.mxu0 %v10680_v54  ;;  %v10510_v54 = vcombine.low %v4645_v33, %v4653_v16  ;;  %v4733_v33 = vld [vmem:[%s15525_s7 + $0x14f8] sm:$0xff] }
 0x785   :  { %6346 = vmatpush1.bf16.msra.mxu1 %v10682_v26  ;;  %6356 = vmatprep.subr.bf16.mxu0 %v10445_v55  ;;  %v10525_v26 = vcombine.high %v4660_v49, %v4668_v50  ;;  %v10527_v55 = vcombine.high %v4661_v11, %v4669_v52  ;;  %v4748_v49 = vld [vmem:[%s15525_s7 + $0x1570] sm:$0xff]  ;;  %v4741_v50 = vld [vmem:[%s15525_s7 + $0x1538] sm:$0xff] }
 0x786   :  { %6397 = vmatprep.subr.bf16.mxu1 %v10447_v56  ;;  %v4676_v56 = vld [vmem:[%s15525_s7 + $0x1330] sm:$0xff]  ;;  %v4749_v11 = vld [vmem:[%s15525_s7 + $0x1578] sm:$0xff] }
 0x787   :  { %6307 = vmatmul.mubr.bf16.vlgmr.msra.gmra.mrb[64].mxu0 %v13640_v1  ;;  %v10540_v14 = vcombine.low %v4676_v56, %v4684_v2 }
 0x788   :  { %6348 = vmatmul.mubr.bf16.vlgmr.msra.gmra.mrb[64].mxu1 %v13640_v1  ;;  %6357 = vmatpush1.bf16.msra.mxu0 %v10444_v57  ;;  %v4685_v57 = vld [vmem:[%s15525_s7 + $0x1378] sm:$0xff] }
 0x789   :  { %6388 = vmatprep.mubr.bf16.mxu0 %v13638_v45  ;;  %6398 = vmatpush1.bf16.msra.mxu1 %v10446_v61  ;;  %v10541_v61 = vcombine.high %v4676_v56, %v4684_v2  ;;  %v4764_v56 = vld [vmem:[%s15525_s7 + $0x15f0] sm:$0xff]  ;;  %v4757_v2 = vld [vmem:[%s15525_s7 + $0x15b8] sm:$0xff] }
 0x78a   :  { %6429 = vmatprep.mubr.bf16.mxu1 %v13638_v45  ;;  %6358 = vmatprep.subr.bf16.mxu0 %v10461_v62  ;;  %v10476_v45 = vcombine.low %v4612_v0, %v4620_v6  ;;  %v10543_v62 = vcombine.high %v4677_v58, %v4685_v57  ;;  %v4692_v0 = vld [vmem:[%s15525_s7 + $0x13b0] sm:$0xff] }
 0x78b   :  { %6399 = vmatprep.subr.bf16.mxu1 %v10463_v12  ;;  %v4700_v6 = vld [vmem:[%s15525_s7 + $0x13f0] sm:$0xff]  ;;  %v4693_v12 = vld [vmem:[%s15525_s7 + $0x13b8] sm:$0xff] }
 0x78c   :  { %6359 = vmatpush1.bf16.msra.mxu0 %v10460_v19  ;;  %v10542_v19 = vcombine.low %v4677_v58, %v4685_v57  ;;  %v10556_v36 = vcombine.low %v4692_v0, %v4700_v6  ;;  %v4765_v58 = vld [vmem:[%s15525_s7 + $0x15f8] sm:$0xff] }
 0x78d   :  { %6400 = vmatpush1.bf16.msra.mxu1 %v10462_v20  ;;  %6360 = vmatprep.subr.bf16.mxu0 %v10477_v21  ;;  %v10557_v20 = vcombine.high %v4692_v0, %v4700_v6  ;;  %v10559_v21 = vcombine.high %v4693_v12, %v4701_v13  ;;  %v4780_v0 = vld [vmem:[%s15525_s7 + $0x1670] sm:$0xff]  ;;  %v4773_v6 = vld [vmem:[%s15525_s7 + $0x1638] sm:$0xff] }
 0x78e   :  { %6401 = vmatprep.subr.bf16.mxu1 %v10479_v24  ;;  %v4708_v24 = vld [vmem:[%s15525_s7 + $0x1430] sm:$0xff] }
 0x78f   :  { %v10572_v16 = vcombine.low %v4708_v24, %v4716_v30 }
 0x790   :  { %6361 = vmatpush1.bf16.msra.mxu0 %v10476_v45  ;;  %v10558_v45 = vcombine.low %v4693_v12, %v4701_v13  ;;  %v4781_v12 = vld [vmem:[%s15525_s7 + $0x1678] sm:$0xff] }
 0x791   :  { %6402 = vmatpush1.bf16.msra.mxu1 %v10478_v42  ;;  %6362 = vmatprep.subr.bf16.mxu0 %v10493_v46  ;;  %v10573_v42 = vcombine.high %v4708_v24, %v4716_v30  ;;  %v10575_v46 = vcombine.high %v4709_v35, %v4717_v39  ;;  %v4796_v24 = vld [vmem:[%s15525_s7 + $0x16f0] sm:$0xff]  ;;  %v4789_v30 = vld [vmem:[%s15525_s7 + $0x16b8] sm:$0xff] }
 0x792   :  { %6403 = vmatprep.subr.bf16.mxu1 %v10495_v44  ;;  %v4724_v44 = vld [vmem:[%s15525_s7 + $0x14b0] sm:$0xff] }
 0x793   :  { %v10588_v52 = vcombine.low %v4724_v44, %v4732_v29 }
 0x794   :  { %6363 = vmatpush1.bf16.msra.mxu0 %v10492_v38  ;;  %v10574_v38 = vcombine.low %v4709_v35, %v4717_v39  ;;  %v4797_v35 = vld [vmem:[%s15525_s7 + $0x16f8] sm:$0xff] }
 0x795   :  { %6404 = vmatpush1.bf16.msra.mxu1 %v10494_v48  ;;  %6364 = vmatprep.subr.bf16.mxu0 %v10509_v5  ;;  %v10589_v48 = vcombine.high %v4724_v44, %v4732_v29  ;;  %v10591_v5 = vcombine.high %v4725_v47, %v4733_v33  ;;  %v4812_v44 = vld [vmem:[%s15525_s7 + $0x1770] sm:$0xff]  ;;  %v4805_v29 = vld [vmem:[%s15525_s7 + $0x1738] sm:$0xff] }
 0x796   :  { %6405 = vmatprep.subr.bf16.mxu1 %v10511_v10  ;;  %v4740_v10 = vld [vmem:[%s15525_s7 + $0x1530] sm:$0xff] }
 0x797   :  { %v10604_v57 = vcombine.low %v4740_v10, %v4748_v49 }
 0x798   :  { %6365 = vmatpush1.bf16.msra.mxu0 %v10508_v53  ;;  %v10590_v53 = vcombine.low %v4725_v47, %v4733_v33  ;;  %v4813_v47 = vld [vmem:[%s15525_s7 + $0x1778] sm:$0xff] }
 0x799   :  { %6406 = vmatpush1.bf16.msra.mxu1 %v10510_v54  ;;  %6366 = vmatprep.subr.bf16.mxu0 %v10525_v26  ;;  %v10605_v54 = vcombine.high %v4740_v10, %v4748_v49  ;;  %v10607_v26 = vcombine.high %v4741_v50, %v4749_v11  ;;  %v4828_v10 = vld [vmem:[%s15525_s7 + $0x17f0] sm:$0xff]  ;;  %v4821_v49 = vld [vmem:[%s15525_s7 + $0x17b8] sm:$0xff] }
 0x79a   :  { %6407 = vmatprep.subr.bf16.mxu1 %v10527_v55  ;;  %v4756_v55 = vld [vmem:[%s15525_s7 + $0x15b0] sm:$0xff] }
 0x79b   :  { %v10620_v13 = vcombine.low %v4756_v55, %v4764_v56 }
 0x79c   :  { %6367 = vmatpush1.bf16.msra.mxu0 %v10524_v59  ;;  %v10606_v59 = vcombine.low %v4741_v50, %v4749_v11  ;;  %v4829_v50 = vld [vmem:[%s15525_s7 + $0x17f8] sm:$0xff] }
 0x79d   :  { %6408 = vmatpush1.bf16.msra.mxu1 %v10526_v60  ;;  %6368 = vmatprep.subr.bf16.mxu0 %v10541_v61  ;;  %v10621_v60 = vcombine.high %v4756_v55, %v4764_v56  ;;  %v10623_v61 = vcombine.high %v4757_v2, %v4765_v58  ;;  %v10686_v55 = vcombine.low %v4821_v49, %v4829_v50  ;;  %v6454_v56 = vld [vmem:[%s15527_s2 + $0xc] sm:$0xf] }
 0x79e   :  { %6409 = vmatprep.subr.bf16.mxu1 %v10543_v62  ;;  %v4772_v62 = vld [vmem:[%s15525_s7 + $0x1630] sm:$0xff] }
 0x79f   :  { %v10636_v39 = vcombine.low %v4772_v62, %v4780_v0 }
 0x7a0   :  { %6369 = vmatpush1.bf16.msra.mxu0 %v10540_v14  ;;  %v10622_v14 = vcombine.low %v4757_v2, %v4765_v58 }
 0x7a1   :  { %6410 = vmatpush1.bf16.msra.mxu1 %v10542_v19  ;;  %6370 = vmatprep.subr.bf16.mxu0 %v10557_v20  ;;  %v10637_v19 = vcombine.high %v4772_v62, %v4780_v0  ;;  %v10639_v20 = vcombine.high %v4773_v6, %v4781_v12 }
 0x7a2   :  { %6411 = vmatprep.subr.bf16.mxu1 %v10559_v21  ;;  %v4788_v21 = vld [vmem:[%s15525_s7 + $0x16b0] sm:$0xff] }
 0x7a3   :  { %v10652_v33 = vcombine.low %v4788_v21, %v4796_v24 }
 0x7a4   :  { %6371 = vmatpush1.bf16.msra.mxu0 %v10556_v36  ;;  %v10638_v36 = vcombine.low %v4773_v6, %v4781_v12 }
 0x7a5   :  { %6412 = vmatpush1.bf16.msra.mxu1 %v10558_v45  ;;  %6372 = vmatprep.subr.bf16.mxu0 %v10573_v42  ;;  %v10653_v45 = vcombine.high %v4788_v21, %v4796_v24  ;;  %v10655_v42 = vcombine.high %v4789_v30, %v4797_v35  ;;  %v6518_v24 = vld [vmem:[%s15525_s7 + $0x1888] sm:$0xff] }
 0x7a6   :  { %6413 = vmatprep.subr.bf16.mxu1 %v10575_v46  ;;  %v4804_v46 = vld [vmem:[%s15525_s7 + $0x1730] sm:$0xff] }
 0x7a7   :  { %v10668_v11 = vcombine.low %v4804_v46, %v4812_v44 }
 0x7a8   :  { %6373 = vmatpush1.bf16.msra.mxu0 %v10572_v16  ;;  %v10654_v16 = vcombine.low %v4789_v30, %v4797_v35  ;;  %v6526_v30 = vld [vmem:[%s15525_s7 + $0x18c8] sm:$0xff]  ;;  %v6533_v35 = vld [vmem:[%s15525_s7 + $0x1900] sm:$0xff] }
 0x7a9   :  { %6414 = vmatpush1.bf16.msra.mxu1 %v10574_v38  ;;  %6374 = vmatprep.subr.bf16.mxu0 %v10589_v48  ;;  %v10669_v38 = vcombine.high %v4804_v46, %v4812_v44  ;;  %v10671_v48 = vcombine.high %v4805_v29, %v4813_v47  ;;  %v10708_v44 = vcombine.low %v6518_v24, %v6526_v30 }
 0x7aa   :  { %6415 = vmatprep.subr.bf16.mxu1 %v10591_v5  ;;  %v4820_v5 = vld [vmem:[%s15525_s7 + $0x17b0] sm:$0xff] }
 0x7ac   :  { %6375 = vmatpush1.bf16.msra.mxu0 %v10588_v52  ;;  %v10670_v52 = vcombine.low %v4805_v29, %v4813_v47 }
 0x7ad   :  { %6416 = vmatpush1.bf16.msra.mxu1 %v10590_v53  ;;  %6376 = vmatprep.subr.bf16.mxu0 %v10605_v54  ;;  %v10685_v53 = vcombine.high %v4820_v5, %v4828_v10  ;;  %v10687_v54 = vcombine.high %v4821_v49, %v4829_v50 }
 0x7ae   :  { %6417 = vmatprep.subr.bf16.mxu1 %v10607_v26  ;;  %v10684_v26 = vcombine.low %v4820_v5, %v4828_v10 }
 0x7b0   :  { %6377 = vmatpush1.bf16.msra.mxu0 %v10604_v57 }
 0x7b1   :  { %6418 = vmatpush1.bf16.msra.mxu1 %v10606_v59  ;;  %6378 = vmatprep.subr.bf16.mxu0 %v10621_v60 }
 0x7b2   :  { %6419 = vmatprep.subr.bf16.mxu1 %v10623_v61 }
 0x7b4   :  { %6379 = vmatpush1.bf16.msra.mxu0 %v10620_v13  ;;  %v6517_v13 = vld [vmem:[%s15525_s7 + $0x1880] sm:$0xff] }
 0x7b5   :  { %6420 = vmatpush1.bf16.msra.mxu1 %v10622_v14  ;;  %6380 = vmatprep.subr.bf16.mxu0 %v10637_v19  ;;  %v6525_v14 = vld [vmem:[%s15525_s7 + $0x18c0] sm:$0xff] }
 0x7b6   :  { %6421 = vmatprep.subr.bf16.mxu1 %v10639_v20  ;;  %v10707_v21 = vcombine.high %v6517_v13, %v6525_v14  ;;  %v10706_v46 = vcombine.low %v6517_v13, %v6525_v14 }
 0x7b8   :  { %6381 = vmatpush1.bf16.msra.mxu0 %v10636_v39  ;;  %v10709_v39 = vcombine.high %v6518_v24, %v6526_v30  ;;  %v6614_v24 = vld [vmem:[%s15525_s7 + $0x1b88] sm:$0xff] }
 0x7b9   :  { %6422 = vmatpush1.bf16.msra.mxu1 %v10638_v36  ;;  %6382 = vmatprep.subr.bf16.mxu0 %v10653_v45  ;;  %v6541_v36 = vld [vmem:[%s15525_s7 + $0x1940] sm:$0xff]  ;;  %v6534_v45 = vld [vmem:[%s15525_s7 + $0x1908] sm:$0xff] }
 0x7ba   :  { %6423 = vmatprep.subr.bf16.mxu1 %v10655_v42  ;;  %v6542_v42 = vld [vmem:[%s15525_s7 + $0x1948] sm:$0xff]  ;;  %v10723_v29 = vcombine.high %v6533_v35, %v6541_v36  ;;  %v10722_v5 = vcombine.low %v6533_v35, %v6541_v36 }
 0x7bb   :  { %v10725_v47 = vcombine.high %v6534_v45, %v6542_v42  ;;  %v10724_v10 = vcombine.low %v6534_v45, %v6542_v42  ;;  %v6622_v30 = vld [vmem:[%s15525_s7 + $0x1bc8] sm:$0xff]  ;;  %v6629_v42 = vld [vmem:[%s15525_s7 + $0x1c00] sm:$0xff] }
 0x7bc   :  { %6383 = vmatpush1.bf16.msra.mxu0 %v10652_v33  ;;  %v6549_v33 = vld [vmem:[%s15525_s7 + $0x1980] sm:$0xff]  ;;  %v10805_v45 = vcombine.high %v6614_v24, %v6622_v30 }
 0x7bd   :  { %6424 = vmatpush1.bf16.msra.mxu1 %v10654_v16  ;;  %6384 = vmatprep.subr.bf16.mxu0 %v10669_v38  ;;  %v6557_v16 = vld [vmem:[%s15525_s7 + $0x19c0] sm:$0xff]  ;;  %v6550_v38 = vld [vmem:[%s15525_s7 + $0x1988] sm:$0xff] }
 0x7be   :  { %6425 = vmatprep.subr.bf16.mxu1 %v10671_v48  ;;  %v6558_v48 = vld [vmem:[%s15525_s7 + $0x19c8] sm:$0xff]  ;;  %v10739_v49 = vcombine.high %v6549_v33, %v6557_v16 }
 0x7bf   :  { %v10741_v50 = vcombine.high %v6550_v38, %v6558_v48 }
 0x7c0   :  { %6385 = vmatpush1.bf16.msra.mxu0 %v10668_v11  ;;  %v6565_v11 = vld [vmem:[%s15525_s7 + $0x1a00] sm:$0xff] }
 0x7c1   :  { %6426 = vmatpush1.bf16.msra.mxu1 %v10670_v52  ;;  %6386 = vmatprep.subr.bf16.mxu0 %v10685_v53  ;;  %v6573_v52 = vld [vmem:[%s15525_s7 + $0x1a40] sm:$0xff]  ;;  %v6566_v53 = vld [vmem:[%s15525_s7 + $0x1a08] sm:$0xff] }
 0x7c2   :  { %6427 = vmatprep.subr.bf16.mxu1 %v10687_v54  ;;  %v6574_v54 = vld [vmem:[%s15525_s7 + $0x1a48] sm:$0xff] }
 0x7c4   :  { %6387 = vmatpush1.bf16.msra.mxu0 %v10684_v26  ;;  %v10738_v26 = vcombine.low %v6549_v33, %v6557_v16  ;;  %v10804_v33 = vcombine.low %v6614_v24, %v6622_v30 }
 0x7c5   :  { %6428 = vmatpush1.bf16.msra.mxu1 %v10686_v55  ;;  %10688 = vmatprep.subr.msk.bf16.mxu0 %vm127_vm3, %v11814_v40  ;;  %v10740_v55 = vcombine.low %v6550_v38, %v6558_v48  ;;  %v6645_v48 = vld [vmem:[%s15525_s7 + $0x1c80] sm:$0xff] }
 0x7c7   :  { %6389 = vmatmul.mubr.bf16.vlgmr.msra.gmra.mrb[68].mxu0 %v13640_v1 }
 0x7c8   :  { %6430 = vmatmul.mubr.bf16.vlgmr.msra.gmra.mrb[68].mxu1 %v13640_v1  ;;  %6459 = vmatpush1.bf16.msra.mxu0 %v11817_v41 }
 0x7c9   :  { %6490 = vmatprep.mubr.bf16.mxu0 %v11488_v37 }
 0x7cf   :  { %10689 = vmatmul.mubr.msk.bf16.vlgmr.msra.gmra.mrb[72].mxu0 %vm699_vm6, %v6454_v56  ;;  %v10755_v56 = vcombine.high %v6565_v11, %v6573_v52 }
 0x7da   :  { %v6144_v2 = vpop.f32.mrb[56].mxu0  ;;  %v6185_v58 = vpop.f32.mrb[56].mxu1 }
 0x7db   :  { %v14219_v57 = vadd.f32 %v6144_v2, %v13375_v28  ;;  %v14222_v40 = vadd.f32 %v6185_v58, %v13378_v31  ;;  %v6146_v59 = vpop.f32.mrb[57].mxu0  ;;  %v6187_v1 = vpop.f32.mrb[57].mxu1  ;;  %v6501_v28 = vld [vmem:[%s15525_s7 + $0x1800] sm:$0xff]  ;;  %v10757_v2 = vcombine.high %v6566_v53, %v6574_v54 }
 0x7dc   :  { %v14225_v41 = vadd.f32 %v6146_v59, %v13381_v51  ;;  %v14228_v37 = vadd.f32 %v6187_v1, %v13384_v43  ;;  %v6148_v60 = vpop.f32.mrb[58].mxu0  ;;  %v6189_v61 = vpop.f32.mrb[58].mxu1  ;;  %v6509_v31 = vld [vmem:[%s15525_s7 + $0x1840] sm:$0xff]  ;;  %v6502_v51 = vld [vmem:[%s15525_s7 + $0x1808] sm:$0xff] }
 0x7dd   :  { %v6149_v62 = vpop.f32.mrb[59].mxu0  ;;  %v6190_v0 = vpop.f32.mrb[59].mxu1  ;;  %v10690_v6 = vcombine.low %v6501_v28, %v6509_v31  ;;  %v10691_v12 = vcombine.high %v6501_v28, %v6509_v31  ;;  %v6510_v43 = vld [vmem:[%s15525_s7 + $0x1848] sm:$0xff]  ;;  %v6581_v58 = vld [vmem:[%s15525_s7 + $0x1a80] sm:$0xff]  ;;  %v10754_v61 = vcombine.low %v6565_v11, %v6573_v52 }
 0x7de   :  { %v10692_v19 = vcombine.low %v6502_v51, %v6510_v43  ;;  %v10693_v20 = vcombine.high %v6502_v51, %v6510_v43  ;;  %v6589_v59 = vld [vmem:[%s15525_s7 + $0x1ac0] sm:$0xff]  ;;  %v6582_v1 = vld [vmem:[%s15525_s7 + $0x1a88] sm:$0xff]  ;;  %v10756_v62 = vcombine.low %v6566_v53, %v6574_v54 }
 0x7df   :  { %8037 = vmatprep.subr.bf16.mxu1 %v10691_v12  ;;  %v6590_v60 = vld [vmem:[%s15525_s7 + $0x1ac8] sm:$0xff]  ;;  %v10771_v0 = vcombine.high %v6581_v58, %v6589_v59  ;;  %v6597_v31 = vld [vmem:[%s15525_s7 + $0x1b00] sm:$0xff]  ;;  %v10770_v43 = vcombine.low %v6581_v58, %v6589_v59 }
 0x7e0   :  { %8078 = vmatprep.subr.bf16.mxu0 %v10693_v20  ;;  %8038 = vmatpush1.bf16.msra.mxu1 %v10690_v6  ;;  %v10773_v28 = vcombine.high %v6582_v1, %v6590_v60  ;;  %v6605_v51 = vld [vmem:[%s15525_s7 + $0x1b40] sm:$0xff]  ;;  %v6598_v6 = vld [vmem:[%s15525_s7 + $0x1b08] sm:$0xff]  ;;  %v10772_v13 = vcombine.low %v6582_v1, %v6590_v60 }
 0x7e1   :  { %8079 = vmatpush1.bf16.msra.mxu0 %v10692_v19  ;;  %8039 = vmatprep.subr.bf16.mxu1 %v10707_v21  ;;  %v6606_v12 = vld [vmem:[%s15525_s7 + $0x1b48] sm:$0xff]  ;;  %v10787_v14 = vcombine.high %v6597_v31, %v6605_v51  ;;  %v6613_v20 = vld [vmem:[%s15525_s7 + $0x1b80] sm:$0xff]  ;;  %v10786_v35 = vcombine.low %v6597_v31, %v6605_v51 }
 0x7e2   :  { %8080 = vmatprep.subr.bf16.mxu0 %v10709_v39  ;;  %v10789_v19 = vcombine.high %v6598_v6, %v6606_v12  ;;  %v6621_v21 = vld [vmem:[%s15525_s7 + $0x1bc0] sm:$0xff]  ;;  %v10788_v39 = vcombine.low %v6598_v6, %v6606_v12 }
 0x7e3   :  { %v10803_v36 = vcombine.high %v6613_v20, %v6621_v21  ;;  %v6661_v54 = vld [vmem:[%s15525_s7 + $0x1d00] sm:$0xff] }
 0x7e4   :  { %8040 = vmatpush1.bf16.msra.mxu1 %v10706_v46  ;;  %v6637_v46 = vld [vmem:[%s15525_s7 + $0x1c40] sm:$0xff] }
 0x7e5   :  { %8081 = vmatpush1.bf16.msra.mxu0 %v10708_v44  ;;  %8041 = vmatprep.subr.bf16.mxu1 %v10723_v29  ;;  %v6630_v44 = vld [vmem:[%s15525_s7 + $0x1c08] sm:$0xff]  ;;  %v10819_v16 = vcombine.high %v6629_v42, %v6637_v46  ;;  %v6677_v60 = vld [vmem:[%s15525_s7 + $0x1d80] sm:$0xff] }
 0x7e6   :  { %8082 = vmatprep.subr.bf16.mxu0 %v10725_v47  ;;  %v6638_v29 = vld [vmem:[%s15525_s7 + $0x1c48] sm:$0xff]  ;;  %v10802_v47 = vcombine.low %v6613_v20, %v6621_v21  ;;  %v6693_v12 = vld [vmem:[%s15525_s7 + $0x1e00] sm:$0xff] }
 0x7e7   :  { %v10821_v38 = vcombine.high %v6630_v44, %v6638_v29  ;;  %v10820_v11 = vcombine.low %v6630_v44, %v6638_v29  ;;  %v6718_v29 = vld [vmem:[%s15525_s7 + $0x1ec8] sm:$0xff] }
 0x7e8   :  { %8042 = vmatpush1.bf16.msra.mxu1 %v10722_v5  ;;  %v6653_v5 = vld [vmem:[%s15525_s7 + $0x1cc0] sm:$0xff] }
 0x7e9   :  { %8083 = vmatpush1.bf16.msra.mxu0 %v10724_v10  ;;  %8043 = vmatprep.subr.bf16.mxu1 %v10739_v49  ;;  %v6646_v10 = vld [vmem:[%s15525_s7 + $0x1c88] sm:$0xff]  ;;  %v10835_v52 = vcombine.high %v6645_v48, %v6653_v5 }
 0x7ea   :  { %8084 = vmatprep.subr.bf16.mxu0 %v10741_v50  ;;  %v6654_v49 = vld [vmem:[%s15525_s7 + $0x1cc8] sm:$0xff]  ;;  %v10818_v50 = vcombine.low %v6629_v42, %v6637_v46 }
 0x7eb   :  { %v10837_v53 = vcombine.high %v6646_v10, %v6654_v49  ;;  %v10836_v58 = vcombine.low %v6646_v10, %v6654_v49 }
 0x7ec   :  { %8044 = vmatpush1.bf16.msra.mxu1 %v10738_v26  ;;  %v6669_v26 = vld [vmem:[%s15525_s7 + $0x1d40] sm:$0xff] }
 0x7ed   :  { %8085 = vmatpush1.bf16.msra.mxu0 %v10740_v55  ;;  %8045 = vmatprep.subr.bf16.mxu1 %v10755_v56  ;;  %v6662_v55 = vld [vmem:[%s15525_s7 + $0x1d08] sm:$0xff]  ;;  %v10851_v59 = vcombine.high %v6661_v54, %v6669_v26 }
 0x7ee   :  { %8086 = vmatprep.subr.bf16.mxu0 %v10757_v2  ;;  %v6670_v56 = vld [vmem:[%s15525_s7 + $0x1d48] sm:$0xff]  ;;  %v10834_v2 = vcombine.low %v6645_v48, %v6653_v5 }
 0x7ef   :  { %v10853_v1 = vcombine.high %v6662_v55, %v6670_v56  ;;  %v10852_v31 = vcombine.low %v6662_v55, %v6670_v56  ;;  %v6734_v55 = vld [vmem:[%s15525_s7 + $0x1f48] sm:$0xff] }
 0x7f0   :  { %8046 = vmatpush1.bf16.msra.mxu1 %v10754_v61  ;;  %v6685_v61 = vld [vmem:[%s15525_s7 + $0x1dc0] sm:$0xff] }
 0x7f1   :  { %8087 = vmatpush1.bf16.msra.mxu0 %v10756_v62  ;;  %8047 = vmatprep.subr.bf16.mxu1 %v10771_v0  ;;  %v6678_v62 = vld [vmem:[%s15525_s7 + $0x1d88] sm:$0xff]  ;;  %v10867_v51 = vcombine.high %v6677_v60, %v6685_v61 }
 0x7f2   :  { %8088 = vmatprep.subr.bf16.mxu0 %v10773_v28  ;;  %v6686_v0 = vld [vmem:[%s15525_s7 + $0x1dc8] sm:$0xff]  ;;  %v10850_v28 = vcombine.low %v6661_v54, %v6669_v26  ;;  %v6733_v54 = vld [vmem:[%s15525_s7 + $0x1f40] sm:$0xff] }
 0x7f3   :  { %v10869_v6 = vcombine.high %v6678_v62, %v6686_v0  ;;  %v10868_v20 = vcombine.low %v6678_v62, %v6686_v0 }
 0x7f4   :  { %8048 = vmatpush1.bf16.msra.mxu1 %v10770_v43  ;;  %v6701_v43 = vld [vmem:[%s15525_s7 + $0x1e40] sm:$0xff] }
 0x7f5   :  { %8089 = vmatpush1.bf16.msra.mxu0 %v10772_v13  ;;  %8049 = vmatprep.subr.bf16.mxu1 %v10787_v14  ;;  %v6694_v13 = vld [vmem:[%s15525_s7 + $0x1e08] sm:$0xff]  ;;  %v10883_v21 = vcombine.high %v6693_v12, %v6701_v43  ;;  %v10882_v30 = vcombine.low %v6693_v12, %v6701_v43 }
 0x7f6   :  { %8090 = vmatprep.subr.bf16.mxu0 %v10789_v19  ;;  %v6702_v14 = vld [vmem:[%s15525_s7 + $0x1e48] sm:$0xff]  ;;  %v10866_v19 = vcombine.low %v6677_v60, %v6685_v61 }
 0x7f7   :  { %v10885_v24 = vcombine.high %v6694_v13, %v6702_v14  ;;  %v6750_v61 = vld [vmem:[%s15525_s7 + $0x1fc8] sm:$0xff] }
 0x7f8   :  { %8050 = vmatpush1.bf16.msra.mxu1 %v10786_v35  ;;  %v10884_v35 = vcombine.low %v6694_v13, %v6702_v14  ;;  %v6512_v13 = vld [vmem:[%s15525_s7 + $0x1858] sm:$0xff] }
 0x7f9   :  { %8091 = vmatpush1.bf16.msra.mxu0 %v10788_v39  ;;  %8051 = vmatprep.subr.bf16.mxu1 %v10803_v36  ;;  %v6709_v39 = vld [vmem:[%s15525_s7 + $0x1e80] sm:$0xff] }
 0x7fa   :  { %8092 = vmatprep.subr.bf16.mxu0 %v10805_v45  ;;  %v6717_v36 = vld [vmem:[%s15525_s7 + $0x1ec0] sm:$0xff]  ;;  %v6710_v45 = vld [vmem:[%s15525_s7 + $0x1e88] sm:$0xff] }
 0x7fb   :  { %v10899_v44 = vcombine.high %v6709_v39, %v6717_v36  ;;  %v10898_v48 = vcombine.low %v6709_v39, %v6717_v36  ;;  %v10900_v5 = vcombine.low %v6710_v45, %v6718_v29 }
 0x7fc   :  { %8052 = vmatpush1.bf16.msra.mxu1 %v10802_v47 }
 0x7fd   :  { %8093 = vmatpush1.bf16.msra.mxu0 %v10804_v33  ;;  %8053 = vmatprep.subr.bf16.mxu1 %v10819_v16 }
 0x7fe   :  { %8094 = vmatprep.subr.bf16.mxu0 %v10821_v38 }
 0x800   :  { %8054 = vmatpush1.bf16.msra.mxu1 %v10818_v50 }
 0x801   :  { %8095 = vmatpush1.bf16.msra.mxu0 %v10820_v11  ;;  %8055 = vmatprep.subr.bf16.mxu1 %v10835_v52  ;;  %v10901_v52 = vcombine.high %v6710_v45, %v6718_v29 }
 0x802   :  { %8096 = vmatprep.subr.bf16.mxu0 %v10837_v53 }
 0x804   :  { %8056 = vmatpush1.bf16.msra.mxu1 %v10834_v2 }
 0x805   :  { %8097 = vmatpush1.bf16.msra.mxu0 %v10836_v58  ;;  %8057 = vmatprep.subr.bf16.mxu1 %v10851_v59  ;;  %v6741_v58 = vld [vmem:[%s15525_s7 + $0x1f80] sm:$0xff] }
 0x806   :  { %8098 = vmatprep.subr.bf16.mxu0 %v10853_v1  ;;  %v6749_v59 = vld [vmem:[%s15525_s7 + $0x1fc0] sm:$0xff]  ;;  %v6742_v1 = vld [vmem:[%s15525_s7 + $0x1f88] sm:$0xff] }
 0x807   :  { %v10931_v60 = vcombine.high %v6741_v58, %v6749_v59  ;;  %v10930_v62 = vcombine.low %v6741_v58, %v6749_v59  ;;  %v10932_v0 = vcombine.low %v6742_v1, %v6750_v61  ;;  %v6543_v58 = vld [vmem:[%s15525_s7 + $0x1950] sm:$0xff]  ;;  %v6536_v59 = vld [vmem:[%s15525_s7 + $0x1918] sm:$0xff] }
 0x808   :  { %8058 = vmatpush1.bf16.msra.mxu1 %v10850_v28  ;;  %v10933_v28 = vcombine.high %v6742_v1, %v6750_v61  ;;  %v6544_v1 = vld [vmem:[%s15525_s7 + $0x1958] sm:$0xff] }
 0x809   :  { %8099 = vmatpush1.bf16.msra.mxu0 %v10852_v31  ;;  %8059 = vmatprep.subr.bf16.mxu1 %v10867_v51  ;;  %v6503_v31 = vld [vmem:[%s15525_s7 + $0x1810] sm:$0xff] }
 0x80a   :  { %8100 = vmatprep.subr.bf16.mxu0 %v10869_v6  ;;  %v6511_v51 = vld [vmem:[%s15525_s7 + $0x1850] sm:$0xff]  ;;  %v6504_v6 = vld [vmem:[%s15525_s7 + $0x1818] sm:$0xff] }
 0x80b   :  { %v10694_v12 = vcombine.low %v6503_v31, %v6511_v51  ;;  %v10695_v43 = vcombine.high %v6503_v31, %v6511_v51  ;;  %v10696_v14 = vcombine.low %v6504_v6, %v6512_v13  ;;  %v6559_v31 = vld [vmem:[%s15525_s7 + $0x19d0] sm:$0xff]  ;;  %v6552_v51 = vld [vmem:[%s15525_s7 + $0x1998] sm:$0xff] }
 0x80c   :  { %8060 = vmatpush1.bf16.msra.mxu1 %v10866_v19  ;;  %v10697_v19 = vcombine.high %v6504_v6, %v6512_v13  ;;  %v6560_v6 = vld [vmem:[%s15525_s7 + $0x19d8] sm:$0xff] }
 0x80d   :  { %8101 = vmatpush1.bf16.msra.mxu0 %v10868_v20  ;;  %8061 = vmatprep.subr.bf16.mxu1 %v10883_v21 }
 0x80e   :  { %8102 = vmatprep.subr.bf16.mxu0 %v10885_v24 }
 0x810   :  { %8062 = vmatpush1.bf16.msra.mxu1 %v10882_v30 }
 0x811   :  { %8103 = vmatpush1.bf16.msra.mxu0 %v10884_v35  ;;  %8063 = vmatprep.subr.bf16.mxu1 %v10899_v44 }
 0x812   :  { %8104 = vmatprep.subr.bf16.mxu0 %v10901_v52 }
 0x814   :  { %8064 = vmatpush1.bf16.msra.mxu1 %v10898_v48 }
 0x815   :  { %8105 = vmatpush1.bf16.msra.mxu0 %v10900_v5 }
 0x81a   :  { %v6226_v42 = vpop.f32.mrb[60].mxu0  ;;  %v6267_v46 = vpop.f32.mrb[60].mxu1 }
 0x81b   :  { %v14399_v47 = vadd.f32 %v6226_v42, %v13555_v15  ;;  %v14402_v33 = vadd.f32 %v6267_v46, %v13558_v22  ;;  %v6228_v16 = vpop.f32.mrb[61].mxu0  ;;  %v6269_v38 = vpop.f32.mrb[61].mxu1  ;;  %v6725_v22 = vld [vmem:[%s15525_s7 + $0x1f00] sm:$0xff] }
 0x81c   :  { %v14405_v10 = vadd.f32 %v6228_v16, %v13561_v23  ;;  %v14408_v49 = vadd.f32 %v6269_v38, %v13564_v3  ;;  %v6230_v50 = vpop.f32.mrb[62].mxu0  ;;  %v6271_v11 = vpop.f32.mrb[62].mxu1  ;;  %v6726_v23 = vld [vmem:[%s15525_s7 + $0x1f08] sm:$0xff]  ;;  %v10914_v3 = vcombine.low %v6725_v22, %v6733_v54  ;;  %v10915_v26 = vcombine.high %v6725_v22, %v6733_v54 }
 0x81d   :  { %v6231_v53 = vpop.f32.mrb[63].mxu0  ;;  %v6272_v15 = vpop.f32.mrb[63].mxu1  ;;  %v10916_v56 = vcombine.low %v6726_v23, %v6734_v55  ;;  %v10917_v2 = vcombine.high %v6726_v23, %v6734_v55 }
 0x81e   :  { %8065 = vmatprep.subr.bf16.mxu1 %v10915_v26 }
 0x81f   :  { %8106 = vmatprep.subr.bf16.mxu0 %v10917_v2  ;;  %8066 = vmatpush1.bf16.msra.mxu1 %v10914_v3 }
 0x820   :  { %8107 = vmatpush1.bf16.msra.mxu0 %v10916_v56  ;;  %8067 = vmatprep.subr.bf16.mxu1 %v10931_v60  ;;  %v6535_v56 = vld [vmem:[%s15525_s7 + $0x1910] sm:$0xff] }
 0x821   :  { %8108 = vmatprep.subr.bf16.mxu0 %v10933_v28  ;;  %v6551_v28 = vld [vmem:[%s15525_s7 + $0x1990] sm:$0xff] }
 0x822   :  { %v10743_v13 = vcombine.high %v6551_v28, %v6559_v31 }
 0x823   :  { %8068 = vmatpush1.bf16.msra.mxu1 %v10930_v62  ;;  %v10727_v62 = vcombine.high %v6535_v56, %v6543_v58 }
 0x824   :  { %8109 = vmatpush1.bf16.msra.mxu0 %v10932_v0  ;;  %8119 = vmatprep.subr.bf16.mxu1 %v10695_v43  ;;  %v10729_v0 = vcombine.high %v6536_v59, %v6544_v1  ;;  %v10728_v43 = vcombine.low %v6536_v59, %v6544_v1 }
 0x825   :  { %8160 = vmatprep.subr.bf16.mxu0 %v10697_v19  ;;  %v6567_v19 = vld [vmem:[%s15525_s7 + $0x1a10] sm:$0xff] }
 0x85a   :  { %v6308_v20 = vpop.f32.mrb[64].mxu0 }
 0x85b   :  { %v14447_v21 = vadd.f32 %v6308_v20, %v13603_v63  ;;  %v6349_v24 = vpop.f32.mrb[64].mxu1  ;;  %v6310_v30 = vpop.f32.mrb[65].mxu0  ;;  %v6575_v20 = vld [vmem:[%s15525_s7 + $0x1a50] sm:$0xff] }
 0x85c   :  { %v14450_v35 = vadd.f32 %v6349_v24, %v13606_v8  ;;  %v14453_v39 = vadd.f32 %v6310_v30, %v13609_v9  ;;  %v6351_v36 = vpop.f32.mrb[65].mxu1  ;;  %v6312_v45 = vpop.f32.mrb[66].mxu0  ;;  %v6568_v24 = vld [vmem:[%s15525_s7 + $0x1a18] sm:$0xff] }
 0x85d   :  { %v14456_v42 = vadd.f32 %v6351_v36, %v13612_v17  ;;  %v6353_v46 = vpop.f32.mrb[66].mxu1  ;;  %v6313_v44 = vpop.f32.mrb[67].mxu0  ;;  %v6576_v30 = vld [vmem:[%s15525_s7 + $0x1a58] sm:$0xff]  ;;  %v10742_v36 = vcombine.low %v6551_v28, %v6559_v31  ;;  %v10744_v45 = vcombine.low %v6552_v51, %v6560_v6 }
 0x85e   :  { %v6354_v29 = vpop.f32.mrb[67].mxu1  ;;  %v10759_v46 = vcombine.high %v6567_v19, %v6575_v20  ;;  %v10761_v44 = vcombine.high %v6568_v24, %v6576_v30  ;;  %v6640_v28 = vld [vmem:[%s15525_s7 + $0x1c58] sm:$0xff] }
 0x85f   :  { %v6583_v29 = vld [vmem:[%s15525_s7 + $0x1a90] sm:$0xff] }
 0x89a   :  { %v6390_v16 = vpop.f32.mrb[68].mxu0 }
 0x89b   :  { %v14459_v63 = vadd.f32 %v6390_v16, %v13615_v4  ;;  %v6431_v38 = vpop.f32.mrb[68].mxu1  ;;  %v6392_v48 = vpop.f32.mrb[69].mxu0  ;;  %v6519_v4 = vld [vmem:[%s15525_s7 + $0x1890] sm:$0xff] }
 0x89c   :  { %v14462_v8 = vadd.f32 %v6431_v38, %v13618_v7  ;;  %v14465_v9 = vadd.f32 %v6392_v48, %v13621_v32  ;;  %v6433_v5 = vpop.f32.mrb[69].mxu1  ;;  %v6394_v50 = vpop.f32.mrb[70].mxu0  ;;  %v6527_v7 = vld [vmem:[%s15525_s7 + $0x18d0] sm:$0xff]  ;;  %v6520_v32 = vld [vmem:[%s15525_s7 + $0x1898] sm:$0xff] }
 0x89d   :  { %v14468_v17 = vadd.f32 %v6433_v5, %v13624_v34  ;;  %v6435_v11 = vpop.f32.mrb[70].mxu1  ;;  %v6395_v52 = vpop.f32.mrb[71].mxu0  ;;  %v6528_v34 = vld [vmem:[%s15525_s7 + $0x18d8] sm:$0xff]  ;;  %v10711_v55 = vcombine.high %v6519_v4, %v6527_v7  ;;  %v10710_v60 = vcombine.low %v6519_v4, %v6527_v7  ;;  %v6591_v16 = vld [vmem:[%s15525_s7 + $0x1ad0] sm:$0xff]  ;;  %v10758_v5 = vcombine.low %v6567_v19, %v6575_v20 }
 0x89e   :  { %v6436_v53 = vpop.f32.mrb[71].mxu1  ;;  %v10713_v2 = vcombine.high %v6520_v32, %v6528_v34  ;;  %v10712_v61 = vcombine.low %v6520_v32, %v6528_v34  ;;  %v6584_v38 = vld [vmem:[%s15525_s7 + $0x1a98] sm:$0xff]  ;;  %v10760_v50 = vcombine.low %v6568_v24, %v6576_v30  ;;  %v10775_v11 = vcombine.high %v6583_v29, %v6591_v16 }
 0x89f   :  { %v6592_v48 = vld [vmem:[%s15525_s7 + $0x1ad8] sm:$0xff]  ;;  %v6599_v53 = vld [vmem:[%s15525_s7 + $0x1b10] sm:$0xff] }
 0x8a0   :  { %v10777_v52 = vcombine.high %v6584_v38, %v6592_v48  ;;  %v6600_v4 = vld [vmem:[%s15525_s7 + $0x1b18] sm:$0xff]  ;;  %v10776_v32 = vcombine.low %v6584_v38, %v6592_v48 }
 0x8a1   :  { %v6608_v7 = vld [vmem:[%s15525_s7 + $0x1b58] sm:$0xff] }
 0x8a2   :  { %v6492_v15 = vpop.f32.mrb[72].mxu0  ;;  %v10792_v59 = vcombine.low %v6600_v4, %v6608_v7  ;;  %v6656_v19 = vld [vmem:[%s15525_s7 + $0x1cd8] sm:$0xff] }
 0x8a3   :  { %v6494_v22 = vpop.f32.mrb[73].mxu0  ;;  %v14484_v3 = vpack.c.bf16 %v6492_v15, %v6492_v15  ;;  %v6607_v15 = vld [vmem:[%s15525_s7 + $0x1b50] sm:$0xff] }
 0x8a4   :  { %v14482_v54 = vpack.c.bf16 %v6494_v22, %v6494_v22  ;;  %v6496_v23 = vpop.f32.mrb[74].mxu0  ;;  %v10774_v22 = vcombine.low %v6583_v29, %v6591_v16  ;;  %v10791_v34 = vcombine.high %v6599_v53, %v6607_v15  ;;  %v6672_v29 = vld [vmem:[%s15525_s7 + $0x1d58] sm:$0xff] }
 0x8a5   :  { %v6497_v26 = vpop.f32.mrb[75].mxu0  ;;  %v10793_v23 = vcombine.high %v6600_v4, %v6608_v7 }
 0x8a6   :  { %8069 = vmatprep.mubr.bf16.mxu1 %v14482_v54  ;;  %8110 = vmatprep.mubr.bf16.mxu0 %v14482_v54  ;;  %v6615_v26 = vld [vmem:[%s15525_s7 + $0x1b90] sm:$0xff] }
 0x8a7   :  { %8070 = vmatmul.mubr.bf16.vlgmr.msra.gmra.mrb[72].mxu1 %v14484_v3  ;;  %8111 = vmatmul.mubr.bf16.vlgmr.msra.gmra.mrb[76].mxu0 %v14484_v3 }
 0x8a8   :  { %8120 = vmatpush1.bf16.msra.mxu1 %v10694_v12  ;;  %8161 = vmatpush1.bf16.msra.mxu0 %v10696_v14  ;;  %v10726_v12 = vcombine.low %v6535_v56, %v6543_v58  ;;  %v10745_v14 = vcombine.high %v6552_v51, %v6560_v6  ;;  %v6616_v56 = vld [vmem:[%s15525_s7 + $0x1b98] sm:$0xff]  ;;  %v10790_v58 = vcombine.low %v6599_v53, %v6607_v15 }
 0x8a9   :  { %8121 = vmatprep.subr.bf16.mxu1 %v10711_v55  ;;  %8151 = vmatprep.mubr.bf16.mxu1 %v14482_v54  ;;  %v6623_v55 = vld [vmem:[%s15525_s7 + $0x1bd0] sm:$0xff]  ;;  %v6688_v53 = vld [vmem:[%s15525_s7 + $0x1dd8] sm:$0xff] }
 0x8aa   :  { %8162 = vmatprep.subr.bf16.mxu0 %v10713_v2  ;;  %8192 = vmatprep.mubr.bf16.mxu0 %v14482_v54  ;;  %v6624_v2 = vld [vmem:[%s15525_s7 + $0x1bd8] sm:$0xff]  ;;  %v10807_v1 = vcombine.high %v6615_v26, %v6623_v55  ;;  %v10806_v31 = vcombine.low %v6615_v26, %v6623_v55 }
 0x8ab   :  { %v10808_v51 = vcombine.low %v6616_v56, %v6624_v2  ;;  %v6704_v26 = vld [vmem:[%s15525_s7 + $0x1e58] sm:$0xff] }
 0x8ac   :  { %8122 = vmatpush1.bf16.msra.mxu1 %v10710_v60  ;;  %8163 = vmatpush1.bf16.msra.mxu0 %v10712_v61  ;;  %v10809_v60 = vcombine.high %v6616_v56, %v6624_v2  ;;  %v6631_v61 = vld [vmem:[%s15525_s7 + $0x1c10] sm:$0xff] }
 0x8ad   :  { %8123 = vmatprep.subr.bf16.mxu1 %v10727_v62  ;;  %8164 = vmatprep.subr.bf16.mxu0 %v10729_v0  ;;  %v6639_v62 = vld [vmem:[%s15525_s7 + $0x1c50] sm:$0xff]  ;;  %v6632_v0 = vld [vmem:[%s15525_s7 + $0x1c18] sm:$0xff] }
 0x8ae   :  { %v10823_v6 = vcombine.high %v6631_v61, %v6639_v62  ;;  %v10822_v20 = vcombine.low %v6631_v61, %v6639_v62  ;;  %v10824_v24 = vcombine.low %v6632_v0, %v6640_v28  ;;  %v6720_v61 = vld [vmem:[%s15525_s7 + $0x1ed8] sm:$0xff] }
 0x8b0   :  { %8124 = vmatpush1.bf16.msra.mxu1 %v10726_v12  ;;  %8165 = vmatpush1.bf16.msra.mxu0 %v10728_v43  ;;  %v10825_v12 = vcombine.high %v6632_v0, %v6640_v28  ;;  %v6647_v43 = vld [vmem:[%s15525_s7 + $0x1c90] sm:$0xff] }
 0x8b1   :  { %8125 = vmatprep.subr.bf16.mxu1 %v10743_v13  ;;  %8166 = vmatprep.subr.bf16.mxu0 %v10745_v14  ;;  %v6655_v13 = vld [vmem:[%s15525_s7 + $0x1cd0] sm:$0xff]  ;;  %v6648_v14 = vld [vmem:[%s15525_s7 + $0x1c98] sm:$0xff] }
 0x8b2   :  { %v10839_v30 = vcombine.high %v6647_v43, %v6655_v13  ;;  %v10838_v16 = vcombine.low %v6647_v43, %v6655_v13  ;;  %v10840_v38 = vcombine.low %v6648_v14, %v6656_v19  ;;  %v6736_v43 = vld [vmem:[%s15525_s7 + $0x1f58] sm:$0xff] }
 0x8b4   :  { %8126 = vmatpush1.bf16.msra.mxu1 %v10742_v36  ;;  %8167 = vmatpush1.bf16.msra.mxu0 %v10744_v45  ;;  %v10841_v36 = vcombine.high %v6648_v14, %v6656_v19  ;;  %v6663_v45 = vld [vmem:[%s15525_s7 + $0x1d10] sm:$0xff] }
 0x8b5   :  { %8127 = vmatprep.subr.bf16.mxu1 %v10759_v46  ;;  %8168 = vmatprep.subr.bf16.mxu0 %v10761_v44  ;;  %v6671_v46 = vld [vmem:[%s15525_s7 + $0x1d50] sm:$0xff]  ;;  %v6664_v44 = vld [vmem:[%s15525_s7 + $0x1d18] sm:$0xff] }
 0x8b6   :  { %v10855_v48 = vcombine.high %v6663_v45, %v6671_v46  ;;  %v10854_v15 = vcombine.low %v6663_v45, %v6671_v46  ;;  %v10856_v4 = vcombine.low %v6664_v44, %v6672_v29  ;;  %v6752_v45 = vld [vmem:[%s15525_s7 + $0x1fd8] sm:$0xff] }
 0x8b8   :  { %8128 = vmatpush1.bf16.msra.mxu1 %v10758_v5  ;;  %8169 = vmatpush1.bf16.msra.mxu0 %v10760_v50  ;;  %v10857_v5 = vcombine.high %v6664_v44, %v6672_v29  ;;  %v6679_v50 = vld [vmem:[%s15525_s7 + $0x1d90] sm:$0xff] }
 0x8b9   :  { %8129 = vmatprep.subr.bf16.mxu1 %v10775_v11  ;;  %8170 = vmatprep.subr.bf16.mxu0 %v10777_v52  ;;  %v6687_v11 = vld [vmem:[%s15525_s7 + $0x1dd0] sm:$0xff]  ;;  %v6680_v52 = vld [vmem:[%s15525_s7 + $0x1d98] sm:$0xff] }
 0x8ba   :  { %v10871_v7 = vcombine.high %v6679_v50, %v6687_v11  ;;  %v10870_v55 = vcombine.low %v6679_v50, %v6687_v11  ;;  %v10872_v56 = vcombine.low %v6680_v52, %v6688_v53  ;;  %v6514_v50 = vld [vmem:[%s15525_s7 + $0x1868] sm:$0xff] }
 0x8bc   :  { %8130 = vmatpush1.bf16.msra.mxu1 %v10774_v22  ;;  %8171 = vmatpush1.bf16.msra.mxu0 %v10776_v32  ;;  %v10873_v22 = vcombine.high %v6680_v52, %v6688_v53  ;;  %v6695_v32 = vld [vmem:[%s15525_s7 + $0x1e10] sm:$0xff] }
 0x8bd   :  { %8131 = vmatprep.subr.bf16.mxu1 %v10791_v34  ;;  %8172 = vmatprep.subr.bf16.mxu0 %v10793_v23  ;;  %v6703_v34 = vld [vmem:[%s15525_s7 + $0x1e50] sm:$0xff]  ;;  %v6696_v23 = vld [vmem:[%s15525_s7 + $0x1e18] sm:$0xff] }
 0x8be   :  { %v10887_v2 = vcombine.high %v6695_v32, %v6703_v34  ;;  %v10886_v62 = vcombine.low %v6695_v32, %v6703_v34  ;;  %v10888_v0 = vcombine.low %v6696_v23, %v6704_v26  ;;  %v6530_v32 = vld [vmem:[%s15525_s7 + $0x18e8] sm:$0xff] }
 0x8c0   :  { %8132 = vmatpush1.bf16.msra.mxu1 %v10790_v58  ;;  %8173 = vmatpush1.bf16.msra.mxu0 %v10792_v59  ;;  %v10889_v58 = vcombine.high %v6696_v23, %v6704_v26  ;;  %v6711_v59 = vld [vmem:[%s15525_s7 + $0x1e90] sm:$0xff] }
 0x8c1   :  { %8133 = vmatprep.subr.bf16.mxu1 %v10807_v1  ;;  %8174 = vmatprep.subr.bf16.mxu0 %v10809_v60  ;;  %v6719_v1 = vld [vmem:[%s15525_s7 + $0x1ed0] sm:$0xff]  ;;  %v6712_v60 = vld [vmem:[%s15525_s7 + $0x1e98] sm:$0xff] }
 0x8c2   :  { %v10903_v28 = vcombine.high %v6711_v59, %v6719_v1  ;;  %v10902_v13 = vcombine.low %v6711_v59, %v6719_v1  ;;  %v10904_v14 = vcombine.low %v6712_v60, %v6720_v61  ;;  %v6546_v59 = vld [vmem:[%s15525_s7 + $0x1968] sm:$0xff] }
 0x8c4   :  { %8134 = vmatpush1.bf16.msra.mxu1 %v10806_v31  ;;  %8175 = vmatpush1.bf16.msra.mxu0 %v10808_v51  ;;  %v10905_v31 = vcombine.high %v6712_v60, %v6720_v61  ;;  %v6727_v51 = vld [vmem:[%s15525_s7 + $0x1f10] sm:$0xff]  ;;  %v6553_v60 = vld [vmem:[%s15525_s7 + $0x19a0] sm:$0xff] }
 0x8c5   :  { %8135 = vmatprep.subr.bf16.mxu1 %v10823_v6  ;;  %8176 = vmatprep.subr.bf16.mxu0 %v10825_v12  ;;  %v6735_v6 = vld [vmem:[%s15525_s7 + $0x1f50] sm:$0xff]  ;;  %v6728_v12 = vld [vmem:[%s15525_s7 + $0x1f18] sm:$0xff] }
 0x8c6   :  { %v10919_v19 = vcombine.high %v6727_v51, %v6735_v6  ;;  %v10918_v46 = vcombine.low %v6727_v51, %v6735_v6  ;;  %v10920_v44 = vcombine.low %v6728_v12, %v6736_v43  ;;  %v6562_v51 = vld [vmem:[%s15525_s7 + $0x19e8] sm:$0xff] }
 0x8c8   :  { %8136 = vmatpush1.bf16.msra.mxu1 %v10822_v20  ;;  %8177 = vmatpush1.bf16.msra.mxu0 %v10824_v24  ;;  %v10921_v20 = vcombine.high %v6728_v12, %v6736_v43  ;;  %v6743_v24 = vld [vmem:[%s15525_s7 + $0x1f90] sm:$0xff]  ;;  %v6569_v12 = vld [vmem:[%s15525_s7 + $0x1a20] sm:$0xff] }
 0x8c9   :  { %8137 = vmatprep.subr.bf16.mxu1 %v10839_v30  ;;  %8178 = vmatprep.subr.bf16.mxu0 %v10841_v36  ;;  %v6751_v30 = vld [vmem:[%s15525_s7 + $0x1fd0] sm:$0xff]  ;;  %v6744_v36 = vld [vmem:[%s15525_s7 + $0x1f98] sm:$0xff] }
 0x8ca   :  { %v10935_v29 = vcombine.high %v6743_v24, %v6751_v30  ;;  %v10934_v11 = vcombine.low %v6743_v24, %v6751_v30  ;;  %v10936_v52 = vcombine.low %v6744_v36, %v6752_v45  ;;  %v6578_v24 = vld [vmem:[%s15525_s7 + $0x1a68] sm:$0xff] }
 0x8cc   :  { %8138 = vmatpush1.bf16.msra.mxu1 %v10838_v16  ;;  %8179 = vmatpush1.bf16.msra.mxu0 %v10840_v38  ;;  %v10937_v16 = vcombine.high %v6744_v36, %v6752_v45  ;;  %v6505_v38 = vld [vmem:[%s15525_s7 + $0x1820] sm:$0xff] }
 0x8cd   :  { %8139 = vmatprep.subr.bf16.mxu1 %v10855_v48  ;;  %8180 = vmatprep.subr.bf16.mxu0 %v10857_v5  ;;  %v6513_v48 = vld [vmem:[%s15525_s7 + $0x1860] sm:$0xff]  ;;  %v6506_v5 = vld [vmem:[%s15525_s7 + $0x1828] sm:$0xff] }
 0x8ce   :  { %v10699_v53 = vcombine.high %v6505_v38, %v6513_v48  ;;  %v10698_v34 = vcombine.low %v6505_v38, %v6513_v48  ;;  %v10700_v23 = vcombine.low %v6506_v5, %v6514_v50  ;;  %v6585_v36 = vld [vmem:[%s15525_s7 + $0x1aa0] sm:$0xff]  ;;  %v6594_v38 = vld [vmem:[%s15525_s7 + $0x1ae8] sm:$0xff] }
 0x8d0   :  { %8140 = vmatpush1.bf16.msra.mxu1 %v10854_v15  ;;  %8181 = vmatpush1.bf16.msra.mxu0 %v10856_v4  ;;  %v10701_v15 = vcombine.high %v6506_v5, %v6514_v50  ;;  %v6521_v4 = vld [vmem:[%s15525_s7 + $0x18a0] sm:$0xff] }
 0x8d1   :  { %8141 = vmatprep.subr.bf16.mxu1 %v10871_v7  ;;  %8182 = vmatprep.subr.bf16.mxu0 %v10873_v22  ;;  %v6529_v7 = vld [vmem:[%s15525_s7 + $0x18e0] sm:$0xff]  ;;  %v6522_v22 = vld [vmem:[%s15525_s7 + $0x18a8] sm:$0xff] }
 0x8d2   :  { %v10715_v26 = vcombine.high %v6521_v4, %v6529_v7  ;;  %v10714_v1 = vcombine.low %v6521_v4, %v6529_v7  ;;  %v10716_v61 = vcombine.low %v6522_v22, %v6530_v32  ;;  %v6601_v5 = vld [vmem:[%s15525_s7 + $0x1b20] sm:$0xff]  ;;  %v6610_v4 = vld [vmem:[%s15525_s7 + $0x1b68] sm:$0xff] }
 0x8d4   :  { %8142 = vmatpush1.bf16.msra.mxu1 %v10870_v55  ;;  %8183 = vmatpush1.bf16.msra.mxu0 %v10872_v56  ;;  %v10717_v55 = vcombine.high %v6522_v22, %v6530_v32  ;;  %v6537_v56 = vld [vmem:[%s15525_s7 + $0x1920] sm:$0xff] }
 0x8d5   :  { %8143 = vmatprep.subr.bf16.mxu1 %v10887_v2  ;;  %8184 = vmatprep.subr.bf16.mxu0 %v10889_v58  ;;  %v6545_v2 = vld [vmem:[%s15525_s7 + $0x1960] sm:$0xff]  ;;  %v6538_v58 = vld [vmem:[%s15525_s7 + $0x1928] sm:$0xff] }
 0x8d6   :  { %v10730_v6 = vcombine.low %v6537_v56, %v6545_v2  ;;  %v10732_v43 = vcombine.low %v6538_v58, %v6546_v59  ;;  %v6617_v22 = vld [vmem:[%s15525_s7 + $0x1ba0] sm:$0xff] }
 0x8d8   :  { %8144 = vmatpush1.bf16.msra.mxu1 %v10886_v62  ;;  %8185 = vmatpush1.bf16.msra.mxu0 %v10888_v0  ;;  %v10731_v62 = vcombine.high %v6537_v56, %v6545_v2  ;;  %v6561_v0 = vld [vmem:[%s15525_s7 + $0x19e0] sm:$0xff]  ;;  %v6626_v56 = vld [vmem:[%s15525_s7 + $0x1be8] sm:$0xff] }
 0x8d9   :  { %8145 = vmatprep.subr.bf16.mxu1 %v10903_v28  ;;  %8186 = vmatprep.subr.bf16.mxu0 %v10905_v31  ;;  %v10733_v28 = vcombine.high %v6538_v58, %v6546_v59  ;;  %v6554_v31 = vld [vmem:[%s15525_s7 + $0x19a8] sm:$0xff]  ;;  %v10746_v30 = vcombine.low %v6553_v60, %v6561_v0  ;;  %v6633_v58 = vld [vmem:[%s15525_s7 + $0x1c20] sm:$0xff] }
 0x8da   :  { %v10748_v45 = vcombine.low %v6554_v31, %v6562_v51 }
 0x8dc   :  { %8146 = vmatpush1.bf16.msra.mxu1 %v10902_v13  ;;  %8187 = vmatpush1.bf16.msra.mxu0 %v10904_v14  ;;  %v10747_v13 = vcombine.high %v6553_v60, %v6561_v0  ;;  %v6577_v14 = vld [vmem:[%s15525_s7 + $0x1a60] sm:$0xff]  ;;  %v6642_v0 = vld [vmem:[%s15525_s7 + $0x1c68] sm:$0xff] }
 0x8dd   :  { %8147 = vmatprep.subr.bf16.mxu1 %v10919_v19  ;;  %8188 = vmatprep.subr.bf16.mxu0 %v10921_v20  ;;  %v10749_v19 = vcombine.high %v6554_v31, %v6562_v51  ;;  %v6570_v20 = vld [vmem:[%s15525_s7 + $0x1a28] sm:$0xff]  ;;  %v10762_v48 = vcombine.low %v6569_v12, %v6577_v14  ;;  %v6641_v60 = vld [vmem:[%s15525_s7 + $0x1c60] sm:$0xff] }
 0x8de   :  { %v10764_v50 = vcombine.low %v6570_v20, %v6578_v24  ;;  %v6649_v31 = vld [vmem:[%s15525_s7 + $0x1ca0] sm:$0xff] }
 0x8e0   :  { %8148 = vmatpush1.bf16.msra.mxu1 %v10918_v46  ;;  %8189 = vmatpush1.bf16.msra.mxu0 %v10920_v44  ;;  %v10763_v46 = vcombine.high %v6569_v12, %v6577_v14  ;;  %v6593_v44 = vld [vmem:[%s15525_s7 + $0x1ae0] sm:$0xff]  ;;  %v6658_v14 = vld [vmem:[%s15525_s7 + $0x1ce8] sm:$0xff] }
 0x8e1   :  { %8149 = vmatprep.subr.bf16.mxu1 %v10935_v29  ;;  %8190 = vmatprep.subr.bf16.mxu0 %v10937_v16  ;;  %v10765_v29 = vcombine.high %v6570_v20, %v6578_v24  ;;  %v6586_v16 = vld [vmem:[%s15525_s7 + $0x1aa8] sm:$0xff]  ;;  %v10778_v7 = vcombine.low %v6585_v36, %v6593_v44  ;;  %v6657_v12 = vld [vmem:[%s15525_s7 + $0x1ce0] sm:$0xff] }
 0x8e2   :  { %v10780_v32 = vcombine.low %v6586_v16, %v6594_v38  ;;  %v6665_v20 = vld [vmem:[%s15525_s7 + $0x1d20] sm:$0xff] }
 0x8e4   :  { %8150 = vmatpush1.bf16.msra.mxu1 %v10934_v11  ;;  %8191 = vmatpush1.bf16.msra.mxu0 %v10936_v52  ;;  %v10779_v11 = vcombine.high %v6585_v36, %v6593_v44  ;;  %v6609_v52 = vld [vmem:[%s15525_s7 + $0x1b60] sm:$0xff]  ;;  %v6674_v44 = vld [vmem:[%s15525_s7 + $0x1d68] sm:$0xff] }
 0x8e5   :  { %8201 = vmatprep.subr.bf16.mxu1 %v10699_v53  ;;  %8242 = vmatprep.subr.bf16.mxu0 %v10701_v15  ;;  %v10781_v53 = vcombine.high %v6586_v16, %v6594_v38  ;;  %v6602_v15 = vld [vmem:[%s15525_s7 + $0x1b28] sm:$0xff]  ;;  %v10794_v2 = vcombine.low %v6601_v5, %v6609_v52  ;;  %v6673_v36 = vld [vmem:[%s15525_s7 + $0x1d60] sm:$0xff] }
 0x8e6   :  { %v10796_v59 = vcombine.low %v6602_v15, %v6610_v4  ;;  %v6681_v16 = vld [vmem:[%s15525_s7 + $0x1da0] sm:$0xff] }
 0x8e7   :  { %8152 = vmatmul.mubr.bf16.vlgmr.msra.gmra.mrb[76].mxu1 %v14484_v3  ;;  %8193 = vmatmul.mubr.bf16.vlgmr.msra.gmra.mrb[80].mxu0 %v14484_v3 }
 0x8e8   :  { %8202 = vmatpush1.bf16.msra.mxu1 %v10698_v34  ;;  %8233 = vmatprep.mubr.bf16.mxu1 %v14482_v54  ;;  %v10795_v34 = vcombine.high %v6601_v5, %v6609_v52  ;;  %v6689_v5 = vld [vmem:[%s15525_s7 + $0x1de0] sm:$0xff]  ;;  %v6690_v52 = vld [vmem:[%s15525_s7 + $0x1de8] sm:$0xff] }
 0x8e9   :  { %8243 = vmatpush1.bf16.msra.mxu0 %v10700_v23  ;;  %8274 = vmatprep.mubr.bf16.mxu0 %v14482_v54  ;;  %v6625_v23 = vld [vmem:[%s15525_s7 + $0x1be0] sm:$0xff] }
 0x8ea   :  { %8203 = vmatprep.subr.bf16.mxu1 %v10715_v26  ;;  %8244 = vmatprep.subr.bf16.mxu0 %v10717_v55  ;;  %v10797_v26 = vcombine.high %v6602_v15, %v6610_v4  ;;  %v6618_v55 = vld [vmem:[%s15525_s7 + $0x1ba8] sm:$0xff]  ;;  %v6697_v15 = vld [vmem:[%s15525_s7 + $0x1e20] sm:$0xff] }
 0x8eb   :  { %v10812_v51 = vcombine.low %v6618_v55, %v6626_v56 }
 0x8ec   :  { %8204 = vmatpush1.bf16.msra.mxu1 %v10714_v1  ;;  %v10811_v1 = vcombine.high %v6617_v22, %v6625_v23 }
 0x8ed   :  { %8245 = vmatpush1.bf16.msra.mxu0 %v10716_v61  ;;  %8205 = vmatprep.subr.bf16.mxu1 %v10731_v62  ;;  %v10813_v61 = vcombine.high %v6618_v55, %v6626_v56  ;;  %v6634_v62 = vld [vmem:[%s15525_s7 + $0x1c28] sm:$0xff]  ;;  %v6713_v55 = vld [vmem:[%s15525_s7 + $0x1ea0] sm:$0xff] }
 0x8ee   :  { %8246 = vmatprep.subr.bf16.mxu0 %v10733_v28  ;;  %v10810_v28 = vcombine.low %v6617_v22, %v6625_v23  ;;  %v10828_v24 = vcombine.low %v6634_v62, %v6642_v0  ;;  %v6705_v22 = vld [vmem:[%s15525_s7 + $0x1e60] sm:$0xff]  ;;  %v6706_v23 = vld [vmem:[%s15525_s7 + $0x1e68] sm:$0xff] }
 0x8f0   :  { %8206 = vmatpush1.bf16.msra.mxu1 %v10730_v6  ;;  %v10827_v6 = vcombine.high %v6633_v58, %v6641_v60 }
 0x8f1   :  { %8247 = vmatpush1.bf16.msra.mxu0 %v10732_v43  ;;  %8207 = vmatprep.subr.bf16.mxu1 %v10747_v13  ;;  %v10829_v43 = vcombine.high %v6634_v62, %v6642_v0  ;;  %v6650_v13 = vld [vmem:[%s15525_s7 + $0x1ca8] sm:$0xff]  ;;  %v6729_v62 = vld [vmem:[%s15525_s7 + $0x1f20] sm:$0xff] }
 0x8f2   :  { %8248 = vmatprep.subr.bf16.mxu0 %v10749_v19  ;;  %v10826_v19 = vcombine.low %v6633_v58, %v6641_v60  ;;  %v10844_v38 = vcombine.low %v6650_v13, %v6658_v14  ;;  %v6721_v58 = vld [vmem:[%s15525_s7 + $0x1ee0] sm:$0xff]  ;;  %v6722_v60 = vld [vmem:[%s15525_s7 + $0x1ee8] sm:$0xff] }
 0x8f4   :  { %8208 = vmatpush1.bf16.msra.mxu1 %v10746_v30  ;;  %v10843_v30 = vcombine.high %v6649_v31, %v6657_v12 }
 0x8f5   :  { %8249 = vmatpush1.bf16.msra.mxu0 %v10748_v45  ;;  %8209 = vmatprep.subr.bf16.mxu1 %v10763_v46  ;;  %v10845_v45 = vcombine.high %v6650_v13, %v6658_v14  ;;  %v6666_v46 = vld [vmem:[%s15525_s7 + $0x1d28] sm:$0xff]  ;;  %v6745_v13 = vld [vmem:[%s15525_s7 + $0x1fa0] sm:$0xff] }
 0x8f6   :  { %8250 = vmatprep.subr.bf16.mxu0 %v10765_v29  ;;  %v10842_v29 = vcombine.low %v6649_v31, %v6657_v12  ;;  %v10860_v4 = vcombine.low %v6666_v46, %v6674_v44  ;;  %v6737_v31 = vld [vmem:[%s15525_s7 + $0x1f60] sm:$0xff]  ;;  %v6738_v12 = vld [vmem:[%s15525_s7 + $0x1f68] sm:$0xff] }
 0x8f8   :  { %8210 = vmatpush1.bf16.msra.mxu1 %v10762_v48  ;;  %v10859_v48 = vcombine.high %v6665_v20, %v6673_v36 }
 0x8f9   :  { %8251 = vmatpush1.bf16.msra.mxu0 %v10764_v50  ;;  %8211 = vmatprep.subr.bf16.mxu1 %v10779_v11  ;;  %v10861_v50 = vcombine.high %v6666_v46, %v6674_v44  ;;  %v6682_v11 = vld [vmem:[%s15525_s7 + $0x1da8] sm:$0xff]  ;;  %v6507_v46 = vld [vmem:[%s15525_s7 + $0x1830] sm:$0xff] }
 0x8fa   :  { %8252 = vmatprep.subr.bf16.mxu0 %v10781_v53  ;;  %v10858_v53 = vcombine.low %v6665_v20, %v6673_v36  ;;  %v10876_v56 = vcombine.low %v6682_v11, %v6690_v52  ;;  %v6753_v20 = vld [vmem:[%s15525_s7 + $0x1fe0] sm:$0xff]  ;;  %v6754_v36 = vld [vmem:[%s15525_s7 + $0x1fe8] sm:$0xff]  ;;  %v6515_v44 = vld [vmem:[%s15525_s7 + $0x1870] sm:$0xff] }
 0x8fc   :  { %8212 = vmatpush1.bf16.msra.mxu1 %v10778_v7  ;;  %v10875_v7 = vcombine.high %v6681_v16, %v6689_v5 }
 0x8fd   :  { %8253 = vmatpush1.bf16.msra.mxu0 %v10780_v32  ;;  %8213 = vmatprep.subr.bf16.mxu1 %v10795_v34  ;;  %v10877_v32 = vcombine.high %v6682_v11, %v6690_v52  ;;  %v6698_v34 = vld [vmem:[%s15525_s7 + $0x1e28] sm:$0xff]  ;;  %v10703_v52 = vcombine.high %v6507_v46, %v6515_v44 }
 0x8fe   :  { %8254 = vmatprep.subr.bf16.mxu0 %v10797_v26  ;;  %v10874_v26 = vcombine.low %v6681_v16, %v6689_v5  ;;  %v10892_v0 = vcombine.low %v6698_v34, %v6706_v23  ;;  %v10939_v16 = vcombine.high %v6745_v13, %v6753_v20 }
 0x900   :  { %8214 = vmatpush1.bf16.msra.mxu1 %v10794_v2  ;;  %v10891_v2 = vcombine.high %v6697_v15, %v6705_v22 }
 0x901   :  { %8255 = vmatpush1.bf16.msra.mxu0 %v10796_v59  ;;  %8215 = vmatprep.subr.bf16.mxu1 %v10811_v1  ;;  %v10893_v59 = vcombine.high %v6698_v34, %v6706_v23  ;;  %v6714_v1 = vld [vmem:[%s15525_s7 + $0x1ea8] sm:$0xff]  ;;  %v6539_v34 = vld [vmem:[%s15525_s7 + $0x1930] sm:$0xff] }
 0x902   :  { %8256 = vmatprep.subr.bf16.mxu0 %v10813_v61  ;;  %v10890_v61 = vcombine.low %v6697_v15, %v6705_v22  ;;  %v10908_v14 = vcombine.low %v6714_v1, %v6722_v60  ;;  %v6531_v15 = vld [vmem:[%s15525_s7 + $0x18f0] sm:$0xff]  ;;  %v6532_v22 = vld [vmem:[%s15525_s7 + $0x18f8] sm:$0xff] }
 0x903   :  { %v6547_v23 = vld [vmem:[%s15525_s7 + $0x1970] sm:$0xff] }
 0x904   :  { %8216 = vmatpush1.bf16.msra.mxu1 %v10810_v28  ;;  %v10907_v28 = vcombine.high %v6713_v55, %v6721_v58 }
 0x905   :  { %8257 = vmatpush1.bf16.msra.mxu0 %v10812_v51  ;;  %8217 = vmatprep.subr.bf16.mxu1 %v10827_v6  ;;  %v10909_v51 = vcombine.high %v6714_v1, %v6722_v60  ;;  %v6730_v6 = vld [vmem:[%s15525_s7 + $0x1f28] sm:$0xff]  ;;  %v6555_v1 = vld [vmem:[%s15525_s7 + $0x19b0] sm:$0xff] }
 0x906   :  { %8258 = vmatprep.subr.bf16.mxu0 %v10829_v43  ;;  %v10906_v43 = vcombine.low %v6713_v55, %v6721_v58  ;;  %v6540_v55 = vld [vmem:[%s15525_s7 + $0x1938] sm:$0xff]  ;;  %v6563_v60 = vld [vmem:[%s15525_s7 + $0x19f0] sm:$0xff] }
 0x908   :  { %8218 = vmatpush1.bf16.msra.mxu1 %v10826_v19  ;;  %v10923_v19 = vcombine.high %v6729_v62, %v6737_v31 }
 0x909   :  { %8259 = vmatpush1.bf16.msra.mxu0 %v10828_v24  ;;  %8219 = vmatprep.subr.bf16.mxu1 %v10843_v30  ;;  %v10925_v24 = vcombine.high %v6730_v6, %v6738_v12  ;;  %v6746_v30 = vld [vmem:[%s15525_s7 + $0x1fa8] sm:$0xff] }
 0x90a   :  { %8260 = vmatprep.subr.bf16.mxu0 %v10845_v45  ;;  %v10922_v45 = vcombine.low %v6729_v62, %v6737_v31  ;;  %v10941_v5 = vcombine.high %v6746_v30, %v6754_v36  ;;  %v10940_v11 = vcombine.low %v6746_v30, %v6754_v36  ;;  %v10735_v62 = vcombine.high %v6539_v34, %v6547_v23  ;;  %v6595_v30 = vld [vmem:[%s15525_s7 + $0x1af0] sm:$0xff] }
 0x90c   :  { %8220 = vmatpush1.bf16.msra.mxu1 %v10842_v29  ;;  %v10924_v29 = vcombine.low %v6730_v6, %v6738_v12  ;;  %v6571_v6 = vld [vmem:[%s15525_s7 + $0x1a30] sm:$0xff] }
 0x90d   :  { %8261 = vmatpush1.bf16.msra.mxu0 %v10844_v38  ;;  %8221 = vmatprep.subr.bf16.mxu1 %v10859_v48  ;;  %v6508_v38 = vld [vmem:[%s15525_s7 + $0x1838] sm:$0xff]  ;;  %v6579_v12 = vld [vmem:[%s15525_s7 + $0x1a70] sm:$0xff] }
 0x90e   :  { %8262 = vmatprep.subr.bf16.mxu0 %v10861_v50  ;;  %v6516_v48 = vld [vmem:[%s15525_s7 + $0x1878] sm:$0xff]  ;;  %v10938_v50 = vcombine.low %v6745_v13, %v6753_v20  ;;  %v10751_v13 = vcombine.high %v6555_v1, %v6563_v60  ;;  %v10750_v20 = vcombine.low %v6555_v1, %v6563_v60 }
 0x90f   :  { %v6636_v60 = vld [vmem:[%s15525_s7 + $0x1c38] sm:$0xff] }
 0x910   :  { %8222 = vmatpush1.bf16.msra.mxu1 %v10858_v53  ;;  %v6523_v53 = vld [vmem:[%s15525_s7 + $0x18b0] sm:$0xff] }
 0x911   :  { %8263 = vmatpush1.bf16.msra.mxu0 %v10860_v4  ;;  %8223 = vmatprep.subr.bf16.mxu1 %v10875_v7  ;;  %v10705_v4 = vcombine.high %v6508_v38, %v6516_v48  ;;  %v6524_v7 = vld [vmem:[%s15525_s7 + $0x18b8] sm:$0xff] }
 0x912   :  { %8264 = vmatprep.subr.bf16.mxu0 %v10877_v32  ;;  %v10702_v32 = vcombine.low %v6507_v46, %v6515_v44  ;;  %v10721_v58 = vcombine.high %v6524_v7, %v6532_v22  ;;  %v6588_v46 = vld [vmem:[%s15525_s7 + $0x1ab8] sm:$0xff] }
 0x913   :  { %v6596_v44 = vld [vmem:[%s15525_s7 + $0x1af8] sm:$0xff] }
 0x914   :  { %8224 = vmatpush1.bf16.msra.mxu1 %v10874_v26  ;;  %v10704_v26 = vcombine.low %v6508_v38, %v6516_v48  ;;  %v6603_v38 = vld [vmem:[%s15525_s7 + $0x1b30] sm:$0xff] }
 0x915   :  { %8265 = vmatpush1.bf16.msra.mxu0 %v10876_v56  ;;  %8225 = vmatprep.subr.bf16.mxu1 %v10891_v2  ;;  %v6548_v56 = vld [vmem:[%s15525_s7 + $0x1978] sm:$0xff]  ;;  %v10719_v2 = vcombine.high %v6523_v53, %v6531_v15  ;;  %v6611_v48 = vld [vmem:[%s15525_s7 + $0x1b70] sm:$0xff] }
 0x916   :  { %8266 = vmatprep.subr.bf16.mxu0 %v10893_v59  ;;  %v10718_v59 = vcombine.low %v6523_v53, %v6531_v15  ;;  %v10737_v31 = vcombine.high %v6540_v55, %v6548_v56  ;;  %v10785_v53 = vcombine.high %v6588_v46, %v6596_v44 }
 0x918   :  { %8226 = vmatpush1.bf16.msra.mxu1 %v10890_v61  ;;  %v10720_v61 = vcombine.low %v6524_v7, %v6532_v22  ;;  %v10784_v7 = vcombine.low %v6588_v46, %v6596_v44  ;;  %v10799_v22 = vcombine.high %v6603_v38, %v6611_v48 }
 0x919   :  { %8267 = vmatpush1.bf16.msra.mxu0 %v10892_v0  ;;  %8227 = vmatprep.subr.bf16.mxu1 %v10907_v28  ;;  %v6556_v0 = vld [vmem:[%s15525_s7 + $0x19b8] sm:$0xff] }
 0x91a   :  { %8268 = vmatprep.subr.bf16.mxu0 %v10909_v51  ;;  %v6564_v28 = vld [vmem:[%s15525_s7 + $0x19f8] sm:$0xff]  ;;  %v10734_v51 = vcombine.low %v6539_v34, %v6547_v23  ;;  %v6627_v34 = vld [vmem:[%s15525_s7 + $0x1bf0] sm:$0xff] }
 0x91b   :  { %v10752_v36 = vcombine.low %v6556_v0, %v6564_v28  ;;  %v6620_v23 = vld [vmem:[%s15525_s7 + $0x1bb8] sm:$0xff] }
 0x91c   :  { %8228 = vmatpush1.bf16.msra.mxu1 %v10906_v43  ;;  %v10736_v43 = vcombine.low %v6540_v55, %v6548_v56  ;;  %v10798_v55 = vcombine.low %v6603_v38, %v6611_v48  ;;  %v6691_v38 = vld [vmem:[%s15525_s7 + $0x1df0] sm:$0xff]  ;;  %v6684_v48 = vld [vmem:[%s15525_s7 + $0x1db8] sm:$0xff] }
 0x91d   :  { %8269 = vmatpush1.bf16.msra.mxu0 %v10908_v14  ;;  %8229 = vmatprep.subr.bf16.mxu1 %v10923_v19  ;;  %v6580_v14 = vld [vmem:[%s15525_s7 + $0x1a78] sm:$0xff]  ;;  %v10753_v19 = vcombine.high %v6556_v0, %v6564_v28 }
 0x91e   :  { %8270 = vmatprep.subr.bf16.mxu0 %v10925_v24  ;;  %v6587_v24 = vld [vmem:[%s15525_s7 + $0x1ab0] sm:$0xff] }
 0x91f   :  { %v10782_v15 = vcombine.low %v6587_v24, %v6595_v30 }
 0x920   :  { %8230 = vmatpush1.bf16.msra.mxu1 %v10922_v45  ;;  %v10767_v45 = vcombine.high %v6571_v6, %v6579_v12 }
 0x921   :  { %8271 = vmatpush1.bf16.msra.mxu0 %v10924_v29  ;;  %8231 = vmatprep.subr.bf16.mxu1 %v10939_v16  ;;  %v10766_v16 = vcombine.low %v6571_v6, %v6579_v12  ;;  %v6652_v12 = vld [vmem:[%s15525_s7 + $0x1cb8] sm:$0xff] }
 0x922   :  { %8272 = vmatprep.subr.bf16.mxu0 %v10941_v5 }
 0x924   :  { %8232 = vmatpush1.bf16.msra.mxu1 %v10938_v50  ;;  %v10783_v50 = vcombine.high %v6587_v24, %v6595_v30  ;;  %v6675_v24 = vld [vmem:[%s15525_s7 + $0x1d70] sm:$0xff]  ;;  %v6668_v30 = vld [vmem:[%s15525_s7 + $0x1d38] sm:$0xff] }
 0x925   :  { %8273 = vmatpush1.bf16.msra.mxu0 %v10940_v11  ;;  %8283 = vmatprep.subr.bf16.mxu1 %v10703_v52  ;;  %v6604_v11 = vld [vmem:[%s15525_s7 + $0x1b38] sm:$0xff] }
 0x926   :  { %8324 = vmatprep.subr.bf16.mxu0 %v10705_v4  ;;  %v6612_v52 = vld [vmem:[%s15525_s7 + $0x1b78] sm:$0xff]  ;;  %v6619_v4 = vld [vmem:[%s15525_s7 + $0x1bb0] sm:$0xff] }
 0x927   :  { %8234 = vmatmul.mubr.bf16.vlgmr.msra.gmra.mrb[80].mxu1 %v14484_v3  ;;  %v10800_v56 = vcombine.low %v6604_v11, %v6612_v52 }
 0x928   :  { %8275 = vmatmul.mubr.bf16.vlgmr.msra.gmra.mrb[84].mxu0 %v14484_v3  ;;  %8284 = vmatpush1.bf16.msra.mxu1 %v10702_v32  ;;  %v10801_v32 = vcombine.high %v6604_v11, %v6612_v52 }
 0x929   :  { %8315 = vmatprep.mubr.bf16.mxu1 %v14482_v54  ;;  %8325 = vmatpush1.bf16.msra.mxu0 %v10704_v26  ;;  %v6628_v26 = vld [vmem:[%s15525_s7 + $0x1bf8] sm:$0xff] }
 0x92a   :  { %8356 = vmatprep.mubr.bf16.mxu0 %v14482_v54  ;;  %8285 = vmatprep.subr.bf16.mxu1 %v10719_v2  ;;  %v6572_v54 = vld [vmem:[%s15525_s7 + $0x1a38] sm:$0xff]  ;;  %v10815_v2 = vcombine.high %v6619_v4, %v6627_v34  ;;  %v10817_v1 = vcombine.high %v6620_v23, %v6628_v26  ;;  %v10816_v0 = vcombine.low %v6620_v23, %v6628_v26 }
 0x92b   :  { %8326 = vmatprep.subr.bf16.mxu0 %v10721_v58  ;;  %v10769_v29 = vcombine.high %v6572_v54, %v6580_v14  ;;  %v10768_v5 = vcombine.low %v6572_v54, %v6580_v14  ;;  %v6635_v58 = vld [vmem:[%s15525_s7 + $0x1c30] sm:$0xff] }
 0x92c   :  { %8286 = vmatpush1.bf16.msra.mxu1 %v10718_v59  ;;  %v6643_v59 = vld [vmem:[%s15525_s7 + $0x1c70] sm:$0xff] }
 0x92d   :  { %8327 = vmatpush1.bf16.msra.mxu0 %v10720_v61  ;;  %8287 = vmatprep.subr.bf16.mxu1 %v10735_v62  ;;  %v6644_v61 = vld [vmem:[%s15525_s7 + $0x1c78] sm:$0xff]  ;;  %v10814_v62 = vcombine.low %v6619_v4, %v6627_v34  ;;  %v10831_v28 = vcombine.high %v6635_v58, %v6643_v59  ;;  %v6707_v4 = vld [vmem:[%s15525_s7 + $0x1e70] sm:$0xff] }
 0x92e   :  { %8328 = vmatprep.subr.bf16.mxu0 %v10737_v31  ;;  %v6651_v31 = vld [vmem:[%s15525_s7 + $0x1cb0] sm:$0xff]  ;;  %v10833_v6 = vcombine.high %v6636_v60, %v6644_v61  ;;  %v10832_v54 = vcombine.low %v6636_v60, %v6644_v61 }
 0x930   :  { %8288 = vmatpush1.bf16.msra.mxu1 %v10734_v51  ;;  %v6659_v51 = vld [vmem:[%s15525_s7 + $0x1cf0] sm:$0xff] }
 0x931   :  { %8329 = vmatpush1.bf16.msra.mxu0 %v10736_v43  ;;  %8289 = vmatprep.subr.bf16.mxu1 %v10751_v13  ;;  %v6660_v43 = vld [vmem:[%s15525_s7 + $0x1cf8] sm:$0xff]  ;;  %v10830_v13 = vcombine.low %v6635_v58, %v6643_v59  ;;  %v10847_v14 = vcombine.high %v6651_v31, %v6659_v51 }
 0x932   :  { %8330 = vmatprep.subr.bf16.mxu0 %v10753_v19  ;;  %v10849_v19 = vcombine.high %v6652_v12, %v6660_v43  ;;  %v10848_v46 = vcombine.low %v6652_v12, %v6660_v43  ;;  %v6724_v58 = vld [vmem:[%s15525_s7 + $0x1ef8] sm:$0xff] }
 0x934   :  { %8290 = vmatpush1.bf16.msra.mxu1 %v10750_v20  ;;  %v6667_v20 = vld [vmem:[%s15525_s7 + $0x1d30] sm:$0xff] }
 0x935   :  { %8331 = vmatpush1.bf16.msra.mxu0 %v10752_v36  ;;  %8291 = vmatprep.subr.bf16.mxu1 %v10767_v45  ;;  %v6676_v36 = vld [vmem:[%s15525_s7 + $0x1d78] sm:$0xff]  ;;  %v10846_v45 = vcombine.low %v6651_v31, %v6659_v51  ;;  %v10863_v44 = vcombine.high %v6667_v20, %v6675_v24 }
 0x936   :  { %8332 = vmatprep.subr.bf16.mxu0 %v10769_v29  ;;  %v10865_v29 = vcombine.high %v6668_v30, %v6676_v36  ;;  %v10864_v11 = vcombine.low %v6668_v30, %v6676_v36  ;;  %v6740_v31 = vld [vmem:[%s15525_s7 + $0x1f78] sm:$0xff] }
 0x938   :  { %8292 = vmatpush1.bf16.msra.mxu1 %v10766_v16  ;;  %v6683_v16 = vld [vmem:[%s15525_s7 + $0x1db0] sm:$0xff] }
 0x939   :  { %8333 = vmatpush1.bf16.msra.mxu0 %v10768_v5  ;;  %8293 = vmatprep.subr.bf16.mxu1 %v10783_v50  ;;  %v6692_v5 = vld [vmem:[%s15525_s7 + $0x1df8] sm:$0xff]  ;;  %v10862_v50 = vcombine.low %v6667_v20, %v6675_v24  ;;  %v10879_v52 = vcombine.high %v6683_v16, %v6691_v38 }
 0x93a   :  { %8334 = vmatprep.subr.bf16.mxu0 %v10785_v53  ;;  %v10881_v53 = vcombine.high %v6684_v48, %v6692_v5  ;;  %v10880_v34 = vcombine.low %v6684_v48, %v6692_v5  ;;  %v11362_v48 = vld [vmem:[%s15528_s9 + $0x48] sm:$0xff]  }
 0x93b   :  { %v11363_v5 = vld [vmem:[%s15528_s9 + $0xc8] sm:$0xff]  }
 0x93c   :  { %8294 = vmatpush1.bf16.msra.mxu1 %v10782_v15  ;;  %v6699_v15 = vld [vmem:[%s15525_s7 + $0x1e30] sm:$0xff] }
 0x93d   :  { %8335 = vmatpush1.bf16.msra.mxu0 %v10784_v7  ;;  %8295 = vmatprep.subr.bf16.mxu1 %v10799_v22  ;;  %v6700_v7 = vld [vmem:[%s15525_s7 + $0x1e38] sm:$0xff]  ;;  %v10895_v23 = vcombine.high %v6699_v15, %v6707_v4  ;;  %v10894_v59 = vcombine.low %v6699_v15, %v6707_v4  ;;  %v11369_v15 = vld [vmem:[%s15528_s9 + $0x90] sm:$0xff]  }
 0x93e   :  { %8336 = vmatprep.subr.bf16.mxu0 %v10801_v32  ;;  %v6708_v22 = vld [vmem:[%s15525_s7 + $0x1e78] sm:$0xff]  ;;  %v10878_v32 = vcombine.low %v6683_v16, %v6691_v38  ;;  %v11360_v16 = vld [vmem:[%s15528_s9] sm:$0xff]  }
 0x93f   :  { %v10897_v26 = vcombine.high %v6700_v7, %v6708_v22  ;;  %v10896_v60 = vcombine.low %v6700_v7, %v6708_v22  ;;  %v11361_v38 = vld [vmem:[%s15528_s9 + $0x80] sm:$0xff]   ;;  %v11370_v4 = vld [vmem:[%s15528_s9 + $0x58] sm:$0xff]  }
 0x940   :  { %8296 = vmatpush1.bf16.msra.mxu1 %v10798_v55  ;;  %v6715_v55 = vld [vmem:[%s15525_s7 + $0x1eb0] sm:$0xff]  ;;  %v11371_v7 = vld [vmem:[%s15528_s9 + $0xd8] sm:$0xff]  }
 0x941   :  { %8337 = vmatpush1.bf16.msra.mxu0 %v10800_v56  ;;  %8297 = vmatprep.subr.bf16.mxu1 %v10815_v2  ;;  %v6723_v56 = vld [vmem:[%s15525_s7 + $0x1ef0] sm:$0xff]  ;;  %v6716_v2 = vld [vmem:[%s15525_s7 + $0x1eb8] sm:$0xff] }
 0x942   :  { %8338 = vmatprep.subr.bf16.mxu0 %v10817_v1  ;;  %v6731_v1 = vld [vmem:[%s15525_s7 + $0x1f30] sm:$0xff]  ;;  %v10911_v61 = vcombine.high %v6715_v55, %v6723_v56  ;;  %v10910_v51 = vcombine.low %v6715_v55, %v6723_v56  ;;  %v11372_v22 = vld [vmem:[%s15528_s9 + $0x18] sm:$0xff]   ;;  %v11377_v55 = vld [vmem:[%s15528_s9 + $0xa0] sm:$0xff]  }
 0x943   :  { %v11378_v56 = vld [vmem:[%s15528_s9 + $0x68] sm:$0xff]  }
 0x944   :  { %8298 = vmatpush1.bf16.msra.mxu1 %v10814_v62  ;;  %v10913_v62 = vcombine.high %v6716_v2, %v6724_v58 }
 0x945   :  { %8339 = vmatpush1.bf16.msra.mxu0 %v10816_v0  ;;  %8299 = vmatprep.subr.bf16.mxu1 %v10831_v28  ;;  %v6739_v0 = vld [vmem:[%s15525_s7 + $0x1f70] sm:$0xff]  ;;  %v6732_v28 = vld [vmem:[%s15525_s7 + $0x1f38] sm:$0xff] }
 0x946   :  { %8340 = vmatprep.subr.bf16.mxu0 %v10833_v6  ;;  %v10912_v6 = vcombine.low %v6716_v2, %v6724_v58  ;;  %v10927_v12 = vcombine.high %v6731_v1, %v6739_v0  ;;  %v10929_v43 = vcombine.high %v6732_v28, %v6740_v31  ;;  %v10926_v20 = vcombine.low %v6731_v1, %v6739_v0  ;;  %v15120_v2 = vld [vmem:[%s15529_s8] sm:$0xff]  ;;  %v11382_v0 = vld [vmem:[%s15528_s9 + $0x70] sm:$0xff]  }
 0x947   :  { %v10928_v24 = vcombine.low %v6732_v28, %v6740_v31  ;;  %v8395_v58 = vsub.s32 2, %v11799_v18  ;;  %v8399_v1 = vsub.s32 3, %v11799_v18 }
 0x948   :  { %8300 = vmatpush1.bf16.msra.mxu1 %v10830_v13  ;;  %v6747_v13 = vld [vmem:[%s15525_s7 + $0x1fb0] sm:$0xff] }
 0x949   :  { %8341 = vmatpush1.bf16.msra.mxu0 %v10832_v54  ;;  %8301 = vmatprep.subr.bf16.mxu1 %v10847_v14  ;;  %v6755_v54 = vld [vmem:[%s15525_s7 + $0x1ff0] sm:$0xff]  ;;  %v6748_v14 = vld [vmem:[%s15525_s7 + $0x1fb8] sm:$0xff] }
 0x94a   :  { %8342 = vmatprep.subr.bf16.mxu0 %v10849_v19  ;;  %v6756_v19 = vld [vmem:[%s15525_s7 + $0x1ff8] sm:$0xff]  ;;  %v10943_v30 = vcombine.high %v6747_v13, %v6755_v54 }
 0x94b   :  { %v10945_v36 = vcombine.high %v6748_v14, %v6756_v19 }
 0x94c   :  { %8302 = vmatpush1.bf16.msra.mxu1 %v10846_v45  ;;  %v10942_v45 = vcombine.low %v6747_v13, %v6755_v54 }
 0x94d   :  { %8343 = vmatpush1.bf16.msra.mxu0 %v10848_v46  ;;  %8303 = vmatprep.subr.bf16.mxu1 %v10863_v44  ;;  %v10944_v46 = vcombine.low %v6748_v14, %v6756_v19  ;;  %v11358_v44 = vld [vmem:[%s15528_s9 + $0x40] sm:$0xff]  }
 0x94e   :  { %8344 = vmatprep.subr.bf16.mxu0 %v10865_v29  ;;  %v11359_v29 = vld [vmem:[%s15528_s9 + $0xc0] sm:$0xff]  }
 0x950   :  { %8304 = vmatpush1.bf16.msra.mxu1 %v10862_v50  ;;  %v11364_v50 = vld [vmem:[%s15528_s9 + $0x8] sm:$0xff]  }
 0x951   :  { %8345 = vmatpush1.bf16.msra.mxu0 %v10864_v11  ;;  %8305 = vmatprep.subr.bf16.mxu1 %v10879_v52  ;;  %v11365_v11 = vld [vmem:[%s15528_s9 + $0x88] sm:$0xff]   ;;  %v11366_v52 = vld [vmem:[%s15528_s9 + $0x50] sm:$0xff]  }
 0x952   :  { %8346 = vmatprep.subr.bf16.mxu0 %v10881_v53  ;;  %v11368_v53 = vld [vmem:[%s15528_s9 + $0x10] sm:$0xff]  }
 0x954   :  { %8306 = vmatpush1.bf16.msra.mxu1 %v10878_v32  ;;  %v11373_v32 = vld [vmem:[%s15528_s9 + $0x98] sm:$0xff]  }
 0x955   :  { %8347 = vmatpush1.bf16.msra.mxu0 %v10880_v34  ;;  %8307 = vmatprep.subr.bf16.mxu1 %v10895_v23  ;;  %v11374_v34 = vld [vmem:[%s15528_s9 + $0x60] sm:$0xff]  }
 0x956   :  { %8348 = vmatprep.subr.bf16.mxu0 %v10897_v26  ;;  %v11375_v23 = vld [vmem:[%s15528_s9 + $0xe0] sm:$0xff]  }
 0x957   :  { %v11376_v26 = vld [vmem:[%s15528_s9 + $0x20] sm:$0xff]  }
 0x958   :  { %8308 = vmatpush1.bf16.msra.mxu1 %v10894_v59  ;;  %v11379_v59 = vld [vmem:[%s15528_s9 + $0xe8] sm:$0xff]  }
 0x959   :  { %8349 = vmatpush1.bf16.msra.mxu0 %v10896_v60  ;;  %8309 = vmatprep.subr.bf16.mxu1 %v10911_v61  ;;  %v11380_v60 = vld [vmem:[%s15528_s9 + $0x28] sm:$0xff]   ;;  %v8388_v61 = vrot.slane %v15120_v2, %v11804_v25 }
 0x95a   :  { %8350 = vmatprep.subr.bf16.mxu0 %v10913_v62  ;;  %v11381_v62 = vld [vmem:[%s15528_s9 + $0xa8] sm:$0xff]  }
 0x95c   :  { %8310 = vmatpush1.bf16.msra.mxu1 %v10910_v51  ;;  %v8396_v51 = vrot.slane %v15120_v2, %v8395_v58 }
 0x95d   :  { %8351 = vmatpush1.bf16.msra.mxu0 %v10912_v6  ;;  %8311 = vmatprep.subr.bf16.mxu1 %v10927_v12  ;;  %v8392_v6 = vrot.slane %v15120_v2, %v11810_v27  ;;  %v8400_v12 = vrot.slane %v15120_v2, %v8399_v1 }
 0x95e   :  { %8352 = vmatprep.subr.bf16.mxu0 %v10929_v43  ;;  %v11383_v43 = vld [vmem:[%s15528_s9 + $0xf0] sm:$0xff]  }
 0x960   :  { %8312 = vmatpush1.bf16.msra.mxu1 %v10926_v20 }
 0x961   :  { %8353 = vmatpush1.bf16.msra.mxu0 %v10928_v24  ;;  %8313 = vmatprep.subr.bf16.mxu1 %v10943_v30 }
 0x962   :  { %8354 = vmatprep.subr.bf16.mxu0 %v10945_v36 }
 0x964   :  { %8314 = vmatpush1.bf16.msra.mxu1 %v10942_v45  ;;  %v11384_v45 = vld [vmem:[%s15528_s9 + $0x30] sm:$0xff]  }
 0x965   :  { %8355 = vmatpush1.bf16.msra.mxu0 %v10944_v46  ;;  %11090 = vmatprep.subr.bf16.mxu1 %v11358_v44 }
 0x966   :  { %11112 = vmatprep.subr.bf16.mxu0 %v11359_v29 }
 0x967   :  { %8316 = vmatmul.mubr.bf16.vlgmr.msra.gmra.mrb[84].mxu1 %v14484_v3 }
 0x968   :  { %8357 = vmatmul.mubr.bf16.vlgmr.msra.gmra.mrb[88].mxu0 %v14484_v3  ;;  %11091 = vmatpush3.bf16.msra.mxu1 %v11360_v16  ;;  %v11367_v3 = vld [vmem:[%s15528_s9 + $0xd0] sm:$0xff]  }
 0x969   :  { %11113 = vmatpush3.bf16.msra.mxu0 %v11361_v38  ;;  %11092 = vmatprep.subr.bf16.mxu1 %v11362_v48  ;;  %v11387_v38 = vld [vmem:[%s15528_s9 + $0xf8] sm:$0xff]  }
 0x96a   :  { %11114 = vmatprep.subr.bf16.mxu0 %v11363_v5 }
 0x96c   :  { %11093 = vmatpush3.bf16.msra.mxu1 %v11364_v50  ;;  %v11388_v50 = vld [vmem:[%s15528_s9 + $0x38] sm:$0xff]  }
 0x96d   :  { %11115 = vmatpush3.bf16.msra.mxu0 %v11365_v11  ;;  %11094 = vmatprep.subr.bf16.mxu1 %v11366_v52  ;;  %v11389_v52 = vld [vmem:[%s15528_s9 + $0xb8] sm:$0xff]  }
 0x96e   :  { %11116 = vmatprep.subr.bf16.mxu0 %v11367_v3 }
 0x970   :  { %11095 = vmatpush3.bf16.msra.mxu1 %v11368_v53 }
 0x971   :  { %11117 = vmatpush3.bf16.msra.mxu0 %v11369_v15  ;;  %11096 = vmatprep.subr.bf16.mxu1 %v11370_v4  ;;  %v11390_v4 = vld [vmem:[%s15528_s9 + $0x140] sm:$0xff]  }
 0x972   :  { %11118 = vmatprep.subr.bf16.mxu0 %v11371_v7  ;;  %v11391_v7 = vld [vmem:[%s15528_s9 + $0x1c0] sm:$0xff]  }
 0x974   :  { %11097 = vmatpush3.bf16.msra.mxu1 %v11372_v22  ;;  %v11392_v22 = vld [vmem:[%s15528_s9 + $0x100] sm:$0xff]  }
 0x975   :  { %11119 = vmatpush3.bf16.msra.mxu0 %v11373_v32  ;;  %11098 = vmatprep.subr.bf16.mxu1 %v11374_v34  ;;  %v11393_v34 = vld [vmem:[%s15528_s9 + $0x180] sm:$0xff]  }
 0x976   :  { %11120 = vmatprep.subr.bf16.mxu0 %v11375_v23  ;;  %v11394_v23 = vld [vmem:[%s15528_s9 + $0x148] sm:$0xff]  }
 0x978   :  { %11099 = vmatpush3.bf16.msra.mxu1 %v11376_v26 }
 0x979   :  { %11121 = vmatpush3.bf16.msra.mxu0 %v11377_v55  ;;  %11100 = vmatprep.subr.bf16.mxu1 %v11378_v56  ;;  %v11395_v55 = vld [vmem:[%s15528_s9 + $0x1c8] sm:$0xff]  }
 0x97a   :  { %v8071_v28 = vpop.f32.mrb[72].mxu1  ;;  %v8112_v31 = vpop.f32.mrb[76].mxu0  ;;  %11122 = vmatprep.subr.bf16.mxu0 %v11379_v59  ;;  %v11396_v56 = vld [vmem:[%s15528_s9 + $0x108] sm:$0xff]  }
 0x97b   :  { %v8365_v13 = vadd.f32 %v8071_v28, %v14219_v57  ;;  %v8367_v54 = vadd.f32 %v8112_v31, %v14222_v40  ;;  %v8073_v14 = vpop.f32.mrb[73].mxu1  ;;  %v8114_v19 = vpop.f32.mrb[77].mxu0  ;;  %v11385_v57 = vld [vmem:[%s15528_s9 + $0xb0] sm:$0xff]   ;;  %v11386_v40 = vld [vmem:[%s15528_s9 + $0x78] sm:$0xff]   ;;  %v11397_v59 = vld [vmem:[%s15528_s9 + $0x188] sm:$0xff]  }
 0x97c   :  { %v8366_v20 = vadd.f32 %v8073_v14, %v14225_v41  ;;  %v8368_v24 = vadd.f32 %v8114_v19, %v14228_v37  ;;  %11101 = vmatpush3.bf16.msra.mxu1 %v11380_v60  ;;  %v8075_v30 = vpop.f32.mrb[74].mxu1  ;;  %v8116_v36 = vpop.f32.mrb[78].mxu0  ;;  %v11398_v60 = vld [vmem:[%s15528_s9 + $0x150] sm:$0xff]   ;;  %v11402_v28 = vld [vmem:[%s15528_s9 + $0x158] sm:$0xff]   ;;  %v11410_v14 = vld [vmem:[%s15528_s9 + $0x168] sm:$0xff]  }
 0x97d   :  { %v8465_v46 = vadd.f32 %v8388_v61, %v8365_v13  ;;  %11123 = vmatpush3.bf16.msra.mxu0 %v11381_v62  ;;  %v8076_v44 = vpop.f32.mrb[75].mxu1  ;;  %v8117_v29 = vpop.f32.mrb[79].mxu0  ;;  %11102 = vmatprep.subr.bf16.mxu1 %v11382_v0  ;;  %v8467_v41 = vadd.f32 %v8396_v51, %v8367_v54  ;;  %v11399_v61 = vld [vmem:[%s15528_s9 + $0x1d0] sm:$0xff]   ;;  %v11403_v31 = vld [vmem:[%s15528_s9 + $0x1d8] sm:$0xff]   ;;  %v11408_v13 = vld [vmem:[%s15528_s9 + $0x120] sm:$0xff]  }
 0x97e   :  { %v8466_v37 = vadd.f32 %v8392_v6, %v8366_v20  ;;  %v8468_v16 = vadd.f32 %v8400_v12, %v8368_v24  ;;  %11124 = vmatprep.subr.bf16.mxu0 %v11383_v43  ;;  %v11400_v62 = vld [vmem:[%s15528_s9 + $0x110] sm:$0xff]   ;;  %v11404_v51 = vld [vmem:[%s15528_s9 + $0x118] sm:$0xff]   ;;  %v11406_v12 = vld [vmem:[%s15528_s9 + $0x160] sm:$0xff]  }
 0x97f   :  { %v8481_v11 = vmax.f32 %v8465_v46, 0.0  ;;  %v8483_v3 = vmax.f32 %v8467_v41, 0.0  ;;  %v11401_v0 = vld [vmem:[%s15528_s9 + $0x190] sm:$0xff]   ;;  %v11405_v6 = vld [vmem:[%s15528_s9 + $0x198] sm:$0xff]   ;;  %v11407_v43 = vld [vmem:[%s15528_s9 + $0x1e0] sm:$0xff]  }
 0x980   :  { %v8482_v48 = vmax.f32 %v8466_v37, 0.0  ;;  %v8484_v5 = vmax.f32 %v8468_v16, 0.0  ;;  %11103 = vmatpush3.bf16.msra.mxu1 %v11384_v45  ;;  %v11409_v54 = vld [vmem:[%s15528_s9 + $0x1a0] sm:$0xff]   ;;  %v11411_v19 = vld [vmem:[%s15528_s9 + $0x1e8] sm:$0xff]   ;;  %v11414_v30 = vld [vmem:[%s15528_s9 + $0x170] sm:$0xff]   ;;  %v8403_v16 = vsub.s32 4, %v11799_v18 }
 0x981   :  { %11125 = vmatpush3.bf16.msra.mxu0 %v11385_v57  ;;  %11104 = vmatprep.subr.bf16.mxu1 %v11386_v40  ;;  %v8497_v32 = vpack.c.bf16 %v8481_v11, %v8481_v11  ;;  %v8499_v26 = vpack.c.bf16 %v8483_v3, %v8483_v3  ;;  %v11412_v20 = vld [vmem:[%s15528_s9 + $0x128] sm:$0xff]   ;;  %v11415_v36 = vld [vmem:[%s15528_s9 + $0x1f0] sm:$0xff]   ;;  %v11418_v44 = vld [vmem:[%s15528_s9 + $0x178] sm:$0xff]  }
 0x982   :  { %v8498_v53 = vpack.c.bf16 %v8482_v48, %v8482_v48  ;;  %v8500_v15 = vpack.c.bf16 %v8484_v5, %v8484_v5  ;;  %11126 = vmatprep.subr.bf16.mxu0 %v11387_v38  ;;  %v11413_v24 = vld [vmem:[%s15528_s9 + $0x1a8] sm:$0xff]   ;;  %v11416_v45 = vld [vmem:[%s15528_s9 + $0x130] sm:$0xff]   ;;  %v11419_v29 = vld [vmem:[%s15528_s9 + $0x1f8] sm:$0xff]   ;;  %v8411_v38 = vsub.s32 6, %v11799_v18  ;;  %v8407_v48 = vsub.s32 5, %v11799_v18 }
 0x983   :  { %v11417_v46 = vld [vmem:[%s15528_s9 + $0x1b0] sm:$0xff]   ;;  %v11420_v57 = vld [vmem:[%s15528_s9 + $0x138] sm:$0xff]   ;;  %v11422_v41 = vld [vmem:[%s15528_s9 + $0x240] sm:$0xff]   ;;  %v8415_v5 = vsub.s32 7, %v11799_v18 }
 0x984   :  { %11105 = vmatpush3.bf16.msra.mxu1 %v11388_v50  ;;  %9576 = vmatprep.mubr.bf16.mxu1 %v8498_v53  ;;  %v11421_v40 = vld [vmem:[%s15528_s9 + $0x1b8] sm:$0xff]   ;;  %v11423_v37 = vld [vmem:[%s15528_s9 + $0x2c0] sm:$0xff]   ;;  %v8404_v50 = vrot.slane %v15120_v2, %v8403_v16  ;;  %v8412_v11 = vrot.slane %v15120_v2, %v8411_v38  ;;  %v8408_v53 = vrot.slane %v15120_v2, %v8407_v48 }
 0x985   :  { %11127 = vmatpush3.bf16.msra.mxu0 %v11389_v52  ;;  %9616 = vmatprep.mubr.bf16.mxu0 %v8500_v15  ;;  %v8416_v15 = vrot.slane %v15120_v2, %v8415_v5 }
 0x986   :  { %11134 = vmatprep.subr.bf16.mxu1 %v11390_v4  ;;  %11156 = vmatprep.subr.bf16.mxu0 %v11391_v7 }
 0x987   :  { %9577 = vmatmul.mubr.bf16.vlgmr.msra.gmra.mrb[88].mxu1 %v8497_v32 }
 0x988   :  { %9617 = vmatmul.mubr.bf16.vlgmr.msra.gmra.mrb[92].mxu0 %v8499_v26  ;;  %11135 = vmatpush3.bf16.msra.mxu1 %v11392_v22 }
 0x989   :  { %11157 = vmatpush3.bf16.msra.mxu0 %v11393_v34  ;;  %11136 = vmatprep.subr.bf16.mxu1 %v11394_v23 }
 0x98a   :  { %11158 = vmatprep.subr.bf16.mxu0 %v11395_v55 }
 0x98c   :  { %11137 = vmatpush3.bf16.msra.mxu1 %v11396_v56 }
 0x98d   :  { %11159 = vmatpush3.bf16.msra.mxu0 %v11397_v59  ;;  %11138 = vmatprep.subr.bf16.mxu1 %v11398_v60 }
 0x98e   :  { %11160 = vmatprep.subr.bf16.mxu0 %v11399_v61 }
 0x990   :  { %11139 = vmatpush3.bf16.msra.mxu1 %v11400_v62 }
 0x991   :  { %11161 = vmatpush3.bf16.msra.mxu0 %v11401_v0  ;;  %11140 = vmatprep.subr.bf16.mxu1 %v11402_v28 }
 0x992   :  { %11162 = vmatprep.subr.bf16.mxu0 %v11403_v31 }
 0x994   :  { %11141 = vmatpush3.bf16.msra.mxu1 %v11404_v51 }
 0x995   :  { %11163 = vmatpush3.bf16.msra.mxu0 %v11405_v6  ;;  %11142 = vmatprep.subr.bf16.mxu1 %v11406_v12 }
 0x996   :  { %11164 = vmatprep.subr.bf16.mxu0 %v11407_v43  ;;  %v11426_v43 = vld [vmem:[%s15528_s9 + $0x248] sm:$0xff]  }
 0x998   :  { %11143 = vmatpush3.bf16.msra.mxu1 %v11408_v13  ;;  %v11427_v13 = vld [vmem:[%s15528_s9 + $0x2c8] sm:$0xff]  }
 0x999   :  { %11165 = vmatpush3.bf16.msra.mxu0 %v11409_v54  ;;  %11144 = vmatprep.subr.bf16.mxu1 %v11410_v14  ;;  %v11428_v54 = vld [vmem:[%s15528_s9 + $0x208] sm:$0xff]  }
 0x99a   :  { %11166 = vmatprep.subr.bf16.mxu0 %v11411_v19  ;;  %v11429_v14 = vld [vmem:[%s15528_s9 + $0x288] sm:$0xff]   ;;  %v11430_v19 = vld [vmem:[%s15528_s9 + $0x250] sm:$0xff]  }
 0x99c   :  { %11145 = vmatpush3.bf16.msra.mxu1 %v11412_v20  ;;  %v11431_v20 = vld [vmem:[%s15528_s9 + $0x2d0] sm:$0xff]  }
 0x99d   :  { %11167 = vmatpush3.bf16.msra.mxu0 %v11413_v24  ;;  %11146 = vmatprep.subr.bf16.mxu1 %v11414_v30  ;;  %v11432_v24 = vld [vmem:[%s15528_s9 + $0x210] sm:$0xff]  }
 0x99e   :  { %11168 = vmatprep.subr.bf16.mxu0 %v11415_v36  ;;  %v11433_v30 = vld [vmem:[%s15528_s9 + $0x290] sm:$0xff]   ;;  %v11434_v36 = vld [vmem:[%s15528_s9 + $0x258] sm:$0xff]  }
 0x9a0   :  { %11147 = vmatpush3.bf16.msra.mxu1 %v11416_v45  ;;  %v11435_v45 = vld [vmem:[%s15528_s9 + $0x2d8] sm:$0xff]  }
 0x9a1   :  { %11169 = vmatpush3.bf16.msra.mxu0 %v11417_v46  ;;  %11148 = vmatprep.subr.bf16.mxu1 %v11418_v44  ;;  %v11436_v46 = vld [vmem:[%s15528_s9 + $0x218] sm:$0xff]  }
 0x9a2   :  { %11170 = vmatprep.subr.bf16.mxu0 %v11419_v29  ;;  %v11437_v44 = vld [vmem:[%s15528_s9 + $0x298] sm:$0xff]   ;;  %v11438_v29 = vld [vmem:[%s15528_s9 + $0x260] sm:$0xff]  }
 0x9a4   :  { %11149 = vmatpush3.bf16.msra.mxu1 %v11420_v57  ;;  %v11439_v57 = vld [vmem:[%s15528_s9 + $0x2e0] sm:$0xff]  }
 0x9a5   :  { %11171 = vmatpush3.bf16.msra.mxu0 %v11421_v40  ;;  %11178 = vmatprep.subr.bf16.mxu1 %v11422_v41  ;;  %v11440_v40 = vld [vmem:[%s15528_s9 + $0x220] sm:$0xff]  }
 0x9a6   :  { %11200 = vmatprep.subr.bf16.mxu0 %v11423_v37  ;;  %v11441_v41 = vld [vmem:[%s15528_s9 + $0x2a0] sm:$0xff]   ;;  %v11442_v37 = vld [vmem:[%s15528_s9 + $0x268] sm:$0xff]  }
 0x9ba   :  { %v8153_v52 = vpop.f32.mrb[76].mxu1  ;;  %v8194_v3 = vpop.f32.mrb[80].mxu0 }
 0x9bb   :  { %v8369_v4 = vadd.f32 %v8153_v52, %v14399_v47  ;;  %v8371_v7 = vadd.f32 %v8194_v3, %v14402_v33  ;;  %v8155_v22 = vpop.f32.mrb[77].mxu1  ;;  %v8196_v32 = vpop.f32.mrb[81].mxu0  ;;  %v11445_v52 = vld [vmem:[%s15528_s9 + $0x2a8] sm:$0xff]   ;;  %v11446_v3 = vld [vmem:[%s15528_s9 + $0x270] sm:$0xff]  }
 0x9bc   :  { %v8370_v34 = vadd.f32 %v8155_v22, %v14405_v10  ;;  %v8372_v23 = vadd.f32 %v8196_v32, %v14408_v49  ;;  %v8157_v26 = vpop.f32.mrb[78].mxu1  ;;  %v8198_v55 = vpop.f32.mrb[82].mxu0  ;;  %v11424_v10 = vld [vmem:[%s15528_s9 + $0x200] sm:$0xff]   ;;  %v11451_v22 = vld [vmem:[%s15528_s9 + $0x2f8] sm:$0xff]  }
 0x9bd   :  { %v8469_v56 = vadd.f32 %v8404_v50, %v8369_v4  ;;  %v8471_v59 = vadd.f32 %v8412_v11, %v8371_v7  ;;  %v8158_v60 = vpop.f32.mrb[79].mxu1  ;;  %v8199_v61 = vpop.f32.mrb[83].mxu0  ;;  %v11425_v49 = vld [vmem:[%s15528_s9 + $0x280] sm:$0xff]   ;;  %v11443_v50 = vld [vmem:[%s15528_s9 + $0x2e8] sm:$0xff]   ;;  %v11449_v4 = vld [vmem:[%s15528_s9 + $0x2b0] sm:$0xff]  }
 0x9be   :  { %v8470_v62 = vadd.f32 %v8408_v53, %v8370_v34  ;;  %v8472_v0 = vadd.f32 %v8416_v15, %v8372_v23  ;;  %v11444_v11 = vld [vmem:[%s15528_s9 + $0x228] sm:$0xff]   ;;  %v11447_v53 = vld [vmem:[%s15528_s9 + $0x2f0] sm:$0xff]   ;;  %v11450_v7 = vld [vmem:[%s15528_s9 + $0x278] sm:$0xff]  }
 0x9bf   :  { %v8485_v28 = vmax.f32 %v8469_v56, 0.0  ;;  %v8487_v2 = vmax.f32 %v8471_v59, 0.0  ;;  %v11448_v15 = vld [vmem:[%s15528_s9 + $0x230] sm:$0xff]   ;;  %v11452_v32 = vld [vmem:[%s15528_s9 + $0x238] sm:$0xff]   ;;  %v11454_v23 = vld [vmem:[%s15528_s9 + $0x340] sm:$0xff]  }
 0x9c0   :  { %v8486_v31 = vmax.f32 %v8470_v62, 0.0  ;;  %v8488_v47 = vmax.f32 %v8472_v0, 0.0  ;;  %v11453_v34 = vld [vmem:[%s15528_s9 + $0x2b8] sm:$0xff]   ;;  %v11455_v26 = vld [vmem:[%s15528_s9 + $0x3c0] sm:$0xff]   ;;  %v15392_v55 = vld [vmem:[%s15529_s8 + $0x8] sm:$0xff] }
 0x9c1   :  { %v8501_v6 = vpack.c.bf16 %v8485_v28, %v8485_v28  ;;  %v8503_v12 = vpack.c.bf16 %v8487_v2, %v8487_v2  ;;  %v8420_v56 = vrot.slane %v15392_v55, %v11804_v25  ;;  %v8428_v60 = vrot.slane %v15392_v55, %v8395_v58 }
 0x9c2   :  { %v8502_v51 = vpack.c.bf16 %v8486_v31, %v8486_v31  ;;  %v8504_v33 = vpack.c.bf16 %v8488_v47, %v8488_v47  ;;  %v8424_v61 = vrot.slane %v15392_v55, %v11810_v27  ;;  %v8432_v2 = vrot.slane %v15392_v55, %v8399_v1 }
 0x9c4   :  { %9656 = vmatprep.mubr.bf16.mxu1 %v8502_v51  ;;  %9696 = vmatprep.mubr.bf16.mxu0 %v8504_v33 }
 0x9c5   :  { %9657 = vmatmul.mubr.bf16.vlgmr.msra.gmra.mrb[92].mxu1 %v8501_v6  ;;  %9697 = vmatmul.mubr.bf16.vlgmr.msra.gmra.mrb[96].mxu0 %v8503_v12 }
 0x9c6   :  { %11179 = vmatpush3.bf16.msra.mxu1 %v11424_v10  ;;  %11201 = vmatpush3.bf16.msra.mxu0 %v11425_v49 }
 0x9c7   :  { %11180 = vmatprep.subr.bf16.mxu1 %v11426_v43  ;;  %11202 = vmatprep.subr.bf16.mxu0 %v11427_v13 }
 0x9ca   :  { %11181 = vmatpush3.bf16.msra.mxu1 %v11428_v54  ;;  %11203 = vmatpush3.bf16.msra.mxu0 %v11429_v14 }
 0x9cb   :  { %11182 = vmatprep.subr.bf16.mxu1 %v11430_v19  ;;  %11204 = vmatprep.subr.bf16.mxu0 %v11431_v20  ;;  %v11458_v20 = vld [vmem:[%s15528_s9 + $0x348] sm:$0xff]  }
 0x9ce   :  { %11183 = vmatpush3.bf16.msra.mxu1 %v11432_v24  ;;  %11205 = vmatpush3.bf16.msra.mxu0 %v11433_v30  ;;  %v11459_v30 = vld [vmem:[%s15528_s9 + $0x3c8] sm:$0xff]  }
 0x9cf   :  { %11184 = vmatprep.subr.bf16.mxu1 %v11434_v36  ;;  %11206 = vmatprep.subr.bf16.mxu0 %v11435_v45  ;;  %v11460_v36 = vld [vmem:[%s15528_s9 + $0x308] sm:$0xff]  }
 0x9d0   :  { %v11461_v45 = vld [vmem:[%s15528_s9 + $0x388] sm:$0xff]  }
 0x9d2   :  { %11185 = vmatpush3.bf16.msra.mxu1 %v11436_v46  ;;  %11207 = vmatpush3.bf16.msra.mxu0 %v11437_v44  ;;  %v11462_v46 = vld [vmem:[%s15528_s9 + $0x350] sm:$0xff]  }
 0x9d3   :  { %11186 = vmatprep.subr.bf16.mxu1 %v11438_v29  ;;  %11208 = vmatprep.subr.bf16.mxu0 %v11439_v57  ;;  %v11463_v44 = vld [vmem:[%s15528_s9 + $0x3d0] sm:$0xff]  }
 0x9d4   :  { %v11464_v29 = vld [vmem:[%s15528_s9 + $0x310] sm:$0xff]  }
 0x9d5   :  { %v11465_v57 = vld [vmem:[%s15528_s9 + $0x390] sm:$0xff]  }
 0x9d6   :  { %11187 = vmatpush3.bf16.msra.mxu1 %v11440_v40  ;;  %11209 = vmatpush3.bf16.msra.mxu0 %v11441_v41  ;;  %v11466_v40 = vld [vmem:[%s15528_s9 + $0x358] sm:$0xff]  }
 0x9d7   :  { %11188 = vmatprep.subr.bf16.mxu1 %v11442_v37  ;;  %11210 = vmatprep.subr.bf16.mxu0 %v11443_v50  ;;  %v11467_v41 = vld [vmem:[%s15528_s9 + $0x3d8] sm:$0xff]  }
 0x9d8   :  { %v11468_v37 = vld [vmem:[%s15528_s9 + $0x318] sm:$0xff]  }
 0x9d9   :  { %v11469_v50 = vld [vmem:[%s15528_s9 + $0x398] sm:$0xff]  }
 0x9da   :  { %11189 = vmatpush3.bf16.msra.mxu1 %v11444_v11  ;;  %11211 = vmatpush3.bf16.msra.mxu0 %v11445_v52  ;;  %v11470_v11 = vld [vmem:[%s15528_s9 + $0x360] sm:$0xff]  }
 0x9db   :  { %11190 = vmatprep.subr.bf16.mxu1 %v11446_v3  ;;  %11212 = vmatprep.subr.bf16.mxu0 %v11447_v53  ;;  %v11471_v52 = vld [vmem:[%s15528_s9 + $0x3e0] sm:$0xff]  }
 0x9dc   :  { %v11472_v3 = vld [vmem:[%s15528_s9 + $0x320] sm:$0xff]  }
 0x9dd   :  { %v11473_v53 = vld [vmem:[%s15528_s9 + $0x3a0] sm:$0xff]  }
 0x9de   :  { %11191 = vmatpush3.bf16.msra.mxu1 %v11448_v15  ;;  %11213 = vmatpush3.bf16.msra.mxu0 %v11449_v4  ;;  %v11474_v15 = vld [vmem:[%s15528_s9 + $0x368] sm:$0xff]  }
 0x9df   :  { %11192 = vmatprep.subr.bf16.mxu1 %v11450_v7  ;;  %11214 = vmatprep.subr.bf16.mxu0 %v11451_v22  ;;  %v11475_v4 = vld [vmem:[%s15528_s9 + $0x3e8] sm:$0xff]  }
 0x9e0   :  { %v11476_v7 = vld [vmem:[%s15528_s9 + $0x328] sm:$0xff]  }
 0x9e1   :  { %v11477_v22 = vld [vmem:[%s15528_s9 + $0x3a8] sm:$0xff]  }
 0x9e2   :  { %11193 = vmatpush3.bf16.msra.mxu1 %v11452_v32  ;;  %11215 = vmatpush3.bf16.msra.mxu0 %v11453_v34  ;;  %v11478_v32 = vld [vmem:[%s15528_s9 + $0x370] sm:$0xff]  }
 0x9e3   :  { %11222 = vmatprep.subr.bf16.mxu1 %v11454_v23  ;;  %11244 = vmatprep.subr.bf16.mxu0 %v11455_v26  ;;  %v11479_v34 = vld [vmem:[%s15528_s9 + $0x3f0] sm:$0xff]  }
 0x9e4   :  { %v11480_v23 = vld [vmem:[%s15528_s9 + $0x330] sm:$0xff]  }
 0x9e5   :  { %v11481_v26 = vld [vmem:[%s15528_s9 + $0x3b0] sm:$0xff]  }
 0x9fa   :  { %v8235_v59 = vpop.f32.mrb[80].mxu1 }
 0x9fb   :  { %v8373_v62 = vadd.f32 %v8235_v59, %v14447_v21  ;;  %v8276_v0 = vpop.f32.mrb[84].mxu0  ;;  %v8237_v28 = vpop.f32.mrb[81].mxu1  ;;  %v11483_v59 = vld [vmem:[%s15528_s9 + $0x3f8] sm:$0xff]  }
 0x9fc   :  { %v8375_v31 = vadd.f32 %v8276_v0, %v14450_v35  ;;  %v8374_v25 = vadd.f32 %v8237_v28, %v14453_v39  ;;  %v8278_v47 = vpop.f32.mrb[85].mxu0  ;;  %v8239_v51 = vpop.f32.mrb[82].mxu1  ;;  %v11456_v35 = vld [vmem:[%s15528_s9 + $0x300] sm:$0xff]   ;;  %v8444_v28 = vrot.slane %v15392_v55, %v8411_v38 }
 0x9fd   :  { %v8473_v33 = vadd.f32 %v8420_v56, %v8373_v62  ;;  %v8376_v58 = vadd.f32 %v8278_v47, %v14456_v42  ;;  %v8280_v10 = vpop.f32.mrb[86].mxu0  ;;  %v8240_v49 = vpop.f32.mrb[83].mxu1  ;;  %v11457_v42 = vld [vmem:[%s15528_s9 + $0x380] sm:$0xff]   ;;  %v11482_v56 = vld [vmem:[%s15528_s9 + $0x378] sm:$0xff]   ;;  %v8436_v62 = vrot.slane %v15392_v55, %v8403_v16  ;;  %v8448_v51 = vrot.slane %v15392_v55, %v8415_v5 }
 0x9fe   :  { %v8475_v27 = vadd.f32 %v8428_v60, %v8375_v31  ;;  %v8474_v6 = vadd.f32 %v8424_v61, %v8374_v25  ;;  %v8281_v21 = vpop.f32.mrb[87].mxu0  ;;  %v11484_v60 = vld [vmem:[%s15528_s9 + $0x338] sm:$0xff]  }
 0x9ff   :  { %v8489_v12 = vmax.f32 %v8473_v33, 0.0  ;;  %v8476_v43 = vadd.f32 %v8432_v2, %v8376_v58  ;;  %v11485_v61 = vld [vmem:[%s15528_s9 + $0x3b8] sm:$0xff]   ;;  %v8440_v2 = vrot.slane %v15392_v55, %v8407_v48 }
 0xa00   :  { %v8491_v13 = vmax.f32 %v8475_v27, 0.0  ;;  %v8490_v54 = vmax.f32 %v8474_v6, 0.0 }
 0xa01   :  { %v8492_v14 = vmax.f32 %v8476_v43, 0.0  ;;  %v8505_v39 = vpack.c.bf16 %v8489_v12, %v8489_v12 }
 0xa02   :  { %v8506_v1 = vpack.c.bf16 %v8490_v54, %v8490_v54  ;;  %v8507_v24 = vpack.c.bf16 %v8491_v13, %v8491_v13 }
 0xa03   :  { %v8508_v19 = vpack.c.bf16 %v8492_v14, %v8492_v14 }
 0xa04   :  { %9736 = vmatprep.mubr.bf16.mxu1 %v8506_v1  ;;  %v10946_v1 = vld [vmem:[%s15530_s10] ss:$0 sm:$0xff] }
 0xa05   :  { %9776 = vmatprep.mubr.bf16.mxu0 %v8508_v19  ;;  %9737 = vmatmul.mubr.bf16.vlgmr.msra.gmra.mrb[96].mxu1 %v8505_v39 }
 0xa06   :  { %9777 = vmatmul.mubr.bf16.vlgmr.msra.gmra.mrb[100].mxu0 %v8507_v24  ;;  %11223 = vmatpush3.bf16.msra.mxu1 %v11456_v35 }
 0xa07   :  { %11245 = vmatpush3.bf16.msra.mxu0 %v11457_v42  ;;  %11224 = vmatprep.subr.bf16.mxu1 %v11458_v20 }
 0xa08   :  { %11246 = vmatprep.subr.bf16.mxu0 %v11459_v30 }
 0xa0a   :  { %11225 = vmatpush3.bf16.msra.mxu1 %v11460_v36 }
 0xa0b   :  { %11247 = vmatpush3.bf16.msra.mxu0 %v11461_v45  ;;  %11226 = vmatprep.subr.bf16.mxu1 %v11462_v46 }
 0xa0c   :  { %11248 = vmatprep.subr.bf16.mxu0 %v11463_v44 }
 0xa0e   :  { %11227 = vmatpush3.bf16.msra.mxu1 %v11464_v29 }
 0xa0f   :  { %11249 = vmatpush3.bf16.msra.mxu0 %v11465_v57  ;;  %11228 = vmatprep.subr.bf16.mxu1 %v11466_v40 }
 0xa10   :  { %11250 = vmatprep.subr.bf16.mxu0 %v11467_v41 }
 0xa12   :  { %11229 = vmatpush3.bf16.msra.mxu1 %v11468_v37 }
 0xa13   :  { %11251 = vmatpush3.bf16.msra.mxu0 %v11469_v50  ;;  %11230 = vmatprep.subr.bf16.mxu1 %v11470_v11 }
 0xa14   :  { %11252 = vmatprep.subr.bf16.mxu0 %v11471_v52 }
 0xa16   :  { %11231 = vmatpush3.bf16.msra.mxu1 %v11472_v3 }
 0xa17   :  { %11253 = vmatpush3.bf16.msra.mxu0 %v11473_v53  ;;  %11232 = vmatprep.subr.bf16.mxu1 %v11474_v15 }
 0xa18   :  { %11254 = vmatprep.subr.bf16.mxu0 %v11475_v4 }
 0xa1a   :  { %11233 = vmatpush3.bf16.msra.mxu1 %v11476_v7 }
 0xa1b   :  { %11255 = vmatpush3.bf16.msra.mxu0 %v11477_v22  ;;  %11234 = vmatprep.subr.bf16.mxu1 %v11478_v32 }
 0xa1c   :  { %11256 = vmatprep.subr.bf16.mxu0 %v11479_v34 }
 0xa1e   :  { %11235 = vmatpush3.bf16.msra.mxu1 %v11480_v23 }
 0xa1f   :  { %11257 = vmatpush3.bf16.msra.mxu0 %v11481_v26  ;;  %11236 = vmatprep.subr.bf16.mxu1 %v11482_v56 }
 0xa20   :  { %11258 = vmatprep.subr.bf16.mxu0 %v11483_v59 }
 0xa22   :  { %11237 = vmatpush3.bf16.msra.mxu1 %v11484_v60 }
 0xa23   :  { %11259 = vmatpush3.bf16.msra.mxu0 %v11485_v61 }
 0xa3a   :  { %v8317_v0 = vpop.f32.mrb[84].mxu1 }
 0xa3b   :  { %v8377_v31 = vadd.f32 %v8317_v0, %v14459_v63  ;;  %v8358_v25 = vpop.f32.mrb[88].mxu0  ;;  %v8319_v47 = vpop.f32.mrb[85].mxu1 }
 0xa3c   :  { %v8379_v33 = vadd.f32 %v8358_v25, %v14462_v8  ;;  %v8378_v16 = vadd.f32 %v8319_v47, %v14465_v9  ;;  %v8360_v58 = vpop.f32.mrb[89].mxu0  ;;  %v8321_v10 = vpop.f32.mrb[86].mxu1 }
 0xa3d   :  { %v8477_v49 = vadd.f32 %v8436_v62, %v8377_v31  ;;  %v8380_v38 = vadd.f32 %v8360_v58, %v14468_v17  ;;  %v8362_v27 = vpop.f32.mrb[90].mxu0  ;;  %v8322_v6 = vpop.f32.mrb[87].mxu1 }
 0xa3e   :  { %v8479_v48 = vadd.f32 %v8444_v28, %v8379_v33  ;;  %v8478_v21 = vadd.f32 %v8440_v2, %v8378_v16  ;;  %v8363_v63 = vpop.f32.mrb[91].mxu0 }
 0xa3f   :  { %v8493_v12 = vmax.f32 %v8477_v49, 0.0  ;;  %v8480_v43 = vadd.f32 %v8448_v51, %v8380_v38 }
 0xa40   :  { %v8495_v13 = vmax.f32 %v8479_v48, 0.0  ;;  %v8494_v18 = vmax.f32 %v8478_v21, 0.0 }
 0xa41   :  { %v8496_v54 = vmax.f32 %v8480_v43, 0.0  ;;  %v8509_v55 = vpack.c.bf16 %v8493_v12, %v8493_v12 }
 0xa42   :  { %v8510_v5 = vpack.c.bf16 %v8494_v18, %v8494_v18  ;;  %v8511_v14 = vpack.c.bf16 %v8495_v13, %v8495_v13 }
 0xa43   :  { %v8512_v8 = vpack.c.bf16 %v8496_v54, %v8496_v54 }
 0xa44   :  { %9816 = vmatprep.mubr.bf16.mxu1 %v8510_v5 }
 0xa45   :  { %9856 = vmatprep.mubr.bf16.mxu0 %v8512_v8  ;;  %9817 = vmatmul.mubr.bf16.vlgmr.msra.gmra.mrb[100].mxu1 %v8509_v55 }
 0xa46   :  { %9857 = vmatmul.mubr.bf16.vlgmr.msra.gmra.mrb[104].mxu0 %v8511_v14 }
 0xa5a   :  { %v11106_v9 = vpop.f32.mrb[88].mxu1 }
 0xa5b   :  { %v11128_v17 = vpop.f32.mrb[92].mxu0  ;;  %v11107_v35 = vpop.f32.mrb[89].mxu1 }
 0xa5c   :  { %v11108_v39 = vadd.f32 %v11107_v35, %v11106_v9  ;;  %v11129_v19 = vpop.f32.mrb[93].mxu0  ;;  %v11109_v42 = vpop.f32.mrb[90].mxu1 }
 0xa5d   :  { %v11130_v20 = vadd.f32 %v11129_v19, %v11128_v17  ;;  %v11131_v24 = vpop.f32.mrb[94].mxu0  ;;  %v11110_v30 = vpop.f32.mrb[91].mxu1 }
 0xa5e   :  { %v9579_v36 = vadd.f32 %v11108_v39, %v10946_v1  ;;  %v11132_v45 = vpop.f32.mrb[95].mxu0 }
 0xa60   :  { %v9619_v46 = vadd.f32 %v11130_v20, %v9579_v36 }
 0xa98   :  { %v11150_v44 = vpop.f32.mrb[92].mxu1  ;;  %v11172_v29 = vpop.f32.mrb[96].mxu0 }
 0xa99   :  { %v11151_v57 = vpop.f32.mrb[93].mxu1  ;;  %v11173_v40 = vpop.f32.mrb[97].mxu0 }
 0xa9a   :  { %v11152_v41 = vadd.f32 %v11151_v57, %v11150_v44  ;;  %v11174_v37 = vadd.f32 %v11173_v40, %v11172_v29  ;;  %v11153_v50 = vpop.f32.mrb[94].mxu1  ;;  %v11175_v11 = vpop.f32.mrb[98].mxu0 }
 0xa9b   :  { %v11154_v52 = vpop.f32.mrb[95].mxu1  ;;  %v11176_v3 = vpop.f32.mrb[99].mxu0 }
 0xa9c   :  { %v9659_v53 = vadd.f32 %v11152_v41, %v9619_v46 }
 0xa9e   :  { %v9699_v15 = vadd.f32 %v11174_v37, %v9659_v53 }
 0xad8   :  { %v11194_v4 = vpop.f32.mrb[96].mxu1 }
 0xad9   :  { %v11216_v7 = vpop.f32.mrb[100].mxu0  ;;  %v11195_v22 = vpop.f32.mrb[97].mxu1 }
 0xada   :  { %v11196_v32 = vadd.f32 %v11195_v22, %v11194_v4  ;;  %v11217_v34 = vpop.f32.mrb[101].mxu0  ;;  %v11197_v23 = vpop.f32.mrb[98].mxu1 }
 0xadb   :  { %v11218_v26 = vadd.f32 %v11217_v34, %v11216_v7  ;;  %v11219_v56 = vpop.f32.mrb[102].mxu0  ;;  %v11198_v59 = vpop.f32.mrb[99].mxu1 }
 0xadc   :  { %v9739_v60 = vadd.f32 %v11196_v32, %v9699_v15  ;;  %v11220_v61 = vpop.f32.mrb[103].mxu0 }
 0xade   :  { %v9779_v62 = vadd.f32 %v11218_v26, %v9739_v60 }
 0xb18   :  { %v11238_v0 = vpop.f32.mrb[100].mxu1 }
 0xb19   :  { %v11260_v28 = vpop.f32.mrb[104].mxu0  ;;  %v11239_v2 = vpop.f32.mrb[101].mxu1 }
 0xb1a   :  { %v11240_v31 = vadd.f32 %v11239_v2, %v11238_v0  ;;  %v11261_v25 = vpop.f32.mrb[105].mxu0  ;;  %v11241_v47 = vpop.f32.mrb[102].mxu1 }
 0xb1b   :  { %v11262_v51 = vadd.f32 %v11261_v25, %v11260_v28  ;;  %v11263_v33 = vpop.f32.mrb[106].mxu0  ;;  %v11242_v16 = vpop.f32.mrb[103].mxu1 }
 0xb1c   :  { %v9819_v58 = vadd.f32 %v11240_v31, %v9779_v62  ;;  %v11264_v10 = vpop.f32.mrb[107].mxu0 }
 0xb1e   :  { %v9859_v49 = vadd.f32 %v11262_v51, %v9819_v58 }
 0xb20   :  { %9864 = vst [vmem:[%s15531_s11] sm:$0xff] %v9859_v49 }

</bundles_post_ra>
